<compile_context>
chip_gen: v7x
topology: tpu7x:2x2x1
jax: 0.10.0
libtpu: 0.0.40
codegen_flags: <defaults>
</compile_context>

<pallas_src>
import jax
import jax.numpy as jnp
from jax.experimental import pallas as pl
from jax.experimental.pallas import tpu as pltpu

MODEL_CONFIG = dict(
    N_freq_xyz=4,      # in_channels_xyz = 3 + 3*4*2 = 27
    N_freq_dir=2,      # in_channels_dir = 3 + 3*2*2 = 15
    inst_D=4,
    inst_W=64,
    inst_W_code=32,
    inst_skips=(2,),
    inst_K=4,
    obj_code_type='param',
)
COARSE = False
NEG_SLOPE = 0.01  # nn.LeakyReLU default

HEADS = ('scene_', 'inst1_', 'inst2_')   # head weights: scene / background / foreground

PARAM_ORDER = ('enc_wx', 'enc_wh', 'w_big', 'dir_w1d',
               'dir2_sb', 'dir2_fg', 'dir3_w', 'rgb_w', 'sig_w', 'bias')


# ----------------------------- parameter init -----------------------------
def init_params(cfg, key):
    W, Wc, K, D = cfg['inst_W'], cfg['inst_W_code'], cfg['inst_K'], cfg['inst_D']
    Cx = 3 + 3 * cfg['N_freq_xyz'] * 2
    Cd = 3 + 3 * cfg['N_freq_dir'] * 2
    skips = set(cfg['inst_skips'])
    params = {}
    cnt = [0]

    def mk(shape):
        cnt[0] += 1
        k = jax.random.fold_in(key, cnt[0])
        scale = 1.0 / float(max(shape[0], 1)) ** 0.5
        return (scale * jax.random.normal(k, shape)).astype(jnp.float32)

    # instance_encoding_{i+1}: Linear + LeakyReLU (skip-layer weight split xyz/h)
    for i in range(D):
        if i == 0:
            params[f'enc{i}_wx'] = mk((Cx, W))
        elif i in skips:
            params[f'enc{i}_wx'] = mk((Cx, W))
            params[f'enc{i}_wh'] = mk((W, W))
        else:
            params[f'enc{i}_wh'] = mk((W, W))
        params[f'enc{i}_b'] = mk((1, W))

    # obj_code: nn.Parameter(zeros(K, W_code)) in torch; random here so the
    # K axis is actually exercised (synthetic init, no checkpoint).
    params['obj_code'] = mk((K, Wc))

    # feat_code_fusion_layer: Linear(W + W_code, W), split into feat/code parts
    params['fuse_wh'] = mk((W, W))
    params['fuse_wc'] = mk((Wc, W))
    params['fuse_b'] = mk((1, W))

    def head(prefix):
        params[f'{prefix}sig_w1'] = mk((W, W)); params[f'{prefix}sig_b1'] = mk((1, W))
        params[f'{prefix}sig_w2'] = mk((W, 1)); params[f'{prefix}sig_b2'] = mk((1, 1))
        params[f'{prefix}ef_w'] = mk((W, W)); params[f'{prefix}ef_b'] = mk((1, W))
        params[f'{prefix}dir_w1x'] = mk((W, W))
        params[f'{prefix}dir_w1d'] = mk((Cd, W))
        params[f'{prefix}dir_b1'] = mk((1, W))
        params[f'{prefix}dir_w2'] = mk((W, W)); params[f'{prefix}dir_b2'] = mk((1, W))
        params[f'{prefix}dir_w3'] = mk((W, W // 2)); params[f'{prefix}dir_b3'] = mk((1, W // 2))
        params[f'{prefix}rgb_w'] = mk((W // 2, 3)); params[f'{prefix}rgb_b'] = mk((1, 3))

    head('scene_')   # self.sigma / encoding_final / dir_encoding / rgb
    head('inst1_')   # instance_*_1 (background, k == 0)
    head('inst2_')   # instance_*_2 (foreground, k >= 1)
    return params


# ----------------------- host-side packing for the kernel ------------------
def _block_diag(blocks):
    rows = sum(b.shape[0] for b in blocks)
    cols = sum(b.shape[1] for b in blocks)
    out = jnp.zeros((rows, cols), jnp.float32)
    r = c = 0
    for b in blocks:
        out = out.at[r:r + b.shape[0], c:c + b.shape[1]].set(b.astype(jnp.float32))
        r += b.shape[0]
        c += b.shape[1]
    return out


def pack_params(params, cfg):
    """Pack the ~47 torch-layout arrays into 10 kernel-facing buffers.

    All host-side weight compositions / bias folds are exact affine algebra
    done in f32 ('highest' precision); MXU weights are then cast to bfloat16,
    biases stay f32 in one slab.
    """
    D, W, K = cfg['inst_D'], cfg['inst_W'], cfg['inst_K']
    Kf = K - 1
    NS = 2 + Kf                      # head slots: scene, bg, fg_1..fg_{K-1}
    skips = set(cfg['inst_skips'])
    f32, bf = jnp.float32, jnp.bfloat16

    with jax.default_matmul_precision('highest'):
        H = []
        for p in HEADS:
            H.append(dict(
                sig1=params[p + 'sig_w1'], sig1b=params[p + 'sig_b1'],
                sig2=params[p + 'sig_w2'], sig2b=params[p + 'sig_b2'],
                ef=params[p + 'ef_w'], efb=params[p + 'ef_b'],
                d1x=params[p + 'dir_w1x'], d1d=params[p + 'dir_w1d'], d1b=params[p + 'dir_b1'],
                d2=params[p + 'dir_w2'], d2b=params[p + 'dir_b2'],
                d3=params[p + 'dir_w3'], d3b=params[p + 'dir_b3'],
                rgbw=params[p + 'rgb_w'], rgbb=params[p + 'rgb_b']))

        fuse_wh = params['fuse_wh']
        # obj-code projection through the fusion layer (point-independent)
        code_proj = params['obj_code'] @ params['fuse_wc'] + params['fuse_b']   # (K, W)
        c_off = [jnp.mean(code_proj, axis=0, keepdims=True),                    # scene (K-mean)
                 code_proj[0:1]]                                                # background
        c_off += [code_proj[k:k + 1] for k in range(1, K)]                      # foreground k
        hd_of = [0, 1] + [2] * Kf          # which head's weights each slot uses

        # --- stage-1 fused weight: fuse_wh composed through sig_w1 / (ef_w @ dir_w1x)
        # column layout of Z = h @ w_big:
        #   [scene_sig1 | bg_sig1 | scene_efdir | bg_efdir | fg_sig1 | fg_efdir]
        sig1_eff = [fuse_wh @ H[i]['sig1'] for i in range(3)]
        efdir_eff = [fuse_wh @ (H[i]['ef'] @ H[i]['d1x']) for i in range(3)]
        w_big = jnp.concatenate([sig1_eff[0], sig1_eff[1],
                                 efdir_eff[0], efdir_eff[1],
                                 sig1_eff[2], efdir_eff[2]], axis=1)            # (W, 6W)

        # --- per-slot folded biases (code offsets pushed through the linear stages)
        def t_bias(s):
            h = H[hd_of[s]]
            return c_off[s] @ h['sig1'] + h['sig1b']

        def d1_bias(s):
            h = H[hd_of[s]]
            return (c_off[s] @ h['ef'] + h['efb']) @ h['d1x'] + h['d1b']

        t_b = jnp.concatenate([t_bias(s) for s in range(NS)], axis=1)           # (1, NS*W)
        d1_b = jnp.concatenate([d1_bias(s) for s in range(NS)], axis=1)
        d2_b = jnp.concatenate([H[hd_of[s]]['d2b'] for s in range(NS)], axis=1)
        d3_b = jnp.concatenate([H[hd_of[s]]['d3b'] for s in range(NS)], axis=1)
        rgb_b = jnp.concatenate([H[hd_of[s]]['rgbb'] for s in range(NS)], axis=1)
        sig_b = jnp.concatenate([H[hd_of[s]]['sig2b'] for s in range(NS)], axis=1)

        BW = NS * W
        bias = jnp.zeros((D + 6, BW), f32)       # ONE f32 bias slab (row = stage)
        for i in range(D):
            bias = bias.at[i, :W].set(params[f'enc{i}_b'][0])
        bias = bias.at[D, :].set(t_b[0])
        bias = bias.at[D + 1, :].set(d1_b[0])
        bias = bias.at[D + 2, :].set(d2_b[0])
        bias = bias.at[D + 3, :d3_b.shape[1]].set(d3_b[0])
        bias = bias.at[D + 4, :rgb_b.shape[1]].set(rgb_b[0])
        bias = bias.at[D + 5, :sig_b.shape[1]].set(sig_b[0])

        packed = {}
        # encoding MLP: layer-0 and skip-layer xyz weights merged along N (one matmul)
        packed['enc_wx'] = jnp.concatenate(
            [params[f'enc{i}_wx'] for i in range(D) if i == 0 or i in skips],
            axis=1).astype(bf)                                                  # (Cx, n*W)
        packed['enc_wh'] = jnp.stack(
            [params[f'enc{i}_wh'] for i in range(1, D)]).astype(bf)             # (D-1, W, W)
        packed['w_big'] = w_big.astype(bf)                                      # (W, 6W)
        packed['dir_w1d'] = jnp.concatenate(
            [H[i]['d1d'] for i in range(3)], axis=1).astype(bf)                 # (Cd, 3W)
        # block-diagonal downstream weights over head slots [scene|bg|fg...]
        packed['dir2_sb'] = _block_diag([H[0]['d2'], H[1]['d2']]).astype(bf)    # (2W, 2W)
        packed['dir2_fg'] = _block_diag([H[2]['d2']] * Kf).astype(bf)           # (KfW, KfW)
        packed['dir3_w'] = _block_diag(
            [H[hd_of[s]]['d3'] for s in range(NS)]).astype(bf)                  # (NSW, NSW/2)
        packed['rgb_w'] = _block_diag(
            [H[hd_of[s]]['rgbw'] for s in range(NS)]).astype(bf)                # (NSW/2, 3NS)
        packed['sig_w'] = _block_diag(
            [H[hd_of[s]]['sig2'] for s in range(NS)]).astype(bf)                # (NSW, NS)
        packed['bias'] = bias                                                   # (D+6, NSW) f32
    return packed


# ------------------------------- Pallas kernel -----------------------------
def make_kernel(cfg, out_w):
    D, W, K = cfg['inst_D'], cfg['inst_W'], cfg['inst_K']
    Kf = K - 1
    NS = 2 + Kf
    skips = set(cfg['inst_skips'])
    n_valid = 4 + 4 * K
    # which columns of the xyz-projection block each encoding layer consumes
    xyz_col = {}
    c = 0
    for i in range(D):
        if i == 0 or i in skips:
            xyz_col[i] = c
            c += W
    R_T, R_D1, R_D2, R_D3, R_RGB, R_SIG = D, D + 1, D + 2, D + 3, D + 4, D + 5

    def kernel(xyz_ref, dir_ref, enc_wx_ref, enc_wh_ref, w_big_ref, dir_w1d_ref,
               dir2_sb_ref, dir2_fg_ref, dir3_ref, rgb_w_ref, sig_w_ref,
               bias_ref, out_ref):
        bf, f32 = jnp.bfloat16, jnp.float32
        tp = xyz_ref.shape[0]

        def dot(x, w):
            # bf16 MXU path, f32 accumulation (weights already bf16 host-side).
            return jnp.dot(x.astype(bf), w, preferred_element_type=f32)

        def leaky(x):
            return jnp.maximum(x, NEG_SLOPE * x)          # 2 VALU ops

        def b_row(r, n):
            return bias_ref[r:r + 1, :n]                  # (1, n) f32

        def tile_fg(x):                                   # (tp, W) -> (tp, Kf*W)
            return jnp.concatenate([x] * Kf, axis=-1)

        xyz = xyz_ref[...]
        dirv = dir_ref[...]

        # ---- instance encoding MLP (skip layer's xyz matmul merged with layer 0) ----
        xyz_proj = dot(xyz, enc_wx_ref[...])              # (tp, n_xyz_cols)
        h = leaky(xyz_proj[:, :W] + b_row(0, W))
        for i in range(1, D):
            z = dot(h, enc_wh_ref[i - 1])
            if i in skips:
                z = z + xyz_proj[:, xyz_col[i]:xyz_col[i] + W]
            h = leaky(z + b_row(i, W))

        # ---- stage 1: ONE wide matmul covers fusion + sigma-l1 + ef@dir-l1 for
        #      all heads; obj-code offsets live in the precomputed bias rows ----
        Z = dot(h, w_big_ref[...])                        # (tp, 6W)
        dp = dot(dirv, dir_w1d_ref[...])                  # (tp, 3W), computed once

        # lane layout of all per-head activations: [scene | bg | fg1 | ... | fg_{K-1}]
        t_all = leaky(jnp.concatenate([Z[:, :2 * W], tile_fg(Z[:, 4 * W:5 * W])], axis=-1)
                      + b_row(R_T, NS * W))                                      # (tp, NS*W)
        d1 = leaky(jnp.concatenate(
            [Z[:, 2 * W:4 * W] + dp[:, :2 * W],
             tile_fg(Z[:, 5 * W:6 * W] + dp[:, 2 * W:3 * W])], axis=-1)
            + b_row(R_D1, NS * W))                                               # (tp, NS*W)

        # ---- dir-encoding layers 2/3 + sigma/rgb heads, block-diagonal weights ----
        d2 = leaky(jnp.concatenate(
            [dot(d1[:, :2 * W], dir2_sb_ref[...]),
             dot(d1[:, 2 * W:], dir2_fg_ref[...])], axis=-1)
            + b_row(R_D2, NS * W))                                               # (tp, NS*W)
        d3 = leaky(dot(d2, dir3_ref[...]) + b_row(R_D3, NS * (W // 2)))          # (tp, NS*W/2)
        rgb = jax.nn.sigmoid(dot(d3, rgb_w_ref[...]) + b_row(R_RGB, 3 * NS))     # (tp, 3*NS)
        sig = dot(t_all, sig_w_ref[...]) + b_row(R_SIG, NS)                      # (tp, NS)

        # ---- single lane-dense packed output slab -> one unmasked store ----
        pad = jnp.zeros((tp, out_w - n_valid), f32)
        out_ref[...] = jnp.concatenate([sig, rgb, pad], axis=-1)

    return kernel


def udc_nerf_forward_instance(params, emb_xyz, emb_dir, cfg, tile_p=256):
    """forward_instance(coarse=False, obj_code_type='param').

    tile_p: 256 keeps >=2 even grid steps at moderate P (so the single
    'parallel' axis shards across both TensorCores on v7x); on single-TC
    v5e/v6e with large P, raise to 512-1024 to amortize per-step overhead and
    weight pushes (VMEM is not the limit on any generation)."""
    P, Cx = emb_xyz.shape
    Cd = emb_dir.shape[1]
    K = cfg['inst_K']
    assert K >= 2, "foreground path of forward_instance needs K >= 2"
    NS = K + 1
    n_valid = 4 * NS                                   # sigma(1)+rgb(3)+usig(K)+urgb(3K)
    out_w = ((max(n_valid, 128) + 127) // 128) * 128   # lane-dense packed output width

    # pad the point axis to a tile multiple (arbitrary ray counts supported)
    Pp = ((P + tile_p - 1) // tile_p) * tile_p
    if Pp != P:
        emb_xyz = jnp.pad(emb_xyz, ((0, Pp - P), (0, 0)))
        emb_dir = jnp.pad(emb_dir, ((0, Pp - P), (0, 0)))

    packed = pack_params(params, cfg)
    vals = [packed[k] for k in PARAM_ORDER]

    def const_spec(shape):
        nd = len(shape)
        return pl.BlockSpec(shape, lambda i, _nd=nd: (0,) * _nd)

    in_specs = [pl.BlockSpec((tile_p, Cx), lambda i: (i, 0)),
                pl.BlockSpec((tile_p, Cd), lambda i: (i, 0))]
    in_specs += [const_spec(tuple(v.shape)) for v in vals]

    slab = pl.pallas_call(
        make_kernel(cfg, out_w),
        out_shape=jax.ShapeDtypeStruct((Pp, out_w), jnp.float32),
        grid_spec=pltpu.PrefetchScalarGridSpec(
            num_scalar_prefetch=0,
            grid=(Pp // tile_p,),
            in_specs=in_specs,
            out_specs=pl.BlockSpec((tile_p, out_w), lambda i: (i, 0)),
        ),
        compiler_params=pltpu.CompilerParams(dimension_semantics=("parallel",)),
    )(emb_xyz, emb_dir, *vals)

    slab = slab[:P]
    # slab columns: [scene_sig, bg_sig, fg_sig... | scene_rgb, bg_rgb, fg_rgb... | pad]
    sigma = slab[:, 0:1]
    usig = slab[:, 1:1 + K].reshape(P, K, 1)
    rgb = slab[:, NS:NS + 3]
    urgb = slab[:, NS + 3:NS + 3 + 3 * K].reshape(P, K, 3)
    return {'sigma': sigma, 'rgb': rgb, 'unmasked_sigma': usig, 'unmasked_rgb': urgb}


# ----------------------- pure-JAX reference (torch-literal) -----------------------
def ref_forward_instance(params, emb_xyz, emb_dir, cfg, mirror_bf16=True):
    """Torch-literal structure (concat forms, full P*K expansion).  With
    mirror_bf16=True the matmul operands are cast to bf16 like the kernel's MXU
    path; with False it is the full-f32 reference."""
    W, Wc, K, D = cfg['inst_W'], cfg['inst_W_code'], cfg['inst_K'], cfg['inst_D']
    skips = set(cfg['inst_skips'])
    P = emb_xyz.shape[0]
    leaky = lambda x: jnp.where(x > 0, x, NEG_SLOPE * x)

    def rdot(x, w):
        if mirror_bf16:
            x = x.astype(jnp.bfloat16)
            w = w.astype(jnp.bfloat16)
        return jnp.dot(x, w, preferred_element_type=jnp.float32)

    x_ = emb_xyz
    for i in range(D):
        if i in skips:
            x_ = jnp.concatenate([emb_xyz, x_], -1)
            w = jnp.concatenate([params[f'enc{i}_wx'], params[f'enc{i}_wh']], 0)
        elif i == 0:
            w = params[f'enc{i}_wx']
        else:
            w = params[f'enc{i}_wh']
        x_ = leaky(rdot(x_, w) + params[f'enc{i}_b'])

    x_flat = jnp.broadcast_to(x_[:, None, :], (P, K, W)).reshape(P * K, W)
    code_flat = jnp.broadcast_to(params['obj_code'][None, :, :], (P, K, Wc)).reshape(P * K, Wc)
    fuse_w = jnp.concatenate([params['fuse_wh'], params['fuse_wc']], 0)
    fused = (rdot(jnp.concatenate([x_flat, code_flat], -1), fuse_w)
             + params['fuse_b']).reshape(P, K, W)

    def head(prefix, feat, dirv):
        t = leaky(rdot(feat, params[f'{prefix}sig_w1']) + params[f'{prefix}sig_b1'])
        sig = rdot(t, params[f'{prefix}sig_w2']) + params[f'{prefix}sig_b2']
        xf = rdot(feat, params[f'{prefix}ef_w']) + params[f'{prefix}ef_b']
        w1 = jnp.concatenate([params[f'{prefix}dir_w1x'], params[f'{prefix}dir_w1d']], 0)
        d = leaky(rdot(jnp.concatenate([xf, dirv], -1), w1) + params[f'{prefix}dir_b1'])
        d = leaky(rdot(d, params[f'{prefix}dir_w2']) + params[f'{prefix}dir_b2'])
        d = leaky(rdot(d, params[f'{prefix}dir_w3']) + params[f'{prefix}dir_b3'])
        rgb = jax.nn.sigmoid(rdot(d, params[f'{prefix}rgb_w']) + params[f'{prefix}rgb_b'])
        return sig, rgb

    mean_x = fused.mean(axis=1)
    scene_sig, scene_rgb = head('scene_', mean_x, emb_dir)

    sig_bg, rgb_bg = head('inst1_', fused[:, 0, :], emb_dir)
    fg = fused[:, 1:, :].reshape(P * (K - 1), W)
    dir_fg = jnp.broadcast_to(emb_dir[:, None, :],
                              (P, K - 1, emb_dir.shape[1])).reshape(P * (K - 1), -1)
    sig_fg, rgb_fg = head('inst2_', fg, dir_fg)

    usig = jnp.concatenate([sig_bg[:, None, :], sig_fg.reshape(P, K - 1, 1)], 1)
    urgb = jnp.concatenate([rgb_bg[:, None, :], rgb_fg.reshape(P, K - 1, 3)], 1)
    return {'sigma': scene_sig, 'rgb': scene_rgb, 'unmasked_sigma': usig, 'unmasked_rgb': urgb}


# ----------------------------------- main -----------------------------------
if __name__ == "__main__":
    cfg = MODEL_CONFIG
    Cx = 3 + 3 * cfg['N_freq_xyz'] * 2   # 27
    Cd = 3 + 3 * cfg['N_freq_dir'] * 2   # 15
    P = 500                              # deliberately not a tile multiple (pad path)

    key = jax.random.PRNGKey(0)
    kx, kd = jax.random.split(key)
    emb_xyz = jax.random.normal(kx, (P, Cx), dtype=jnp.float32)
    emb_dir = jax.random.normal(kd, (P, Cd), dtype=jnp.float32)
    params = init_params(cfg, jax.random.PRNGKey(42))

    out = jax.block_until_ready(
        udc_nerf_forward_instance(params, emb_xyz, emb_dir, cfg, tile_p=256))

    # Reference with the kernel's bf16 operand casts (validates the structural
    # transforms: host-composed affine weights, folded code-offset biases,
    # lane-stacked block-diagonal heads, packed output).
    ref_bf = jax.block_until_ready(
        ref_forward_instance(params, emb_xyz, emb_dir, cfg, mirror_bf16=True))
    # Full-f32 "highest" reference (bounds the total bf16 MXU error).
    with jax.default_matmul_precision("highest"):
        ref_f32 = jax.block_until_ready(
            ref_forward_instance(params, emb_xyz, emb_dir, cfg, mirror_bf16=False))

    for name in ('sigma', 'rgb', 'unmasked_sigma', 'unmasked_rgb'):
        assert out[name].shape == ref_bf[name].shape, (name, out[name].shape, ref_bf[name].shape)
        err = float(jnp.max(jnp.abs(out[name] - ref_bf[name])))
        assert err < 5e-2, ('bf16-mirrored mismatch', name, err)
        err32 = float(jnp.max(jnp.abs(out[name] - ref_f32[name])))
        assert err32 < 0.2, ('f32 sanity band exceeded', name, err32)

    print("KERNEL_OK")
</pallas_src>

<mosaic_0001>
module attributes {stable_mosaic.version = 11 : i64} {
  func.func @kernel(%arg0: i32, %arg1: memref<256x27xf32, #tpu.memory_space<vmem>>, %arg2: memref<256x15xf32, #tpu.memory_space<vmem>>, %arg3: memref<27x128xbf16, #tpu.memory_space<vmem>>, %arg4: memref<3x64x64xbf16, #tpu.memory_space<vmem>>, %arg5: memref<64x384xbf16, #tpu.memory_space<vmem>>, %arg6: memref<15x192xbf16, #tpu.memory_space<vmem>>, %arg7: memref<128x128xbf16, #tpu.memory_space<vmem>>, %arg8: memref<192x192xbf16, #tpu.memory_space<vmem>>, %arg9: memref<320x160xbf16, #tpu.memory_space<vmem>>, %arg10: memref<160x15xbf16, #tpu.memory_space<vmem>>, %arg11: memref<320x5xbf16, #tpu.memory_space<vmem>>, %arg12: memref<10x320xf32, #tpu.memory_space<vmem>>, %arg13: memref<256x128xf32, #tpu.memory_space<vmem>>) attributes {dimension_semantics = [#tpu.dimension_semantics<parallel>], iteration_bounds = array<i64: 2>, scalar_prefetch = 0 : i64, scratch_operands = 0 : i64, tpu.core_type = #tpu.core_type<tc>, window_params = [{transform_indices = @transform_0, window_bounds = array<i64: 256, 27>}, {transform_indices = @transform_1, window_bounds = array<i64: 256, 15>}, {pipeline_mode = #tpu.pipeline_mode<synchronous>, transform_indices = @transform_2, window_bounds = array<i64: 27, 128>}, {pipeline_mode = #tpu.pipeline_mode<synchronous>, transform_indices = @transform_3, window_bounds = array<i64: 3, 64, 64>}, {pipeline_mode = #tpu.pipeline_mode<synchronous>, transform_indices = @transform_4, window_bounds = array<i64: 64, 384>}, {pipeline_mode = #tpu.pipeline_mode<synchronous>, transform_indices = @transform_5, window_bounds = array<i64: 15, 192>}, {pipeline_mode = #tpu.pipeline_mode<synchronous>, transform_indices = @transform_6, window_bounds = array<i64: 128, 128>}, {pipeline_mode = #tpu.pipeline_mode<synchronous>, transform_indices = @transform_7, window_bounds = array<i64: 192, 192>}, {pipeline_mode = #tpu.pipeline_mode<synchronous>, transform_indices = @transform_8, window_bounds = array<i64: 320, 160>}, {pipeline_mode = #tpu.pipeline_mode<synchronous>, transform_indices = @transform_9, window_bounds = array<i64: 160, 15>}, {pipeline_mode = #tpu.pipeline_mode<synchronous>, transform_indices = @transform_10, window_bounds = array<i64: 320, 5>}, {pipeline_mode = #tpu.pipeline_mode<synchronous>, transform_indices = @transform_11, window_bounds = array<i64: 10, 320>}, {transform_indices = @transform_12, window_bounds = array<i64: 256, 128>}]} {
    %c0 = arith.constant 0 : index
    %c0_0 = arith.constant 0 : index
    %0 = vector.load %arg1[%c0, %c0_0] : memref<256x27xf32, #tpu.memory_space<vmem>>, vector<256x27xf32>
    %c0_1 = arith.constant 0 : index
    %c0_2 = arith.constant 0 : index
    %1 = vector.load %arg2[%c0_1, %c0_2] : memref<256x15xf32, #tpu.memory_space<vmem>>, vector<256x15xf32>
    %c0_3 = arith.constant 0 : index
    %c0_4 = arith.constant 0 : index
    %2 = vector.load %arg3[%c0_3, %c0_4] : memref<27x128xbf16, #tpu.memory_space<vmem>>, vector<27x128xbf16>
    %3 = arith.truncf %0 : vector<256x27xf32> to vector<256x27xbf16>
    %cst = arith.constant dense<0.000000e+00> : vector<256x128xf32>
    %4 = tpu.matmul %3, %2, %cst {dimension_numbers = #tpu.dot_dimension_numbers<[1], [0], [0], [1], [0, 0, 1, 1], [], []>} : vector<256x27xbf16>, vector<27x128xbf16>, vector<256x128xf32> -> vector<256x128xf32>
    %5 = vector.extract_strided_slice %4 {offsets = [0, 0], sizes = [256, 64], strides = [1, 1]} : vector<256x128xf32> to vector<256x64xf32>
    %c0_5 = arith.constant 0 : index
    %c0_6 = arith.constant 0 : index
    %6 = vector.load %arg12[%c0_5, %c0_6] : memref<10x320xf32, #tpu.memory_space<vmem>>, vector<1x64xf32>
    %7 = vector.broadcast %6 : vector<1x64xf32> to vector<256x64xf32>
    %8 = arith.addf %5, %7 : vector<256x64xf32>
    %cst_7 = arith.constant 0.00999999977 : f32
    %9 = vector.broadcast %cst_7 : f32 to vector<256x64xf32>
    %10 = arith.mulf %9, %8 : vector<256x64xf32>
    %11 = arith.maximumf %8, %10 : vector<256x64xf32>
    %c0_8 = arith.constant 0 : index
    %c0_9 = arith.constant 0 : index
    %c0_10 = arith.constant 0 : index
    %12 = vector.load %arg4[%c0_8, %c0_9, %c0_10] : memref<3x64x64xbf16, #tpu.memory_space<vmem>>, vector<1x64x64xbf16>
    %13 = vector.shape_cast %12 : vector<1x64x64xbf16> to vector<64x64xbf16>
    %14 = arith.truncf %11 : vector<256x64xf32> to vector<256x64xbf16>
    %cst_11 = arith.constant dense<0.000000e+00> : vector<256x64xf32>
    %15 = tpu.matmul %14, %13, %cst_11 {dimension_numbers = #tpu.dot_dimension_numbers<[1], [0], [0], [1], [0, 0, 1, 1], [], []>} : vector<256x64xbf16>, vector<64x64xbf16>, vector<256x64xf32> -> vector<256x64xf32>
    %c1 = arith.constant 1 : index
    %c0_12 = arith.constant 0 : index
    %16 = vector.load %arg12[%c1, %c0_12] : memref<10x320xf32, #tpu.memory_space<vmem>>, vector<1x64xf32>
    %17 = vector.broadcast %16 : vector<1x64xf32> to vector<256x64xf32>
    %18 = arith.addf %15, %17 : vector<256x64xf32>
    %cst_13 = arith.constant 0.00999999977 : f32
    %19 = vector.broadcast %cst_13 : f32 to vector<256x64xf32>
    %20 = arith.mulf %19, %18 : vector<256x64xf32>
    %21 = arith.maximumf %18, %20 : vector<256x64xf32>
    %c1_14 = arith.constant 1 : index
    %c0_15 = arith.constant 0 : index
    %c0_16 = arith.constant 0 : index
    %22 = vector.load %arg4[%c1_14, %c0_15, %c0_16] : memref<3x64x64xbf16, #tpu.memory_space<vmem>>, vector<1x64x64xbf16>
    %23 = vector.shape_cast %22 : vector<1x64x64xbf16> to vector<64x64xbf16>
    %24 = arith.truncf %21 : vector<256x64xf32> to vector<256x64xbf16>
    %cst_17 = arith.constant dense<0.000000e+00> : vector<256x64xf32>
    %25 = tpu.matmul %24, %23, %cst_17 {dimension_numbers = #tpu.dot_dimension_numbers<[1], [0], [0], [1], [0, 0, 1, 1], [], []>} : vector<256x64xbf16>, vector<64x64xbf16>, vector<256x64xf32> -> vector<256x64xf32>
    %26 = vector.extract_strided_slice %4 {offsets = [0, 64], sizes = [256, 64], strides = [1, 1]} : vector<256x128xf32> to vector<256x64xf32>
    %27 = arith.addf %25, %26 : vector<256x64xf32>
    %c2 = arith.constant 2 : index
    %c0_18 = arith.constant 0 : index
    %28 = vector.load %arg12[%c2, %c0_18] : memref<10x320xf32, #tpu.memory_space<vmem>>, vector<1x64xf32>
    %29 = vector.broadcast %28 : vector<1x64xf32> to vector<256x64xf32>
    %30 = arith.addf %27, %29 : vector<256x64xf32>
    %cst_19 = arith.constant 0.00999999977 : f32
    %31 = vector.broadcast %cst_19 : f32 to vector<256x64xf32>
    %32 = arith.mulf %31, %30 : vector<256x64xf32>
    %33 = arith.maximumf %30, %32 : vector<256x64xf32>
    %c2_20 = arith.constant 2 : index
    %c0_21 = arith.constant 0 : index
    %c0_22 = arith.constant 0 : index
    %34 = vector.load %arg4[%c2_20, %c0_21, %c0_22] : memref<3x64x64xbf16, #tpu.memory_space<vmem>>, vector<1x64x64xbf16>
    %35 = vector.shape_cast %34 : vector<1x64x64xbf16> to vector<64x64xbf16>
    %36 = arith.truncf %33 : vector<256x64xf32> to vector<256x64xbf16>
    %cst_23 = arith.constant dense<0.000000e+00> : vector<256x64xf32>
    %37 = tpu.matmul %36, %35, %cst_23 {dimension_numbers = #tpu.dot_dimension_numbers<[1], [0], [0], [1], [0, 0, 1, 1], [], []>} : vector<256x64xbf16>, vector<64x64xbf16>, vector<256x64xf32> -> vector<256x64xf32>
    %c3 = arith.constant 3 : index
    %c0_24 = arith.constant 0 : index
    %38 = vector.load %arg12[%c3, %c0_24] : memref<10x320xf32, #tpu.memory_space<vmem>>, vector<1x64xf32>
    %39 = vector.broadcast %38 : vector<1x64xf32> to vector<256x64xf32>
    %40 = arith.addf %37, %39 : vector<256x64xf32>
    %cst_25 = arith.constant 0.00999999977 : f32
    %41 = vector.broadcast %cst_25 : f32 to vector<256x64xf32>
    %42 = arith.mulf %41, %40 : vector<256x64xf32>
    %43 = arith.maximumf %40, %42 : vector<256x64xf32>
    %c0_26 = arith.constant 0 : index
    %c0_27 = arith.constant 0 : index
    %44 = vector.load %arg5[%c0_26, %c0_27] : memref<64x384xbf16, #tpu.memory_space<vmem>>, vector<64x384xbf16>
    %45 = arith.truncf %43 : vector<256x64xf32> to vector<256x64xbf16>
    %cst_28 = arith.constant dense<0.000000e+00> : vector<256x384xf32>
    %46 = tpu.matmul %45, %44, %cst_28 {dimension_numbers = #tpu.dot_dimension_numbers<[1], [0], [0], [1], [0, 0, 1, 1], [], []>} : vector<256x64xbf16>, vector<64x384xbf16>, vector<256x384xf32> -> vector<256x384xf32>
    %c0_29 = arith.constant 0 : index
    %c0_30 = arith.constant 0 : index
    %47 = vector.load %arg6[%c0_29, %c0_30] : memref<15x192xbf16, #tpu.memory_space<vmem>>, vector<15x192xbf16>
    %48 = arith.truncf %1 : vector<256x15xf32> to vector<256x15xbf16>
    %cst_31 = arith.constant dense<0.000000e+00> : vector<256x192xf32>
    %49 = tpu.matmul %48, %47, %cst_31 {dimension_numbers = #tpu.dot_dimension_numbers<[1], [0], [0], [1], [0, 0, 1, 1], [], []>} : vector<256x15xbf16>, vector<15x192xbf16>, vector<256x192xf32> -> vector<256x192xf32>
    %50 = vector.extract_strided_slice %46 {offsets = [0, 0], sizes = [256, 128], strides = [1, 1]} : vector<256x384xf32> to vector<256x128xf32>
    %51 = vector.extract_strided_slice %46 {offsets = [0, 256], sizes = [256, 64], strides = [1, 1]} : vector<256x384xf32> to vector<256x64xf32>
    %52 = tpu.concatenate %51, %51, %51 in 1 : vector<256x64xf32>, vector<256x64xf32>, vector<256x64xf32> -> vector<256x192xf32>
    %53 = tpu.concatenate %50, %52 in 1 : vector<256x128xf32>, vector<256x192xf32> -> vector<256x320xf32>
    %c4 = arith.constant 4 : index
    %c0_32 = arith.constant 0 : index
    %54 = vector.load %arg12[%c4, %c0_32] : memref<10x320xf32, #tpu.memory_space<vmem>>, vector<1x320xf32>
    %55 = vector.broadcast %54 : vector<1x320xf32> to vector<256x320xf32>
    %56 = arith.addf %53, %55 : vector<256x320xf32>
    %cst_33 = arith.constant 0.00999999977 : f32
    %57 = vector.broadcast %cst_33 : f32 to vector<256x320xf32>
    %58 = arith.mulf %57, %56 : vector<256x320xf32>
    %59 = arith.maximumf %56, %58 : vector<256x320xf32>
    %60 = vector.extract_strided_slice %46 {offsets = [0, 128], sizes = [256, 128], strides = [1, 1]} : vector<256x384xf32> to vector<256x128xf32>
    %61 = vector.extract_strided_slice %49 {offsets = [0, 0], sizes = [256, 128], strides = [1, 1]} : vector<256x192xf32> to vector<256x128xf32>
    %62 = arith.addf %60, %61 : vector<256x128xf32>
    %63 = vector.extract_strided_slice %46 {offsets = [0, 320], sizes = [256, 64], strides = [1, 1]} : vector<256x384xf32> to vector<256x64xf32>
    %64 = vector.extract_strided_slice %49 {offsets = [0, 128], sizes = [256, 64], strides = [1, 1]} : vector<256x192xf32> to vector<256x64xf32>
    %65 = arith.addf %63, %64 : vector<256x64xf32>
    %66 = tpu.concatenate %65, %65, %65 in 1 : vector<256x64xf32>, vector<256x64xf32>, vector<256x64xf32> -> vector<256x192xf32>
    %67 = tpu.concatenate %62, %66 in 1 : vector<256x128xf32>, vector<256x192xf32> -> vector<256x320xf32>
    %c5 = arith.constant 5 : index
    %c0_34 = arith.constant 0 : index
    %68 = vector.load %arg12[%c5, %c0_34] : memref<10x320xf32, #tpu.memory_space<vmem>>, vector<1x320xf32>
    %69 = vector.broadcast %68 : vector<1x320xf32> to vector<256x320xf32>
    %70 = arith.addf %67, %69 : vector<256x320xf32>
    %cst_35 = arith.constant 0.00999999977 : f32
    %71 = vector.broadcast %cst_35 : f32 to vector<256x320xf32>
    %72 = arith.mulf %71, %70 : vector<256x320xf32>
    %73 = arith.maximumf %70, %72 : vector<256x320xf32>
    %74 = vector.extract_strided_slice %73 {offsets = [0, 0], sizes = [256, 128], strides = [1, 1]} : vector<256x320xf32> to vector<256x128xf32>
    %c0_36 = arith.constant 0 : index
    %c0_37 = arith.constant 0 : index
    %75 = vector.load %arg7[%c0_36, %c0_37] : memref<128x128xbf16, #tpu.memory_space<vmem>>, vector<128x128xbf16>
    %76 = arith.truncf %74 : vector<256x128xf32> to vector<256x128xbf16>
    %cst_38 = arith.constant dense<0.000000e+00> : vector<256x128xf32>
    %77 = tpu.matmul %76, %75, %cst_38 {dimension_numbers = #tpu.dot_dimension_numbers<[1], [0], [0], [1], [0, 0, 1, 1], [], []>} : vector<256x128xbf16>, vector<128x128xbf16>, vector<256x128xf32> -> vector<256x128xf32>
    %78 = vector.extract_strided_slice %73 {offsets = [0, 128], sizes = [256, 192], strides = [1, 1]} : vector<256x320xf32> to vector<256x192xf32>
    %c0_39 = arith.constant 0 : index
    %c0_40 = arith.constant 0 : index
    %79 = vector.load %arg8[%c0_39, %c0_40] : memref<192x192xbf16, #tpu.memory_space<vmem>>, vector<192x192xbf16>
    %80 = arith.truncf %78 : vector<256x192xf32> to vector<256x192xbf16>
    %cst_41 = arith.constant dense<0.000000e+00> : vector<256x192xf32>
    %81 = tpu.matmul %80, %79, %cst_41 {dimension_numbers = #tpu.dot_dimension_numbers<[1], [0], [0], [1], [0, 0, 1, 1], [], []>} : vector<256x192xbf16>, vector<192x192xbf16>, vector<256x192xf32> -> vector<256x192xf32>
    %82 = tpu.concatenate %77, %81 in 1 : vector<256x128xf32>, vector<256x192xf32> -> vector<256x320xf32>
    %c6 = arith.constant 6 : index
    %c0_42 = arith.constant 0 : index
    %83 = vector.load %arg12[%c6, %c0_42] : memref<10x320xf32, #tpu.memory_space<vmem>>, vector<1x320xf32>
    %84 = vector.broadcast %83 : vector<1x320xf32> to vector<256x320xf32>
    %85 = arith.addf %82, %84 : vector<256x320xf32>
    %cst_43 = arith.constant 0.00999999977 : f32
    %86 = vector.broadcast %cst_43 : f32 to vector<256x320xf32>
    %87 = arith.mulf %86, %85 : vector<256x320xf32>
    %88 = arith.maximumf %85, %87 : vector<256x320xf32>
    %c0_44 = arith.constant 0 : index
    %c0_45 = arith.constant 0 : index
    %89 = vector.load %arg9[%c0_44, %c0_45] : memref<320x160xbf16, #tpu.memory_space<vmem>>, vector<320x160xbf16>
    %90 = arith.truncf %88 : vector<256x320xf32> to vector<256x320xbf16>
    %cst_46 = arith.constant dense<0.000000e+00> : vector<256x160xf32>
    %91 = tpu.matmul %90, %89, %cst_46 {dimension_numbers = #tpu.dot_dimension_numbers<[1], [0], [0], [1], [0, 0, 1, 1], [], []>} : vector<256x320xbf16>, vector<320x160xbf16>, vector<256x160xf32> -> vector<256x160xf32>
    %c7 = arith.constant 7 : index
    %c0_47 = arith.constant 0 : index
    %92 = vector.load %arg12[%c7, %c0_47] : memref<10x320xf32, #tpu.memory_space<vmem>>, vector<1x160xf32>
    %93 = vector.broadcast %92 : vector<1x160xf32> to vector<256x160xf32>
    %94 = arith.addf %91, %93 : vector<256x160xf32>
    %cst_48 = arith.constant 0.00999999977 : f32
    %95 = vector.broadcast %cst_48 : f32 to vector<256x160xf32>
    %96 = arith.mulf %95, %94 : vector<256x160xf32>
    %97 = arith.maximumf %94, %96 : vector<256x160xf32>
    %c0_49 = arith.constant 0 : index
    %c0_50 = arith.constant 0 : index
    %98 = vector.load %arg10[%c0_49, %c0_50] : memref<160x15xbf16, #tpu.memory_space<vmem>>, vector<160x15xbf16>
    %99 = arith.truncf %97 : vector<256x160xf32> to vector<256x160xbf16>
    %cst_51 = arith.constant dense<0.000000e+00> : vector<256x15xf32>
    %100 = tpu.matmul %99, %98, %cst_51 {dimension_numbers = #tpu.dot_dimension_numbers<[1], [0], [0], [1], [0, 0, 1, 1], [], []>} : vector<256x160xbf16>, vector<160x15xbf16>, vector<256x15xf32> -> vector<256x15xf32>
    %c8 = arith.constant 8 : index
    %c0_52 = arith.constant 0 : index
    %101 = vector.load %arg12[%c8, %c0_52] : memref<10x320xf32, #tpu.memory_space<vmem>>, vector<1x15xf32>
    %102 = vector.broadcast %101 : vector<1x15xf32> to vector<256x15xf32>
    %103 = arith.addf %100, %102 : vector<256x15xf32>
    %104 = arith.negf %103 : vector<256x15xf32>
    %105 = math.exp %104 : vector<256x15xf32>
    %cst_53 = arith.constant 1.000000e+00 : f32
    %106 = vector.broadcast %cst_53 : f32 to vector<256x15xf32>
    %107 = arith.addf %106, %105 : vector<256x15xf32>
    %108 = arith.divf %106, %107 : vector<256x15xf32>
    %c0_54 = arith.constant 0 : index
    %c0_55 = arith.constant 0 : index
    %109 = vector.load %arg11[%c0_54, %c0_55] : memref<320x5xbf16, #tpu.memory_space<vmem>>, vector<320x5xbf16>
    %110 = arith.truncf %59 : vector<256x320xf32> to vector<256x320xbf16>
    %cst_56 = arith.constant dense<0.000000e+00> : vector<256x5xf32>
    %111 = tpu.matmul %110, %109, %cst_56 {dimension_numbers = #tpu.dot_dimension_numbers<[1], [0], [0], [1], [0, 0, 1, 1], [], []>} : vector<256x320xbf16>, vector<320x5xbf16>, vector<256x5xf32> -> vector<256x5xf32>
    %c9 = arith.constant 9 : index
    %c0_57 = arith.constant 0 : index
    %112 = vector.load %arg12[%c9, %c0_57] : memref<10x320xf32, #tpu.memory_space<vmem>>, vector<1x5xf32>
    %113 = vector.broadcast %112 : vector<1x5xf32> to vector<256x5xf32>
    %114 = arith.addf %111, %113 : vector<256x5xf32>
    %cst_58 = arith.constant 0.000000e+00 : f32
    %115 = vector.broadcast %cst_58 : f32 to vector<256x108xf32>
    %116 = tpu.concatenate %114, %108, %115 in 1 : vector<256x5xf32>, vector<256x15xf32>, vector<256x108xf32> -> vector<256x128xf32>
    %c0_59 = arith.constant 0 : index
    %c0_60 = arith.constant 0 : index
    %117 = vector.load %arg13[%c0_59, %c0_60] : memref<256x128xf32, #tpu.memory_space<vmem>>, vector<256x128xf32>
    tpu.vector_store %arg13[%c0_59, %c0_60], %116 {strides = array<i32>} : memref<256x128xf32, #tpu.memory_space<vmem>>, vector<256x128xf32>,
    return
  }
  func.func @transform_0(%arg0: i32) -> (i32, i32) {
    %c0_i32 = arith.constant 0 : i32
    %c0_i32_0 = arith.constant 0 : i32
    return %arg0, %c0_i32 : i32, i32
  }
  func.func @transform_1(%arg0: i32) -> (i32, i32) {
    %c0_i32 = arith.constant 0 : i32
    %c0_i32_0 = arith.constant 0 : i32
    return %arg0, %c0_i32 : i32, i32
  }
  func.func @transform_2(%arg0: i32) -> (i32, i32) {
    %c0_i32 = arith.constant 0 : i32
    %c0_i32_0 = arith.constant 0 : i32
    %c0_i32_1 = arith.constant 0 : i32
    return %c0_i32, %c0_i32_0 : i32, i32
  }
  func.func @transform_3(%arg0: i32) -> (i32, i32, i32) {
    %c0_i32 = arith.constant 0 : i32
    %c0_i32_0 = arith.constant 0 : i32
    %c0_i32_1 = arith.constant 0 : i32
    %c0_i32_2 = arith.constant 0 : i32
    return %c0_i32, %c0_i32_0, %c0_i32_1 : i32, i32, i32
  }
  func.func @transform_4(%arg0: i32) -> (i32, i32) {
    %c0_i32 = arith.constant 0 : i32
    %c0_i32_0 = arith.constant 0 : i32
    %c0_i32_1 = arith.constant 0 : i32
    return %c0_i32, %c0_i32_0 : i32, i32
  }
  func.func @transform_5(%arg0: i32) -> (i32, i32) {
    %c0_i32 = arith.constant 0 : i32
    %c0_i32_0 = arith.constant 0 : i32
    %c0_i32_1 = arith.constant 0 : i32
    return %c0_i32, %c0_i32_0 : i32, i32
  }
  func.func @transform_6(%arg0: i32) -> (i32, i32) {
    %c0_i32 = arith.constant 0 : i32
    %c0_i32_0 = arith.constant 0 : i32
    %c0_i32_1 = arith.constant 0 : i32
    return %c0_i32, %c0_i32_0 : i32, i32
  }
  func.func @transform_7(%arg0: i32) -> (i32, i32) {
    %c0_i32 = arith.constant 0 : i32
    %c0_i32_0 = arith.constant 0 : i32
    %c0_i32_1 = arith.constant 0 : i32
    return %c0_i32, %c0_i32_0 : i32, i32
  }
  func.func @transform_8(%arg0: i32) -> (i32, i32) {
    %c0_i32 = arith.constant 0 : i32
    %c0_i32_0 = arith.constant 0 : i32
    %c0_i32_1 = arith.constant 0 : i32
    return %c0_i32, %c0_i32_0 : i32, i32
  }
  func.func @transform_9(%arg0: i32) -> (i32, i32) {
    %c0_i32 = arith.constant 0 : i32
    %c0_i32_0 = arith.constant 0 : i32
    %c0_i32_1 = arith.constant 0 : i32
    return %c0_i32, %c0_i32_0 : i32, i32
  }
  func.func @transform_10(%arg0: i32) -> (i32, i32) {
    %c0_i32 = arith.constant 0 : i32
    %c0_i32_0 = arith.constant 0 : i32
    %c0_i32_1 = arith.constant 0 : i32
    return %c0_i32, %c0_i32_0 : i32, i32
  }
  func.func @transform_11(%arg0: i32) -> (i32, i32) {
    %c0_i32 = arith.constant 0 : i32
    %c0_i32_0 = arith.constant 0 : i32
    %c0_i32_1 = arith.constant 0 : i32
    return %c0_i32, %c0_i32_0 : i32, i32
  }
  func.func @transform_12(%arg0: i32) -> (i32, i32) {
    %c0_i32 = arith.constant 0 : i32
    %c0_i32_0 = arith.constant 0 : i32
    return %arg0, %c0_i32 : i32, i32
  }
}

</mosaic_0001>

<bundles_post_ra>
// kernel: tpu_custom_call.1
= control target key start
LH: loop header
LB: loop body
LE: loop exit
PB: predicated region body
PF: predicated region fallthrough
CT: control target
= control target key end

     0   :  { %s11331_s0 = inlined_call_operand.vmem [shape: f32[512,27], index: 0, kind: input, shape index: {}]   ;;  %s11332_s1 = inlined_call_operand.vmem [shape: f32[512,15], index: 1, kind: input, shape index: {}]   ;;  %s11333_s2 = inlined_call_operand.vmem [shape: bf16[27,128], index: 2, kind: input, shape index: {}]   ;;  %s11334_s3 = inlined_call_operand.vmem [shape: bf16[3,64,64], index: 3, kind: input, shape index: {}]   ;;  %s11335_s4 = inlined_call_operand.vmem [shape: bf16[64,384], index: 4, kind: input, shape index: {}]   ;;  %s11336_s5 = inlined_call_operand.vmem [shape: bf16[15,192], index: 5, kind: input, shape index: {}]   ;;  %s11337_s6 = inlined_call_operand.vmem [shape: bf16[128,128], index: 6, kind: input, shape index: {}]   ;;  %s11338_s7 = inlined_call_operand.vmem [shape: bf16[192,192], index: 7, kind: input, shape index: {}]   ;;  %s11339_s8 = inlined_call_operand.vmem [shape: bf16[320,160], index: 8, kind: input, shape index: {}]   ;;  %s11340_s9 = inlined_call_operand.vmem [shape: bf16[160,15], index: 9, kind: input, shape index: {}]   ;;  %s11341_s10 = inlined_call_operand.vmem [shape: bf16[320,5], index: 10, kind: input, shape index: {}]   ;;  %s11342_s11 = inlined_call_operand.vmem [shape: f32[10,320], index: 11, kind: input, shape index: {}]   ;;  %s11343_s12 = inlined_call_operand.hbm [shape: f32[512,128], index: 12, kind: output, shape index: {}]  }
   0x1   :  { %11392 = sst [smem:[#allocation64_spill]] %s11331_s0 }
   0x2   :  { %11393 = sst [smem:[#allocation65_spill]] %s11333_s2 }
   0x3   :  { %17 = vsyncpa [#allocation3], 0 }
   0x4   :  { %19 = vsyncpa [#allocation3 + $0x1], 0  ;;  %s8632_s21 = smov 0   ;;  %s8634_s22 = smov 0  }
   0x5   :  { %s8636_s23 = smov 0   ;;  %s8638_s24 = smov 0  }
   0x6 LB: > { %s8653_s25 = sadd.s32 4294967295, %s8558_s24   ;;  %s7111_s26 = sadd.s32 4294967294, %s8558_s24   ;;  %s8558_s24 = sphi %s8638_s24, %s11551_s24   ;;  %s8554_s23 = sphi %s8636_s23, %s11550_s23   ;;  %s8550_s22 = sphi %s8634_s22, %s11549_s22   ;;  %s8546_s21 = sphi %s8632_s21, %s11548_s21  }
   0x7   : > { %s8657_s27 = sadd.s32 1, %s8558_s24   ;;  %s294_s28 = sadd.s32 1, %s8554_s23 }
   0x8   : > { %s291_s29 = ssub.s32 %s8558_s24, %s8657_s27  ;;  %p304_p0 = scmp.ne.s32.totalorder %s8554_s23, %s8550_s22 }
   0x9   : > { %p292_p1 = scmp.eq.s32.totalorder %s291_s29, 0  ;;  %p305_p2 = scmp.eq.s32.totalorder %s8653_s25, 1 }
   0xa   : > { %p310_p3 = scmp.ne.s32.totalorder %s8550_s22, %s8546_s21  ;;  %p311_p4 = scmp.eq.s32.totalorder %s7111_s26, 1 }
   0xb   : > { %s8668_s30 = scalar_select %p292_p1, %s8554_s23, %s294_s28  }
   0xc   : > { %p8670_p5 = por %p305_p2, %p304_p0  ;;  %p8674_p6 = por %p311_p4, %p310_p3 }
   0xd   : > { %p7114_p7 = scmp.ge.s32.totalorder %s8558_s24, 1  ;;  %p377_p8 = scmp.lt.s32.totalorder %s8558_s24, 3 }
   0xf   : > { %p378_p9 = pnand %p7114_p7, %p377_p8 }
  0x11   : > { %381 = sbr.rel (%p378_p9) target bundleno = 2584 (0xa18), region = 68 }
  0x18   : > { %s11396_s2 = sld [smem:[#allocation65_spill]]  ;;  %vm582_vm0 = vcmask 1044480   ;;  %vm583_vm1 = vcmask 1045504   ;;  %s7116_s19 = sshll.u32 %s8653_s25, 5  ;;  %v8560_v2 = vmov 65535   ;;  %v8201_v5 = vld [vmem:[%s11334_s3] sm:$0xff]  }
  0x19   : > { %v584_v3 = vsel %vm582_vm0, 4294967295, %v8560_v2  ;;  %p425_p10 = scmp.lt.s32.totalorder %s7116_s19, 63  ;;  %s11397_s0 = sld [smem:[#allocation64_spill]]  ;;  %vm533_vm2 = vcmask 220160   ;;  %v8202_v28 = vld [vmem:[%s11334_s3 + $0x8] sm:$0xff]   ;;  %v8203_v34 = vld [vmem:[%s11334_s3 + $0x10] sm:$0xff]  }
  0x1a   : > { %v585_v4 = vsel %vm583_vm1, %v584_v3, 0  ;;  %v8204_v57 = vld [vmem:[%s11334_s3 + $0x18] sm:$0xff]   ;;  %v8761_v58 = vld [vmem:[%s11342_s11] ss:$0 sm:$0xff]  ;;  %vm896_vm3 = vcmask 523264   ;;  %vm2549_vm4 = vcmask 1046528  }
  0x1b   : > { %s11553_s19 = smov (!%p425_p10, %s7116_s19), 63  ;;  %vm2550_vm5 = vcmask 1047552   ;;  %vm2500_vm6 = vcmask 121856   ;;  %s11438_s29 = smov 64   ;;  %vm5816_vm7 = vcmask 261120   ;;  %vm6925_vm8 = vcmask 39936  }
  0x1c   : > { %s11346_s28 = sshll.u32 %s11553_s19, 3  ;;  %s11398_s20 = sshll.u32 %s11553_s19, 3  ;;  %vm6958_vm9 = vcmask 162816  }
  0x1d   : > { %s9198_s15 = scalar_lea.vmem %s11332_s1, %s11398_s20  ;;  %s8563_s19 = smov 5  }
  0x1e   : > { %v8199_v0 = vld [vmem:[%s11396_s2] sm:$0xff]   ;;  %v8200_v1 = vld [vmem:[%s11396_s2 + $0x8] sm:$0x3f]   ;;  %s7483_s17 = sshll.u32 %s8653_s25, 12 }
  0x1f   : > { %7738 = vmatprep.subr.bf16.mxu0 %v8199_v0  ;;  %8022 = vmatprep.subr.bf16.mxu1 %v8199_v0  ;;  %v587_v6 = vand.u32 %v8200_v1, %v585_v4  ;;  %s8699_s16 = scalar_lea.vmem %s11397_s0, %s11346_s28  ;;  %s421_s0 = sand.u32 1, %s8550_s22  }
  0x20   : > { %7739 = vmatpush3.bf16.msra.mxu0 %v8199_v0  ;;  %8024 = vmatpush3.bf16.msra.mxu1 %v8199_v0  ;;  %v438_v7 = vld [vmem:[%s8699_s16] sm:$0xff]  ;;  %v439_v8 = vld [vmem:[%s8699_s16 + $0x8] sm:$0xff]  ;;  %v440_v9 = vld [vmem:[%s8699_s16 + $0x10] sm:$0xff]  ;;  %s11280_s26 = scalar_lea.hbm %s11343_s12, %s7483_s17  ;;  %s11290_s25 = scalar_lea.sflag [#allocation3], %s421_s0 }
  0x21   : > { %7740 = vmatprep.subr.bf16.mxu0 %v587_v6  ;;  %8023 = vmatprep.subr.bf16.mxu1 %v587_v6  ;;  %v506_v10 = vpack.c.bf16 %v439_v8, %v438_v7  ;;  %v441_v11 = vld [vmem:[%s8699_s16 + $0x18] sm:$0xff]  ;;  %v442_v12 = vld [vmem:[%s8699_s16 + $0x20] sm:$0xff]  ;;  %v443_v13 = vld [vmem:[%s8699_s16 + $0x28] sm:$0xff]  ;;  %s8564_s28 = smov [#allocation2]  }
  0x22   : > { %v507_v14 = vpack.c.bf16 %v441_v11, %v440_v9  ;;  %v508_v15 = vpack.c.bf16 %v443_v13, %v442_v12  ;;  %v444_v16 = vld [vmem:[%s8699_s16 + $0x30] sm:$0xff]  ;;  %v445_v17 = vld [vmem:[%s8699_s16 + $0x38] sm:$0xff]  ;;  %v446_v18 = vld [vmem:[%s8699_s16 + $0x40] sm:$0xff] }
  0x23   : > { %7742 = vmatprep.mubr.msk.bf16.mxu0 %vm533_vm2, %v506_v10  ;;  %v447_v19 = vld [vmem:[%s8699_s16 + $0x48] sm:$0xff]  ;;  %v454_v20 = vld [vmem:[%s8699_s16 + $0x80] sm:$0xff]  ;;  %v456_v23 = vld [vmem:[%s8699_s16 + $0x90] sm:$0xff]  ;;  %v509_v29 = vpack.c.bf16 %v445_v17, %v444_v16 }
  0x24   : > { %7741 = vmatpush3.bf16.msra.mxu0 %v587_v6  ;;  %8025 = vmatpush3.bf16.msra.mxu1 %v587_v6  ;;  %v455_v21 = vld [vmem:[%s8699_s16 + $0x88] sm:$0xff]  ;;  %v457_v24 = vld [vmem:[%s8699_s16 + $0x98] sm:$0xff]  ;;  %v458_v25 = vld [vmem:[%s8699_s16 + $0xa0] sm:$0xff]  ;;  %v510_v31 = vpack.c.bf16 %v447_v19, %v446_v18 }
  0x25   : > { %7774 = vmatprep.subr.bf16.mxu1 %v8201_v5  ;;  %v514_v22 = vpack.c.bf16 %v455_v21, %v454_v20  ;;  %v515_v26 = vpack.c.bf16 %v457_v24, %v456_v23  ;;  %v459_v27 = vld [vmem:[%s8699_s16 + $0xa8] sm:$0xff]  ;;  %v460_v32 = vld [vmem:[%s8699_s16 + $0xb0] sm:$0xff]  ;;  %v461_v33 = vld [vmem:[%s8699_s16 + $0xb8] sm:$0xff] }
  0x26   : > { %v516_v30 = vpack.c.bf16 %v459_v27, %v458_v25  ;;  %v462_v35 = vld [vmem:[%s8699_s16 + $0xc0] sm:$0xff]  ;;  %v463_v36 = vld [vmem:[%s8699_s16 + $0xc8] sm:$0xff]  ;;  %v448_v37 = vld [vmem:[%s8699_s16 + $0x50] sm:$0xff]  ;;  %v517_v41 = vpack.c.bf16 %v461_v33, %v460_v32 }
  0x27   : > { %7743 = vmatmul.mubr.msk.bf16.vlgmr.msra.gmra.mrb[0].mxu0 %vm533_vm2, %v507_v14  ;;  %7758 = vmatprep.mubr.msk.bf16.mxu1 %vm533_vm2, %v514_v22  ;;  %v449_v38 = vld [vmem:[%s8699_s16 + $0x58] sm:$0xff]  ;;  %v450_v39 = vld [vmem:[%s8699_s16 + $0x60] sm:$0xff]  ;;  %v451_v40 = vld [vmem:[%s8699_s16 + $0x68] sm:$0xff]  ;;  %v518_v42 = vpack.c.bf16 %v463_v36, %v462_v35 }
  0x28   : > { %7746 = vmatprep.mubr.msk.bf16.mxu0 %vm533_vm2, %v508_v15  ;;  %7759 = vmatmul.mubr.msk.bf16.vlgmr.msra.gmra.mrb[0].mxu1 %vm533_vm2, %v515_v26  ;;  %v511_v43 = vpack.c.bf16 %v449_v38, %v448_v37  ;;  %v464_v44 = vld [vmem:[%s8699_s16 + $0xd0] sm:$0xff]  ;;  %v465_v45 = vld [vmem:[%s8699_s16 + $0xd8] sm:$0xff]  ;;  %v512_v46 = vpack.c.bf16 %v451_v40, %v450_v39  ;;  %v466_v47 = vld [vmem:[%s8699_s16 + $0xe0] sm:$0xff] }
  0x29   : > { %7762 = vmatprep.mubr.msk.bf16.mxu1 %vm533_vm2, %v516_v30  ;;  %7775 = vmatpush3.bf16.msra.mxu1 %v8201_v5  ;;  %v467_v48 = vld [vmem:[%s8699_s16 + $0xe8] sm:$0xff]  ;;  %v452_v49 = vld [vmem:[%s8699_s16 + $0x70] sm:$0xff]  ;;  %v453_v50 = vld [vmem:[%s8699_s16 + $0x78] sm:$0xff]  ;;  %v519_v51 = vpack.c.bf16 %v465_v45, %v464_v44 }
  0x2a   : > { %7776 = vmatprep.subr.bf16.mxu1 %v8202_v28  ;;  %v520_v52 = vpack.c.bf16 %v467_v48, %v466_v47  ;;  %v513_v53 = vpack.c.bf16 %v453_v50, %v452_v49  ;;  %v468_v54 = vld [vmem:[%s8699_s16 + $0xf0] sm:$0xff]  ;;  %v469_v55 = vld [vmem:[%s8699_s16 + $0xf8] sm:$0xff]  ;;  %s11344_s16 = smov 64  }
  0x2b   : > { %v521_v56 = vpack.c.bf16 %v469_v55, %v468_v54 }
  0x2d   : > { %7777 = vmatpush3.bf16.msra.mxu1 %v8202_v28 }
  0x2e   : > { %7778 = vmatprep.subr.bf16.mxu1 %v8203_v34 }
  0x2f   : > { %7747 = vmatmul.mubr.msk.bf16.gmra.mrb[4].mxu0 %vm533_vm2, %v509_v29 }
  0x30   : > { %7750 = vmatprep.mubr.msk.bf16.mxu0 %vm533_vm2, %v510_v31  ;;  %7763 = vmatmul.mubr.msk.bf16.gmra.mrb[4].mxu1 %vm533_vm2, %v517_v41 }
  0x31   : > { %7766 = vmatprep.mubr.msk.bf16.mxu1 %vm533_vm2, %v518_v42  ;;  %7779 = vmatpush3.bf16.msra.mxu1 %v8203_v34 }
  0x32   : > { %7780 = vmatprep.subr.bf16.mxu1 %v8204_v57 }
  0x35   : > { %7781 = vmatpush3.bf16.msra.mxu1 %v8204_v57 }
  0x37   : > { %7751 = vmatmul.mubr.msk.bf16.gmra.mrb[8].mxu0 %vm533_vm2, %v511_v43 }
  0x38   : > { %7754 = vmatprep.mubr.msk.bf16.mxu0 %vm533_vm2, %v512_v46  ;;  %7767 = vmatmul.mubr.msk.bf16.gmra.mrb[8].mxu1 %vm533_vm2, %v519_v51 }
  0x39   : > { %7770 = vmatprep.mubr.msk.bf16.mxu1 %vm533_vm2, %v520_v52 }
  0x3f   : > { %7755 = vmatmul.mubr.msk.bf16.gmra.mrb[12].mxu0 %vm533_vm2, %v513_v53 }
  0x40   : > { %7771 = vmatmul.mubr.msk.bf16.gmra.mrb[12].mxu1 %vm533_vm2, %v521_v56 }
  0xfa   : > { %v7744_v59 = vpop.f32.mrb[0].mxu0 }
  0xfb   : > { %v753_v60 = vadd.f32 %v7744_v59, %v8761_v58  ;;  %1255 = vrot.lane.b32.xlu1 %v7744_v59, %s11344_s16  ;;  %v623_v61 = vpop.f32.mrb[1].mxu0  ;;  %v8770_v7 = vpop.f32.mrb[0].mxu1 }
  0xfc   : > { %v751_v62 = vadd.f32 %v8761_v58, %v623_v61  ;;  %1251 = vrot.lane.b32.xlu0 %v623_v61, %s11344_s16  ;;  %v7745_v63 = vpop.f32.mrb[2].mxu0  ;;  %v769_v9 = vadd.f32 %v8770_v7, %v8761_v58  ;;  %v8775_v10 = vpop.f32.mrb[1].mxu1 }
  0xfd   : > { %v785_v0 = vmul.f32 0.01, %v753_v60  ;;  %v754_v1 = vadd.f32 %v7745_v63, %v8761_v58  ;;  %v626_v3 = vpop.f32.mrb[3].mxu0  ;;  %v767_v13 = vadd.f32 %v8761_v58, %v8775_v10  ;;  %v8779_v14 = vpop.f32.mrb[2].mxu1 }
  0xfe   : > { %v783_v4 = vmul.f32 0.01, %v751_v62  ;;  %v752_v5 = vadd.f32 %v8761_v58, %v626_v3  ;;  %v801_v18 = vmul.f32 0.01, %v769_v9  ;;  %v770_v19 = vadd.f32 %v8779_v14, %v8761_v58  ;;  %v8783_v20 = vpop.f32.mrb[3].mxu1 }
  0xff   : > { %v786_v6 = vmul.f32 0.01, %v754_v1  ;;  %1257 = vrot.lane.b32.xlu1 %v7745_v63, %s11344_s16  ;;  %v817_v11 = vmax.f32 %v753_v60, %v785_v0  ;;  %v799_v24 = vmul.f32 0.01, %v767_v13  ;;  %v768_v25 = vadd.f32 %v8761_v58, %v8783_v20 }
 0x100   : > { %v784_v8 = vmul.f32 0.01, %v752_v5  ;;  %1253 = vrot.lane.b32.xlu0 %v626_v3, %s11344_s16  ;;  %v815_v15 = vmax.f32 %v751_v62, %v783_v4  ;;  %v833_v29 = vmax.f32 %v769_v9, %v801_v18  ;;  %v802_v30 = vmul.f32 0.01, %v770_v19 }
 0x101   : > { %v818_v12 = vmax.f32 %v754_v1, %v786_v6  ;;  %v831_v34 = vmax.f32 %v767_v13, %v799_v24  ;;  %v800_v35 = vmul.f32 0.01, %v768_v25 }
 0x102   : > { %v816_v16 = vmax.f32 %v752_v5, %v784_v8  ;;  %v7748_v17 = vpop.f32.mrb[4].mxu0  ;;  %v834_v38 = vmax.f32 %v770_v19, %v802_v30 }
 0x103   : > { %v856_v21 = vpack.c.bf16 %v818_v12, %v817_v11  ;;  %v757_v22 = vadd.f32 %v7748_v17, %v8761_v58  ;;  %v639_v23 = vpop.f32.mrb[5].mxu0  ;;  %v832_v40 = vmax.f32 %v768_v25, %v800_v35  ;;  %v8795_v41 = vpop.f32.mrb[4].mxu1 }
 0x104   : > { %v755_v26 = vadd.f32 %v8761_v58, %v639_v23  ;;  %1259 = vrot.lane.b32.xlu0 %v639_v23, %s11344_s16  ;;  %v7749_v27 = vpop.f32.mrb[6].mxu0  ;;  %v855_v28 = vpack.c.bf16 %v816_v16, %v815_v15  ;;  %v773_v43 = vadd.f32 %v8795_v41, %v8761_v58  ;;  %v8800_v44 = vpop.f32.mrb[5].mxu1  ;;  %v8802_v45 = vpack.c.bf16 %v834_v38, %v833_v29 }
 0x105   : > { %v789_v31 = vmul.f32 0.01, %v757_v22  ;;  %v758_v32 = vadd.f32 %v7749_v27, %v8761_v58  ;;  %v642_v33 = vpop.f32.mrb[7].mxu0  ;;  %v771_v48 = vadd.f32 %v8761_v58, %v8800_v44  ;;  %v8806_v49 = vpop.f32.mrb[6].mxu1  ;;  %v8808_v50 = vpack.c.bf16 %v832_v40, %v831_v34 }
 0x106   : > { %v787_v36 = vmul.f32 0.01, %v755_v26  ;;  %v756_v37 = vadd.f32 %v8761_v58, %v642_v33  ;;  %7782 = vmatprep.mubr.msk.bf16.mxu1 %vm896_vm3, %v855_v28  ;;  %1261 = vrot.lane.b32.xlu1 %v642_v33, %s11344_s16  ;;  %v805_v54 = vmul.f32 0.01, %v773_v43  ;;  %v774_v55 = vadd.f32 %v8806_v49, %v8761_v58  ;;  %v8813_v56 = vpop.f32.mrb[7].mxu1 }
 0x107   : > { %v790_v39 = vmul.f32 0.01, %v758_v32  ;;  %7783 = vmatmul.mubr.msk.bf16.vlgmr.msra.gmra.mrb[16].mxu1 %vm896_vm3, %v856_v21  ;;  %v821_v46 = vmax.f32 %v757_v22, %v789_v31  ;;  %v803_v61 = vmul.f32 0.01, %v771_v48  ;;  %v772_v62 = vadd.f32 %v8761_v58, %v8813_v56 }
 0x108   : > { %v788_v42 = vmul.f32 0.01, %v756_v37  ;;  %1263 = vrot.lane.b32.xlu0 %v7748_v17, %s11344_s16  ;;  %v819_v51 = vmax.f32 %v755_v26, %v787_v36  ;;  %v837_v3 = vmax.f32 %v773_v43, %v805_v54  ;;  %v806_v4 = vmul.f32 0.01, %v774_v55 }
 0x109   : > { %v822_v47 = vmax.f32 %v758_v32, %v790_v39  ;;  %v835_v9 = vmax.f32 %v771_v48, %v803_v61  ;;  %v804_v11 = vmul.f32 0.01, %v772_v62 }
 0x10a   : > { %v820_v52 = vmax.f32 %v756_v37, %v788_v42  ;;  %1265 = vrot.lane.b32.xlu1 %v7749_v27, %s11344_s16  ;;  %v7752_v53 = vpop.f32.mrb[8].mxu0  ;;  %v838_v15 = vmax.f32 %v774_v55, %v806_v4 }
 0x10b   : > { %v761_v57 = vadd.f32 %v7752_v53, %v8761_v58  ;;  %v655_v59 = vpop.f32.mrb[9].mxu0  ;;  %v858_v60 = vpack.c.bf16 %v822_v47, %v821_v46  ;;  %v836_v17 = vmax.f32 %v772_v62, %v804_v11  ;;  %v8825_v18 = vpop.f32.mrb[8].mxu1 }
 0x10c   : > { %v759_v63 = vadd.f32 %v8761_v58, %v655_v59  ;;  %1267 = vrot.lane.b32.xlu0 %v655_v59, %s11344_s16  ;;  %v7753_v0 = vpop.f32.mrb[10].mxu0  ;;  %v857_v1 = vpack.c.bf16 %v820_v52, %v819_v51  ;;  %v777_v21 = vadd.f32 %v8825_v18, %v8761_v58  ;;  %v8830_v22 = vpop.f32.mrb[9].mxu1  ;;  %v8832_v23 = vpack.c.bf16 %v838_v15, %v837_v3 }
 0x10d   : > { %v793_v5 = vmul.f32 0.01, %v761_v57  ;;  %v762_v6 = vadd.f32 %v7753_v0, %v8761_v58  ;;  %v658_v8 = vpop.f32.mrb[11].mxu0  ;;  %v775_v26 = vadd.f32 %v8761_v58, %v8830_v22  ;;  %v8836_v27 = vpop.f32.mrb[10].mxu1  ;;  %v8838_v28 = vpack.c.bf16 %v836_v17, %v835_v9 }
 0x10e   : > { %v791_v12 = vmul.f32 0.01, %v759_v63  ;;  %v760_v13 = vadd.f32 %v8761_v58, %v658_v8  ;;  %7786 = vmatprep.mubr.msk.bf16.mxu1 %vm896_vm3, %v857_v1  ;;  %1269 = vrot.lane.b32.xlu1 %v658_v8, %s11344_s16  ;;  %v809_v32 = vmul.f32 0.01, %v777_v21  ;;  %v778_v33 = vadd.f32 %v8836_v27, %v8761_v58  ;;  %v8843_v34 = vpop.f32.mrb[11].mxu1 }
 0x10f   : > { %v794_v16 = vmul.f32 0.01, %v762_v6  ;;  %7787 = vmatmul.mubr.msk.bf16.gmra.mrb[20].mxu1 %vm896_vm3, %v858_v60  ;;  %v825_v24 = vmax.f32 %v761_v57, %v793_v5  ;;  %v807_v38 = vmul.f32 0.01, %v775_v26  ;;  %v776_v39 = vadd.f32 %v8761_v58, %v8843_v34 }
 0x110   : > { %v792_v19 = vmul.f32 0.01, %v760_v13  ;;  %1271 = vrot.lane.b32.xlu0 %v7752_v53, %s11344_s16  ;;  %v823_v29 = vmax.f32 %v759_v63, %v791_v12  ;;  %v841_v46 = vmax.f32 %v777_v21, %v809_v32  ;;  %v810_v47 = vmul.f32 0.01, %v778_v33 }
 0x111   : > { %v826_v25 = vmax.f32 %v762_v6, %v794_v16  ;;  %v839_v53 = vmax.f32 %v775_v26, %v807_v38  ;;  %v808_v54 = vmul.f32 0.01, %v776_v39 }
 0x112   : > { %v824_v30 = vmax.f32 %v760_v13, %v792_v19  ;;  %1273 = vrot.lane.b32.xlu1 %v7753_v0, %s11344_s16  ;;  %v7756_v31 = vpop.f32.mrb[12].mxu0  ;;  %v842_v59 = vmax.f32 %v778_v33, %v810_v47 }
 0x113   : > { %v765_v35 = vadd.f32 %v7756_v31, %v8761_v58  ;;  %v671_v36 = vpop.f32.mrb[13].mxu0  ;;  %v860_v37 = vpack.c.bf16 %v826_v25, %v825_v24  ;;  %v840_v61 = vmax.f32 %v776_v39, %v808_v54  ;;  %v7772_v62 = vpop.f32.mrb[12].mxu1 }
 0x114   : > { %v763_v40 = vadd.f32 %v8761_v58, %v671_v36  ;;  %1275 = vrot.lane.b32.xlu0 %v671_v36, %s11344_s16  ;;  %v7757_v42 = vpop.f32.mrb[14].mxu0  ;;  %v859_v43 = vpack.c.bf16 %v824_v30, %v823_v29  ;;  %v781_v0 = vadd.f32 %v7772_v62, %v8761_v58  ;;  %v735_v1 = vpop.f32.mrb[13].mxu1  ;;  %v868_v3 = vpack.c.bf16 %v842_v59, %v841_v46 }
 0x115   : > { %v797_v48 = vmul.f32 0.01, %v765_v35  ;;  %v766_v51 = vadd.f32 %v7757_v42, %v8761_v58  ;;  %v674_v52 = vpop.f32.mrb[15].mxu0  ;;  %v779_v6 = vadd.f32 %v8761_v58, %v735_v1  ;;  %v7773_v8 = vpop.f32.mrb[14].mxu1  ;;  %v867_v9 = vpack.c.bf16 %v840_v61, %v839_v53 }
 0x116   : > { %v795_v55 = vmul.f32 0.01, %v763_v40  ;;  %v764_v57 = vadd.f32 %v8761_v58, %v674_v52  ;;  %7790 = vmatprep.mubr.msk.bf16.mxu1 %vm896_vm3, %v859_v43  ;;  %1277 = vrot.lane.b32.xlu1 %v674_v52, %s11344_s16  ;;  %v813_v13 = vmul.f32 0.01, %v781_v0  ;;  %v782_v15 = vadd.f32 %v7773_v8, %v8761_v58  ;;  %v738_v16 = vpop.f32.mrb[15].mxu1 }
 0x117   : > { %v798_v60 = vmul.f32 0.01, %v766_v51  ;;  %7791 = vmatmul.mubr.msk.bf16.gmra.mrb[24].mxu1 %vm896_vm3, %v860_v37  ;;  %v829_v4 = vmax.f32 %v765_v35, %v797_v48  ;;  %v811_v19 = vmul.f32 0.01, %v779_v6  ;;  %v780_v21 = vadd.f32 %v8761_v58, %v738_v16 }
 0x118   : > { %v796_v63 = vmul.f32 0.01, %v764_v57  ;;  %1279 = vrot.lane.b32.xlu0 %v7756_v31, %s11344_s16  ;;  %v827_v11 = vmax.f32 %v763_v40, %v795_v55  ;;  %v845_v25 = vmax.f32 %v781_v0, %v813_v13  ;;  %v814_v26 = vmul.f32 0.01, %v782_v15 }
 0x119   : > { %v830_v5 = vmax.f32 %v766_v51, %v798_v60  ;;  %v843_v29 = vmax.f32 %v779_v6, %v811_v19  ;;  %v812_v30 = vmul.f32 0.01, %v780_v21 }
 0x11a   : > { %v828_v12 = vmax.f32 %v764_v57, %v796_v63  ;;  %1281 = vrot.lane.b32.xlu1 %v7757_v42, %s11344_s16  ;;  %v846_v31 = vmax.f32 %v782_v15, %v814_v26 }
 0x11b   : > { %v862_v17 = vpack.c.bf16 %v830_v5, %v829_v4  ;;  %v844_v32 = vmax.f32 %v780_v21, %v812_v30 }
 0x11c   : > { %1283 = vrot.lane.b32.xlu0 %v8775_v10, %s11344_s16  ;;  %v861_v24 = vpack.c.bf16 %v828_v12, %v827_v11  ;;  %v870_v58 = vpack.c.bf16 %v846_v31, %v845_v25 }
 0x11d   : > { %v869_v10 = vpack.c.bf16 %v844_v32, %v843_v29 }
 0x11e   : > { %1285 = vrot.lane.b32.xlu1 %v8783_v20, %s11344_s16  ;;  %7794 = vmatprep.mubr.msk.bf16.mxu1 %vm896_vm3, %v861_v24  ;;  %v8207_v20 = vld [vmem:[%s11334_s3 + $0x30] sm:$0xff]  }
 0x11f   : > { %7795 = vmatmul.mubr.msk.bf16.gmra.mrb[28].mxu1 %vm896_vm3, %v862_v17 }
 0x120   : > { %1287 = vrot.lane.b32.xlu0 %v8770_v7, %s11344_s16  ;;  %7798 = vmatprep.mubr.msk.bf16.mxu1 %vm896_vm3, %v8808_v50  ;;  %v8205_v7 = vld [vmem:[%s11334_s3 + $0x20] sm:$0xff]   ;;  %v8212_v50 = vld [vmem:[%s11334_s3 + $0x58] sm:$0xff]  }
 0x121   : > { %7814 = vmatprep.subr.bf16.mxu0 %v8205_v7 }
 0x122   : > { %1289 = vrot.lane.b32.xlu1 %v8779_v14, %s11344_s16  ;;  %v8206_v14 = vld [vmem:[%s11334_s3 + $0x28] sm:$0xff]   ;;  %7815 = vmatpush3.bf16.msra.mxu0 %v8205_v7 }
 0x123   : > { %7816 = vmatprep.subr.bf16.mxu0 %v8206_v14 }
 0x124   : > { %1291 = vrot.lane.b32.xlu0 %v8800_v44, %s11344_s16  ;;  %v8209_v44 = vld [vmem:[%s11334_s3 + $0x40] sm:$0xff]  }
 0x125   : > { %7854 = vmatprep.subr.bf16.mxu1 %v8209_v44 }
 0x126   : > { %1293 = vrot.lane.b32.xlu1 %v8813_v56, %s11344_s16  ;;  %7817 = vmatpush3.bf16.msra.mxu0 %v8206_v14  ;;  %v8930_v56 = vld [vmem:[%s11342_s11 + $0x1] ss:$0 sm:$0xff] }
 0x127   : > { %7799 = vmatmul.mubr.msk.bf16.gmra.mrb[32].mxu1 %vm896_vm3, %v8802_v45  ;;  %7818 = vmatprep.subr.bf16.mxu0 %v8207_v20  ;;  %v8210_v45 = vld [vmem:[%s11334_s3 + $0x48] sm:$0xff]  }
 0x128   : > { %1295 = vrot.lane.b32.xlu0 %v8795_v41, %s11344_s16  ;;  %7802 = vmatprep.mubr.msk.bf16.mxu1 %vm896_vm3, %v8838_v28  ;;  %v8208_v41 = vld [vmem:[%s11334_s3 + $0x38] sm:$0xff]  }
 0x129   : > { %7855 = vmatpush3.bf16.msra.mxu1 %v8209_v44 }
 0x12a   : > { %1297 = vrot.lane.b32.xlu1 %v8806_v49, %s11344_s16  ;;  %7819 = vmatpush3.bf16.msra.mxu0 %v8207_v20  ;;  %v8211_v49 = vld [vmem:[%s11334_s3 + $0x50] sm:$0xff]  }
 0x12b   : > { %7820 = vmatprep.subr.bf16.mxu0 %v8208_v41  ;;  %7856 = vmatprep.subr.bf16.mxu1 %v8210_v45 }
 0x12c   : > { %1299 = vrot.lane.b32.xlu0 %v8830_v22, %s11344_s16 }
 0x12d   : > { %7857 = vmatpush3.bf16.msra.mxu1 %v8210_v45 }
 0x12e   : > { %1301 = vrot.lane.b32.xlu1 %v8843_v34, %s11344_s16  ;;  %7821 = vmatpush3.bf16.msra.mxu0 %v8208_v41 }
 0x12f   : > { %7803 = vmatmul.mubr.msk.bf16.gmra.mrb[36].mxu1 %vm896_vm3, %v8832_v23  ;;  %7858 = vmatprep.subr.bf16.mxu1 %v8211_v49 }
 0x130   : > { %1303 = vrot.lane.b32.xlu0 %v8825_v18, %s11344_s16  ;;  %7806 = vmatprep.mubr.msk.bf16.mxu1 %vm896_vm3, %v867_v9 }
 0x131   : > { %7859 = vmatpush3.bf16.msra.mxu1 %v8211_v49 }
 0x132   : > { %1305 = vrot.lane.b32.xlu1 %v8836_v27, %s11344_s16  ;;  %7860 = vmatprep.subr.bf16.mxu1 %v8212_v50 }
 0x134   : > { %1307 = vrot.lane.b32.xlu0 %v735_v1, %s11344_s16 }
 0x135   : > { %7861 = vmatpush3.bf16.msra.mxu1 %v8212_v50 }
 0x136   : > { %1309 = vrot.lane.b32.xlu1 %v738_v16, %s11344_s16 }
 0x137   : > { %7807 = vmatmul.mubr.msk.bf16.gmra.mrb[40].mxu1 %vm896_vm3, %v868_v3 }
 0x138   : > { %1311 = vrot.lane.b32.xlu0 %v7772_v62, %s11344_s16  ;;  %7810 = vmatprep.mubr.msk.bf16.mxu1 %vm896_vm3, %v869_v10 }
 0x13a   : > { %1313 = vrot.lane.b32.xlu1 %v7773_v8, %s11344_s16  ;;  %s8500_s16 = sshll.u32 %s8564_s28, 4  ;;  %s8501_s16 = int_to_ptr.vmem [resolvable:$false] %s8500_s16 }
 0x13f   : > { %7811 = vmatmul.mubr.msk.bf16.gmra.mrb[44].mxu1 %vm896_vm3, %v870_v58 }
 0x1da   : > { %v7784_v18 = vpop.f32.mrb[16].mxu1 }
 0x1db   : > { %v988_v22 = vadd.f32 %v7784_v18, %v8930_v56  ;;  %v979_v23 = vpop.f32.mrb[17].mxu1 }
 0x1dc   : > { %v980_v27 = vadd.f32 %v979_v23, %v8930_v56  ;;  %v7785_v28 = vpop.f32.mrb[18].mxu1 }
 0x1dd   : > { %v1108_v33 = vmul.f32 0.01, %v988_v22  ;;  %v991_v34 = vadd.f32 %v7785_v28, %v8930_v56  ;;  %v982_v35 = vpop.f32.mrb[19].mxu1 }
 0x1de   : > { %v1106_v36 = vmul.f32 0.01, %v980_v27  ;;  %v983_v37 = vadd.f32 %v982_v35, %v8930_v56 }
 0x1df   : > { %v1109_v38 = vmul.f32 0.01, %v991_v34  ;;  %v1140_v40 = vmax.f32 %v988_v22, %v1108_v33 }
 0x1e0   : > { %v1107_v39 = vmul.f32 0.01, %v983_v37  ;;  %v1138_v43 = vmax.f32 %v980_v27, %v1106_v36 }
 0x1e1   : > { %v1141_v42 = vmax.f32 %v991_v34, %v1109_v38 }
 0x1e2   : > { %v1139_v46 = vmax.f32 %v983_v37, %v1107_v39  ;;  %v7788_v47 = vpop.f32.mrb[20].mxu1 }
 0x1e3   : > { %v1180_v48 = vpack.c.bf16 %v1141_v42, %v1140_v40  ;;  %v1004_v51 = vadd.f32 %v7788_v47, %v8930_v56  ;;  %v995_v52 = vpop.f32.mrb[21].mxu1 }
 0x1e4   : > { %v1179_v53 = vpack.c.bf16 %v1139_v46, %v1138_v43  ;;  %v996_v54 = vadd.f32 %v995_v52, %v8930_v56  ;;  %v7789_v55 = vpop.f32.mrb[22].mxu1 }
 0x1e5   : > { %v1112_v57 = vmul.f32 0.01, %v1004_v51  ;;  %v1007_v59 = vadd.f32 %v7789_v55, %v8930_v56  ;;  %v998_v60 = vpop.f32.mrb[23].mxu1 }
 0x1e6   : > { %v1110_v61 = vmul.f32 0.01, %v996_v54  ;;  %v999_v62 = vadd.f32 %v998_v60, %v8930_v56  ;;  %7822 = vmatprep.mubr.msk.bf16.mxu0 %vm896_vm3, %v1179_v53 }
 0x1e7   : > { %v1113_v63 = vmul.f32 0.01, %v1007_v59  ;;  %7823 = vmatmul.mubr.msk.bf16.vlgmr.msra.gmra.mrb[16].mxu0 %vm896_vm3, %v1180_v48  ;;  %v1144_v1 = vmax.f32 %v1004_v51, %v1112_v57 }
 0x1e8   : > { %v1111_v0 = vmul.f32 0.01, %v999_v62  ;;  %v1142_v4 = vmax.f32 %v996_v54, %v1110_v61 }
 0x1e9   : > { %v1145_v3 = vmax.f32 %v1007_v59, %v1113_v63 }
 0x1ea   : > { %v1143_v5 = vmax.f32 %v999_v62, %v1111_v0  ;;  %v7792_v6 = vpop.f32.mrb[24].mxu1 }
 0x1eb   : > { %v1182_v8 = vpack.c.bf16 %v1145_v3, %v1144_v1  ;;  %v1020_v9 = vadd.f32 %v7792_v6, %v8930_v56  ;;  %v1011_v11 = vpop.f32.mrb[25].mxu1 }
 0x1ec   : > { %v1181_v12 = vpack.c.bf16 %v1143_v5, %v1142_v4  ;;  %v1012_v13 = vadd.f32 %v1011_v11, %v8930_v56  ;;  %v7793_v15 = vpop.f32.mrb[26].mxu1 }
 0x1ed   : > { %v1116_v16 = vmul.f32 0.01, %v1020_v9  ;;  %v1023_v17 = vadd.f32 %v7793_v15, %v8930_v56  ;;  %v1014_v19 = vpop.f32.mrb[27].mxu1 }
 0x1ee   : > { %v1114_v21 = vmul.f32 0.01, %v1012_v13  ;;  %v1015_v24 = vadd.f32 %v1014_v19, %v8930_v56  ;;  %7826 = vmatprep.mubr.msk.bf16.mxu0 %vm896_vm3, %v1181_v12 }
 0x1ef   : > { %v1117_v25 = vmul.f32 0.01, %v1023_v17  ;;  %7827 = vmatmul.mubr.msk.bf16.gmra.mrb[20].mxu0 %vm896_vm3, %v1182_v8  ;;  %v1148_v29 = vmax.f32 %v1020_v9, %v1116_v16 }
 0x1f0   : > { %v1115_v26 = vmul.f32 0.01, %v1015_v24  ;;  %v1146_v31 = vmax.f32 %v1012_v13, %v1114_v21 }
 0x1f1   : > { %v1149_v30 = vmax.f32 %v1023_v17, %v1117_v25 }
 0x1f2   : > { %v1147_v32 = vmax.f32 %v1015_v24, %v1115_v26  ;;  %v7796_v58 = vpop.f32.mrb[28].mxu1 }
 0x1f3   : > { %v1184_v10 = vpack.c.bf16 %v1149_v30, %v1148_v29  ;;  %v1036_v7 = vadd.f32 %v7796_v58, %v8930_v56  ;;  %v1027_v14 = vpop.f32.mrb[29].mxu1 }
 0x1f4   : > { %v1183_v20 = vpack.c.bf16 %v1147_v32, %v1146_v31  ;;  %v1028_v41 = vadd.f32 %v1027_v14, %v8930_v56  ;;  %v7797_v44 = vpop.f32.mrb[30].mxu1 }
 0x1f5   : > { %v1120_v45 = vmul.f32 0.01, %v1036_v7  ;;  %v1039_v49 = vadd.f32 %v7797_v44, %v8930_v56  ;;  %v1030_v50 = vpop.f32.mrb[31].mxu1 }
 0x1f6   : > { %v1118_v18 = vmul.f32 0.01, %v1028_v41  ;;  %v1031_v22 = vadd.f32 %v1030_v50, %v8930_v56  ;;  %7830 = vmatprep.mubr.msk.bf16.mxu0 %vm896_vm3, %v1183_v20 }
 0x1f7   : > { %v1121_v23 = vmul.f32 0.01, %v1039_v49  ;;  %7831 = vmatmul.mubr.msk.bf16.gmra.mrb[24].mxu0 %vm896_vm3, %v1184_v10  ;;  %v1152_v28 = vmax.f32 %v1036_v7, %v1120_v45 }
 0x1f8   : > { %v1119_v27 = vmul.f32 0.01, %v1031_v22  ;;  %v1150_v34 = vmax.f32 %v1028_v41, %v1118_v18 }
 0x1f9   : > { %v1153_v33 = vmax.f32 %v1039_v49, %v1121_v23 }
 0x1fa   : > { %v1151_v35 = vmax.f32 %v1031_v22, %v1119_v27  ;;  %v7800_v36 = vpop.f32.mrb[32].mxu1 }
 0x1fb   : > { %v1186_v37 = vpack.c.bf16 %v1153_v33, %v1152_v28  ;;  %v1052_v38 = vadd.f32 %v7800_v36, %v8930_v56  ;;  %v1043_v39 = vpop.f32.mrb[33].mxu1 }
 0x1fc   : > { %v1185_v40 = vpack.c.bf16 %v1151_v35, %v1150_v34  ;;  %v1044_v42 = vadd.f32 %v1043_v39, %v8930_v56  ;;  %v7801_v43 = vpop.f32.mrb[34].mxu1 }
 0x1fd   : > { %v1124_v46 = vmul.f32 0.01, %v1052_v38  ;;  %v1055_v47 = vadd.f32 %v7801_v43, %v8930_v56  ;;  %v1046_v48 = vpop.f32.mrb[35].mxu1 }
 0x1fe   : > { %v1122_v51 = vmul.f32 0.01, %v1044_v42  ;;  %v1047_v52 = vadd.f32 %v1046_v48, %v8930_v56  ;;  %7834 = vmatprep.mubr.msk.bf16.mxu0 %vm896_vm3, %v1185_v40 }
 0x1ff   : > { %v1125_v53 = vmul.f32 0.01, %v1055_v47  ;;  %7835 = vmatmul.mubr.msk.bf16.gmra.mrb[28].mxu0 %vm896_vm3, %v1186_v37  ;;  %v1156_v55 = vmax.f32 %v1052_v38, %v1124_v46 }
 0x200   : > { %v1123_v54 = vmul.f32 0.01, %v1047_v52  ;;  %v1154_v59 = vmax.f32 %v1044_v42, %v1122_v51 }
 0x201   : > { %v1157_v57 = vmax.f32 %v1055_v47, %v1125_v53  ;;  %v8216_v53 = vld [vmem:[%s11335_s4] ss:$12 sps:$4 sm:$0xff]  }
 0x202   : > { %v1155_v60 = vmax.f32 %v1047_v52, %v1123_v54  ;;  %v7804_v61 = vpop.f32.mrb[36].mxu1  ;;  %v8218_v54 = vld [vmem:[%s11335_s4 + $0x4] ss:$12 sps:$4 sm:$0xff]  }
 0x203   : > { %v1188_v62 = vpack.c.bf16 %v1157_v57, %v1156_v55  ;;  %v1068_v63 = vadd.f32 %v7804_v61, %v8930_v56  ;;  %v1059_v0 = vpop.f32.mrb[37].mxu1  ;;  %2120 = vmatprep.subr.bf16.mxu0 %v8218_v54  ;;  %v1252_v55 = vpop.permute.xlu0 %1251 }
 0x204   : > { %v1187_v1 = vpack.c.bf16 %v1155_v60, %v1154_v59  ;;  %v1060_v3 = vadd.f32 %v1059_v0, %v8930_v56  ;;  %v7805_v4 = vpop.f32.mrb[38].mxu1  ;;  %2121 = vmatpush1.bf16.msra.mxu0 %v8216_v53  ;;  %v1256_v57 = vpop.permute.xlu1 %1255 }
 0x205   : > { %v1128_v5 = vmul.f32 0.01, %v1068_v63  ;;  %v1071_v6 = vadd.f32 %v7805_v4, %v8930_v56  ;;  %v1062_v8 = vpop.f32.mrb[39].mxu1 }
 0x206   : > { %v1126_v9 = vmul.f32 0.01, %v1060_v3  ;;  %v1063_v11 = vadd.f32 %v1062_v8, %v8930_v56  ;;  %7838 = vmatprep.mubr.msk.bf16.mxu0 %vm896_vm3, %v1187_v1  ;;  %v8997_v8 = vld [vmem:[%s11342_s11 + $0x2] ss:$0 sm:$0xff] }
 0x207   : > { %v1129_v12 = vmul.f32 0.01, %v1071_v6  ;;  %7839 = vmatmul.mubr.msk.bf16.gmra.mrb[32].mxu0 %vm896_vm3, %v1188_v62  ;;  %v1160_v15 = vmax.f32 %v1068_v63, %v1128_v5  ;;  %v1254_v59 = vpop.permute.xlu0 %1253 }
 0x208   : > { %v1127_v13 = vmul.f32 0.01, %v1063_v11  ;;  %v1158_v17 = vmax.f32 %v1060_v3, %v1126_v9  ;;  %v1258_v60 = vpop.permute.xlu1 %1257 }
 0x209   : > { %v1161_v16 = vmax.f32 %v1071_v6, %v1129_v12 }
 0x20a   : > { %v1159_v19 = vmax.f32 %v1063_v11, %v1127_v13  ;;  %v7808_v21 = vpop.f32.mrb[40].mxu1 }
 0x20b   : > { %v1190_v24 = vpack.c.bf16 %v1161_v16, %v1160_v15  ;;  %v1084_v25 = vadd.f32 %v7808_v21, %v8930_v56  ;;  %v1075_v26 = vpop.f32.mrb[41].mxu1  ;;  %v1260_v61 = vpop.permute.xlu0 %1259 }
 0x20c   : > { %v1189_v29 = vpack.c.bf16 %v1159_v19, %v1158_v17  ;;  %v1076_v30 = vadd.f32 %v1075_v26, %v8930_v56  ;;  %v7809_v31 = vpop.f32.mrb[42].mxu1  ;;  %v1262_v62 = vpop.permute.xlu1 %1261 }
 0x20d   : > { %v1132_v32 = vmul.f32 0.01, %v1084_v25  ;;  %v1087_v58 = vadd.f32 %v7809_v31, %v8930_v56  ;;  %v1078_v10 = vpop.f32.mrb[43].mxu1 }
 0x20e   : > { %v1130_v7 = vmul.f32 0.01, %v1076_v30  ;;  %v1079_v14 = vadd.f32 %v1078_v10, %v8930_v56  ;;  %7842 = vmatprep.mubr.msk.bf16.mxu0 %vm896_vm3, %v1189_v29 }
 0x20f   : > { %v1133_v20 = vmul.f32 0.01, %v1087_v58  ;;  %7843 = vmatmul.mubr.msk.bf16.gmra.mrb[36].mxu0 %vm896_vm3, %v1190_v24  ;;  %v1164_v44 = vmax.f32 %v1084_v25, %v1132_v32  ;;  %v1264_v63 = vpop.permute.xlu0 %1263 }
 0x210   : > { %v1131_v41 = vmul.f32 0.01, %v1079_v14  ;;  %v1162_v49 = vmax.f32 %v1076_v30, %v1130_v7  ;;  %v1266_v0 = vpop.permute.xlu1 %1265 }
 0x211   : > { %v1165_v45 = vmax.f32 %v1087_v58, %v1133_v20 }
 0x212   : > { %v1163_v50 = vmax.f32 %v1079_v14, %v1131_v41  ;;  %v7812_v18 = vpop.f32.mrb[44].mxu1 }
 0x213   : > { %v1192_v22 = vpack.c.bf16 %v1165_v45, %v1164_v44  ;;  %v1100_v23 = vadd.f32 %v7812_v18, %v8930_v56  ;;  %v1091_v27 = vpop.f32.mrb[45].mxu1  ;;  %v1268_v1 = vpop.permute.xlu0 %1267 }
 0x214   : > { %v1191_v28 = vpack.c.bf16 %v1163_v50, %v1162_v49  ;;  %v1092_v33 = vadd.f32 %v1091_v27, %v8930_v56  ;;  %v7813_v34 = vpop.f32.mrb[46].mxu1  ;;  %v8992_v3 = vpop.permute.xlu1 %1269 }
 0x215   : > { %v1136_v35 = vmul.f32 0.01, %v1100_v23  ;;  %v1103_v36 = vadd.f32 %v7813_v34, %v8930_v56  ;;  %v1094_v37 = vpop.f32.mrb[47].mxu1 }
 0x216   : > { %v1134_v38 = vmul.f32 0.01, %v1092_v33  ;;  %v1095_v39 = vadd.f32 %v1094_v37, %v8930_v56  ;;  %7846 = vmatprep.mubr.msk.bf16.mxu0 %vm896_vm3, %v1191_v28  ;;  %v8983_v56 = vld [vmem:[%s11335_s4 + $0x8] ss:$12 sps:$4 sm:$0xff]  }
 0x217   : > { %v1137_v40 = vmul.f32 0.01, %v1103_v36  ;;  %7847 = vmatmul.mubr.msk.bf16.gmra.mrb[40].mxu0 %vm896_vm3, %v1192_v22  ;;  %v1168_v43 = vmax.f32 %v1100_v23, %v1136_v35  ;;  %7894 = vmatprep.subr.bf16.mxu1 %v8983_v56  ;;  %v1272_v4 = vpop.permute.xlu0 %1271 }
 0x218   : > { %v1135_v42 = vmul.f32 0.01, %v1095_v39  ;;  %v1166_v47 = vmax.f32 %v1092_v33, %v1134_v38  ;;  %v1274_v5 = vpop.permute.xlu1 %1273 }
 0x219   : > { %v1169_v46 = vmax.f32 %v1103_v36, %v1137_v40 }
 0x21a   : > { %v1167_v48 = vmax.f32 %v1095_v39, %v1135_v42  ;;  %v8214_v39 = vld [vmem:[%s11335_s4 + $0x20] ss:$12 sps:$4 sm:$0xff]  }
 0x21b   : > { %v1194_v51 = vpack.c.bf16 %v1169_v46, %v1168_v43  ;;  %v8999_v12 = vpop.permute.xlu0 %1275 }
 0x21c   : > { %v1193_v52 = vpack.c.bf16 %v1167_v48, %v1166_v47  ;;  %v9002_v21 = vpop.permute.xlu1 %1277 }
 0x21e   : > { %7850 = vmatprep.mubr.msk.bf16.mxu0 %vm896_vm3, %v1193_v52 }
 0x21f   : > { %7851 = vmatmul.mubr.msk.bf16.gmra.mrb[44].mxu0 %vm896_vm3, %v1194_v51  ;;  %v9007_v58 = vpop.permute.xlu0 %1279 }
 0x220   : > { %v9009_v45 = vpop.permute.xlu1 %1281 }
 0x223   : > { %v9017_v40 = vpop.permute.xlu0 %1283 }
 0x224   : > { %v9022_v47 = vpop.permute.xlu1 %1285 }
 0x2ba   : > { %v7824_v6 = vpop.f32.mrb[16].mxu0 }
 0x2bb   : > { %v1438_v9 = vadd.f32 %v7824_v6, %v1256_v57  ;;  %v1429_v11 = vpop.f32.mrb[17].mxu0  ;;  %v8215_v57 = vld [vmem:[%s11335_s4 + $0x38] ss:$12 sps:$4 sm:$0xff]  }
 0x2bc   : > { %v1430_v13 = vadd.f32 %v1429_v11, %v1252_v55  ;;  %v7825_v15 = vpop.f32.mrb[18].mxu0  ;;  %v1288_v11 = vpop.permute.xlu0 %1287 }
 0x2bd   : > { %v1559_v16 = vadd.f32 %v8997_v8, %v1438_v9  ;;  %v1441_v17 = vadd.f32 %v7825_v15, %v1258_v60  ;;  %v1432_v19 = vpop.f32.mrb[19].mxu0 }
 0x2be   : > { %v1557_v24 = vadd.f32 %v8997_v8, %v1430_v13  ;;  %v1433_v25 = vadd.f32 %v1432_v19, %v1254_v59 }
 0x2bf   : > { %v1591_v26 = vmul.f32 0.01, %v1559_v16  ;;  %v1560_v29 = vadd.f32 %v8997_v8, %v1441_v17  ;;  %v1290_v17 = vpop.permute.xlu1 %1289 }
 0x2c0   : > { %v1589_v30 = vmul.f32 0.01, %v1557_v24  ;;  %v1558_v31 = vadd.f32 %v8997_v8, %v1433_v25 }
 0x2c1   : > { %v1592_v32 = vmul.f32 0.01, %v1560_v29  ;;  %v1623_v14 = vmax.f32 %v1559_v16, %v1591_v26 }
 0x2c2   : > { %v1590_v10 = vmul.f32 0.01, %v1558_v31  ;;  %v7828_v7 = vpop.f32.mrb[20].mxu0  ;;  %v1621_v49 = vmax.f32 %v1557_v24, %v1589_v30 }
 0x2c3   : > { %v1624_v20 = vmax.f32 %v1560_v29, %v1592_v32  ;;  %v1454_v41 = vadd.f32 %v7828_v7, %v1264_v63  ;;  %v1445_v44 = vpop.f32.mrb[21].mxu0  ;;  %v1292_v32 = vpop.permute.xlu0 %1291 }
 0x2c4   : > { %v1622_v50 = vmax.f32 %v1558_v31, %v1590_v10  ;;  %v1446_v18 = vadd.f32 %v1445_v44, %v1260_v61  ;;  %v7829_v22 = vpop.f32.mrb[22].mxu0 }
 0x2c5   : > { %v1663_v23 = vpack.c.bf16 %v1624_v20, %v1623_v14  ;;  %v1563_v27 = vadd.f32 %v8997_v8, %v1454_v41  ;;  %v1457_v28 = vadd.f32 %v7829_v22, %v1266_v0  ;;  %v1448_v33 = vpop.f32.mrb[23].mxu0 }
 0x2c6   : > { %v1561_v34 = vadd.f32 %v8997_v8, %v1446_v18  ;;  %v1449_v35 = vadd.f32 %v1448_v33, %v1262_v62  ;;  %v1662_v36 = vpack.c.bf16 %v1622_v50, %v1621_v49  ;;  %v1294_v18 = vpop.permute.xlu1 %1293 }
 0x2c7   : > { %v1595_v37 = vmul.f32 0.01, %v1563_v27  ;;  %v1564_v38 = vadd.f32 %v8997_v8, %v1457_v28 }
 0x2c8   : > { %v1593_v42 = vmul.f32 0.01, %v1561_v34  ;;  %v1562_v43 = vadd.f32 %v8997_v8, %v1449_v35  ;;  %7862 = vmatprep.mubr.msk.bf16.mxu1 %vm896_vm3, %v1662_v36 }
 0x2c9   : > { %v1596_v46 = vmul.f32 0.01, %v1564_v38  ;;  %7863 = vmatmul.mubr.msk.bf16.vlgmr.msra.gmra.mrb[48].mxu1 %vm896_vm3, %v1663_v23  ;;  %v1627_v52 = vmax.f32 %v1563_v27, %v1595_v37 }
 0x2ca   : > { %v1594_v48 = vmul.f32 0.01, %v1562_v43  ;;  %v7832_v51 = vpop.f32.mrb[24].mxu0  ;;  %7895 = vmatpush3.bf16.msra.mxu1 %v8983_v56  ;;  %v1625_v59 = vmax.f32 %v1561_v34, %v1593_v42  ;;  %v1298_v42 = vpop.permute.xlu1 %1297 }
 0x2cb   : > { %v1628_v53 = vmax.f32 %v1564_v38, %v1596_v46  ;;  %v1470_v54 = vadd.f32 %v7832_v51, %v1272_v4  ;;  %v1461_v55 = vpop.f32.mrb[25].mxu0  ;;  %7896 = vmatprep.subr.bf16.mxu1 %v8214_v39 }
 0x2cc   : > { %v1626_v60 = vmax.f32 %v1562_v43, %v1594_v48  ;;  %v1462_v61 = vadd.f32 %v1461_v55, %v1268_v1  ;;  %v7833_v62 = vpop.f32.mrb[26].mxu0  ;;  %v8219_v1 = vld [vmem:[%s11335_s4 + $0x50] ss:$12 sps:$4 sm:$0xff]  }
 0x2cd   : > { %v1567_v63 = vadd.f32 %v8997_v8, %v1470_v54  ;;  %v1473_v0 = vadd.f32 %v7833_v62, %v1274_v5  ;;  %v1464_v6 = vpop.f32.mrb[27].mxu0  ;;  %v1665_v9 = vpack.c.bf16 %v1628_v53, %v1627_v52 }
 0x2ce   : > { %v1565_v56 = vadd.f32 %v8997_v8, %v1462_v61  ;;  %v1465_v4 = vadd.f32 %v1464_v6, %v8992_v3  ;;  %v1664_v13 = vpack.c.bf16 %v1626_v60, %v1625_v59  ;;  %7897 = vmatpush3.bf16.msra.mxu1 %v8214_v39 }
 0x2cf   : > { %v1599_v15 = vmul.f32 0.01, %v1567_v63  ;;  %v1568_v16 = vadd.f32 %v8997_v8, %v1473_v0  ;;  %7898 = vmatprep.subr.bf16.mxu1 %v8215_v57 }
 0x2d0   : > { %v1597_v19 = vmul.f32 0.01, %v1565_v56  ;;  %v1566_v5 = vadd.f32 %v8997_v8, %v1465_v4  ;;  %7866 = vmatprep.mubr.msk.bf16.mxu1 %vm896_vm3, %v1664_v13 }
 0x2d1   : > { %v1600_v24 = vmul.f32 0.01, %v1568_v16  ;;  %7867 = vmatmul.mubr.msk.bf16.gmra.mrb[52].mxu1 %vm896_vm3, %v1665_v9  ;;  %v1631_v26 = vmax.f32 %v1567_v63, %v1599_v15  ;;  %v1302_v9 = vpop.permute.xlu1 %1301 }
 0x2d2   : > { %v1598_v3 = vmul.f32 0.01, %v1566_v5  ;;  %v7836_v25 = vpop.f32.mrb[28].mxu0  ;;  %7899 = vmatpush3.bf16.msra.mxu1 %v8215_v57  ;;  %v1629_v10 = vmax.f32 %v1565_v56, %v1597_v19 }
 0x2d3   : > { %v1632_v29 = vmax.f32 %v1568_v16, %v1600_v24  ;;  %v1486_v30 = vadd.f32 %v7836_v25, %v9007_v58  ;;  %v1477_v31 = vpop.f32.mrb[29].mxu0  ;;  %7900 = vmatprep.subr.bf16.mxu1 %v8219_v1 }
 0x2d4   : > { %v1630_v7 = vmax.f32 %v1566_v5, %v1598_v3  ;;  %v1478_v14 = vadd.f32 %v1477_v31, %v8999_v12  ;;  %v7837_v20 = vpop.f32.mrb[30].mxu0 }
 0x2d5   : > { %v1571_v41 = vadd.f32 %v8997_v8, %v1486_v30  ;;  %v1489_v44 = vadd.f32 %v7837_v20, %v9009_v45  ;;  %v1480_v49 = vpop.f32.mrb[31].mxu0  ;;  %v1667_v50 = vpack.c.bf16 %v1632_v29, %v1631_v26  ;;  %v1296_v45 = vpop.permute.xlu0 %1295 }
 0x2d6   : > { %v1569_v22 = vadd.f32 %v8997_v8, %v1478_v14  ;;  %v1481_v23 = vadd.f32 %v1480_v49, %v9002_v21  ;;  %v1666_v58 = vpack.c.bf16 %v1630_v7, %v1629_v10  ;;  %7901 = vmatpush3.bf16.msra.mxu1 %v8219_v1  ;;  %v1306_v14 = vpop.permute.xlu1 %1305 }
 0x2d7   : > { %v1603_v27 = vmul.f32 0.01, %v1571_v41  ;;  %v1572_v28 = vadd.f32 %v8997_v8, %v1489_v44 }
 0x2d8   : > { %v1601_v33 = vmul.f32 0.01, %v1569_v22  ;;  %v1570_v12 = vadd.f32 %v8997_v8, %v1481_v23  ;;  %7870 = vmatprep.mubr.msk.bf16.mxu1 %vm896_vm3, %v1666_v58 }
 0x2d9   : > { %v1604_v34 = vmul.f32 0.01, %v1572_v28  ;;  %7871 = vmatmul.mubr.msk.bf16.gmra.mrb[56].mxu1 %vm896_vm3, %v1667_v50  ;;  %v1635_v37 = vmax.f32 %v1571_v41, %v1603_v27  ;;  %v1300_v63 = vpop.permute.xlu0 %1299 }
 0x2da   : > { %v1602_v35 = vmul.f32 0.01, %v1570_v12  ;;  %v7840_v36 = vpop.f32.mrb[32].mxu0  ;;  %v1633_v43 = vmax.f32 %v1569_v22, %v1601_v33 }
 0x2db   : > { %v1636_v38 = vmax.f32 %v1572_v28, %v1604_v34  ;;  %v1502_v39 = vadd.f32 %v7840_v36, %v1288_v11  ;;  %v1493_v21 = vpop.f32.mrb[33].mxu0 }
 0x2dc   : > { %v1634_v46 = vmax.f32 %v1570_v12, %v1602_v35  ;;  %v1494_v48 = vadd.f32 %v1493_v21, %v9017_v40  ;;  %v7841_v51 = vpop.f32.mrb[34].mxu0 }
 0x2dd   : > { %v1575_v52 = vadd.f32 %v8997_v8, %v1502_v39  ;;  %v1505_v53 = vadd.f32 %v7841_v51, %v1290_v17  ;;  %v1496_v54 = vpop.f32.mrb[35].mxu0  ;;  %v1669_v55 = vpack.c.bf16 %v1636_v38, %v1635_v37  ;;  %v1304_v26 = vpop.permute.xlu0 %1303 }
 0x2de   : > { %v1573_v57 = vadd.f32 %v8997_v8, %v1494_v48  ;;  %v1497_v59 = vadd.f32 %v1496_v54, %v9022_v47  ;;  %v1668_v60 = vpack.c.bf16 %v1634_v46, %v1633_v43  ;;  %v1310_v37 = vpop.permute.xlu1 %1309 }
 0x2df   : > { %v1607_v61 = vmul.f32 0.01, %v1575_v52  ;;  %v1576_v62 = vadd.f32 %v8997_v8, %v1505_v53 }
 0x2e0   : > { %v1605_v0 = vmul.f32 0.01, %v1573_v57  ;;  %v1574_v6 = vadd.f32 %v8997_v8, %v1497_v59  ;;  %7874 = vmatprep.mubr.msk.bf16.mxu1 %vm896_vm3, %v1668_v60 }
 0x2e1   : > { %v1608_v40 = vmul.f32 0.01, %v1576_v62  ;;  %7875 = vmatmul.mubr.msk.bf16.gmra.mrb[60].mxu1 %vm896_vm3, %v1669_v55  ;;  %v1639_v4 = vmax.f32 %v1575_v52, %v1607_v61 }
 0x2e2   : > { %v1606_v11 = vmul.f32 0.01, %v1574_v6  ;;  %v7844_v56 = vpop.f32.mrb[36].mxu0  ;;  %v1637_v16 = vmax.f32 %v1573_v57, %v1605_v0  ;;  %v1314_v61 = vpop.permute.xlu1 %1313 }
 0x2e3   : > { %v1640_v13 = vmax.f32 %v1576_v62, %v1608_v40  ;;  %v1518_v15 = vadd.f32 %v7844_v56, %v1296_v45  ;;  %v1509_v47 = vpop.f32.mrb[37].mxu0 }
 0x2e4   : > { %v1638_v1 = vmax.f32 %v1574_v6, %v1606_v11  ;;  %v1510_v17 = vadd.f32 %v1509_v47, %v1292_v32  ;;  %v7845_v19 = vpop.f32.mrb[38].mxu0 }
 0x2e5   : > { %v1579_v5 = vadd.f32 %v8997_v8, %v1518_v15  ;;  %v1521_v24 = vadd.f32 %v7845_v19, %v1298_v42  ;;  %v1512_v3 = vpop.f32.mrb[39].mxu0  ;;  %v1671_v25 = vpack.c.bf16 %v1640_v13, %v1639_v4 }
 0x2e6   : > { %v1577_v29 = vadd.f32 %v8997_v8, %v1510_v17  ;;  %v1513_v30 = vadd.f32 %v1512_v3, %v1294_v18  ;;  %v1670_v31 = vpack.c.bf16 %v1638_v1, %v1637_v16  ;;  %v1308_v18 = vpop.permute.xlu0 %1307 }
 0x2e7   : > { %v1611_v10 = vmul.f32 0.01, %v1579_v5  ;;  %v1580_v7 = vadd.f32 %v8997_v8, %v1521_v24 }
 0x2e8   : > { %v1609_v20 = vmul.f32 0.01, %v1577_v29  ;;  %v1578_v41 = vadd.f32 %v8997_v8, %v1513_v30  ;;  %7878 = vmatprep.mubr.msk.bf16.mxu1 %vm896_vm3, %v1670_v31  ;;  %v8220_v31 = vld [vmem:[%s11335_s4 + $0x18] ss:$12 sps:$4 sm:$0xff]  }
 0x2e9   : > { %v1612_v32 = vmul.f32 0.01, %v1580_v7  ;;  %7879 = vmatmul.mubr.msk.bf16.gmra.mrb[64].mxu1 %vm896_vm3, %v1671_v25  ;;  %v1643_v50 = vmax.f32 %v1579_v5, %v1611_v10  ;;  %v8225_v10 = vld [vmem:[%s11335_s4 + $0x34] ss:$12 sps:$4 sm:$0xff]  }
 0x2ea   : > { %v1610_v44 = vmul.f32 0.01, %v1578_v41  ;;  %v7848_v49 = vpop.f32.mrb[40].mxu0  ;;  %v1641_v27 = vmax.f32 %v1577_v29, %v1609_v20  ;;  %v1312_v52 = vpop.permute.xlu0 %1311  ;;  %v8226_v20 = vld [vmem:[%s11335_s4 + $0x48] ss:$12 sps:$4 sm:$0xff]  }
 0x2eb   : > { %v1644_v22 = vmax.f32 %v1580_v7, %v1612_v32  ;;  %v1534_v23 = vadd.f32 %v7848_v49, %v1304_v26  ;;  %v1525_v58 = vpop.f32.mrb[41].mxu0  ;;  %v8223_v7 = vld [vmem:[%s11335_s4 + $0x30] ss:$12 sps:$4 sm:$0xff]   ;;  %v8231_v32 = vld [vmem:[%s11336_s5 + $0x4] ss:$8 sps:$4 sm:$0xff]  }
 0x2ec   : > { %v1642_v28 = vmax.f32 %v1578_v41, %v1610_v44  ;;  %v1526_v33 = vadd.f32 %v1525_v58, %v1300_v63  ;;  %v7849_v12 = vpop.f32.mrb[42].mxu0  ;;  %v11347_v41 = vmov 0   ;;  %v2551_v44 = vsel %vm2549_vm4, 4294967295, %v8560_v2 }
 0x2ed   : > { %v1583_v34 = vadd.f32 %v8997_v8, %v1534_v23  ;;  %v1537_v45 = vadd.f32 %v7849_v12, %v1306_v14  ;;  %v1528_v35 = vpop.f32.mrb[43].mxu0  ;;  %v1673_v36 = vpack.c.bf16 %v1644_v22, %v1643_v50  ;;  %v8228_v14 = vld [vmem:[%s11335_s4 + $0x4c] ss:$12 sps:$4 sm:$0xff]   ;;  %2152 = vmatprep.mubr.bf16.mxu0 %v11347_v41  ;;  %v2552_v49 = vsel %vm2550_vm5, %v2551_v44, 0  ;;  %v9102_v22 = vld [vmem:[%s11342_s11 + $0x3] ss:$0 sm:$0xff] }
 0x2ee   : > { %v1581_v38 = vadd.f32 %v8997_v8, %v1526_v33  ;;  %v1529_v39 = vadd.f32 %v1528_v35, %v1302_v9  ;;  %v1672_v21 = vpack.c.bf16 %v1642_v28, %v1641_v27  ;;  %v2557_v50 = vand.u32 %v8231_v32, %v2552_v49 }
 0x2ef   : > { %v1615_v42 = vmul.f32 0.01, %v1583_v34  ;;  %v1584_v43 = vadd.f32 %v8997_v8, %v1537_v45 }
 0x2f0   : > { %v1613_v46 = vmul.f32 0.01, %v1581_v38  ;;  %v1582_v48 = vadd.f32 %v8997_v8, %v1529_v39  ;;  %7882 = vmatprep.mubr.msk.bf16.mxu1 %vm896_vm3, %v1672_v21  ;;  %2559 = vmatprep.subr.bf16.mxu1 %v2557_v50 }
 0x2f1   : > { %v1616_v51 = vmul.f32 0.01, %v1584_v43  ;;  %7883 = vmatmul.mubr.msk.bf16.gmra.mrb[68].mxu1 %vm896_vm3, %v1673_v36  ;;  %v1647_v55 = vmax.f32 %v1583_v34, %v1615_v42 }
 0x2f2   : > { %v1614_v53 = vmul.f32 0.01, %v1582_v48  ;;  %v7852_v54 = vpop.f32.mrb[44].mxu0  ;;  %v1645_v62 = vmax.f32 %v1581_v38, %v1613_v46 }
 0x2f3   : > { %v1648_v57 = vmax.f32 %v1584_v43, %v1616_v51  ;;  %v1550_v59 = vadd.f32 %v7852_v54, %v1312_v52  ;;  %v1541_v60 = vpop.f32.mrb[45].mxu0 }
 0x2f4   : > { %v1646_v63 = vmax.f32 %v1582_v48, %v1614_v53  ;;  %v1542_v0 = vadd.f32 %v1541_v60, %v1308_v18  ;;  %v7853_v6 = vpop.f32.mrb[46].mxu0 }
 0x2f5   : > { %v1587_v40 = vadd.f32 %v8997_v8, %v1550_v59  ;;  %v1553_v9 = vadd.f32 %v7853_v6, %v1314_v61  ;;  %v1544_v11 = vpop.f32.mrb[47].mxu0  ;;  %v1675_v56 = vpack.c.bf16 %v1648_v57, %v1647_v55 }
 0x2f6   : > { %v1585_v4 = vadd.f32 %v8997_v8, %v1542_v0  ;;  %v1545_v13 = vadd.f32 %v1544_v11, %v1310_v37  ;;  %v1674_v15 = vpack.c.bf16 %v1646_v63, %v1645_v62  ;;  %v8229_v37 = vld [vmem:[%s11336_s5] ss:$8 sps:$4 sm:$0xff]  }
 0x2f7   : > { %v1619_v47 = vmul.f32 0.01, %v1587_v40  ;;  %v1588_v16 = vadd.f32 %v8997_v8, %v1553_v9  ;;  %v2554_v55 = vand.u32 %v8229_v37, %v2552_v49 }
 0x2f8   : > { %v1617_v1 = vmul.f32 0.01, %v1585_v4  ;;  %v1586_v17 = vadd.f32 %v8997_v8, %v1545_v13  ;;  %7886 = vmatprep.mubr.msk.bf16.mxu1 %vm896_vm3, %v1674_v15  ;;  %v8222_v8 = vld [vmem:[%s11335_s4 + $0x1c] ss:$12 sps:$4 sm:$0xff]  }
 0x2f9   : > { %v1620_v19 = vmul.f32 0.01, %v1588_v16  ;;  %7887 = vmatmul.mubr.msk.bf16.gmra.mrb[72].mxu1 %vm896_vm3, %v1675_v56  ;;  %v1651_v24 = vmax.f32 %v1587_v40, %v1619_v47  ;;  %2122 = vmatprep.subr.bf16.mxu0 %v8222_v8 }
 0x2fa   : > { %v1618_v5 = vmul.f32 0.01, %v1586_v17  ;;  %v1649_v25 = vmax.f32 %v1585_v4, %v1617_v1  ;;  %2123 = vmatpush1.bf16.msra.mxu0 %v8220_v31 }
 0x2fb   : > { %v1652_v3 = vmax.f32 %v1588_v16, %v1620_v19  ;;  %2124 = vmatprep.subr.bf16.mxu0 %v8225_v10 }
 0x2fc   : > { %v1650_v26 = vmax.f32 %v1586_v17, %v1618_v5 }
 0x2fd   : > { %v1677_v29 = vpack.c.bf16 %v1652_v3, %v1651_v24 }
 0x2fe   : > { %v1676_v30 = vpack.c.bf16 %v1650_v26, %v1649_v25  ;;  %2125 = vmatpush1.bf16.msra.mxu0 %v8223_v7 }
 0x2ff   : > { %2126 = vmatprep.subr.bf16.mxu0 %v8228_v14 }
 0x300   : > { %7890 = vmatprep.mubr.msk.bf16.mxu1 %vm896_vm3, %v1676_v30 }
 0x301   : > { %7891 = vmatmul.mubr.msk.bf16.gmra.mrb[76].mxu1 %vm896_vm3, %v1677_v29 }
 0x302   : > { %2127 = vmatpush1.bf16.msra.mxu0 %v8226_v20 }
 0x39c   : > { %v7864_v23 = vpop.f32.mrb[48].mxu1 }
 0x39d   : > { %v1794_v58 = vadd.f32 %v7864_v23, %v9102_v22  ;;  %v1785_v18 = vpop.f32.mrb[49].mxu1 }
 0x39e   : > { %v1786_v27 = vadd.f32 %v1785_v18, %v9102_v22  ;;  %v7865_v28 = vpop.f32.mrb[50].mxu1 }
 0x39f   : > { %v1914_v33 = vmul.f32 0.01, %v1794_v58  ;;  %v1797_v12 = vadd.f32 %v7865_v28, %v9102_v22  ;;  %v1788_v34 = vpop.f32.mrb[51].mxu1 }
 0x3a0   : > { %v1912_v2 = vmul.f32 0.01, %v1786_v27  ;;  %v1789_v45 = vadd.f32 %v1788_v34, %v9102_v22 }
 0x3a1   : > { %v1915_v35 = vmul.f32 0.01, %v1797_v12  ;;  %v1946_v38 = vmax.f32 %v1794_v58, %v1914_v33 }
 0x3a2   : > { %v1913_v36 = vmul.f32 0.01, %v1789_v45  ;;  %v1944_v21 = vmax.f32 %v1786_v27, %v1912_v2 }
 0x3a3   : > { %v1947_v39 = vmax.f32 %v1797_v12, %v1915_v35 }
 0x3a4   : > { %v1945_v42 = vmax.f32 %v1789_v45, %v1913_v36  ;;  %v7868_v43 = vpop.f32.mrb[52].mxu1 }
 0x3a5   : > { %v1993_v46 = vpack.c.bf16 %v1947_v39, %v1946_v38  ;;  %v1810_v48 = vadd.f32 %v7868_v43, %v9102_v22  ;;  %v1801_v51 = vpop.f32.mrb[53].mxu1 }
 0x3a6   : > { %v1992_v52 = vpack.c.bf16 %v1945_v42, %v1944_v21  ;;  %v1802_v53 = vadd.f32 %v1801_v51, %v9102_v22  ;;  %v7869_v54 = vpop.f32.mrb[54].mxu1 }
 0x3a7   : > { %v1918_v57 = vmul.f32 0.01, %v1810_v48  ;;  %v1813_v59 = vadd.f32 %v7869_v54, %v9102_v22  ;;  %v1804_v60 = vpop.f32.mrb[55].mxu1 }
 0x3a8   : > { %v1916_v61 = vmul.f32 0.01, %v1802_v53  ;;  %v1805_v62 = vadd.f32 %v1804_v60, %v9102_v22  ;;  %7226 = vmatmul.mubr.msk.bf16.vlgmr.msra.gmra.mrb[48].mxu0 %vm896_vm3, %v1992_v52  ;;  %7902 = vmatprep.mubr.msk.bf16.mxu1 %vm896_vm3, %v1992_v52 }
 0x3a9   : > { %v1919_v63 = vmul.f32 0.01, %v1813_v59  ;;  %7903 = vmatmul.mubr.msk.bf16.vlgmr.msra.gmra.mrb[80].mxu1 %vm896_vm3, %v1993_v46  ;;  %2162 = vmatprep.mubr.bf16.mxu0 %v11347_v41  ;;  %v1950_v6 = vmax.f32 %v1810_v48, %v1918_v57 }
 0x3aa   : > { %v1917_v0 = vmul.f32 0.01, %v1805_v62  ;;  %2560 = vmatpush1.bf16.msra.mxu1 %v2554_v55  ;;  %v1948_v9 = vmax.f32 %v1802_v53, %v1916_v61 }
 0x3ab   : > { %v1951_v40 = vmax.f32 %v1813_v59, %v1919_v63 }
 0x3ac   : > { %v1949_v11 = vmax.f32 %v1805_v62, %v1917_v0  ;;  %v7872_v56 = vpop.f32.mrb[56].mxu1 }
 0x3ad   : > { %v1995_v4 = vpack.c.bf16 %v1951_v40, %v1950_v6  ;;  %v1826_v13 = vadd.f32 %v7872_v56, %v9102_v22  ;;  %v1817_v15 = vpop.f32.mrb[57].mxu1 }
 0x3ae   : > { %v1994_v47 = vpack.c.bf16 %v1949_v11, %v1948_v9  ;;  %v1818_v16 = vadd.f32 %v1817_v15, %v9102_v22  ;;  %v7873_v1 = vpop.f32.mrb[58].mxu1 }
 0x3af   : > { %v1922_v17 = vmul.f32 0.01, %v1826_v13  ;;  %v1829_v19 = vadd.f32 %v7873_v1, %v9102_v22  ;;  %v1820_v5 = vpop.f32.mrb[59].mxu1 }
 0x3b0   : > { %v1920_v24 = vmul.f32 0.01, %v1818_v16  ;;  %v1821_v3 = vadd.f32 %v1820_v5, %v9102_v22  ;;  %7227 = vmatmul.mubr.msk.bf16.gmra.mrb[52].mxu0 %vm896_vm3, %v1993_v46  ;;  %7906 = vmatprep.mubr.msk.bf16.mxu1 %vm896_vm3, %v1994_v47 }
 0x3b1   : > { %v1923_v25 = vmul.f32 0.01, %v1829_v19  ;;  %7907 = vmatmul.mubr.msk.bf16.gmra.mrb[84].mxu1 %vm896_vm3, %v1995_v4  ;;  %2172 = vmatprep.mubr.bf16.mxu0 %v11347_v41  ;;  %v1954_v29 = vmax.f32 %v1826_v13, %v1922_v17 }
 0x3b2   : > { %v1921_v26 = vmul.f32 0.01, %v1821_v3  ;;  %v1952_v8 = vmax.f32 %v1818_v16, %v1920_v24 }
 0x3b3   : > { %v1955_v30 = vmax.f32 %v1829_v19, %v1923_v25 }
 0x3b4   : > { %v1953_v31 = vmax.f32 %v1821_v3, %v1921_v26  ;;  %v7876_v10 = vpop.f32.mrb[60].mxu1 }
 0x3b5   : > { %v9127_v7 = vpack.c.bf16 %v1955_v30, %v1954_v29  ;;  %v1842_v14 = vadd.f32 %v7876_v10, %v9102_v22  ;;  %v1833_v20 = vpop.f32.mrb[61].mxu1 }
 0x3b6   : > { %v1996_v32 = vpack.c.bf16 %v1953_v31, %v1952_v8  ;;  %v1834_v44 = vadd.f32 %v1833_v20, %v9102_v22  ;;  %v7877_v49 = vpop.f32.mrb[62].mxu1 }
 0x3b7   : > { %v1926_v50 = vmul.f32 0.01, %v1842_v14  ;;  %v1845_v23 = vadd.f32 %v7877_v49, %v9102_v22  ;;  %v1836_v58 = vpop.f32.mrb[63].mxu1 }
 0x3b8   : > { %v1924_v18 = vmul.f32 0.01, %v1834_v44  ;;  %v1837_v27 = vadd.f32 %v1836_v58, %v9102_v22  ;;  %7228 = vmatmul.mubr.msk.bf16.gmra.mrb[56].mxu0 %vm896_vm3, %v1994_v47  ;;  %7910 = vmatprep.mubr.msk.bf16.mxu1 %vm896_vm3, %v1996_v32 }
 0x3b9   : > { %v1927_v28 = vmul.f32 0.01, %v1845_v23  ;;  %7911 = vmatmul.mubr.msk.bf16.gmra.mrb[88].mxu1 %vm896_vm3, %v9127_v7  ;;  %2182 = vmatprep.mubr.bf16.mxu0 %v11347_v41  ;;  %v1958_v12 = vmax.f32 %v1842_v14, %v1926_v50 }
 0x3ba   : > { %v1925_v33 = vmul.f32 0.01, %v1837_v27  ;;  %v1956_v2 = vmax.f32 %v1834_v44, %v1924_v18 }
 0x3bb   : > { %v1959_v34 = vmax.f32 %v1845_v23, %v1927_v28 }
 0x3bc   : > { %v1957_v45 = vmax.f32 %v1837_v27, %v1925_v33  ;;  %v7880_v35 = vpop.f32.mrb[64].mxu1 }
 0x3bd   : > { %v9138_v36 = vpack.c.bf16 %v1959_v34, %v1958_v12  ;;  %v1858_v37 = vadd.f32 %v7880_v35, %v9102_v22  ;;  %v1849_v38 = vpop.f32.mrb[65].mxu1 }
 0x3be   : > { %v9141_v39 = vpack.c.bf16 %v1957_v45, %v1956_v2  ;;  %v1850_v21 = vadd.f32 %v1849_v38, %v9102_v22  ;;  %v7881_v42 = vpop.f32.mrb[66].mxu1 }
 0x3bf   : > { %v1930_v43 = vmul.f32 0.01, %v1858_v37  ;;  %v1861_v46 = vadd.f32 %v7881_v42, %v9102_v22  ;;  %v1852_v48 = vpop.f32.mrb[67].mxu1 }
 0x3c0   : > { %v1928_v51 = vmul.f32 0.01, %v1850_v21  ;;  %v1853_v52 = vadd.f32 %v1852_v48, %v9102_v22  ;;  %7229 = vmatmul.mubr.msk.bf16.gmra.mrb[60].mxu0 %vm896_vm3, %v1995_v4  ;;  %7914 = vmatprep.mubr.msk.bf16.mxu1 %vm896_vm3, %v9141_v39 }
 0x3c1   : > { %v1931_v53 = vmul.f32 0.01, %v1861_v46  ;;  %7915 = vmatmul.mubr.msk.bf16.gmra.mrb[92].mxu1 %vm896_vm3, %v9138_v36  ;;  %2192 = vmatprep.mubr.bf16.mxu0 %v11347_v41  ;;  %v1962_v55 = vmax.f32 %v1858_v37, %v1930_v43 }
 0x3c2   : > { %v1929_v54 = vmul.f32 0.01, %v1853_v52  ;;  %v1960_v59 = vmax.f32 %v1850_v21, %v1928_v51 }
 0x3c3   : > { %v1963_v57 = vmax.f32 %v1861_v46, %v1931_v53 }
 0x3c4   : > { %v1961_v60 = vmax.f32 %v1853_v52, %v1929_v54  ;;  %v7884_v61 = vpop.f32.mrb[68].mxu1 }
 0x3c5   : > { %v9152_v62 = vpack.c.bf16 %v1963_v57, %v1962_v55  ;;  %v1874_v63 = vadd.f32 %v7884_v61, %v9102_v22  ;;  %v1865_v0 = vpop.f32.mrb[69].mxu1  ;;  %v473_v57 = vld [vmem:[%s9198_s15 + $0x18] sm:$0xff]  ;;  %v475_v61 = vld [vmem:[%s9198_s15 + $0x28] sm:$0xff] }
 0x3c6   : > { %v9155_v6 = vpack.c.bf16 %v1961_v60, %v1960_v59  ;;  %v1866_v40 = vadd.f32 %v1865_v0, %v9102_v22  ;;  %v7885_v9 = vpop.f32.mrb[70].mxu1  ;;  %v474_v60 = vld [vmem:[%s9198_s15 + $0x20] sm:$0xff]  ;;  %v477_v0 = vld [vmem:[%s9198_s15 + $0x38] sm:$0xff] }
 0x3c7   : > { %v1934_v11 = vmul.f32 0.01, %v1874_v63  ;;  %v1877_v56 = vadd.f32 %v7885_v9, %v9102_v22  ;;  %v1868_v4 = vpop.f32.mrb[71].mxu1  ;;  %v479_v9 = vld [vmem:[%s9198_s15 + $0x48] sm:$0xff] }
 0x3c8   : > { %v1932_v13 = vmul.f32 0.01, %v1866_v40  ;;  %v1869_v15 = vadd.f32 %v1868_v4, %v9102_v22  ;;  %7230 = vmatmul.mubr.msk.bf16.gmra.mrb[64].mxu0 %vm896_vm3, %v1996_v32  ;;  %7918 = vmatprep.mubr.msk.bf16.mxu1 %vm896_vm3, %v9155_v6  ;;  %v481_v4 = vld [vmem:[%s9198_s15 + $0x58] sm:$0xff] }
 0x3c9   : > { %v1935_v47 = vmul.f32 0.01, %v1877_v56  ;;  %7919 = vmatmul.mubr.msk.bf16.gmra.mrb[96].mxu1 %vm896_vm3, %v9152_v62  ;;  %2202 = vmatprep.mubr.bf16.mxu0 %v11347_v41  ;;  %v1966_v1 = vmax.f32 %v1874_v63, %v1934_v11  ;;  %v2478_v63 = vpack.c.bf16 %v475_v61, %v474_v60 }
 0x3ca   : > { %v1933_v16 = vmul.f32 0.01, %v1869_v15  ;;  %v1964_v19 = vmax.f32 %v1866_v40, %v1932_v13  ;;  %v478_v40 = vld [vmem:[%s9198_s15 + $0x40] sm:$0xff] }
 0x3cb   : > { %v1967_v17 = vmax.f32 %v1877_v56, %v1935_v47  ;;  %v2480_v11 = vpack.c.bf16 %v479_v9, %v478_v40  ;;  %v480_v56 = vld [vmem:[%s9198_s15 + $0x50] sm:$0xff]  ;;  %v483_v47 = vld [vmem:[%s9198_s15 + $0x68] sm:$0xff] }
 0x3cc   : > { %v1965_v5 = vmax.f32 %v1869_v15, %v1933_v16  ;;  %v7888_v24 = vpop.f32.mrb[72].mxu1  ;;  %v2481_v13 = vpack.c.bf16 %v481_v4, %v480_v56  ;;  %v482_v15 = vld [vmem:[%s9198_s15 + $0x60] sm:$0xff] }
 0x3cd   : > { %v9166_v3 = vpack.c.bf16 %v1967_v17, %v1966_v1  ;;  %v1890_v25 = vadd.f32 %v7888_v24, %v9102_v22  ;;  %v1881_v26 = vpop.f32.mrb[73].mxu1  ;;  %v2482_v16 = vpack.c.bf16 %v483_v47, %v482_v15  ;;  %v484_v1 = vld [vmem:[%s9198_s15 + $0x70] sm:$0xff]  ;;  %v485_v17 = vld [vmem:[%s9198_s15 + $0x78] sm:$0xff]  ;;  %v487_v24 = vld [vmem:[%s9198_s15 + $0x88] sm:$0xff] }
 0x3ce   : > { %v9169_v29 = vpack.c.bf16 %v1965_v5, %v1964_v19  ;;  %v1882_v30 = vadd.f32 %v1881_v26, %v9102_v22  ;;  %v7889_v8 = vpop.f32.mrb[74].mxu1  ;;  %v2483_v19 = vpack.c.bf16 %v485_v17, %v484_v1  ;;  %v486_v5 = vld [vmem:[%s9198_s15 + $0x80] sm:$0xff]  ;;  %v489_v26 = vld [vmem:[%s9198_s15 + $0x98] sm:$0xff] }
 0x3cf   : > { %v1938_v31 = vmul.f32 0.01, %v1890_v25  ;;  %v1893_v10 = vadd.f32 %v7889_v8, %v9102_v22  ;;  %v1884_v14 = vpop.f32.mrb[75].mxu1  ;;  %v490_v8 = vld [vmem:[%s9198_s15 + $0xa0] sm:$0xff] }
 0x3d0   : > { %v1936_v20 = vmul.f32 0.01, %v1882_v30  ;;  %v1885_v32 = vadd.f32 %v1884_v14, %v9102_v22  ;;  %7231 = vmatmul.mubr.msk.bf16.gmra.mrb[68].mxu0 %vm896_vm3, %v9127_v7  ;;  %7922 = vmatprep.mubr.msk.bf16.mxu1 %vm896_vm3, %v9169_v29 }
 0x3d1   : > { %v1939_v44 = vmul.f32 0.01, %v1893_v10  ;;  %7923 = vmatmul.mubr.msk.bf16.gmra.mrb[100].mxu1 %vm896_vm3, %v9166_v3  ;;  %2212 = vmatprep.mubr.bf16.mxu0 %v11347_v41  ;;  %v1970_v50 = vmax.f32 %v1890_v25, %v1938_v31  ;;  %v488_v25 = vld [vmem:[%s9198_s15 + $0x90] sm:$0xff]  ;;  %v491_v31 = vld [vmem:[%s9198_s15 + $0xa8] sm:$0xff] }
 0x3d2   : > { %v1937_v49 = vmul.f32 0.01, %v1885_v32  ;;  %v1968_v58 = vmax.f32 %v1882_v30, %v1936_v20  ;;  %v8232_v30 = vld [vmem:[%s11337_s6] sm:$0xff]   ;;  %v2486_v14 = vpack.c.bf16 %v491_v31, %v490_v8  ;;  %v8234_v20 = vld [vmem:[%s11337_s6 + $0x10] sm:$0xff]  }
 0x3d3   : > { %v1971_v23 = vmax.f32 %v1893_v10, %v1939_v44  ;;  %7934 = vmatprep.subr.bf16.mxu0 %v8232_v30  ;;  %v8233_v10 = vld [vmem:[%s11337_s6 + $0x8] sm:$0xff]   ;;  %v493_v44 = vld [vmem:[%s9198_s15 + $0xb8] sm:$0xff] }
 0x3d4   : > { %v1969_v18 = vmax.f32 %v1885_v32, %v1937_v49  ;;  %v7892_v27 = vpop.f32.mrb[76].mxu1  ;;  %7935 = vmatpush3.bf16.msra.mxu0 %v8232_v30  ;;  %v492_v32 = vld [vmem:[%s9198_s15 + $0xb0] sm:$0xff]  ;;  %v8235_v49 = vld [vmem:[%s11337_s6 + $0x18] sm:$0xff]  }
 0x3d5   : > { %v9181_v28 = vpack.c.bf16 %v1971_v23, %v1970_v50  ;;  %v1906_v33 = vadd.f32 %v7892_v27, %v9102_v22  ;;  %v1897_v7 = vpop.f32.mrb[77].mxu1  ;;  %7936 = vmatprep.subr.bf16.mxu0 %v8233_v10  ;;  %v2487_v50 = vpack.c.bf16 %v493_v44, %v492_v32  ;;  %v8236_v23 = vld [vmem:[%s11337_s6 + $0x20] sm:$0xff]   ;;  %v8237_v27 = vld [vmem:[%s11337_s6 + $0x28] sm:$0xff]  }
 0x3d6   : > { %v2004_v12 = vpack.c.bf16 %v1969_v18, %v1968_v58  ;;  %v1898_v34 = vadd.f32 %v1897_v7, %v9102_v22  ;;  %v7893_v2 = vpop.f32.mrb[78].mxu1  ;;  %v494_v58 = vld [vmem:[%s9198_s15 + $0xc0] sm:$0xff]  ;;  %v495_v18 = vld [vmem:[%s9198_s15 + $0xc8] sm:$0xff]  ;;  %v496_v7 = vld [vmem:[%s9198_s15 + $0xd0] sm:$0xff] }
 0x3d7   : > { %v1942_v45 = vmul.f32 0.01, %v1906_v33  ;;  %v1909_v35 = vadd.f32 %v7893_v2, %v9102_v22  ;;  %v1900_v37 = vpop.f32.mrb[79].mxu1 }
 0x3d8   : > { %v1940_v38 = vmul.f32 0.01, %v1898_v34  ;;  %v1901_v21 = vadd.f32 %v1900_v37, %v9102_v22  ;;  %7232 = vmatmul.mubr.msk.bf16.gmra.mrb[72].mxu0 %vm896_vm3, %v9141_v39  ;;  %7926 = vmatprep.mubr.msk.bf16.mxu1 %vm896_vm3, %v2004_v12  ;;  %v470_v22 = vld [vmem:[%s9198_s15] sm:$0xff]  ;;  %v471_v39 = vld [vmem:[%s9198_s15 + $0x8] sm:$0xff] }
 0x3d9   : > { %v1943_v42 = vmul.f32 0.01, %v1909_v35  ;;  %7927 = vmatmul.mubr.msk.bf16.gmra.mrb[104].mxu1 %vm896_vm3, %v9181_v28  ;;  %2222 = vmatprep.mubr.bf16.mxu0 %v11347_v41  ;;  %v1974_v46 = vmax.f32 %v1906_v33, %v1942_v45  ;;  %v2476_v55 = vpack.c.bf16 %v471_v39, %v470_v22  ;;  %v8238_v33 = vld [vmem:[%s11337_s6 + $0x30] sm:$0xff]   ;;  %v498_v45 = vld [vmem:[%s9198_s15 + $0xe0] sm:$0xff] }
 0x3da   : > { %v1941_v43 = vmul.f32 0.01, %v1901_v21  ;;  %v1972_v51 = vmax.f32 %v1898_v34, %v1940_v38  ;;  %7937 = vmatpush3.bf16.msra.mxu0 %v8233_v10  ;;  %v8239_v34 = vld [vmem:[%s11337_s6 + $0x38] sm:$0xff]   ;;  %v500_v38 = vld [vmem:[%s9198_s15 + $0xf0] sm:$0xff] }
 0x3db   : > { %v1975_v48 = vmax.f32 %v1909_v35, %v1943_v42  ;;  %7938 = vmatprep.subr.bf16.mxu0 %v8234_v20  ;;  %v499_v35 = vld [vmem:[%s9198_s15 + $0xe8] sm:$0xff] }
 0x3dc   : > { %v1973_v52 = vmax.f32 %v1901_v21, %v1941_v43  ;;  %v2490_v37 = vpack.c.bf16 %v499_v35, %v498_v45  ;;  %v501_v21 = vld [vmem:[%s9198_s15 + $0xf8] sm:$0xff]  ;;  %v2915_v43 = vlaneseq }
 0x3dd   : > { %v2007_v53 = vpack.c.bf16 %v1975_v48, %v1974_v46  ;;  %v2491_v42 = vpack.c.bf16 %v501_v21, %v500_v38 }
 0x3de   : > { %v2006_v54 = vpack.c.bf16 %v1973_v52, %v1972_v51  ;;  %7939 = vmatpush3.bf16.msra.mxu0 %v8234_v20  ;;  %v9313_v46 = vshrl.u32 %v2915_v43, 7  ;;  %v7276_v51 = vld [vmem:[%s11342_s11 + $0x4] ss:$8 sm:$0x7] }
 0x3df   : > { %7940 = vmatprep.subr.bf16.mxu0 %v8235_v49 }
 0x3e0   : > { %7233 = vmatmul.mubr.msk.bf16.gmra.mrb[76].mxu0 %vm896_vm3, %v9138_v36  ;;  %7930 = vmatprep.mubr.msk.bf16.mxu1 %vm896_vm3, %v2006_v54  ;;  %v472_v36 = vld [vmem:[%s9198_s15 + $0x10] sm:$0xff]  ;;  %v9316_v48 = vsub.s32 0, %v9313_v46  ;;  %v9322_v52 = vsub.s32 2, %v9313_v46 }
 0x3e1   : > { %7931 = vmatmul.mubr.msk.bf16.gmra.mrb[108].mxu1 %vm896_vm3, %v2007_v53  ;;  %2232 = vmatprep.mubr.bf16.mxu0 %v11347_v41  ;;  %v2477_v59 = vpack.c.bf16 %v473_v57, %v472_v36 }
 0x3e2   : > { %2591 = vmatprep.mubr.bf16.mxu1 %v11347_v41  ;;  %7941 = vmatpush3.bf16.msra.mxu0 %v8235_v49  ;;  %11399 = vst [vmem:[#allocation5_spill] sm:$0xff] %v9316_v48  ;;  %11400 = vst [vmem:[#allocation6_spill] sm:$0xff] %v9322_v52 }
 0x3e3   : > { %7942 = vmatprep.subr.bf16.mxu0 %v8236_v23 }
 0x3e6   : > { %7943 = vmatpush3.bf16.msra.mxu0 %v8236_v23 }
 0x3e7   : > { %7944 = vmatprep.subr.bf16.mxu0 %v8237_v27 }
 0x3e8   : > { %7234 = vmatmul.mubr.msk.bf16.gmra.mrb[80].mxu0 %vm896_vm3, %v9155_v6 }
 0x3e9   : > { %7260 = vmatmul.mubr.msk.bf16.vlgmr.msra.gmra.mrb[112].mxu1 %vm2500_vm6, %v2476_v55  ;;  %2242 = vmatprep.mubr.bf16.mxu0 %v11347_v41 }
 0x3ea   : > { %2601 = vmatprep.mubr.bf16.mxu1 %v11347_v41  ;;  %7945 = vmatpush3.bf16.msra.mxu0 %v8237_v27 }
 0x3eb   : > { %7946 = vmatprep.subr.bf16.mxu0 %v8238_v33 }
 0x3ee   : > { %7947 = vmatpush3.bf16.msra.mxu0 %v8238_v33 }
 0x3ef   : > { %7948 = vmatprep.subr.bf16.mxu0 %v8239_v34 }
 0x3f0   : > { %7235 = vmatmul.mubr.msk.bf16.gmra.mrb[84].mxu0 %vm896_vm3, %v9152_v62  ;;  %v476_v62 = vld [vmem:[%s9198_s15 + $0x30] sm:$0xff] }
 0x3f1   : > { %7261 = vmatmul.mubr.msk.bf16.gmra.mrb[116].mxu1 %vm2500_vm6, %v2477_v59  ;;  %2252 = vmatprep.mubr.bf16.mxu0 %v11347_v41  ;;  %v2479_v6 = vpack.c.bf16 %v477_v0, %v476_v62 }
 0x3f2   : > { %2611 = vmatprep.mubr.bf16.mxu1 %v11347_v41  ;;  %7949 = vmatpush3.bf16.msra.mxu0 %v8239_v34 }
 0x3f8   : > { %7236 = vmatmul.mubr.msk.bf16.gmra.mrb[88].mxu0 %vm896_vm3, %v9169_v29  ;;  %v2485_v29 = vpack.c.bf16 %v489_v26, %v488_v25 }
 0x3f9   : > { %7262 = vmatmul.mubr.msk.bf16.gmra.mrb[120].mxu1 %vm2500_vm6, %v2478_v63  ;;  %2262 = vmatprep.mubr.bf16.mxu0 %v11347_v41 }
 0x3fa   : > { %2621 = vmatprep.mubr.bf16.mxu1 %v11347_v41 }
 0x400   : > { %7237 = vmatmul.mubr.msk.bf16.gmra.mrb[92].mxu0 %vm896_vm3, %v9166_v3  ;;  %v2484_v3 = vpack.c.bf16 %v487_v24, %v486_v5 }
 0x401   : > { %7263 = vmatmul.mubr.msk.bf16.gmra.mrb[124].mxu1 %vm2500_vm6, %v2479_v6  ;;  %2272 = vmatprep.mubr.bf16.mxu0 %v11347_v41 }
 0x402   : > { %2631 = vmatprep.mubr.bf16.mxu1 %v11347_v41 }
 0x408   : > { %7238 = vmatmul.mubr.msk.bf16.gmra.mrb[96].mxu0 %vm896_vm3, %v2004_v12  ;;  %v497_v12 = vld [vmem:[%s9198_s15 + $0xd8] sm:$0xff] }
 0x409   : > { %7264 = vmatmul.mubr.msk.bf16.gmra.mrb[128].mxu1 %vm2500_vm6, %v2480_v11  ;;  %2282 = vmatprep.mubr.bf16.mxu0 %v11347_v41  ;;  %v2489_v2 = vpack.c.bf16 %v497_v12, %v496_v7 }
 0x40a   : > { %2641 = vmatprep.mubr.bf16.mxu1 %v11347_v41 }
 0x410   : > { %7239 = vmatmul.mubr.msk.bf16.gmra.mrb[100].mxu0 %vm896_vm3, %v9181_v28  ;;  %v2488_v28 = vpack.c.bf16 %v495_v18, %v494_v58 }
 0x411   : > { %7265 = vmatmul.mubr.msk.bf16.gmra.mrb[132].mxu1 %vm2500_vm6, %v2481_v13  ;;  %2292 = vmatprep.mubr.bf16.mxu0 %v11347_v41 }
 0x412   : > { %2651 = vmatprep.mubr.bf16.mxu1 %v11347_v41 }
 0x418   : > { %7240 = vmatmul.mubr.msk.bf16.gmra.mrb[104].mxu0 %vm896_vm3, %v2006_v54  ;;  %v9328_v54 = vrot.slane %v7276_v51, %v9322_v52 }
 0x419   : > { %7266 = vmatmul.mubr.msk.bf16.gmra.mrb[136].mxu1 %vm2500_vm6, %v2482_v16  ;;  %2302 = vmatprep.mubr.bf16.mxu0 %v11347_v41 }
 0x41a   : > { %2661 = vmatprep.mubr.bf16.mxu1 %v11347_v41 }
 0x420   : > { %7241 = vmatmul.mubr.msk.bf16.gmra.mrb[108].mxu0 %vm896_vm3, %v2007_v53  ;;  %v9325_v53 = vrot.slane %v7276_v51, %v9316_v48 }
 0x421   : > { %7267 = vmatmul.mubr.msk.bf16.gmra.mrb[140].mxu1 %vm2500_vm6, %v2483_v19 }
 0x422   : > { %2671 = vmatprep.mubr.bf16.mxu1 %v11347_v41 }
 0x429   : > { %7268 = vmatmul.mubr.msk.bf16.gmra.mrb[144].mxu1 %vm2500_vm6, %v2484_v3 }
 0x42a   : > { %2681 = vmatprep.mubr.bf16.mxu1 %v11347_v41 }
 0x431   : > { %7269 = vmatmul.mubr.msk.bf16.gmra.mrb[148].mxu1 %vm2500_vm6, %v2485_v29 }
 0x432   : > { %2691 = vmatprep.mubr.bf16.mxu1 %v11347_v41 }
 0x439   : > { %7270 = vmatmul.mubr.msk.bf16.gmra.mrb[152].mxu1 %vm2500_vm6, %v2486_v14 }
 0x43a   : > { %2701 = vmatprep.mubr.bf16.mxu1 %v11347_v41 }
 0x441   : > { %7271 = vmatmul.mubr.msk.bf16.gmra.mrb[156].mxu1 %vm2500_vm6, %v2487_v50 }
 0x442   : > { %2711 = vmatprep.mubr.bf16.mxu1 %v11347_v41 }
 0x449   : > { %7272 = vmatmul.mubr.msk.bf16.gmra.mrb[160].mxu1 %vm2500_vm6, %v2488_v28 }
 0x44a   : > { %2721 = vmatprep.mubr.bf16.mxu1 %v11347_v41 }
 0x451   : > { %7273 = vmatmul.mubr.msk.bf16.gmra.mrb[164].mxu1 %vm2500_vm6, %v2489_v2 }
 0x452   : > { %2731 = vmatprep.mubr.bf16.mxu1 %v11347_v41 }
 0x459   : > { %7274 = vmatmul.mubr.msk.bf16.gmra.mrb[168].mxu1 %vm2500_vm6, %v2490_v37 }
 0x45a   : > { %2741 = vmatprep.mubr.bf16.mxu1 %v11347_v41 }
 0x461   : > { %7275 = vmatmul.mubr.msk.bf16.gmra.mrb[172].mxu1 %vm2500_vm6, %v2491_v42 }
 0x47b   : > { %v2154_v22 = vpop.f32.mrb[48].mxu0 }
 0x47c   : > { %v2930_v39 = vadd.f32 %v9325_v53, %v2154_v22  ;;  %v9331_v55 = vpop.f32.mrb[49].mxu0  ;;  %v9333_v36 = vpop.f32.mrb[80].mxu1 }
 0x47d   : > { %v2938_v57 = vadd.f32 %v9333_v36, %v9328_v54  ;;  %v2158_v59 = vpop.f32.mrb[50].mxu0  ;;  %v9337_v60 = vpop.f32.mrb[81].mxu1 }
 0x47e   : > { %v3026_v61 = vmul.f32 0.01, %v2930_v39  ;;  %v2933_v63 = vadd.f32 %v9325_v53, %v2158_v59  ;;  %v2932_v62 = vadd.f32 %v9328_v54, %v9337_v60  ;;  %v9342_v0 = vpop.f32.mrb[51].mxu0  ;;  %v9344_v6 = vpop.f32.mrb[82].mxu1 }
 0x47f   : > { %v3034_v40 = vmul.f32 0.01, %v2938_v57  ;;  %v2941_v9 = vadd.f32 %v9344_v6, %v9328_v54  ;;  %v9348_v11 = vpop.f32.mrb[83].mxu1 }
 0x480   : > { %v3029_v56 = vmul.f32 0.01, %v2933_v63  ;;  %v3028_v4 = vmul.f32 0.01, %v2932_v62  ;;  %v2935_v13 = vadd.f32 %v9328_v54, %v9348_v11  ;;  %v3122_v47 = vmax.f32 %v2930_v39, %v3026_v61 }
 0x481   : > { %v3037_v15 = vmul.f32 0.01, %v2941_v9  ;;  %v3130_v17 = vmax.f32 %v2938_v57, %v3034_v40 }
 0x482   : > { %v3125_v16 = vmax.f32 %v2933_v63, %v3029_v56  ;;  %v3031_v1 = vmul.f32 0.01, %v2935_v13  ;;  %v3124_v3 = vmax.f32 %v2932_v62, %v3028_v4 }
 0x483   : > { %v3133_v19 = vmax.f32 %v2941_v9, %v3037_v15  ;;  %v2164_v5 = vpop.f32.mrb[52].mxu0 }
 0x484   : > { %v9352_v24 = vpack.c.bf16 %v3125_v16, %v3122_v47  ;;  %v3127_v25 = vmax.f32 %v2935_v13, %v3031_v1  ;;  %v2936_v26 = vadd.f32 %v9325_v53, %v2164_v5  ;;  %v9355_v29 = vpop.f32.mrb[53].mxu0  ;;  %v9357_v30 = vpop.f32.mrb[84].mxu1 }
 0x485   : > { %v9359_v8 = vpack.c.bf16 %v3133_v19, %v3130_v17  ;;  %v2950_v31 = vadd.f32 %v9357_v30, %v9328_v54  ;;  %v2168_v10 = vpop.f32.mrb[54].mxu0  ;;  %v9363_v14 = vpop.f32.mrb[85].mxu1 }
 0x486   : > { %11401 = vst [vmem:[#allocation7_spill] sm:$0xff] %v9352_v24  ;;  %v3032_v20 = vmul.f32 0.01, %v2936_v26  ;;  %v2939_v32 = vadd.f32 %v9325_v53, %v2168_v10  ;;  %v2944_v44 = vadd.f32 %v9328_v54, %v9363_v14  ;;  %v9368_v49 = vpop.f32.mrb[55].mxu0  ;;  %v9370_v50 = vpop.f32.mrb[86].mxu1  ;;  %v9372_v23 = vpack.c.bf16 %v3127_v25, %v3124_v3 }
 0x487   : > { %11402 = vst [vmem:[#allocation8_spill] sm:$0xff] %v9359_v8  ;;  %v3046_v58 = vmul.f32 0.01, %v2950_v31  ;;  %v2953_v18 = vadd.f32 %v9370_v50, %v9328_v54  ;;  %v9376_v27 = vpop.f32.mrb[87].mxu1 }
 0x488   : > { %11403 = vst [vmem:[#allocation9_spill] sm:$0xff] %v9372_v23  ;;  %v3035_v28 = vmul.f32 0.01, %v2939_v32  ;;  %v3040_v33 = vmul.f32 0.01, %v2944_v44  ;;  %v2947_v7 = vadd.f32 %v9328_v54, %v9376_v27  ;;  %v3128_v34 = vmax.f32 %v2936_v26, %v3032_v20 }
 0x489   : > { %v3049_v12 = vmul.f32 0.01, %v2953_v18  ;;  %v3142_v35 = vmax.f32 %v2950_v31, %v3046_v58 }
 0x48a   : > { %v3131_v2 = vmax.f32 %v2939_v32, %v3035_v28  ;;  %v3043_v45 = vmul.f32 0.01, %v2947_v7  ;;  %v3136_v42 = vmax.f32 %v2944_v44, %v3040_v33 }
 0x48b   : > { %v3145_v37 = vmax.f32 %v2953_v18, %v3049_v12  ;;  %v2174_v38 = vpop.f32.mrb[56].mxu0 }
 0x48c   : > { %v9380_v21 = vpack.c.bf16 %v3131_v2, %v3128_v34  ;;  %v3139_v43 = vmax.f32 %v2947_v7, %v3043_v45  ;;  %v2942_v51 = vadd.f32 %v9325_v53, %v2174_v38  ;;  %v9383_v22 = vpop.f32.mrb[57].mxu0  ;;  %v9385_v39 = vpop.f32.mrb[88].mxu1 }
 0x48d   : > { %v2962_v57 = vadd.f32 %v9385_v39, %v9328_v54  ;;  %v2178_v59 = vpop.f32.mrb[58].mxu0  ;;  %v9389_v61 = vpop.f32.mrb[89].mxu1  ;;  %v9391_v63 = vpack.c.bf16 %v3145_v37, %v3142_v35 }
 0x48e   : > { %11404 = vst [vmem:[#allocation10_spill] sm:$0xff] %v9380_v21  ;;  %v3038_v62 = vmul.f32 0.01, %v2942_v51  ;;  %v2945_v40 = vadd.f32 %v9325_v53, %v2178_v59  ;;  %v2956_v9 = vadd.f32 %v9328_v54, %v9389_v61  ;;  %v9396_v56 = vpop.f32.mrb[59].mxu0  ;;  %v9398_v4 = vpop.f32.mrb[90].mxu1  ;;  %v9400_v13 = vpack.c.bf16 %v3139_v43, %v3136_v42 }
 0x48f   : > { %11405 = vst [vmem:[#allocation11_spill] sm:$0xff] %v9391_v63  ;;  %v3058_v15 = vmul.f32 0.01, %v2962_v57  ;;  %v2965_v47 = vadd.f32 %v9398_v4, %v9328_v54  ;;  %v9404_v16 = vpop.f32.mrb[91].mxu1 }
 0x490   : > { %11406 = vst [vmem:[#allocation12_spill] sm:$0xff] %v9400_v13  ;;  %v3041_v1 = vmul.f32 0.01, %v2945_v40  ;;  %v3052_v17 = vmul.f32 0.01, %v2956_v9  ;;  %v2959_v19 = vadd.f32 %v9328_v54, %v9404_v16  ;;  %v3134_v3 = vmax.f32 %v2942_v51, %v3038_v62 }
 0x491   : > { %v3061_v5 = vmul.f32 0.01, %v2965_v47  ;;  %v3154_v31 = vmax.f32 %v2962_v57, %v3058_v15 }
 0x492   : > { %v3137_v25 = vmax.f32 %v2945_v40, %v3041_v1  ;;  %v3055_v26 = vmul.f32 0.01, %v2959_v19  ;;  %v3148_v44 = vmax.f32 %v2956_v9, %v3052_v17 }
 0x493   : > { %v3157_v10 = vmax.f32 %v2965_v47, %v3061_v5  ;;  %v2184_v20 = vpop.f32.mrb[60].mxu0 }
 0x494   : > { %v9408_v32 = vpack.c.bf16 %v3137_v25, %v3134_v3  ;;  %v3151_v58 = vmax.f32 %v2959_v19, %v3055_v26  ;;  %v2948_v18 = vadd.f32 %v9325_v53, %v2184_v20  ;;  %v9411_v28 = vpop.f32.mrb[61].mxu0  ;;  %v9413_v33 = vpop.f32.mrb[92].mxu1 }
 0x495   : > { %v2974_v7 = vadd.f32 %v9413_v33, %v9328_v54  ;;  %v2188_v12 = vpop.f32.mrb[62].mxu0  ;;  %v9417_v34 = vpop.f32.mrb[93].mxu1  ;;  %v9419_v2 = vpack.c.bf16 %v3157_v10, %v3154_v31 }
 0x496   : > { %11407 = vst [vmem:[#allocation13_spill] sm:$0xff] %v9408_v32  ;;  %v3044_v45 = vmul.f32 0.01, %v2948_v18  ;;  %v2951_v35 = vadd.f32 %v9325_v53, %v2188_v12  ;;  %v2968_v37 = vadd.f32 %v9328_v54, %v9417_v34  ;;  %v9424_v38 = vpop.f32.mrb[63].mxu0  ;;  %v9426_v42 = vpop.f32.mrb[94].mxu1  ;;  %v9428_v43 = vpack.c.bf16 %v3151_v58, %v3148_v44 }
 0x497   : > { %11408 = vst [vmem:[#allocation14_spill] sm:$0xff] %v9419_v2  ;;  %v3070_v51 = vmul.f32 0.01, %v2974_v7  ;;  %v2977_v57 = vadd.f32 %v9426_v42, %v9328_v54  ;;  %v9432_v59 = vpop.f32.mrb[95].mxu1 }
 0x498   : > { %11409 = vst [vmem:[#allocation15_spill] sm:$0xff] %v9428_v43  ;;  %v3047_v62 = vmul.f32 0.01, %v2951_v35  ;;  %v3064_v40 = vmul.f32 0.01, %v2968_v37  ;;  %v2971_v9 = vadd.f32 %v9328_v54, %v9432_v59  ;;  %v3140_v47 = vmax.f32 %v2948_v18, %v3044_v45 }
 0x499   : > { %v3073_v15 = vmul.f32 0.01, %v2977_v57  ;;  %v3166_v19 = vmax.f32 %v2974_v7, %v3070_v51 }
 0x49a   : > { %v3143_v1 = vmax.f32 %v2951_v35, %v3047_v62  ;;  %v3067_v17 = vmul.f32 0.01, %v2971_v9  ;;  %v3160_v26 = vmax.f32 %v2968_v37, %v3064_v40 }
 0x49b   : > { %v3169_v5 = vmax.f32 %v2977_v57, %v3073_v15  ;;  %v2194_v3 = vpop.f32.mrb[64].mxu0 }
 0x49c   : > { %v9436_v25 = vpack.c.bf16 %v3143_v1, %v3140_v47  ;;  %v3163_v31 = vmax.f32 %v2971_v9, %v3067_v17  ;;  %v2954_v10 = vadd.f32 %v9325_v53, %v2194_v3  ;;  %v9439_v20 = vpop.f32.mrb[65].mxu0  ;;  %v9441_v44 = vpop.f32.mrb[96].mxu1 }
 0x49d   : > { %11411 = vst [vmem:[#allocation17_spill] sm:$0xff] %v9441_v44  ;;  %v2986_v58 = vadd.f32 %v9441_v44, %v9328_v54  ;;  %v2198_v12 = vpop.f32.mrb[66].mxu0  ;;  %v9445_v18 = vpop.f32.mrb[97].mxu1  ;;  %v9447_v45 = vpack.c.bf16 %v3169_v5, %v3166_v19 }
 0x49e   : > { %11410 = vst [vmem:[#allocation16_spill] sm:$0xff] %v9436_v25  ;;  %v3050_v7 = vmul.f32 0.01, %v2954_v10  ;;  %v2957_v35 = vadd.f32 %v9325_v53, %v2198_v12  ;;  %v2980_v37 = vadd.f32 %v9328_v54, %v9445_v18  ;;  %v9452_v51 = vpop.f32.mrb[67].mxu0  ;;  %v9454_v57 = vpop.f32.mrb[98].mxu1  ;;  %v9456_v62 = vpack.c.bf16 %v3163_v31, %v3160_v26 }
 0x49f   : > { %11412 = vst [vmem:[#allocation18_spill] sm:$0xff] %v9447_v45  ;;  %11413 = vst [vmem:[#allocation19_spill] sm:$0xff] %v9454_v57  ;;  %v3082_v40 = vmul.f32 0.01, %v2986_v58  ;;  %v2989_v9 = vadd.f32 %v9454_v57, %v9328_v54  ;;  %v9460_v15 = vpop.f32.mrb[99].mxu1 }
 0x4a0   : > { %11414 = vst [vmem:[#allocation20_spill] sm:$0xff] %v9456_v62  ;;  %v3053_v47 = vmul.f32 0.01, %v2957_v35  ;;  %v3076_v1 = vmul.f32 0.01, %v2980_v37  ;;  %v2983_v17 = vadd.f32 %v9328_v54, %v9460_v15  ;;  %v3146_v5 = vmax.f32 %v2954_v10, %v3050_v7 }
 0x4a1   : > { %v3085_v19 = vmul.f32 0.01, %v2989_v9  ;;  %v3178_v41 = vmax.f32 %v2986_v58, %v3082_v40 }
 0x4a2   : > { %v3149_v3 = vmax.f32 %v2957_v35, %v3053_v47  ;;  %v3079_v12 = vmul.f32 0.01, %v2983_v17  ;;  %v3172_v31 = vmax.f32 %v2980_v37, %v3076_v1 }
 0x4a3   : > { %v3181_v25 = vmax.f32 %v2989_v9, %v3085_v19  ;;  %v2204_v32 = vpop.f32.mrb[68].mxu0 }
 0x4a4   : > { %v9464_v26 = vpack.c.bf16 %v3149_v3, %v3146_v5  ;;  %v3175_v21 = vmax.f32 %v2983_v17, %v3079_v12  ;;  %v2960_v24 = vadd.f32 %v9325_v53, %v2204_v32  ;;  %v9467_v45 = vpop.f32.mrb[69].mxu0  ;;  %v9469_v62 = vpop.f32.mrb[100].mxu1 }
 0x4a5   : > { %11416 = vst [vmem:[#allocation22_spill] sm:$0xff] %v9469_v62  ;;  %v9471_v2 = vpack.c.bf16 %v3181_v25, %v3178_v41  ;;  %v2998_v10 = vadd.f32 %v9469_v62, %v9328_v54  ;;  %v2208_v7 = vpop.f32.mrb[70].mxu0  ;;  %v9475_v35 = vpop.f32.mrb[101].mxu1 }
 0x4a6   : > { %11415 = vst [vmem:[#allocation21_spill] sm:$0xff] %v9464_v26  ;;  %11418 = vst [vmem:[#allocation24_spill] sm:$0xff] %v9475_v35  ;;  %v3056_v58 = vmul.f32 0.01, %v2960_v24  ;;  %v2963_v40 = vadd.f32 %v9325_v53, %v2208_v7  ;;  %v2992_v37 = vadd.f32 %v9328_v54, %v9475_v35  ;;  %v9480_v9 = vpop.f32.mrb[71].mxu0  ;;  %v9482_v32 = vpop.f32.mrb[102].mxu1  ;;  %v9484_v47 = vpack.c.bf16 %v3175_v21, %v3172_v31 }
 0x4a7   : > { %11417 = vst [vmem:[#allocation23_spill] sm:$0xff] %v9471_v2  ;;  %11419 = vst [vmem:[#allocation25_spill] sm:$0xff] %v9482_v32  ;;  %v3094_v41 = vmul.f32 0.01, %v2998_v10  ;;  %v3001_v25 = vadd.f32 %v9482_v32, %v9328_v54  ;;  %v9488_v1 = vpop.f32.mrb[103].mxu1 }
 0x4a8   : > { %11420 = vst [vmem:[#allocation26_spill] sm:$0xff] %v9484_v47  ;;  %11421 = vst [vmem:[#allocation27_spill] sm:$0xff] %v9488_v1  ;;  %v3059_v17 = vmul.f32 0.01, %v2963_v40  ;;  %v3088_v19 = vmul.f32 0.01, %v2992_v37  ;;  %v2995_v5 = vadd.f32 %v9328_v54, %v9488_v1  ;;  %v3152_v12 = vmax.f32 %v2960_v24, %v3056_v58 }
 0x4a9   : > { %v3097_v3 = vmul.f32 0.01, %v3001_v25  ;;  %v3190_v2 = vmax.f32 %v2998_v10, %v3094_v41 }
 0x4aa   : > { %v3155_v7 = vmax.f32 %v2963_v40, %v3059_v17  ;;  %v3091_v26 = vmul.f32 0.01, %v2995_v5  ;;  %v3184_v31 = vmax.f32 %v2992_v37, %v3088_v19 }
 0x4ab   : > { %v3193_v43 = vmax.f32 %v3001_v25, %v3097_v3  ;;  %v2214_v63 = vpop.f32.mrb[72].mxu0 }
 0x4ac   : > { %v9492_v21 = vpack.c.bf16 %v3155_v7, %v3152_v12  ;;  %v3187_v47 = vmax.f32 %v2995_v5, %v3091_v26  ;;  %v2966_v13 = vadd.f32 %v9325_v53, %v2214_v63  ;;  %v9495_v8 = vpop.f32.mrb[73].mxu0  ;;  %v9497_v23 = vpop.f32.mrb[104].mxu1 }
 0x4ad   : > { %11423 = vst [vmem:[#allocation29_spill] sm:$0xff] %v9497_v23  ;;  %v9499_v32 = vpack.c.bf16 %v3193_v43, %v3190_v2  ;;  %v3010_v24 = vadd.f32 %v9497_v23, %v9328_v54  ;;  %v2218_v58 = vpop.f32.mrb[74].mxu0  ;;  %v9503_v40 = vpop.f32.mrb[105].mxu1 }
 0x4ae   : > { %11422 = vst [vmem:[#allocation28_spill] sm:$0xff] %v9492_v21  ;;  %11425 = vst [vmem:[#allocation31_spill] sm:$0xff] %v9503_v40  ;;  %v3062_v10 = vmul.f32 0.01, %v2966_v13  ;;  %v2969_v41 = vadd.f32 %v9325_v53, %v2218_v58  ;;  %v3004_v26 = vadd.f32 %v9328_v54, %v9503_v40  ;;  %v9508_v37 = vpop.f32.mrb[75].mxu0  ;;  %v9510_v63 = vpop.f32.mrb[106].mxu1  ;;  %v9512_v25 = vpack.c.bf16 %v3187_v47, %v3184_v31 }
 0x4af   : > { %11424 = vst [vmem:[#allocation30_spill] sm:$0xff] %v9499_v32  ;;  %11426 = vst [vmem:[#allocation32_spill] sm:$0xff] %v9510_v63  ;;  %v3106_v2 = vmul.f32 0.01, %v3010_v24  ;;  %v3013_v43 = vadd.f32 %v9510_v63, %v9328_v54  ;;  %v9516_v17 = vpop.f32.mrb[107].mxu1 }
 0x4b0   : > { %11427 = vst [vmem:[#allocation33_spill] sm:$0xff] %v9512_v25  ;;  %11428 = vst [vmem:[#allocation34_spill] sm:$0xff] %v9516_v17  ;;  %v3065_v19 = vmul.f32 0.01, %v2969_v41  ;;  %v3100_v5 = vmul.f32 0.01, %v3004_v26  ;;  %v3007_v3 = vadd.f32 %v9328_v54, %v9516_v17  ;;  %v3158_v7 = vmax.f32 %v2966_v13, %v3062_v10 }
 0x4b1   : > { %v3109_v12 = vmul.f32 0.01, %v3013_v43  ;;  %v3202_v32 = vmax.f32 %v3010_v24, %v3106_v2 }
 0x4b2   : > { %v3161_v58 = vmax.f32 %v2969_v41, %v3065_v19  ;;  %v3103_v21 = vmul.f32 0.01, %v3007_v3  ;;  %v3196_v31 = vmax.f32 %v3004_v26, %v3100_v5  ;;  %v9549_v5 = vld [vmem:[%s11342_s11 + $0x5] ss:$8 sm:$0x7] }
 0x4b3   : > { %v3205_v23 = vmax.f32 %v3013_v43, %v3109_v12  ;;  %v2224_v40 = vpop.f32.mrb[76].mxu0 }
 0x4b4   : > { %v9520_v47 = vpack.c.bf16 %v3161_v58, %v3158_v7  ;;  %v3199_v25 = vmax.f32 %v3007_v3, %v3103_v21  ;;  %v2972_v63 = vadd.f32 %v9325_v53, %v2224_v40  ;;  %v9523_v62 = vpop.f32.mrb[77].mxu0  ;;  %v9525_v1 = vpop.f32.mrb[108].mxu1 }
 0x4b5   : > { %11430 = vst [vmem:[#allocation36_spill] sm:$0xff] %v9525_v1  ;;  %v9527_v35 = vpack.c.bf16 %v3205_v23, %v3202_v32  ;;  %v3022_v13 = vadd.f32 %v9525_v1, %v9328_v54  ;;  %v2228_v10 = vpop.f32.mrb[78].mxu0  ;;  %v9531_v41 = vpop.f32.mrb[109].mxu1 }
 0x4b6   : > { %11429 = vst [vmem:[#allocation35_spill] sm:$0xff] %v9520_v47  ;;  %11432 = vst [vmem:[#allocation38_spill] sm:$0xff] %v9531_v41  ;;  %v3068_v24 = vmul.f32 0.01, %v2972_v63  ;;  %v2975_v2 = vadd.f32 %v9325_v53, %v2228_v10  ;;  %v3016_v21 = vadd.f32 %v9328_v54, %v9531_v41  ;;  %v9536_v26 = vpop.f32.mrb[79].mxu0  ;;  %v9538_v40 = vpop.f32.mrb[110].mxu1  ;;  %v9540_v43 = vpack.c.bf16 %v3199_v25, %v3196_v31 }
 0x4b7   : > { %11431 = vst [vmem:[#allocation37_spill] sm:$0xff] %v9527_v35  ;;  %11433 = vst [vmem:[#allocation39_spill] sm:$0xff] %v9538_v40  ;;  %v3118_v23 = vmul.f32 0.01, %v3022_v13  ;;  %v3025_v32 = vadd.f32 %v9538_v40, %v9328_v54  ;;  %v9544_v19 = vpop.f32.mrb[111].mxu1  ;;  %v9555_v40 = vrot.slane %v9549_v5, %v9316_v48 }
 0x4b8   : > { %11434 = vst [vmem:[#allocation40_spill] sm:$0xff] %v9540_v43  ;;  %11435 = vst [vmem:[#allocation41_spill] sm:$0xff] %v9544_v19  ;;  %v3071_v3 = vmul.f32 0.01, %v2975_v2  ;;  %v3112_v12 = vmul.f32 0.01, %v3016_v21  ;;  %v3019_v7 = vadd.f32 %v9328_v54, %v9544_v19  ;;  %v3164_v10 = vmax.f32 %v2972_v63, %v3068_v24 }
 0x4b9   : > { %v3121_v58 = vmul.f32 0.01, %v3025_v32  ;;  %v3214_v47 = vmax.f32 %v3022_v13, %v3118_v23 }
 0x4ba   : > { %v3167_v25 = vmax.f32 %v2975_v2, %v3071_v3  ;;  %v3115_v31 = vmul.f32 0.01, %v3019_v7  ;;  %v3208_v41 = vmax.f32 %v3016_v21, %v3112_v12 }
 0x4bb   : > { %v3217_v35 = vmax.f32 %v3025_v32, %v3121_v58  ;;  %v2234_v43 = vpop.f32.mrb[80].mxu0 }
 0x4bc   : > { %v9557_v1 = vpack.c.bf16 %v3167_v25, %v3164_v10  ;;  %v3211_v17 = vmax.f32 %v3019_v7, %v3115_v31  ;;  %v2978_v57 = vadd.f32 %v9325_v53, %v2234_v43  ;;  %v9560_v44 = vpop.f32.mrb[81].mxu0  ;;  %v2593_v54 = vpop.f32.mrb[112].mxu1 }
 0x4bd   : > { %v9562_v19 = vpack.c.bf16 %v3217_v35, %v3214_v47  ;;  %v3218_v63 = vadd.f32 %v2593_v54, %v9331_v55  ;;  %v2238_v13 = vpop.f32.mrb[82].mxu0  ;;  %v2595_v24 = vpop.f32.mrb[113].mxu1 }
 0x4be   : > { %11436 = vst [vmem:[#allocation42_spill] sm:$0xff] %v9557_v1  ;;  %v3074_v2 = vmul.f32 0.01, %v2978_v57  ;;  %v2981_v23 = vadd.f32 %v9325_v53, %v2238_v13  ;;  %3282 = vrot.lane.b32.xlu0 %v2595_v24, %s11438_s29  ;;  %v9567_v32 = vpop.f32.mrb[83].mxu0  ;;  %v2597_v21 = vpop.f32.mrb[114].mxu1  ;;  %v9569_v3 = vpack.c.bf16 %v3211_v17, %v3208_v41 }
 0x4bf   : > { %11437 = vst [vmem:[#allocation43_spill] sm:$0xff] %v9562_v19  ;;  %v3588_v43 = vadd.f32 %v9555_v40, %v3218_v63  ;;  %v3219_v12 = vadd.f32 %v2597_v21, %v9342_v0  ;;  %v2599_v35 = vpop.f32.mrb[115].mxu1 }
 0x4c0   : > { %11439 = vst [vmem:[#allocation44_spill] sm:$0xff] %v9569_v3  ;;  %v3077_v47 = vmul.f32 0.01, %v2981_v23  ;;  %3284 = vrot.lane.b32.xlu1 %v2599_v35, %s11438_s29  ;;  %v3170_v58 = vmax.f32 %v2978_v57, %v3074_v2 }
 0x4c1   : > { %v3684_v55 = vmul.f32 0.01, %v3588_v43  ;;  %v3591_v7 = vadd.f32 %v9555_v40, %v3219_v12 }
 0x4c2   : > { %v3173_v10 = vmax.f32 %v2981_v23, %v3077_v47 }
 0x4c3   : > { %v3687_v25 = vmul.f32 0.01, %v3591_v7  ;;  %v2244_v31 = vpop.f32.mrb[84].mxu0  ;;  %v3780_v13 = vmax.f32 %v3588_v43, %v3684_v55 }
 0x4c4   : > { %v9575_v54 = vpack.c.bf16 %v3173_v10, %v3170_v58  ;;  %v2984_v17 = vadd.f32 %v9325_v53, %v2244_v31  ;;  %v9578_v41 = vpop.f32.mrb[85].mxu0  ;;  %v2603_v63 = vpop.f32.mrb[116].mxu1 }
 0x4c5   : > { %v3783_v0 = vmax.f32 %v3591_v7, %v3687_v25  ;;  %v3220_v24 = vadd.f32 %v2603_v63, %v9355_v29  ;;  %v2248_v21 = vpop.f32.mrb[86].mxu0  ;;  %v2605_v35 = vpop.f32.mrb[117].mxu1 }
 0x4c6   : > { %11440 = vst [vmem:[#allocation45_spill] sm:$0xff] %v9575_v54  ;;  %v3080_v1 = vmul.f32 0.01, %v2984_v17  ;;  %v2987_v12 = vadd.f32 %v9325_v53, %v2248_v21  ;;  %3286 = vrot.lane.b32.xlu0 %v2605_v35, %s11438_s29  ;;  %v9583_v57 = vpop.f32.mrb[87].mxu0  ;;  %v2607_v2 = vpop.f32.mrb[118].mxu1 }
 0x4c7   : > { %v3594_v23 = vadd.f32 %v9555_v40, %v3220_v24  ;;  %v3221_v47 = vadd.f32 %v2607_v2, %v9368_v49  ;;  %v2609_v58 = vpop.f32.mrb[119].mxu1  ;;  %v3892_v10 = vpack.c.bf16 %v3783_v0, %v3780_v13 }
 0x4c8   : > { %v3083_v43 = vmul.f32 0.01, %v2987_v12  ;;  %3288 = vrot.lane.b32.xlu1 %v2609_v58, %s11438_s29  ;;  %v3176_v7 = vmax.f32 %v2984_v17, %v3080_v1 }
 0x4c9   : > { %v3690_v29 = vmul.f32 0.01, %v3594_v23  ;;  %v3597_v55 = vadd.f32 %v9555_v40, %v3221_v47  ;;  %7950 = vmatprep.mubr.bf16.mxu0 %v3892_v10 }
 0x4ca   : > { %v3179_v25 = vmax.f32 %v2987_v12, %v3083_v43 }
 0x4cb   : > { %v3693_v31 = vmul.f32 0.01, %v3597_v55  ;;  %v2254_v63 = vpop.f32.mrb[88].mxu0  ;;  %v3786_v2 = vmax.f32 %v3594_v23, %v3690_v29 }
 0x4cc   : > { %v9589_v21 = vpack.c.bf16 %v3179_v25, %v3176_v7  ;;  %v2990_v35 = vadd.f32 %v9325_v53, %v2254_v63  ;;  %v9592_v24 = vpop.f32.mrb[89].mxu0  ;;  %v2613_v49 = vpop.f32.mrb[120].mxu1 }
 0x4cd   : > { %v3789_v13 = vmax.f32 %v3597_v55, %v3693_v31  ;;  %v3222_v0 = vadd.f32 %v2613_v49, %v9383_v22  ;;  %v2258_v58 = vpop.f32.mrb[90].mxu0  ;;  %v2615_v54 = vpop.f32.mrb[121].mxu1 }
 0x4ce   : > { %11441 = vst [vmem:[#allocation46_spill] sm:$0xff] %v9589_v21  ;;  %v3086_v19 = vmul.f32 0.01, %v2990_v35  ;;  %v2993_v47 = vadd.f32 %v9325_v53, %v2258_v58  ;;  %3290 = vrot.lane.b32.xlu0 %v2615_v54, %s11438_s29  ;;  %v9597_v1 = vpop.f32.mrb[91].mxu0  ;;  %v2617_v17 = vpop.f32.mrb[122].mxu1 }
 0x4cf   : > { %v3893_v12 = vpack.c.bf16 %v3789_v13, %v3786_v2  ;;  %v3600_v10 = vadd.f32 %v9555_v40, %v3222_v0  ;;  %v3223_v43 = vadd.f32 %v2617_v17, %v9396_v56  ;;  %v2619_v7 = vpop.f32.mrb[123].mxu1 }
 0x4d0   : > { %v3089_v23 = vmul.f32 0.01, %v2993_v47  ;;  %3292 = vrot.lane.b32.xlu1 %v2619_v7, %s11438_s29  ;;  %v3182_v55 = vmax.f32 %v2990_v35, %v3086_v19 }
 0x4d1   : > { %v3696_v22 = vmul.f32 0.01, %v3600_v10  ;;  %v3603_v29 = vadd.f32 %v9555_v40, %v3223_v43  ;;  %7951 = vmatmul.mubr.bf16.vlgmr.msra.gmra.mrb[112].mxu0 %v3893_v12 }
 0x4d2   : > { %v3185_v25 = vmax.f32 %v2993_v47, %v3089_v23 }
 0x4d3   : > { %v3699_v31 = vmul.f32 0.01, %v3603_v29  ;;  %v2264_v54 = vpop.f32.mrb[92].mxu0  ;;  %v3792_v56 = vmax.f32 %v3600_v10, %v3696_v22 }
 0x4d4   : > { %v9603_v63 = vpack.c.bf16 %v3185_v25, %v3182_v55  ;;  %v2996_v49 = vadd.f32 %v9325_v53, %v2264_v54  ;;  %v9606_v2 = vpop.f32.mrb[93].mxu0  ;;  %v2623_v13 = vpop.f32.mrb[124].mxu1 }
 0x4d5   : > { %v3795_v0 = vmax.f32 %v3603_v29, %v3699_v31  ;;  %v3224_v58 = vadd.f32 %v2623_v13, %v9411_v28  ;;  %v2268_v17 = vpop.f32.mrb[94].mxu0  ;;  %v2625_v7 = vpop.f32.mrb[125].mxu1 }
 0x4d6   : > { %11442 = vst [vmem:[#allocation47_spill] sm:$0xff] %v9603_v63  ;;  %v3092_v21 = vmul.f32 0.01, %v2996_v49  ;;  %v2999_v12 = vadd.f32 %v9325_v53, %v2268_v17  ;;  %3294 = vrot.lane.b32.xlu0 %v2625_v7, %s11438_s29  ;;  %v9611_v19 = vpop.f32.mrb[95].mxu0  ;;  %v2627_v35 = vpop.f32.mrb[126].mxu1 }
 0x4d7   : > { %v3606_v47 = vadd.f32 %v9555_v40, %v3224_v58  ;;  %v3225_v43 = vadd.f32 %v2627_v35, %v9424_v38  ;;  %v2629_v23 = vpop.f32.mrb[127].mxu1  ;;  %v3894_v55 = vpack.c.bf16 %v3795_v0, %v3792_v56 }
 0x4d8   : > { %v3095_v10 = vmul.f32 0.01, %v2999_v12  ;;  %3296 = vrot.lane.b32.xlu1 %v2629_v23, %s11438_s29  ;;  %v3188_v29 = vmax.f32 %v2996_v49, %v3092_v21 }
 0x4d9   : > { %v3702_v28 = vmul.f32 0.01, %v3606_v47  ;;  %v3609_v22 = vadd.f32 %v9555_v40, %v3225_v43  ;;  %7954 = vmatprep.mubr.bf16.mxu0 %v3894_v55 }
 0x4da   : > { %v3191_v25 = vmax.f32 %v2999_v12, %v3095_v10 }
 0x4db   : > { %v3705_v31 = vmul.f32 0.01, %v3609_v22  ;;  %v2274_v54 = vpop.f32.mrb[96].mxu0  ;;  %v3798_v7 = vmax.f32 %v3606_v47, %v3702_v28 }
 0x4dc   : > { %v9617_v13 = vpack.c.bf16 %v3191_v25, %v3188_v29  ;;  %v3002_v17 = vadd.f32 %v9325_v53, %v2274_v54  ;;  %v9620_v58 = vpop.f32.mrb[97].mxu0  ;;  %v2633_v38 = vpop.f32.mrb[128].mxu1 }
 0x4dd   : > { %v3801_v56 = vmax.f32 %v3609_v22, %v3705_v31  ;;  %v3226_v0 = vadd.f32 %v2633_v38, %v9439_v20  ;;  %v2278_v35 = vpop.f32.mrb[98].mxu0  ;;  %v2635_v23 = vpop.f32.mrb[129].mxu1 }
 0x4de   : > { %11443 = vst [vmem:[#allocation48_spill] sm:$0xff] %v9617_v13  ;;  %v3098_v63 = vmul.f32 0.01, %v3002_v17  ;;  %v3005_v43 = vadd.f32 %v9325_v53, %v2278_v35  ;;  %3298 = vrot.lane.b32.xlu0 %v2635_v23, %s11438_s29  ;;  %v9625_v21 = vpop.f32.mrb[99].mxu0  ;;  %v2637_v49 = vpop.f32.mrb[130].mxu1 }
 0x4df   : > { %v3612_v12 = vadd.f32 %v9555_v40, %v3226_v0  ;;  %v3227_v55 = vadd.f32 %v2637_v49, %v9452_v51  ;;  %v2639_v10 = vpop.f32.mrb[131].mxu1  ;;  %v3895_v29 = vpack.c.bf16 %v3801_v56, %v3798_v7 }
 0x4e0   : > { %v3101_v47 = vmul.f32 0.01, %v3005_v43  ;;  %3300 = vrot.lane.b32.xlu1 %v2639_v10, %s11438_s29  ;;  %v3194_v22 = vmax.f32 %v3002_v17, %v3098_v63 }
 0x4e1   : > { %v3708_v20 = vmul.f32 0.01, %v3612_v12  ;;  %v3615_v28 = vadd.f32 %v9555_v40, %v3227_v55  ;;  %7955 = vmatmul.mubr.bf16.gmra.mrb[116].mxu0 %v3895_v29 }
 0x4e2   : > { %v3197_v25 = vmax.f32 %v3005_v43, %v3101_v47 }
 0x4e3   : > { %v3711_v31 = vmul.f32 0.01, %v3615_v28  ;;  %v2284_v54 = vpop.f32.mrb[100].mxu0  ;;  %v3804_v23 = vmax.f32 %v3612_v12, %v3708_v20 }
 0x4e4   : > { %v9631_v38 = vpack.c.bf16 %v3197_v25, %v3194_v22  ;;  %v3008_v35 = vadd.f32 %v9325_v53, %v2284_v54  ;;  %v9634_v0 = vpop.f32.mrb[101].mxu0  ;;  %v2643_v51 = vpop.f32.mrb[132].mxu1 }
 0x4e5   : > { %v3807_v7 = vmax.f32 %v3615_v28, %v3711_v31  ;;  %v3228_v56 = vadd.f32 %v2643_v51, %v9467_v45  ;;  %v2288_v49 = vpop.f32.mrb[102].mxu0  ;;  %v2645_v10 = vpop.f32.mrb[133].mxu1 }
 0x4e6   : > { %11444 = vst [vmem:[#allocation49_spill] sm:$0xff] %v9631_v38  ;;  %v3104_v13 = vmul.f32 0.01, %v3008_v35  ;;  %v3011_v55 = vadd.f32 %v9325_v53, %v2288_v49  ;;  %3302 = vrot.lane.b32.xlu0 %v2645_v10, %s11438_s29  ;;  %v9639_v63 = vpop.f32.mrb[103].mxu0  ;;  %v2647_v17 = vpop.f32.mrb[134].mxu1 }
 0x4e7   : > { %v3618_v43 = vadd.f32 %v9555_v40, %v3228_v56  ;;  %v3229_v29 = vadd.f32 %v2647_v17, %v9480_v9  ;;  %v2649_v47 = vpop.f32.mrb[135].mxu1  ;;  %v3896_v22 = vpack.c.bf16 %v3807_v7, %v3804_v23 }
 0x4e8   : > { %v3107_v12 = vmul.f32 0.01, %v3011_v55  ;;  %3304 = vrot.lane.b32.xlu1 %v2649_v47, %s11438_s29  ;;  %v3200_v28 = vmax.f32 %v3008_v35, %v3104_v13 }
 0x4e9   : > { %v3714_v45 = vmul.f32 0.01, %v3618_v43  ;;  %v3621_v20 = vadd.f32 %v9555_v40, %v3229_v29  ;;  %7958 = vmatprep.mubr.bf16.mxu0 %v3896_v22 }
 0x4ea   : > { %v3203_v25 = vmax.f32 %v3011_v55, %v3107_v12 }
 0x4eb   : > { %v3717_v31 = vmul.f32 0.01, %v3621_v20  ;;  %v2294_v54 = vpop.f32.mrb[104].mxu0  ;;  %v3810_v10 = vmax.f32 %v3618_v43, %v3714_v45 }
 0x4ec   : > { %v9645_v51 = vpack.c.bf16 %v3203_v25, %v3200_v28  ;;  %v3014_v49 = vadd.f32 %v9325_v53, %v2294_v54  ;;  %v9648_v56 = vpop.f32.mrb[105].mxu0  ;;  %v2653_v9 = vpop.f32.mrb[136].mxu1  ;;  %v8242_v25 = vld [vmem:[%s11338_s7 + $0x4] ss:$8 sps:$4 sm:$0xff]  }
 0x4ed   : > { %v3813_v23 = vmax.f32 %v3621_v20, %v3717_v31  ;;  %v3230_v7 = vadd.f32 %v2653_v9, %v9495_v8  ;;  %v2298_v17 = vpop.f32.mrb[106].mxu0  ;;  %v2655_v47 = vpop.f32.mrb[137].mxu1  ;;  %v8240_v20 = vld [vmem:[%s11338_s7] ss:$8 sps:$4 sm:$0xff]   ;;  %4341 = vmatprep.subr.bf16.mxu0 %v8242_v25 }
 0x4ee   : > { %11445 = vst [vmem:[#allocation50_spill] sm:$0xff] %v9645_v51  ;;  %v3110_v38 = vmul.f32 0.01, %v3014_v49  ;;  %v3017_v29 = vadd.f32 %v9325_v53, %v2298_v17  ;;  %3306 = vrot.lane.b32.xlu0 %v2655_v47, %s11438_s29  ;;  %v9653_v13 = vpop.f32.mrb[107].mxu0  ;;  %v2657_v35 = vpop.f32.mrb[138].mxu1  ;;  %4342 = vmatpush1.bf16.msra.mxu0 %v8240_v20 }
 0x4ef   : > { %v3624_v55 = vadd.f32 %v9555_v40, %v3230_v7  ;;  %v3231_v22 = vadd.f32 %v2657_v35, %v9508_v37  ;;  %v2659_v12 = vpop.f32.mrb[139].mxu1  ;;  %v3897_v28 = vpack.c.bf16 %v3813_v23, %v3810_v10  ;;  %v8245_v37 = vld [vmem:[%s11338_s7 + $0x14] ss:$8 sps:$4 sm:$0xff]  }
 0x4f0   : > { %v3113_v43 = vmul.f32 0.01, %v3017_v29  ;;  %3308 = vrot.lane.b32.xlu1 %v2659_v12, %s11438_s29  ;;  %v3206_v31 = vmax.f32 %v3014_v49, %v3110_v38  ;;  %v8243_v38 = vld [vmem:[%s11338_s7 + $0x10] ss:$8 sps:$4 sm:$0xff]   ;;  %4343 = vmatprep.subr.bf16.mxu0 %v8245_v37  ;;  %v8246_v37 = vld [vmem:[%s11338_s7 + $0x20] ss:$8 sps:$4 sm:$0xff]  }
 0x4f1   : > { %v3720_v8 = vmul.f32 0.01, %v3624_v55  ;;  %v3627_v45 = vadd.f32 %v9555_v40, %v3231_v22  ;;  %7959 = vmatmul.mubr.bf16.gmra.mrb[120].mxu0 %v3897_v28  ;;  %v8248_v28 = vld [vmem:[%s11338_s7 + $0x24] ss:$8 sps:$4 sm:$0xff]  }
 0x4f2   : > { %v3209_v54 = vmax.f32 %v3017_v29, %v3113_v43  ;;  %4344 = vmatpush1.bf16.msra.mxu0 %v8243_v38  ;;  %v8249_v38 = vld [vmem:[%s11338_s7 + $0x30] ss:$8 sps:$4 sm:$0xff]  }
 0x4f3   : > { %v3723_v9 = vmul.f32 0.01, %v3627_v45  ;;  %v2304_v10 = vpop.f32.mrb[108].mxu0  ;;  %v3816_v49 = vmax.f32 %v3624_v55, %v3720_v8  ;;  %4345 = vmatprep.subr.bf16.mxu0 %v8248_v28 }
 0x4f4   : > { %v9668_v23 = vpack.c.bf16 %v3209_v54, %v3206_v31  ;;  %v3020_v7 = vadd.f32 %v9325_v53, %v2304_v10  ;;  %v9671_v17 = vpop.f32.mrb[109].mxu0  ;;  %v2663_v47 = vpop.f32.mrb[140].mxu1  ;;  %v8251_v10 = vld [vmem:[%s11338_s7 + $0x34] ss:$8 sps:$4 sm:$0xff]  }
 0x4f5   : > { %v3819_v29 = vmax.f32 %v3627_v45, %v3723_v9  ;;  %v3232_v35 = vadd.f32 %v2663_v47, %v9523_v62  ;;  %v2308_v22 = vpop.f32.mrb[110].mxu0  ;;  %v2665_v12 = vpop.f32.mrb[141].mxu1 }
 0x4f6   : > { %11446 = vst [vmem:[#allocation51_spill] sm:$0xff] %v9668_v23  ;;  %v3116_v43 = vmul.f32 0.01, %v3020_v7  ;;  %v3023_v25 = vadd.f32 %v9325_v53, %v2308_v22  ;;  %3310 = vrot.lane.b32.xlu0 %v2665_v12, %s11438_s29  ;;  %v9682_v20 = vpop.f32.mrb[111].mxu0  ;;  %v2667_v31 = vpop.f32.mrb[142].mxu1  ;;  %4346 = vmatpush1.bf16.msra.mxu0 %v8246_v37 }
 0x4f7   : > { %v3630_v55 = vadd.f32 %v9555_v40, %v3232_v35  ;;  %v3233_v8 = vadd.f32 %v2667_v31, %v9536_v26  ;;  %v2669_v62 = vpop.f32.mrb[143].mxu1  ;;  %v3898_v45 = vpack.c.bf16 %v3819_v29, %v3816_v49  ;;  %4347 = vmatprep.subr.bf16.mxu0 %v8251_v10  ;;  %v8257_v37 = vld [vmem:[%s11338_s7 + $0x54] ss:$8 sps:$4 sm:$0xff]  }
 0x4f8   : > { %v3119_v54 = vmul.f32 0.01, %v3023_v25  ;;  %3312 = vrot.lane.b32.xlu1 %v2669_v62, %s11438_s29  ;;  %v3212_v26 = vmax.f32 %v3020_v7, %v3116_v43  ;;  %v8254_v7 = vld [vmem:[%s11338_s7 + $0x44] ss:$8 sps:$4 sm:$0xff]  }
 0x4f9   : > { %v3726_v53 = vmul.f32 0.01, %v3630_v55  ;;  %v3633_v9 = vadd.f32 %v9555_v40, %v3233_v8  ;;  %7962 = vmatprep.mubr.bf16.mxu0 %v3898_v45 }
 0x4fa   : > { %v3215_v47 = vmax.f32 %v3023_v25, %v3119_v54  ;;  %4348 = vmatpush1.bf16.msra.mxu0 %v8249_v38 }
 0x4fb   : > { %v3729_v49 = vmul.f32 0.01, %v3633_v9  ;;  %v3822_v22 = vmax.f32 %v3630_v55, %v3726_v53  ;;  %4349 = vmatprep.subr.bf16.mxu0 %v8254_v7 }
 0x4fc   : > { %v9694_v29 = vpack.c.bf16 %v3215_v47, %v3212_v26  ;;  %v2673_v35 = vpop.f32.mrb[144].mxu1 }
 0x4fd   : > { %v3825_v12 = vmax.f32 %v3633_v9, %v3729_v49  ;;  %v3234_v31 = vadd.f32 %v2673_v35, %v9560_v44  ;;  %v9700_v28 = vpop.f32.mrb[145].mxu1  ;;  %v8252_v44 = vld [vmem:[%s11338_s7 + $0x40] ss:$8 sps:$4 sm:$0xff]   ;;  %v8260_v35 = vld [vmem:[%s11338_s7 + $0x64] ss:$8 sps:$4 sm:$0xff]  }
 0x4fe   : > { %11447 = vst [vmem:[#allocation52_spill] sm:$0xff] %v9694_v29  ;;  %v2677_v43 = vpop.f32.mrb[146].mxu1  ;;  %4350 = vmatpush1.bf16.msra.mxu0 %v8252_v44 }
 0x4ff   : > { %v3636_v25 = vadd.f32 %v9555_v40, %v3234_v31  ;;  %v3235_v8 = vadd.f32 %v2677_v43, %v9567_v32  ;;  %v3899_v62 = vpack.c.bf16 %v3825_v12, %v3822_v22  ;;  %v9707_v45 = vpop.f32.mrb[147].mxu1  ;;  %v8255_v32 = vld [vmem:[%s11338_s7 + $0x50] ss:$8 sps:$4 sm:$0xff]   ;;  %4351 = vmatprep.subr.bf16.mxu0 %v8257_v37 }
 0x501   : > { %v3732_v55 = vmul.f32 0.01, %v3636_v25  ;;  %v3639_v54 = vadd.f32 %v9555_v40, %v3235_v8  ;;  %7963 = vmatmul.mubr.bf16.gmra.mrb[124].mxu0 %v3899_v62  ;;  %v8263_v8 = vld [vmem:[%s11338_s7 + $0x74] ss:$8 sps:$4 sm:$0xff]  }
 0x502   : > { %4352 = vmatpush1.bf16.msra.mxu0 %v8255_v32 }
 0x503   : > { %v3735_v53 = vmul.f32 0.01, %v3639_v54  ;;  %v3828_v10 = vmax.f32 %v3636_v25, %v3732_v55  ;;  %4353 = vmatprep.subr.bf16.mxu0 %v8260_v35 }
 0x504   : > { %v2683_v9 = vpop.f32.mrb[148].mxu1 }
 0x505   : > { %v3831_v26 = vmax.f32 %v3639_v54, %v3735_v53  ;;  %v3236_v47 = vadd.f32 %v2683_v9, %v9578_v41  ;;  %v9720_v49 = vpop.f32.mrb[149].mxu1  ;;  %v8258_v41 = vld [vmem:[%s11338_s7 + $0x60] ss:$8 sps:$4 sm:$0xff]   ;;  %v8266_v9 = vld [vmem:[%s11338_s7 + $0x84] ss:$8 sps:$4 sm:$0xff]  }
 0x506   : > { %v2687_v38 = vpop.f32.mrb[150].mxu1  ;;  %4354 = vmatpush1.bf16.msra.mxu0 %v8258_v41 }
 0x507   : > { %v3642_v22 = vadd.f32 %v9555_v40, %v3236_v47  ;;  %v3237_v12 = vadd.f32 %v2687_v38, %v9583_v57  ;;  %v3900_v31 = vpack.c.bf16 %v3831_v26, %v3828_v10  ;;  %v9727_v7 = vpop.f32.mrb[151].mxu1  ;;  %v8261_v57 = vld [vmem:[%s11338_s7 + $0x70] ss:$8 sps:$4 sm:$0xff]   ;;  %4355 = vmatprep.subr.bf16.mxu0 %v8263_v8 }
 0x509   : > { %v3738_v43 = vmul.f32 0.01, %v3642_v22  ;;  %v3645_v25 = vadd.f32 %v9555_v40, %v3237_v12  ;;  %7966 = vmatprep.mubr.bf16.mxu0 %v3900_v31 }
 0x50a   : > { %4356 = vmatpush1.bf16.msra.mxu0 %v8261_v57 }
 0x50b   : > { %v3741_v62 = vmul.f32 0.01, %v3645_v25  ;;  %v3834_v55 = vmax.f32 %v3642_v22, %v3738_v43  ;;  %4357 = vmatprep.subr.bf16.mxu0 %v8266_v9 }
 0x50c   : > { %v2693_v44 = vpop.f32.mrb[152].mxu1 }
 0x50d   : > { %v3837_v54 = vmax.f32 %v3645_v25, %v3741_v62  ;;  %v3238_v37 = vadd.f32 %v2693_v44, %v9592_v24  ;;  %v9740_v53 = vpop.f32.mrb[153].mxu1  ;;  %v8264_v24 = vld [vmem:[%s11338_s7 + $0x80] ss:$8 sps:$4 sm:$0xff]  }
 0x50e   : > { %v2697_v32 = vpop.f32.mrb[154].mxu1  ;;  %4358 = vmatpush1.bf16.msra.mxu0 %v8264_v24 }
 0x50f   : > { %v3648_v10 = vadd.f32 %v9555_v40, %v3238_v37  ;;  %v3239_v26 = vadd.f32 %v2697_v32, %v9597_v1  ;;  %v3901_v47 = vpack.c.bf16 %v3837_v54, %v3834_v55  ;;  %v9747_v35 = vpop.f32.mrb[155].mxu1 }
 0x511   : > { %v3744_v38 = vmul.f32 0.01, %v3648_v10  ;;  %v3651_v22 = vadd.f32 %v9555_v40, %v3239_v26  ;;  %7967 = vmatmul.mubr.bf16.gmra.mrb[128].mxu0 %v3901_v47 }
 0x513   : > { %v3747_v12 = vmul.f32 0.01, %v3651_v22  ;;  %v3840_v41 = vmax.f32 %v3648_v10, %v3744_v38 }
 0x514   : > { %v2703_v31 = vpop.f32.mrb[156].mxu1 }
 0x515   : > { %v3843_v43 = vmax.f32 %v3651_v22, %v3747_v12  ;;  %v3240_v1 = vadd.f32 %v2703_v31, %v9606_v2  ;;  %v9754_v25 = vpop.f32.mrb[157].mxu1 }
 0x516   : > { %v2707_v8 = vpop.f32.mrb[158].mxu1 }
 0x517   : > { %v3654_v62 = vadd.f32 %v9555_v40, %v3240_v1  ;;  %v3241_v44 = vadd.f32 %v2707_v8, %v9611_v19  ;;  %v3902_v57 = vpack.c.bf16 %v3843_v43, %v3840_v41  ;;  %v9758_v55 = vpop.f32.mrb[159].mxu1  ;;  %v8269_v1 = vld [vmem:[%s11338_s7 + $0x94] ss:$8 sps:$4 sm:$0xff]   ;;  %v8267_v8 = vld [vmem:[%s11338_s7 + $0x90] ss:$8 sps:$4 sm:$0xff]  }
 0x518   : > { %4359 = vmatprep.subr.bf16.mxu0 %v8269_v1 }
 0x519   : > { %v3750_v54 = vmul.f32 0.01, %v3654_v62  ;;  %v3657_v37 = vadd.f32 %v9555_v40, %v3241_v44  ;;  %7970 = vmatprep.mubr.bf16.mxu0 %v3902_v57  ;;  %4360 = vmatpush1.bf16.msra.mxu0 %v8267_v8 }
 0x51b   : > { %v3753_v9 = vmul.f32 0.01, %v3657_v37  ;;  %v3846_v10 = vmax.f32 %v3654_v62, %v3750_v54 }
 0x51c   : > { %v2713_v32 = vpop.f32.mrb[160].mxu1 }
 0x51d   : > { %v3849_v26 = vmax.f32 %v3657_v37, %v3753_v9  ;;  %v3242_v2 = vadd.f32 %v2713_v32, %v9620_v58  ;;  %v9762_v47 = vpop.f32.mrb[161].mxu1 }
 0x51e   : > { %v2717_v24 = vpop.f32.mrb[162].mxu1 }
 0x51f   : > { %v3660_v38 = vadd.f32 %v9555_v40, %v3242_v2  ;;  %v3243_v19 = vadd.f32 %v2717_v24, %v9625_v21  ;;  %v3903_v22 = vpack.c.bf16 %v3849_v26, %v3846_v10  ;;  %v9766_v12 = vpop.f32.mrb[163].mxu1  ;;  %v8270_v24 = vld [vmem:[%s11338_s7 + $0xa0] ss:$8 sps:$4 sm:$0xff]  }
 0x521   : > { %v3756_v31 = vmul.f32 0.01, %v3660_v38  ;;  %v3663_v41 = vadd.f32 %v9555_v40, %v3243_v19  ;;  %7971 = vmatmul.mubr.bf16.gmra.mrb[132].mxu0 %v3903_v22 }
 0x523   : > { %v3759_v43 = vmul.f32 0.01, %v3663_v41  ;;  %v3852_v62 = vmax.f32 %v3660_v38, %v3756_v31 }
 0x524   : > { %v2723_v58 = vpop.f32.mrb[164].mxu1 }
 0x525   : > { %v3855_v44 = vmax.f32 %v3663_v41, %v3759_v43  ;;  %v3244_v21 = vadd.f32 %v2723_v58, %v9634_v0  ;;  %v9776_v57 = vpop.f32.mrb[165].mxu1  ;;  %v8272_v0 = vld [vmem:[%s11338_s7 + $0xa4] ss:$8 sps:$4 sm:$0xff]   ;;  %v8275_v43 = vld [vmem:[%s11338_s7 + $0xb4] ss:$8 sps:$4 sm:$0xff]  }
 0x526   : > { %v2727_v54 = vpop.f32.mrb[166].mxu1  ;;  %4361 = vmatprep.subr.bf16.mxu0 %v8272_v0  ;;  %v8273_v58 = vld [vmem:[%s11338_s7 + $0xb0] ss:$8 sps:$4 sm:$0xff]  }
 0x527   : > { %v3666_v37 = vadd.f32 %v9555_v40, %v3244_v21  ;;  %v3245_v9 = vadd.f32 %v2727_v54, %v9639_v63  ;;  %v3904_v32 = vpack.c.bf16 %v3855_v44, %v3852_v62  ;;  %v9780_v10 = vpop.f32.mrb[167].mxu1  ;;  %4362 = vmatpush1.bf16.msra.mxu0 %v8270_v24 }
 0x528   : > { %4363 = vmatprep.subr.bf16.mxu0 %v8275_v43 }
 0x529   : > { %v3762_v26 = vmul.f32 0.01, %v3666_v37  ;;  %v3669_v2 = vadd.f32 %v9555_v40, %v3245_v9  ;;  %7974 = vmatprep.mubr.bf16.mxu0 %v3904_v32  ;;  %v11448_v32 = vmov 0  }
 0x52b   : > { %v3765_v38 = vmul.f32 0.01, %v3669_v2  ;;  %v3858_v63 = vmax.f32 %v3666_v37, %v3762_v26  ;;  %4364 = vmatpush1.bf16.msra.mxu0 %v8273_v58 }
 0x52c   : > { %v2733_v19 = vpop.f32.mrb[168].mxu1  ;;  %5865 = vmatprep.subr.bf16.mxu0 %v11448_v32 }
 0x52d   : > { %v3861_v22 = vmax.f32 %v3669_v2, %v3765_v38  ;;  %v3246_v31 = vadd.f32 %v2733_v19, %v9648_v56  ;;  %v9790_v41 = vpop.f32.mrb[169].mxu1 }
 0x52e   : > { %v2737_v1 = vpop.f32.mrb[170].mxu1 }
 0x52f   : > { %v3672_v8 = vadd.f32 %v9555_v40, %v3246_v31  ;;  %v3247_v62 = vadd.f32 %v2737_v1, %v9653_v13  ;;  %v3905_v44 = vpack.c.bf16 %v3861_v22, %v3858_v63  ;;  %v9800_v21 = vpop.f32.mrb[171].mxu1 }
 0x530   : > { %v3283_v56 = vpop.permute.xlu0 %3282 }
 0x531   : > { %v3768_v54 = vmul.f32 0.01, %v3672_v8  ;;  %v3675_v37 = vadd.f32 %v9555_v40, %v3247_v62  ;;  %v9804_v9 = vadd.f32 %v3283_v56, %v9337_v60  ;;  %7975 = vmatmul.mubr.bf16.gmra.mrb[136].mxu0 %v3905_v44 }
 0x532   : > { %v3285_v26 = vpop.permute.xlu1 %3284 }
 0x533   : > { %v3771_v2 = vmul.f32 0.01, %v3675_v37  ;;  %v9808_v0 = vadd.f32 %v3285_v26, %v9348_v11  ;;  %3442 = vrot.lane.b32.xlu0 %v9804_v9, %s11438_s29  ;;  %v3864_v24 = vmax.f32 %v3672_v8, %v3768_v54 }
 0x534   : > { %v2743_v13 = vpop.f32.mrb[172].mxu1 }
 0x535   : > { %v3867_v38 = vmax.f32 %v3675_v37, %v3771_v2  ;;  %v3248_v19 = vadd.f32 %v2743_v13, %v9671_v17  ;;  %3444 = vrot.lane.b32.xlu1 %v9808_v0, %s11438_s29  ;;  %v9815_v63 = vpop.f32.mrb[173].mxu1 }
 0x536   : > { %v2747_v22 = vpop.f32.mrb[174].mxu1 }
 0x537   : > { %v3678_v31 = vadd.f32 %v9555_v40, %v3248_v19  ;;  %v3249_v43 = vadd.f32 %v2747_v22, %v9682_v20  ;;  %3314 = vrot.lane.b32.xlu0 %v9700_v28, %s11438_s29  ;;  %v3906_v1 = vpack.c.bf16 %v3867_v38, %v3864_v24  ;;  %v9821_v58 = vpop.f32.mrb[175].mxu1 }
 0x538   : > { %v3287_v8 = vpop.permute.xlu0 %3286 }
 0x539   : > { %v3774_v62 = vmul.f32 0.01, %v3678_v31  ;;  %v3681_v17 = vadd.f32 %v9555_v40, %v3249_v43  ;;  %v9825_v44 = vadd.f32 %v9333_v36, %v3287_v8  ;;  %3316 = vrot.lane.b32.xlu1 %v9707_v45, %s11438_s29  ;;  %7978 = vmatprep.mubr.bf16.mxu0 %v3906_v1 }
 0x53a   : > { %v3289_v56 = vpop.permute.xlu1 %3288 }
 0x53b   : > { %v3777_v54 = vmul.f32 0.01, %v3681_v17  ;;  %v9830_v20 = vadd.f32 %v9344_v6, %v3289_v56  ;;  %3446 = vrot.lane.b32.xlu0 %v9825_v44, %s11438_s29  ;;  %v3870_v28 = vmax.f32 %v3678_v31, %v3774_v62 }
 0x53d   : > { %v3873_v37 = vmax.f32 %v3681_v17, %v3777_v54  ;;  %3448 = vrot.lane.b32.xlu1 %v9830_v20, %s11438_s29  ;;  %v9935_v54 = vrot.slane %v9549_v5, %v9322_v52 }
 0x53f   : > { %3318 = vrot.lane.b32.xlu0 %v9720_v49, %s11438_s29  ;;  %v3907_v40 = vpack.c.bf16 %v3873_v37, %v3870_v28 }
 0x540   : > { %v3291_v26 = vpop.permute.xlu0 %3290 }
 0x541   : > { %v9839_v45 = vadd.f32 %v3291_v26, %v9363_v14  ;;  %3320 = vrot.lane.b32.xlu1 %v9727_v7, %s11438_s29  ;;  %7979 = vmatmul.mubr.bf16.gmra.mrb[140].mxu0 %v3907_v40 }
 0x542   : > { %v3293_v2 = vpop.permute.xlu1 %3292 }
 0x543   : > { %v9844_v13 = vadd.f32 %v3293_v2, %v9376_v27  ;;  %3450 = vrot.lane.b32.xlu0 %v9839_v45, %s11438_s29 }
 0x545   : > { %3452 = vrot.lane.b32.xlu1 %v9844_v13, %s11438_s29 }
 0x547   : > { %3322 = vrot.lane.b32.xlu0 %v9740_v53, %s11438_s29 }
 0x548   : > { %v3295_v49 = vpop.permute.xlu0 %3294 }
 0x549   : > { %v9853_v24 = vadd.f32 %v9357_v30, %v3295_v49  ;;  %3324 = vrot.lane.b32.xlu1 %v9747_v35, %s11438_s29 }
 0x54a   : > { %v3297_v7 = vpop.permute.xlu1 %3296 }
 0x54b   : > { %v9858_v38 = vadd.f32 %v9370_v50, %v3297_v7  ;;  %3454 = vrot.lane.b32.xlu0 %v9853_v24, %s11438_s29 }
 0x54d   : > { %3456 = vrot.lane.b32.xlu1 %v9858_v38, %s11438_s29 }
 0x54f   : > { %3326 = vrot.lane.b32.xlu0 %v9754_v25, %s11438_s29 }
 0x550   : > { %v3299_v53 = vpop.permute.xlu0 %3298 }
 0x551   : > { %v9867_v19 = vadd.f32 %v3299_v53, %v9389_v61  ;;  %3328 = vrot.lane.b32.xlu1 %v9758_v55, %s11438_s29 }
 0x552   : > { %v3301_v35 = vpop.permute.xlu1 %3300 }
 0x553   : > { %v9872_v22 = vadd.f32 %v3301_v35, %v9404_v16  ;;  %3458 = vrot.lane.b32.xlu0 %v9867_v19, %s11438_s29 }
 0x555   : > { %3460 = vrot.lane.b32.xlu1 %v9872_v22, %s11438_s29 }
 0x557   : > { %3330 = vrot.lane.b32.xlu0 %v9762_v47, %s11438_s29 }
 0x558   : > { %v3303_v25 = vpop.permute.xlu0 %3302 }
 0x559   : > { %v9881_v31 = vadd.f32 %v9385_v39, %v3303_v25  ;;  %3332 = vrot.lane.b32.xlu1 %v9766_v12, %s11438_s29 }
 0x55a   : > { %v3305_v55 = vpop.permute.xlu1 %3304 }
 0x55b   : > { %v9886_v43 = vadd.f32 %v9398_v4, %v3305_v55  ;;  %3462 = vrot.lane.b32.xlu0 %v9881_v31, %s11438_s29 }
 0x55d   : > { %3464 = vrot.lane.b32.xlu1 %v9886_v43, %s11438_s29 }
 0x55f   : > { %3334 = vrot.lane.b32.xlu0 %v9776_v57, %s11438_s29 }
 0x560   : > { %v3307_v47 = vpop.permute.xlu0 %3306 }
 0x561   : > { %v9895_v1 = vadd.f32 %v3307_v47, %v9417_v34  ;;  %3336 = vrot.lane.b32.xlu1 %v9780_v10, %s11438_s29 }
 0x562   : > { %v3309_v12 = vpop.permute.xlu1 %3308 }
 0x563   : > { %v9900_v8 = vadd.f32 %v3309_v12, %v9432_v59  ;;  %3466 = vrot.lane.b32.xlu0 %v9895_v1, %s11438_s29 }
 0x565   : > { %3468 = vrot.lane.b32.xlu1 %v9900_v8, %s11438_s29 }
 0x567   : > { %3338 = vrot.lane.b32.xlu0 %v9790_v41, %s11438_s29  ;;  %v7326_v41 = vld [vmem:[%s11342_s11 + $0x6] ss:$8 sm:$0x7] }
 0x568   : > { %v3311_v57 = vpop.permute.xlu0 %3310  ;;  %v9931_v56 = vrot.slane %v7326_v41, %v9316_v48 }
 0x569   : > { %v9909_v62 = vadd.f32 %v9413_v33, %v3311_v57  ;;  %3340 = vrot.lane.b32.xlu1 %v9800_v21, %s11438_s29  ;;  %v9928_v21 = vsub.s32 1, %v9313_v46 }
 0x56a   : > { %v3313_v10 = vpop.permute.xlu1 %3312 }
 0x56b   : > { %v9914_v17 = vadd.f32 %v9426_v42, %v3313_v10  ;;  %3470 = vrot.lane.b32.xlu0 %v9909_v62, %s11438_s29  ;;  %11449 = vst [vmem:[#allocation53_spill] sm:$0xff] %v9928_v21 }
 0x56d   : > { %3472 = vrot.lane.b32.xlu1 %v9914_v17, %s11438_s29 }
 0x56f   : > { %3342 = vrot.lane.b32.xlu0 %v9815_v63, %s11438_s29  ;;  %v9939_v63 = vrot.slane %v9549_v5, %v9928_v21 }
 0x571   : > { %3344 = vrot.lane.b32.xlu1 %v9821_v58, %s11438_s29 }
 0x5a4   : > { %v7952_v28 = vpop.f32.mrb[112].mxu0 }
 0x5a5   : > { %v4558_v58 = vadd.f32 %v7952_v28, %v9931_v56  ;;  %v3443_v37 = vpop.permute.xlu0 %3442  ;;  %v3990_v40 = vpop.f32.mrb[113].mxu0 }
 0x5a6   : > { %v3538_v46 = vsel %vm896_vm3, %v3443_v37, %v9804_v9  ;;  %v3590_v26 = vadd.f32 %v9935_v54, %v3443_v37  ;;  %v4552_v2 = vadd.f32 %v9931_v56, %v3990_v40  ;;  %v7953_v49 = vpop.f32.mrb[114].mxu0 }
 0x5a7   : > { %v4654_v7 = vmul.f32 0.01, %v4558_v58  ;;  %v3589_v53 = vadd.f32 %v9939_v63, %v3538_v46  ;;  %v4561_v35 = vadd.f32 %v7953_v49, %v9931_v56  ;;  %v3445_v5 = vpop.permute.xlu1 %3444  ;;  %v3993_v25 = vpop.f32.mrb[115].mxu0 }
 0x5a8   : > { %v3686_v55 = vmul.f32 0.01, %v3590_v26  ;;  %v3539_v47 = vsel %vm896_vm3, %v3445_v5, %v9808_v0  ;;  %v3593_v12 = vadd.f32 %v9935_v54, %v3445_v5  ;;  %v4648_v9 = vmul.f32 0.01, %v4552_v2 }
 0x5a9   : > { %v3685_v57 = vmul.f32 0.01, %v3589_v53  ;;  %v4657_v10 = vmul.f32 0.01, %v4561_v35  ;;  %v3592_v41 = vadd.f32 %v9939_v63, %v3539_v47  ;;  %v3315_v28 = vpop.permute.xlu0 %3314  ;;  %v4555_v40 = vadd.f32 %v9931_v56, %v3993_v25 }
 0x5aa   : > { %v3689_v37 = vmul.f32 0.01, %v3593_v12  ;;  %v4750_v46 = vmax.f32 %v4558_v58, %v4654_v7  ;;  %v9954_v23 = vadd.f32 %v3315_v28, %v9445_v18  ;;  %v3782_v48 = vmax.f32 %v3590_v26, %v3686_v55 }
 0x5ab   : > { %v4753_v29 = vmax.f32 %v4561_v35, %v4657_v10  ;;  %v3688_v49 = vmul.f32 0.01, %v3592_v41  ;;  %v3317_v51 = vpop.permute.xlu1 %3316  ;;  %v4651_v3 = vmul.f32 0.01, %v4555_v40  ;;  %v3781_v32 = vmax.f32 %v3589_v53, %v3685_v57 }
 0x5ac   : > { %v3785_v0 = vmax.f32 %v3593_v12, %v3689_v37  ;;  %v9957_v5 = vadd.f32 %v3317_v51, %v9460_v15  ;;  %v4744_v52 = vmax.f32 %v4552_v2, %v4648_v9  ;;  %3474 = vrot.lane.b32.xlu0 %v9954_v23, %s11438_s29 }
 0x5ad   : > { %v3784_v47 = vmax.f32 %v3592_v41, %v3688_v49  ;;  %v3447_v25 = vpop.permute.xlu0 %3446  ;;  %v9961_v58 = vpack.c.bf16 %v4753_v29, %v4750_v46  ;;  %v4747_v7 = vmax.f32 %v4555_v40, %v4651_v3  ;;  %v11455_v46 = vld [vmem:[#allocation19_spill] sm:$0xff] }
 0x5ae   : > { %11450 = vst [vmem:[#allocation54_spill] sm:$0xff] %v9957_v5  ;;  %v3540_v35 = vsel %vm896_vm3, %v3447_v25, %v9825_v44  ;;  %v3596_v26 = vadd.f32 %v9935_v54, %v3447_v25  ;;  %3476 = vrot.lane.b32.xlu1 %v9957_v5, %s11438_s29  ;;  %v4142_v51 = vpack.c.bf16 %v3785_v0, %v3782_v48 }
 0x5af   : > { %11451 = vst [vmem:[#allocation55_spill] sm:$0xff] %v9961_v58  ;;  %v4141_v55 = vpack.c.bf16 %v3784_v47, %v3781_v32  ;;  %v3595_v2 = vadd.f32 %v9939_v63, %v3540_v35  ;;  %v3449_v53 = vpop.permute.xlu1 %3448  ;;  %v9969_v12 = vpack.c.bf16 %v4747_v7, %v4744_v52  ;;  %v11453_v32 = vld [vmem:[#allocation17_spill] sm:$0xff]  ;;  %v11457_v58 = vld [vmem:[#allocation24_spill] sm:$0xff] }
 0x5b0   : > { %v3692_v57 = vmul.f32 0.01, %v3596_v26  ;;  %v3541_v29 = vsel %vm896_vm3, %v3449_v53, %v9830_v20  ;;  %v3599_v3 = vadd.f32 %v9935_v54, %v3449_v53  ;;  %7310 = vmatprep.mubr.msk.bf16.mxu0 %vm896_vm3, %v4142_v51 }
 0x5b1   : > { %11452 = vst [vmem:[#allocation56_spill] sm:$0xff] %v9969_v12  ;;  %v3691_v44 = vmul.f32 0.01, %v3595_v2  ;;  %v3598_v9 = vadd.f32 %v9939_v63, %v3541_v29  ;;  %v3319_v10 = vpop.permute.xlu0 %3318  ;;  %4374 = vmatmul.mubr.bf16.vlgmr.msra.gmra.mrb[144].mxu0 %v4141_v55 }
 0x5b2   : > { %v3695_v48 = vmul.f32 0.01, %v3599_v3  ;;  %v9977_v41 = vadd.f32 %v11453_v32, %v3319_v10  ;;  %v3788_v37 = vmax.f32 %v3596_v26, %v3692_v57 }
 0x5b3   : > { %v3694_v28 = vmul.f32 0.01, %v3598_v9  ;;  %v3321_v52 = vpop.permute.xlu1 %3320  ;;  %v3787_v7 = vmax.f32 %v3595_v2, %v3691_v44 }
 0x5b4   : > { %11454 = vst [vmem:[#allocation17_spill] sm:$0xff] %v9977_v41  ;;  %v3791_v40 = vmax.f32 %v3599_v3, %v3695_v48  ;;  %v9980_v49 = vadd.f32 %v11455_v46, %v3321_v52  ;;  %3478 = vrot.lane.b32.xlu0 %v9977_v41, %s11438_s29  ;;  %v7956_v20 = vpop.f32.mrb[116].mxu0 }
 0x5b5   : > { %v4570_v0 = vadd.f32 %v7956_v20, %v9931_v56  ;;  %v3451_v47 = vpop.permute.xlu0 %3450  ;;  %v4006_v25 = vpop.f32.mrb[117].mxu0  ;;  %v3790_v35 = vmax.f32 %v3598_v9, %v3694_v28 }
 0x5b6   : > { %11456 = vst [vmem:[#allocation19_spill] sm:$0xff] %v9980_v49  ;;  %v3542_v51 = vsel %vm896_vm3, %v3451_v47, %v9839_v45  ;;  %v3602_v55 = vadd.f32 %v9935_v54, %v3451_v47  ;;  %v4564_v26 = vadd.f32 %v9931_v56, %v4006_v25  ;;  %3480 = vrot.lane.b32.xlu1 %v9980_v49, %s11438_s29  ;;  %v7957_v53 = vpop.f32.mrb[118].mxu0  ;;  %v11459_v49 = vld [vmem:[#allocation27_spill] sm:$0xff] }
 0x5b7   : > { %v4144_v57 = vpack.c.bf16 %v3791_v40, %v3788_v37  ;;  %v4666_v29 = vmul.f32 0.01, %v4570_v0  ;;  %v3601_v3 = vadd.f32 %v9939_v63, %v3542_v51  ;;  %v4573_v10 = vadd.f32 %v7957_v53, %v9931_v56  ;;  %v3453_v48 = vpop.permute.xlu1 %3452  ;;  %v4009_v2 = vpop.f32.mrb[119].mxu0 }
 0x5b8   : > { %v4143_v44 = vpack.c.bf16 %v3790_v35, %v3787_v7  ;;  %v3698_v9 = vmul.f32 0.01, %v3602_v55  ;;  %v3543_v45 = vsel %vm896_vm3, %v3453_v48, %v9844_v13  ;;  %v3605_v28 = vadd.f32 %v9935_v54, %v3453_v48 }
 0x5b9   : > { %7311 = vmatprep.mubr.msk.bf16.mxu0 %vm896_vm3, %v4144_v57  ;;  %v3697_v52 = vmul.f32 0.01, %v3601_v3  ;;  %v4660_v20 = vmul.f32 0.01, %v4564_v26  ;;  %v4669_v47 = vmul.f32 0.01, %v4573_v10  ;;  %v3604_v37 = vadd.f32 %v9939_v63, %v3543_v45  ;;  %v3323_v40 = vpop.permute.xlu0 %3322 }
 0x5ba   : > { %4384 = vmatmul.mubr.bf16.gmra.mrb[148].mxu0 %v4143_v44  ;;  %v3701_v25 = vmul.f32 0.01, %v3605_v28  ;;  %v4567_v51 = vadd.f32 %v9931_v56, %v4009_v2  ;;  %v4762_v53 = vmax.f32 %v4570_v0, %v4666_v29  ;;  %v10000_v12 = vadd.f32 %v3323_v40, %v11457_v58 }
 0x5bb   : > { %v4765_v7 = vmax.f32 %v4573_v10, %v4669_v47  ;;  %v3700_v35 = vmul.f32 0.01, %v3604_v37  ;;  %v3325_v13 = vpop.permute.xlu1 %3324  ;;  %v3794_v48 = vmax.f32 %v3602_v55, %v3698_v9  ;;  %v4756_v5 = vmax.f32 %v4564_v26, %v4660_v20 }
 0x5bc   : > { %11458 = vst [vmem:[#allocation24_spill] sm:$0xff] %v10000_v12  ;;  %v3797_v21 = vmax.f32 %v3605_v28, %v3701_v25  ;;  %v4663_v57 = vmul.f32 0.01, %v4567_v51  ;;  %v10003_v41 = vadd.f32 %v3325_v13, %v11459_v49  ;;  %3482 = vrot.lane.b32.xlu0 %v10000_v12, %s11438_s29  ;;  %v3793_v45 = vmax.f32 %v3601_v3, %v3697_v52  ;;  %v8287_v12 = vld [vmem:[%s11339_s8 + $0x34] ss:$8 sps:$4 sm:$0xff]  }
 0x5bd   : > { %v3455_v44 = vpop.permute.xlu0 %3454  ;;  %v3796_v2 = vmax.f32 %v3604_v37, %v3700_v35  ;;  %v10007_v0 = vpack.c.bf16 %v4765_v7, %v4762_v53 }
 0x5be   : > { %11460 = vst [vmem:[#allocation27_spill] sm:$0xff] %v10003_v41  ;;  %v4759_v29 = vmax.f32 %v4567_v51, %v4663_v57  ;;  %v3544_v10 = vsel %vm896_vm3, %v3455_v44, %v9853_v24  ;;  %v3608_v55 = vadd.f32 %v9935_v54, %v3455_v44  ;;  %3484 = vrot.lane.b32.xlu1 %v10003_v41, %s11438_s29  ;;  %v11463_v51 = vld [vmem:[#allocation22_spill] sm:$0xff] }
 0x5bf   : > { %11461 = vst [vmem:[#allocation57_spill] sm:$0xff] %v10007_v0  ;;  %v4146_v9 = vpack.c.bf16 %v3797_v21, %v3794_v48  ;;  %v3607_v26 = vadd.f32 %v9939_v63, %v3544_v10  ;;  %v3457_v28 = vpop.permute.xlu1 %3456  ;;  %v4145_v20 = vpack.c.bf16 %v3796_v2, %v3793_v45  ;;  %v11467_v0 = vld [vmem:[#allocation31_spill] sm:$0xff] }
 0x5c0   : > { %v3704_v47 = vmul.f32 0.01, %v3608_v55  ;;  %v3545_v3 = vsel %vm896_vm3, %v3457_v28, %v9858_v38  ;;  %v3611_v52 = vadd.f32 %v9935_v54, %v3457_v28  ;;  %v10019_v37 = vpack.c.bf16 %v4759_v29, %v4756_v5  ;;  %v11465_v38 = vld [vmem:[#allocation25_spill] sm:$0xff] }
 0x5c1   : > { %7312 = vmatprep.mubr.msk.bf16.mxu0 %vm896_vm3, %v4146_v9  ;;  %v3703_v24 = vmul.f32 0.01, %v3607_v26  ;;  %v3610_v40 = vadd.f32 %v9939_v63, %v3545_v3  ;;  %v3327_v25 = vpop.permute.xlu0 %3326 }
 0x5c2   : > { %11462 = vst [vmem:[#allocation58_spill] sm:$0xff] %v10019_v37  ;;  %4394 = vmatmul.mubr.bf16.gmra.mrb[152].mxu0 %v4145_v20  ;;  %v3707_v21 = vmul.f32 0.01, %v3611_v52  ;;  %v10023_v53 = vadd.f32 %v11463_v51, %v3327_v25  ;;  %v3800_v13 = vmax.f32 %v3608_v55, %v3704_v47 }
 0x5c3   : > { %v3706_v7 = vmul.f32 0.01, %v3610_v40  ;;  %v3329_v35 = vpop.permute.xlu1 %3328  ;;  %v3799_v29 = vmax.f32 %v3607_v26, %v3703_v24 }
 0x5c4   : > { %11464 = vst [vmem:[#allocation22_spill] sm:$0xff] %v10023_v53  ;;  %v3803_v48 = vmax.f32 %v3611_v52, %v3707_v21  ;;  %v10026_v57 = vadd.f32 %v11465_v38, %v3329_v35  ;;  %3486 = vrot.lane.b32.xlu0 %v10023_v53, %s11438_s29  ;;  %v7960_v5 = vpop.f32.mrb[120].mxu0  ;;  %v11469_v53 = vld [vmem:[#allocation34_spill] sm:$0xff] }
 0x5c5   : > { %v4582_v44 = vadd.f32 %v7960_v5, %v9931_v56  ;;  %v3459_v45 = vpop.permute.xlu0 %3458  ;;  %v4022_v2 = vpop.f32.mrb[121].mxu0  ;;  %v3802_v10 = vmax.f32 %v3610_v40, %v3706_v7 }
 0x5c6   : > { %11466 = vst [vmem:[#allocation25_spill] sm:$0xff] %v10026_v57  ;;  %v3546_v9 = vsel %vm896_vm3, %v3459_v45, %v9867_v19  ;;  %v3614_v28 = vadd.f32 %v9935_v54, %v3459_v45  ;;  %v4576_v55 = vadd.f32 %v9931_v56, %v4022_v2  ;;  %3488 = vrot.lane.b32.xlu1 %v10026_v57, %s11438_s29  ;;  %v7961_v20 = vpop.f32.mrb[122].mxu0 }
 0x5c7   : > { %v4148_v47 = vpack.c.bf16 %v3803_v48, %v3800_v13  ;;  %v4678_v3 = vmul.f32 0.01, %v4582_v44  ;;  %v3613_v52 = vadd.f32 %v9939_v63, %v3546_v9  ;;  %v4585_v25 = vadd.f32 %v7961_v20, %v9931_v56  ;;  %v3461_v21 = vpop.permute.xlu1 %3460  ;;  %v4025_v26 = vpop.f32.mrb[123].mxu0 }
 0x5c8   : > { %v4147_v24 = vpack.c.bf16 %v3802_v10, %v3799_v29  ;;  %v3710_v40 = vmul.f32 0.01, %v3614_v28  ;;  %v3547_v19 = vsel %vm896_vm3, %v3461_v21, %v9872_v22  ;;  %v3617_v7 = vadd.f32 %v9935_v54, %v3461_v21 }
 0x5c9   : > { %7313 = vmatprep.mubr.msk.bf16.mxu0 %vm896_vm3, %v4148_v47  ;;  %v3709_v35 = vmul.f32 0.01, %v3613_v52  ;;  %v4672_v5 = vmul.f32 0.01, %v4576_v55  ;;  %v4681_v45 = vmul.f32 0.01, %v4585_v25  ;;  %v3616_v13 = vadd.f32 %v9939_v63, %v3547_v19  ;;  %v3331_v48 = vpop.permute.xlu0 %3330 }
 0x5ca   : > { %4404 = vmatmul.mubr.bf16.gmra.mrb[156].mxu0 %v4147_v24  ;;  %v3713_v2 = vmul.f32 0.01, %v3617_v7  ;;  %v4579_v9 = vadd.f32 %v9931_v56, %v4025_v26  ;;  %v4774_v20 = vmax.f32 %v4582_v44, %v4678_v3  ;;  %v10046_v37 = vadd.f32 %v3331_v48, %v11467_v0  ;;  %v8276_v24 = vld [vmem:[%s11339_s8] ss:$8 sps:$4 sm:$0xff]   ;;  %v8278_v44 = vld [vmem:[%s11339_s8 + $0x4] ss:$8 sps:$4 sm:$0xff]  }
 0x5cb   : > { %v4777_v29 = vmax.f32 %v4585_v25, %v4681_v45  ;;  %v3712_v10 = vmul.f32 0.01, %v3616_v13  ;;  %v3333_v22 = vpop.permute.xlu1 %3332  ;;  %v3806_v21 = vmax.f32 %v3614_v28, %v3710_v40  ;;  %v3805_v3 = vmax.f32 %v3613_v52, %v3709_v35  ;;  %5189 = vmatprep.subr.bf16.mxu1 %v8278_v44 }
 0x5cc   : > { %11468 = vst [vmem:[#allocation31_spill] sm:$0xff] %v10046_v37  ;;  %v3809_v57 = vmax.f32 %v3617_v7, %v3713_v2  ;;  %v4675_v47 = vmul.f32 0.01, %v4579_v9  ;;  %v10049_v41 = vadd.f32 %v3333_v22, %v11469_v53  ;;  %v4768_v25 = vmax.f32 %v4576_v55, %v4672_v5  ;;  %3490 = vrot.lane.b32.xlu0 %v10046_v37, %s11438_s29  ;;  %v11478_v37 = vld [vmem:[#allocation41_spill] sm:$0xff] }
 0x5cd   : > { %v3808_v26 = vmax.f32 %v3616_v13, %v3712_v10  ;;  %v3463_v28 = vpop.permute.xlu0 %3462  ;;  %v10059_v40 = vpack.c.bf16 %v4777_v29, %v4774_v20  ;;  %5190 = vmatpush1.bf16.msra.mxu1 %v8276_v24  ;;  %v11473_v10 = vld [vmem:[#allocation29_spill] sm:$0xff] }
 0x5ce   : > { %11470 = vst [vmem:[#allocation34_spill] sm:$0xff] %v10049_v41  ;;  %v4150_v19 = vpack.c.bf16 %v3809_v57, %v3806_v21  ;;  %v4771_v7 = vmax.f32 %v4579_v9, %v4675_v47  ;;  %v3548_v45 = vsel %vm896_vm3, %v3463_v28, %v9881_v31  ;;  %v3620_v48 = vadd.f32 %v9935_v54, %v3463_v28 }
 0x5cf   : > { %11471 = vst [vmem:[#allocation59_spill] sm:$0xff] %v10059_v40  ;;  %3492 = vrot.lane.b32.xlu1 %v10049_v41, %s11438_s29  ;;  %v3619_v52 = vadd.f32 %v9939_v63, %v3548_v45  ;;  %v3465_v55 = vpop.permute.xlu1 %3464  ;;  %v4149_v35 = vpack.c.bf16 %v3808_v26, %v3805_v3  ;;  %v11475_v3 = vld [vmem:[#allocation32_spill] sm:$0xff]  ;;  %v11477_v40 = vld [vmem:[#allocation38_spill] sm:$0xff] }
 0x5d0   : > { %v3716_v5 = vmul.f32 0.01, %v3620_v48  ;;  %v3549_v13 = vsel %vm896_vm3, %v3465_v55, %v9886_v43  ;;  %v3623_v57 = vadd.f32 %v9935_v54, %v3465_v55  ;;  %7314 = vmatprep.mubr.msk.bf16.mxu0 %vm896_vm3, %v4150_v19  ;;  %v10071_v31 = vpack.c.bf16 %v4771_v7, %v4768_v25  ;;  %v8281_v25 = vld [vmem:[%s11339_s8 + $0x14] ss:$8 sps:$4 sm:$0xff]  }
 0x5d1   : > { %v3715_v2 = vmul.f32 0.01, %v3619_v52  ;;  %v3622_v9 = vadd.f32 %v9939_v63, %v3549_v13  ;;  %v3335_v20 = vpop.permute.xlu0 %3334  ;;  %5191 = vmatprep.subr.bf16.mxu1 %v8281_v25  ;;  %v8282_v25 = vld [vmem:[%s11339_s8 + $0x20] ss:$8 sps:$4 sm:$0xff]  }
 0x5d2   : > { %11472 = vst [vmem:[#allocation60_spill] sm:$0xff] %v10071_v31  ;;  %4414 = vmatmul.mubr.bf16.gmra.mrb[160].mxu0 %v4149_v35  ;;  %v3719_v29 = vmul.f32 0.01, %v3623_v57  ;;  %v10075_v22 = vadd.f32 %v11473_v10, %v3335_v20  ;;  %v3812_v44 = vmax.f32 %v3620_v48, %v3716_v5  ;;  %v8279_v48 = vld [vmem:[%s11339_s8 + $0x10] ss:$8 sps:$4 sm:$0xff]  }
 0x5d3   : > { %v3718_v21 = vmul.f32 0.01, %v3622_v9  ;;  %v3337_v47 = vpop.permute.xlu1 %3336  ;;  %v3811_v28 = vmax.f32 %v3619_v52, %v3715_v2  ;;  %5192 = vmatpush1.bf16.msra.mxu1 %v8279_v48 }
 0x5d4   : > { %11474 = vst [vmem:[#allocation29_spill] sm:$0xff] %v10075_v22  ;;  %v3815_v43 = vmax.f32 %v3623_v57, %v3719_v29  ;;  %v10078_v26 = vadd.f32 %v11475_v3, %v3337_v47  ;;  %3494 = vrot.lane.b32.xlu0 %v10075_v22, %s11438_s29  ;;  %v7964_v24 = vpop.f32.mrb[124].mxu0 }
 0x5d5   : > { %v3814_v19 = vmax.f32 %v3622_v9, %v3718_v21  ;;  %v4594_v7 = vadd.f32 %v7964_v24, %v9931_v56  ;;  %v3467_v45 = vpop.permute.xlu0 %3466  ;;  %v4038_v55 = vpop.f32.mrb[125].mxu0 }
 0x5d6   : > { %11476 = vst [vmem:[#allocation32_spill] sm:$0xff] %v10078_v26  ;;  %v4152_v35 = vpack.c.bf16 %v3815_v43, %v3812_v44  ;;  %v3550_v5 = vsel %vm896_vm3, %v3467_v45, %v9895_v1  ;;  %v3626_v13 = vadd.f32 %v9935_v54, %v3467_v45  ;;  %v4588_v57 = vadd.f32 %v9931_v56, %v4038_v55  ;;  %v7965_v52 = vpop.f32.mrb[126].mxu0  ;;  %v8284_v45 = vld [vmem:[%s11339_s8 + $0x24] ss:$8 sps:$4 sm:$0xff]  }
 0x5d7   : > { %3496 = vrot.lane.b32.xlu1 %v10078_v26, %s11438_s29  ;;  %v4690_v2 = vmul.f32 0.01, %v4594_v7  ;;  %v3625_v9 = vadd.f32 %v9939_v63, %v3550_v5  ;;  %v4597_v20 = vadd.f32 %v7965_v52, %v9931_v56  ;;  %v3469_v29 = vpop.permute.xlu1 %3468  ;;  %v4041_v21 = vpop.f32.mrb[127].mxu0  ;;  %v4151_v47 = vpack.c.bf16 %v3814_v19, %v3811_v28  ;;  %5193 = vmatprep.subr.bf16.mxu1 %v8284_v45 }
 0x5d8   : > { %v3722_v44 = vmul.f32 0.01, %v3626_v13  ;;  %v4684_v43 = vmul.f32 0.01, %v4588_v57  ;;  %v3551_v1 = vsel %vm896_vm3, %v3469_v29, %v9900_v8  ;;  %v3629_v24 = vadd.f32 %v9935_v54, %v3469_v29  ;;  %7315 = vmatprep.mubr.msk.bf16.mxu0 %vm896_vm3, %v4152_v35  ;;  %5194 = vmatpush1.bf16.msra.mxu1 %v8282_v25 }
 0x5d9   : > { %v3721_v55 = vmul.f32 0.01, %v3625_v9  ;;  %v4693_v5 = vmul.f32 0.01, %v4597_v20  ;;  %v3628_v52 = vadd.f32 %v9939_v63, %v3551_v1  ;;  %v3339_v28 = vpop.permute.xlu0 %3338  ;;  %v4591_v19 = vadd.f32 %v9931_v56, %v4041_v21  ;;  %5195 = vmatprep.subr.bf16.mxu1 %v8287_v12 }
 0x5da   : > { %4424 = vmatmul.mubr.bf16.gmra.mrb[164].mxu0 %v4151_v47  ;;  %v3725_v8 = vmul.f32 0.01, %v3629_v24  ;;  %v4786_v35 = vmax.f32 %v4594_v7, %v4690_v2  ;;  %v10110_v31 = vadd.f32 %v3339_v28, %v11477_v40  ;;  %v3818_v22 = vmax.f32 %v3626_v13, %v3722_v44  ;;  %v8285_v13 = vld [vmem:[%s11339_s8 + $0x30] ss:$8 sps:$4 sm:$0xff]  }
 0x5db   : > { %v4789_v48 = vmax.f32 %v4597_v20, %v4693_v5  ;;  %v3724_v29 = vmul.f32 0.01, %v3628_v52  ;;  %v3341_v26 = vpop.permute.xlu1 %3340  ;;  %v4687_v1 = vmul.f32 0.01, %v4591_v19  ;;  %v3817_v21 = vmax.f32 %v3625_v9, %v3721_v55 }
 0x5dc   : > { %v3821_v41 = vmax.f32 %v3629_v24, %v3725_v8  ;;  %v10113_v47 = vadd.f32 %v3341_v26, %v11478_v37  ;;  %v4780_v45 = vmax.f32 %v4588_v57, %v4684_v43  ;;  %3498 = vrot.lane.b32.xlu0 %v10110_v31, %s11438_s29  ;;  %5196 = vmatpush1.bf16.msra.mxu1 %v8285_v13  ;;  %v8293_v13 = vld [vmem:[%s11339_s8 + $0x54] ss:$8 sps:$4 sm:$0xff]  }
 0x5dd   : > { %v3820_v7 = vmax.f32 %v3628_v52, %v3724_v29  ;;  %v3471_v2 = vpop.permute.xlu0 %3470  ;;  %v10123_v20 = vpack.c.bf16 %v4789_v48, %v4786_v35  ;;  %v4783_v44 = vmax.f32 %v4591_v19, %v4687_v1  ;;  %v11479_v19 = vld [vmem:[#allocation36_spill] sm:$0xff] }
 0x5de   : > { %v4154_v26 = vpack.c.bf16 %v3821_v41, %v3818_v22  ;;  %v3552_v24 = vsel %vm896_vm3, %v3471_v2, %v9909_v62  ;;  %v3632_v5 = vadd.f32 %v9935_v54, %v3471_v2  ;;  %3500 = vrot.lane.b32.xlu1 %v10113_v47, %s11438_s29  ;;  %v8290_v62 = vld [vmem:[%s11339_s8 + $0x44] ss:$8 sps:$4 sm:$0xff]  }
 0x5df   : > { %v3631_v57 = vadd.f32 %v9939_v63, %v3552_v24  ;;  %v3473_v9 = vpop.permute.xlu1 %3472  ;;  %v4153_v43 = vpack.c.bf16 %v3820_v7, %v3817_v21  ;;  %v10138_v22 = vpack.c.bf16 %v4783_v44, %v4780_v45  ;;  %5197 = vmatprep.subr.bf16.mxu1 %v8290_v62  ;;  %v11480_v45 = vld [vmem:[#allocation39_spill] sm:$0xff] }
 0x5e0   : > { %v3728_v55 = vmul.f32 0.01, %v3632_v5  ;;  %v3553_v52 = vsel %vm896_vm3, %v3473_v9, %v9914_v17  ;;  %v3635_v41 = vadd.f32 %v9935_v54, %v3473_v9  ;;  %7316 = vmatprep.mubr.msk.bf16.mxu0 %vm896_vm3, %v4154_v26  ;;  %v8288_v17 = vld [vmem:[%s11339_s8 + $0x40] ss:$8 sps:$4 sm:$0xff]  }
 0x5e1   : > { %v3727_v28 = vmul.f32 0.01, %v3631_v57  ;;  %v3634_v25 = vadd.f32 %v9939_v63, %v3553_v52  ;;  %v3343_v8 = vpop.permute.xlu0 %3342  ;;  %5198 = vmatpush1.bf16.msra.mxu1 %v8288_v17  ;;  %v8296_v17 = vld [vmem:[%s11339_s8 + $0x64] ss:$8 sps:$4 sm:$0xff]  }
 0x5e2   : > { %4434 = vmatmul.mubr.bf16.gmra.mrb[168].mxu0 %v4153_v43  ;;  %v3731_v12 = vmul.f32 0.01, %v3635_v41  ;;  %v10145_v35 = vadd.f32 %v11479_v19, %v3343_v8  ;;  %v3824_v1 = vmax.f32 %v3632_v5, %v3728_v55  ;;  %v8291_v5 = vld [vmem:[%s11339_s8 + $0x50] ss:$8 sps:$4 sm:$0xff]   ;;  %5199 = vmatprep.subr.bf16.mxu1 %v8293_v13 }
 0x5e3   : > { %v3730_v48 = vmul.f32 0.01, %v3634_v25  ;;  %v3345_v29 = vpop.permute.xlu1 %3344  ;;  %v3823_v26 = vmax.f32 %v3631_v57, %v3727_v28 }
 0x5e4   : > { %v3827_v21 = vmax.f32 %v3635_v41, %v3731_v12  ;;  %v10148_v7 = vadd.f32 %v11480_v45, %v3345_v29  ;;  %3502 = vrot.lane.b32.xlu0 %v10145_v35, %s11438_s29  ;;  %v7968_v2 = vpop.f32.mrb[128].mxu0 }
 0x5e5   : > { %v3826_v44 = vmax.f32 %v3634_v25, %v3730_v48  ;;  %v4606_v24 = vadd.f32 %v7968_v2, %v9931_v56  ;;  %v4054_v9 = vpop.f32.mrb[129].mxu0  ;;  %5200 = vmatpush1.bf16.msra.mxu1 %v8291_v5  ;;  %v8294_v48 = vld [vmem:[%s11339_s8 + $0x60] ss:$8 sps:$4 sm:$0xff]   ;;  %v8302_v5 = vld [vmem:[%s11339_s8 + $0x84] ss:$8 sps:$4 sm:$0xff]  }
 0x5e6   : > { %v4156_v43 = vpack.c.bf16 %v3827_v21, %v3824_v1  ;;  %v4600_v55 = vadd.f32 %v9931_v56, %v4054_v9  ;;  %3504 = vrot.lane.b32.xlu1 %v10148_v7, %s11438_s29  ;;  %v7969_v52 = vpop.f32.mrb[130].mxu0  ;;  %5201 = vmatprep.subr.bf16.mxu1 %v8296_v17 }
 0x5e7   : > { %v4702_v41 = vmul.f32 0.01, %v4606_v24  ;;  %v4609_v62 = vadd.f32 %v7969_v52, %v9931_v56  ;;  %v4057_v57 = vpop.f32.mrb[131].mxu0  ;;  %v4155_v28 = vpack.c.bf16 %v3826_v44, %v3823_v26  ;;  %v8299_v26 = vld [vmem:[%s11339_s8 + $0x74] ss:$8 sps:$4 sm:$0xff]  }
 0x5e8   : > { %v4696_v25 = vmul.f32 0.01, %v4600_v55  ;;  %v4603_v8 = vadd.f32 %v9931_v56, %v4057_v57  ;;  %2784 = vrot.lane.b32.xlu0 %v9337_v60, %s11438_s29  ;;  %7317 = vmatprep.mubr.msk.bf16.mxu0 %vm896_vm3, %v4156_v43  ;;  %v8297_v44 = vld [vmem:[%s11339_s8 + $0x70] ss:$8 sps:$4 sm:$0xff]   ;;  %v8300_v43 = vld [vmem:[%s11339_s8 + $0x80] ss:$8 sps:$4 sm:$0xff]  }
 0x5e9   : > { %v4705_v12 = vmul.f32 0.01, %v4609_v62  ;;  %v4798_v1 = vmax.f32 %v4606_v24, %v4702_v41  ;;  %5202 = vmatpush1.bf16.msra.mxu1 %v8294_v48  ;;  %v8305_v52 = vld [vmem:[%s11339_s8 + $0x94] ss:$8 sps:$4 sm:$0xff]   ;;  %v8303_v57 = vld [vmem:[%s11339_s8 + $0x90] ss:$8 sps:$4 sm:$0xff]  }
 0x5ea   : > { %4444 = vmatmul.mubr.bf16.gmra.mrb[172].mxu0 %v4155_v28  ;;  %v4699_v29 = vmul.f32 0.01, %v4603_v8  ;;  %2786 = vrot.lane.b32.xlu1 %v9348_v11, %s11438_s29  ;;  %v4792_v2 = vmax.f32 %v4600_v55, %v4696_v25 }
 0x5eb   : > { %v4801_v21 = vmax.f32 %v4609_v62, %v4705_v12  ;;  %5203 = vmatprep.subr.bf16.mxu1 %v8299_v26 }
 0x5ec   : > { %v4795_v13 = vmax.f32 %v4603_v8, %v4699_v29  ;;  %2788 = vrot.lane.b32.xlu0 %v9333_v36, %s11438_s29 }
 0x5ed   : > { %v10183_v9 = vpack.c.bf16 %v4801_v21, %v4798_v1  ;;  %5204 = vmatpush1.bf16.msra.mxu1 %v8297_v44  ;;  %v8308_v1 = vld [vmem:[%s11339_s8 + $0xa4] ss:$8 sps:$4 sm:$0xff]  }
 0x5ee   : > { %2790 = vrot.lane.b32.xlu1 %v9344_v6, %s11438_s29  ;;  %v10187_v24 = vpack.c.bf16 %v4795_v13, %v4792_v2  ;;  %5205 = vmatprep.subr.bf16.mxu1 %v8302_v5  ;;  %v8306_v2 = vld [vmem:[%s11339_s8 + $0xa0] ss:$8 sps:$4 sm:$0xff]  }
 0x5ef   : > { %11481 = vst [vmem:[#allocation38_spill] sm:$0xff] %v10183_v9  ;;  %v11492_v9 = vld [vmem:[#allocation27_spill] sm:$0xff] }
 0x5f0   : > { %2792 = vrot.lane.b32.xlu0 %v9363_v14, %s11438_s29 }
 0x5f1   : > { %5206 = vmatpush1.bf16.msra.mxu1 %v8300_v43 }
 0x5f2   : > { %2794 = vrot.lane.b32.xlu1 %v9376_v27, %s11438_s29  ;;  %5207 = vmatprep.subr.bf16.mxu1 %v8305_v52  ;;  %v8309_v52 = vld [vmem:[%s11339_s8 + $0xb0] ss:$8 sps:$4 sm:$0xff]  }
 0x5f4   : > { %2796 = vrot.lane.b32.xlu0 %v9357_v30, %s11438_s29  ;;  %v7972_v55 = vpop.f32.mrb[132].mxu0 }
 0x5f5   : > { %v4618_v41 = vadd.f32 %v7972_v55, %v9931_v56  ;;  %v4070_v62 = vpop.f32.mrb[133].mxu0  ;;  %5208 = vmatpush1.bf16.msra.mxu1 %v8303_v57  ;;  %v8311_v55 = vld [vmem:[%s11339_s8 + $0xb4] ss:$8 sps:$4 sm:$0xff]   ;;  %v8314_v57 = vld [vmem:[%s11339_s8 + $0xc4] ss:$8 sps:$4 sm:$0xff]  }
 0x5f6   : > { %v4612_v28 = vadd.f32 %v9931_v56, %v4070_v62  ;;  %2798 = vrot.lane.b32.xlu1 %v9370_v50, %s11438_s29  ;;  %v7973_v25 = vpop.f32.mrb[134].mxu0  ;;  %5209 = vmatprep.subr.bf16.mxu1 %v8308_v1 }
 0x5f7   : > { %v4714_v8 = vmul.f32 0.01, %v4618_v41  ;;  %v4621_v17 = vadd.f32 %v7973_v25, %v9931_v56  ;;  %v4073_v12 = vpop.f32.mrb[135].mxu0 }
 0x5f8   : > { %v4708_v48 = vmul.f32 0.01, %v4612_v28  ;;  %v4615_v29 = vadd.f32 %v9931_v56, %v4073_v12  ;;  %2800 = vrot.lane.b32.xlu0 %v9389_v61, %s11438_s29 }
 0x5f9   : > { %v4717_v21 = vmul.f32 0.01, %v4621_v17  ;;  %v4810_v26 = vmax.f32 %v4618_v41, %v4714_v8  ;;  %5210 = vmatpush1.bf16.msra.mxu1 %v8306_v2  ;;  %v8317_v8 = vld [vmem:[%s11339_s8 + $0xd4] ss:$8 sps:$4 sm:$0xff]  }
 0x5fa   : > { %v4711_v13 = vmul.f32 0.01, %v4615_v29  ;;  %2802 = vrot.lane.b32.xlu1 %v9404_v16, %s11438_s29  ;;  %v4804_v5 = vmax.f32 %v4612_v28, %v4708_v48  ;;  %5211 = vmatprep.subr.bf16.mxu1 %v8311_v55  ;;  %v8312_v28 = vld [vmem:[%s11339_s8 + $0xc0] ss:$8 sps:$4 sm:$0xff]   ;;  %v8315_v48 = vld [vmem:[%s11339_s8 + $0xd0] ss:$8 sps:$4 sm:$0xff]  }
 0x5fb   : > { %v4813_v44 = vmax.f32 %v4621_v17, %v4717_v21  ;;  %v8318_v55 = vld [vmem:[%s11339_s8 + $0xe0] ss:$8 sps:$4 sm:$0xff]  }
 0x5fc   : > { %v4807_v43 = vmax.f32 %v4615_v29, %v4711_v13  ;;  %2804 = vrot.lane.b32.xlu0 %v9385_v39, %s11438_s29 }
 0x5fd   : > { %v10231_v62 = vpack.c.bf16 %v4813_v44, %v4810_v26  ;;  %5212 = vmatpush1.bf16.msra.mxu1 %v8309_v52 }
 0x5fe   : > { %2806 = vrot.lane.b32.xlu1 %v9398_v4, %s11438_s29  ;;  %v10235_v41 = vpack.c.bf16 %v4807_v43, %v4804_v5  ;;  %5213 = vmatprep.subr.bf16.mxu1 %v8314_v57  ;;  %v8320_v5 = vld [vmem:[%s11339_s8 + $0xe4] ss:$8 sps:$4 sm:$0xff]  }
 0x5ff   : > { %11482 = vst [vmem:[#allocation41_spill] sm:$0xff] %v10231_v62 }
 0x600   : > { %11483 = vst [vmem:[#allocation36_spill] sm:$0xff] %v10235_v41  ;;  %2808 = vrot.lane.b32.xlu0 %v9417_v34, %s11438_s29  ;;  %v11490_v41 = vld [vmem:[#allocation19_spill] sm:$0xff] }
 0x601   : > { %5214 = vmatpush1.bf16.msra.mxu1 %v8312_v28 }
 0x602   : > { %2810 = vrot.lane.b32.xlu1 %v9432_v59, %s11438_s29  ;;  %5215 = vmatprep.subr.bf16.mxu1 %v8317_v8 }
 0x604   : > { %2812 = vrot.lane.b32.xlu0 %v9413_v33, %s11438_s29  ;;  %v7976_v25 = vpop.f32.mrb[136].mxu0 }
 0x605   : > { %v4630_v17 = vadd.f32 %v7976_v25, %v9931_v56  ;;  %v4086_v12 = vpop.f32.mrb[137].mxu0  ;;  %5216 = vmatpush1.bf16.msra.mxu1 %v8315_v48  ;;  %v8321_v48 = vld [vmem:[%s11339_s8 + $0xf0] ss:$8 sps:$4 sm:$0xff]  }
 0x606   : > { %v4624_v29 = vadd.f32 %v9931_v56, %v4086_v12  ;;  %2814 = vrot.lane.b32.xlu1 %v9426_v42, %s11438_s29  ;;  %v7977_v1 = vpop.f32.mrb[138].mxu0  ;;  %5217 = vmatprep.subr.bf16.mxu1 %v8320_v5  ;;  %v8323_v12 = vld [vmem:[%s11339_s8 + $0xf4] ss:$8 sps:$4 sm:$0xff]  }
 0x607   : > { %v4726_v21 = vmul.f32 0.01, %v4630_v17  ;;  %v4633_v2 = vadd.f32 %v7977_v1, %v9931_v56  ;;  %v4089_v13 = vpop.f32.mrb[139].mxu0 }
 0x608   : > { %v4720_v26 = vmul.f32 0.01, %v4624_v29  ;;  %v4627_v44 = vadd.f32 %v9931_v56, %v4089_v13  ;;  %2816 = vrot.lane.b32.xlu0 %v9445_v18, %s11438_s29 }
 0x609   : > { %v4729_v43 = vmul.f32 0.01, %v4633_v2  ;;  %v4822_v57 = vmax.f32 %v4630_v17, %v4726_v21  ;;  %5218 = vmatpush1.bf16.msra.mxu1 %v8318_v55 }
 0x60a   : > { %v4723_v52 = vmul.f32 0.01, %v4627_v44  ;;  %2818 = vrot.lane.b32.xlu1 %v9460_v15, %s11438_s29  ;;  %v4816_v25 = vmax.f32 %v4624_v29, %v4720_v26  ;;  %5219 = vmatprep.subr.bf16.mxu1 %v8323_v12 }
 0x60b   : > { %v4825_v28 = vmax.f32 %v4633_v2, %v4729_v43 }
 0x60c   : > { %v4819_v8 = vmax.f32 %v4627_v44, %v4723_v52  ;;  %2820 = vrot.lane.b32.xlu0 %v11453_v32, %s11438_s29 }
 0x60d   : > { %v10279_v1 = vpack.c.bf16 %v4825_v28, %v4822_v57  ;;  %5220 = vmatpush1.bf16.msra.mxu1 %v8321_v48 }
 0x60e   : > { %2822 = vrot.lane.b32.xlu1 %v11455_v46, %s11438_s29  ;;  %v10283_v17 = vpack.c.bf16 %v4819_v8, %v4816_v25 }
 0x60f   : > { %11484 = vst [vmem:[#allocation39_spill] sm:$0xff] %v10279_v1 }
 0x610   : > { %11485 = vst [vmem:[#allocation61_spill] sm:$0xff] %v10283_v17  ;;  %2824 = vrot.lane.b32.xlu0 %v11457_v58, %s11438_s29 }
 0x612   : > { %2826 = vrot.lane.b32.xlu1 %v11459_v49, %s11438_s29 }
 0x614   : > { %2828 = vrot.lane.b32.xlu0 %v11463_v51, %s11438_s29  ;;  %v7980_v29 = vpop.f32.mrb[140].mxu0 }
 0x615   : > { %v4642_v21 = vadd.f32 %v7980_v29, %v9931_v56  ;;  %v4102_v2 = vpop.f32.mrb[141].mxu0 }
 0x616   : > { %v4636_v13 = vadd.f32 %v9931_v56, %v4102_v2  ;;  %2830 = vrot.lane.b32.xlu1 %v11465_v38, %s11438_s29  ;;  %v7981_v26 = vpop.f32.mrb[142].mxu0 }
 0x617   : > { %v4738_v44 = vmul.f32 0.01, %v4642_v21  ;;  %v4645_v5 = vadd.f32 %v7981_v26, %v9931_v56  ;;  %v4105_v43 = vpop.f32.mrb[143].mxu0 }
 0x618   : > { %v4732_v55 = vmul.f32 0.01, %v4636_v13  ;;  %v4639_v52 = vadd.f32 %v9931_v56, %v4105_v43  ;;  %2832 = vrot.lane.b32.xlu0 %v11467_v0, %s11438_s29 }
 0x619   : > { %v4741_v57 = vmul.f32 0.01, %v4645_v5  ;;  %v4834_v25 = vmax.f32 %v4642_v21, %v4738_v44  ;;  %v11488_v44 = vld [vmem:[#allocation54_spill] sm:$0xff] }
 0x61a   : > { %v4735_v28 = vmul.f32 0.01, %v4639_v52  ;;  %2834 = vrot.lane.b32.xlu1 %v11469_v53, %s11438_s29  ;;  %v4828_v12 = vmax.f32 %v4636_v13, %v4732_v55 }
 0x61b   : > { %v4837_v8 = vmax.f32 %v4645_v5, %v4741_v57 }
 0x61c   : > { %v4831_v48 = vmax.f32 %v4639_v52, %v4735_v28  ;;  %2836 = vrot.lane.b32.xlu0 %v11473_v10, %s11438_s29 }
 0x61d   : > { %v10303_v29 = vpack.c.bf16 %v4837_v8, %v4834_v25 }
 0x61e   : > { %2838 = vrot.lane.b32.xlu1 %v11475_v3, %s11438_s29  ;;  %v10307_v56 = vpack.c.bf16 %v4831_v48, %v4828_v12  ;;  %v3475_v2 = vpop.permute.xlu0 %3474 }
 0x61f   : > { %11486 = vst [vmem:[#allocation62_spill] sm:$0xff] %v10303_v29  ;;  %v3554_v26 = vsel %vm896_vm3, %v3475_v2, %v9954_v23  ;;  %v3638_v43 = vadd.f32 %v9935_v54, %v3475_v2 }
 0x620   : > { %11487 = vst [vmem:[#allocation63_spill] sm:$0xff] %v10307_v56  ;;  %2840 = vrot.lane.b32.xlu0 %v11477_v40, %s11438_s29  ;;  %v3477_v21 = vpop.permute.xlu1 %3476  ;;  %v3637_v13 = vadd.f32 %v9939_v63, %v3554_v26 }
 0x621   : > { %v3555_v5 = vsel %vm896_vm3, %v3477_v21, %v11488_v44  ;;  %v3641_v55 = vadd.f32 %v9935_v54, %v3477_v21  ;;  %v3734_v52 = vmul.f32 0.01, %v3638_v43  ;;  %v11489_v44 = vld [vmem:[#allocation17_spill] sm:$0xff] }
 0x622   : > { %v3640_v57 = vadd.f32 %v9939_v63, %v3555_v5  ;;  %2842 = vrot.lane.b32.xlu1 %v11478_v37, %s11438_s29  ;;  %v3733_v23 = vmul.f32 0.01, %v3637_v13 }
 0x623   : > { %v3737_v28 = vmul.f32 0.01, %v3641_v55  ;;  %v3830_v8 = vmax.f32 %v3638_v43, %v3734_v52 }
 0x624   : > { %v3736_v25 = vmul.f32 0.01, %v3640_v57  ;;  %2844 = vrot.lane.b32.xlu0 %v11479_v19, %s11438_s29  ;;  %v3829_v48 = vmax.f32 %v3637_v13, %v3733_v23 }
 0x625   : > { %v3833_v12 = vmax.f32 %v3641_v55, %v3737_v28 }
 0x626   : > { %v3832_v2 = vmax.f32 %v3640_v57, %v3736_v25  ;;  %v3479_v26 = vpop.permute.xlu0 %3478  ;;  %2846 = vrot.lane.b32.xlu1 %v11480_v45, %s11438_s29  ;;  %s7115_s29 = sshll.u32 %s421_s0, 8 }
 0x627   : > { %v4158_v21 = vpack.c.bf16 %v3833_v12, %v3830_v8  ;;  %v3556_v5 = vsel %vm896_vm3, %v3479_v26, %v11489_v44  ;;  %v3644_v29 = vadd.f32 %v9935_v54, %v3479_v26  ;;  %s11125_s2 = scalar_lea.vmem [#allocation2], %s7115_s29  ;;  %s8502_s29 = scalar_lea.vmem %s8501_s16, 8192 }
 0x628   : > { %v3643_v56 = vadd.f32 %v9939_v63, %v3556_v5  ;;  %v3481_v1 = vpop.permute.xlu1 %3480  ;;  %v4157_v17 = vpack.c.bf16 %v3832_v2, %v3829_v48  ;;  %v11491_v2 = vld [vmem:[#allocation24_spill] sm:$0xff]  ;;  %s7037_s18 = sshll.u32 %s11125_s2, 4  ;;  %s11282_s18 = int_to_ptr.vmem [resolvable:$true] %s7037_s18 }
 0x629   : > { %v3740_v62 = vmul.f32 0.01, %v3644_v29  ;;  %v3557_v43 = vsel %vm896_vm3, %v3481_v1, %v11490_v41  ;;  %v3647_v13 = vadd.f32 %v9935_v54, %v3481_v1  ;;  %7318 = vmatprep.mubr.msk.bf16.mxu0 %vm896_vm3, %v4158_v21  ;;  %p8503_p0 = scmp.lt.s32.totalorder %s11282_s18, %s8501_s16 }
 0x62a   : > { %v3739_v55 = vmul.f32 0.01, %v3643_v56  ;;  %v3646_v52 = vadd.f32 %v9939_v63, %v3557_v43  ;;  %4454 = vmatmul.mubr.bf16.gmra.mrb[176].mxu0 %v4157_v17 }
 0x62b   : > { %v3743_v57 = vmul.f32 0.01, %v3647_v13  ;;  %v3836_v28 = vmax.f32 %v3644_v29, %v3740_v62 }
 0x62c   : > { %v3742_v23 = vmul.f32 0.01, %v3646_v52  ;;  %v3835_v8 = vmax.f32 %v3643_v56, %v3739_v55 }
 0x62d   : > { %v3839_v25 = vmax.f32 %v3647_v13, %v3743_v57 }
 0x62e   : > { %v3838_v12 = vmax.f32 %v3646_v52, %v3742_v23  ;;  %v3483_v48 = vpop.permute.xlu0 %3482 }
 0x62f   : > { %v4160_v26 = vpack.c.bf16 %v3839_v25, %v3836_v28  ;;  %v3558_v44 = vsel %vm896_vm3, %v3483_v48, %v11491_v2  ;;  %v3650_v41 = vadd.f32 %v9935_v54, %v3483_v48 }
 0x630   : > { %v3485_v1 = vpop.permute.xlu1 %3484  ;;  %v4159_v5 = vpack.c.bf16 %v3838_v12, %v3835_v8  ;;  %v3649_v21 = vadd.f32 %v9939_v63, %v3558_v44  ;;  %v11493_v12 = vld [vmem:[#allocation22_spill] sm:$0xff] }
 0x631   : > { %v3559_v17 = vsel %vm896_vm3, %v3485_v1, %v11492_v9  ;;  %v3653_v43 = vadd.f32 %v9935_v54, %v3485_v1  ;;  %7319 = vmatprep.mubr.msk.bf16.mxu0 %vm896_vm3, %v4160_v26  ;;  %v3746_v62 = vmul.f32 0.01, %v3650_v41 }
 0x632   : > { %v3652_v29 = vadd.f32 %v9939_v63, %v3559_v17  ;;  %4464 = vmatmul.mubr.bf16.gmra.mrb[180].mxu0 %v4159_v5  ;;  %v3745_v56 = vmul.f32 0.01, %v3649_v21  ;;  %v11494_v5 = vld [vmem:[#allocation25_spill] sm:$0xff] }
 0x633   : > { %v3749_v13 = vmul.f32 0.01, %v3653_v43  ;;  %v3842_v52 = vmax.f32 %v3650_v41, %v3746_v62 }
 0x634   : > { %v3748_v55 = vmul.f32 0.01, %v3652_v29  ;;  %v3841_v23 = vmax.f32 %v3649_v21, %v3745_v56 }
 0x635   : > { %v3845_v57 = vmax.f32 %v3653_v43, %v3749_v13 }
 0x636   : > { %v3844_v28 = vmax.f32 %v3652_v29, %v3748_v55  ;;  %v3487_v25 = vpop.permute.xlu0 %3486 }
 0x637   : > { %v4162_v8 = vpack.c.bf16 %v3845_v57, %v3842_v52  ;;  %v3560_v9 = vsel %vm896_vm3, %v3487_v25, %v11493_v12  ;;  %v3656_v48 = vadd.f32 %v9935_v54, %v3487_v25 }
 0x638   : > { %v3655_v26 = vadd.f32 %v9939_v63, %v3560_v9  ;;  %v3489_v2 = vpop.permute.xlu1 %3488  ;;  %v4161_v44 = vpack.c.bf16 %v3844_v28, %v3841_v23  ;;  %v11495_v28 = vld [vmem:[#allocation31_spill] sm:$0xff] }
 0x639   : > { %v3752_v1 = vmul.f32 0.01, %v3656_v48  ;;  %v3561_v17 = vsel %vm896_vm3, %v3489_v2, %v11494_v5  ;;  %v3659_v41 = vadd.f32 %v9935_v54, %v3489_v2  ;;  %7320 = vmatprep.mubr.msk.bf16.mxu0 %vm896_vm3, %v4162_v8  ;;  %v11496_v5 = vld [vmem:[#allocation34_spill] sm:$0xff] }
 0x63a   : > { %v3751_v21 = vmul.f32 0.01, %v3655_v26  ;;  %v3658_v43 = vadd.f32 %v9939_v63, %v3561_v17  ;;  %4474 = vmatmul.mubr.bf16.gmra.mrb[184].mxu0 %v4161_v44 }
 0x63b   : > { %v3755_v62 = vmul.f32 0.01, %v3659_v41  ;;  %v3848_v56 = vmax.f32 %v3656_v48, %v3752_v1 }
 0x63c   : > { %v3754_v29 = vmul.f32 0.01, %v3658_v43  ;;  %v3847_v55 = vmax.f32 %v3655_v26, %v3751_v21 }
 0x63d   : > { %v3851_v13 = vmax.f32 %v3659_v41, %v3755_v62 }
 0x63e   : > { %v3850_v52 = vmax.f32 %v3658_v43, %v3754_v29  ;;  %v3491_v23 = vpop.permute.xlu0 %3490 }
 0x63f   : > { %v4164_v57 = vpack.c.bf16 %v3851_v13, %v3848_v56  ;;  %v3562_v25 = vsel %vm896_vm3, %v3491_v23, %v11495_v28  ;;  %v3662_v12 = vadd.f32 %v9935_v54, %v3491_v23 }
 0x640   : > { %v4163_v2 = vpack.c.bf16 %v3850_v52, %v3847_v55  ;;  %v3661_v8 = vadd.f32 %v9939_v63, %v3562_v25  ;;  %v11497_v52 = vld [vmem:[#allocation29_spill] sm:$0xff] }
 0x641   : > { %v3493_v9 = vpop.permute.xlu1 %3492  ;;  %7321 = vmatprep.mubr.msk.bf16.mxu0 %vm896_vm3, %v4164_v57  ;;  %v3758_v48 = vmul.f32 0.01, %v3662_v12 }
 0x642   : > { %v3563_v44 = vsel %vm896_vm3, %v3493_v9, %v11496_v5  ;;  %v3665_v17 = vadd.f32 %v9935_v54, %v3493_v9  ;;  %4484 = vmatmul.mubr.bf16.gmra.mrb[188].mxu0 %v4163_v2  ;;  %v3757_v1 = vmul.f32 0.01, %v3661_v8  ;;  %v8326_v2 = vld [vmem:[%s11339_s8 + $0x104] ss:$8 sps:$4 sm:$0xff]  }
 0x643   : > { %v3664_v26 = vadd.f32 %v9939_v63, %v3563_v44  ;;  %v3854_v43 = vmax.f32 %v3662_v12, %v3758_v48  ;;  %v11498_v12 = vld [vmem:[#allocation32_spill] sm:$0xff]  ;;  %5382 = vmatprep.subr.bf16.mxu1 %v8326_v2 }
 0x644   : > { %v3761_v41 = vmul.f32 0.01, %v3665_v17  ;;  %v3853_v29 = vmax.f32 %v3661_v8, %v3757_v1 }
 0x645   : > { %v3760_v21 = vmul.f32 0.01, %v3664_v26 }
 0x646   : > { %v3857_v62 = vmax.f32 %v3665_v17, %v3761_v41  ;;  %v3495_v13 = vpop.permute.xlu0 %3494 }
 0x647   : > { %v3856_v56 = vmax.f32 %v3664_v26, %v3760_v21  ;;  %v3564_v23 = vsel %vm896_vm3, %v3495_v13, %v11497_v52  ;;  %v3668_v28 = vadd.f32 %v9935_v54, %v3495_v13 }
 0x648   : > { %v4166_v55 = vpack.c.bf16 %v3857_v62, %v3854_v43  ;;  %v3667_v57 = vadd.f32 %v9939_v63, %v3564_v23 }
 0x649   : > { %v3497_v25 = vpop.permute.xlu1 %3496  ;;  %v4165_v9 = vpack.c.bf16 %v3856_v56, %v3853_v29  ;;  %v3764_v5 = vmul.f32 0.01, %v3668_v28 }
 0x64a   : > { %v3565_v8 = vsel %vm896_vm3, %v3497_v25, %v11498_v12  ;;  %v3671_v44 = vadd.f32 %v9935_v54, %v3497_v25  ;;  %7322 = vmatprep.mubr.msk.bf16.mxu0 %vm896_vm3, %v4166_v55  ;;  %v3763_v17 = vmul.f32 0.01, %v3667_v57 }
 0x64b   : > { %v3670_v48 = vadd.f32 %v9939_v63, %v3565_v8  ;;  %4494 = vmatmul.mubr.bf16.gmra.mrb[192].mxu0 %v4165_v9  ;;  %v3860_v41 = vmax.f32 %v3668_v28, %v3764_v5 }
 0x64c   : > { %v3767_v26 = vmul.f32 0.01, %v3671_v44  ;;  %v3859_v43 = vmax.f32 %v3667_v57, %v3763_v17 }
 0x64d   : > { %v3766_v1 = vmul.f32 0.01, %v3670_v48 }
 0x64e   : > { %v3863_v21 = vmax.f32 %v3671_v44, %v3767_v26  ;;  %v3499_v56 = vpop.permute.xlu0 %3498 }
 0x64f   : > { %v3862_v62 = vmax.f32 %v3670_v48, %v3766_v1  ;;  %v3566_v13 = vsel %vm896_vm3, %v3499_v56, %v10110_v31  ;;  %v3674_v52 = vadd.f32 %v9935_v54, %v3499_v56 }
 0x650   : > { %v4168_v29 = vpack.c.bf16 %v3863_v21, %v3860_v41  ;;  %v3501_v23 = vpop.permute.xlu1 %3500  ;;  %v3673_v25 = vadd.f32 %v9939_v63, %v3566_v13 }
 0x651   : > { %v4167_v55 = vpack.c.bf16 %v3862_v62, %v3859_v43  ;;  %v3567_v9 = vsel %vm896_vm3, %v3501_v23, %v10113_v47  ;;  %v3677_v2 = vadd.f32 %v9935_v54, %v3501_v23  ;;  %v3770_v28 = vmul.f32 0.01, %v3674_v52  ;;  %v8494_v62 = vld [vmem:[%s11342_s11 + $0x4] ss:$8 sm:$0x7] }
 0x652   : > { %7323 = vmatprep.mubr.msk.bf16.mxu0 %vm896_vm3, %v4168_v29  ;;  %v3676_v57 = vadd.f32 %v9939_v63, %v3567_v9  ;;  %v3769_v5 = vmul.f32 0.01, %v3673_v25  ;;  %v11499_v29 = vld [vmem:[#allocation53_spill] sm:$0xff] }
 0x653   : > { %4504 = vmatmul.mubr.bf16.gmra.mrb[196].mxu0 %v4167_v55  ;;  %v3773_v12 = vmul.f32 0.01, %v3677_v2  ;;  %v3866_v8 = vmax.f32 %v3674_v52, %v3770_v28  ;;  %v10390_v56 = vrot.slane %v8494_v62, %v11499_v29 }
 0x654   : > { %v3772_v31 = vmul.f32 0.01, %v3676_v57  ;;  %v3865_v17 = vmax.f32 %v3673_v25, %v3769_v5 }
 0x655   : > { %v3869_v44 = vmax.f32 %v3677_v2, %v3773_v12 }
 0x656   : > { %v3868_v48 = vmax.f32 %v3676_v57, %v3772_v31  ;;  %v3503_v26 = vpop.permute.xlu0 %3502 }
 0x657   : > { %v4170_v1 = vpack.c.bf16 %v3869_v44, %v3866_v8  ;;  %v3568_v47 = vsel %vm896_vm3, %v3503_v26, %v10145_v35  ;;  %v3680_v41 = vadd.f32 %v9935_v54, %v3503_v26 }
 0x658   : > { %v3679_v21 = vadd.f32 %v9939_v63, %v3568_v47  ;;  %v3505_v43 = vpop.permute.xlu1 %3504  ;;  %v4169_v13 = vpack.c.bf16 %v3868_v48, %v3865_v17 }
 0x659   : > { %v3776_v52 = vmul.f32 0.01, %v3680_v41  ;;  %v3569_v23 = vsel %vm896_vm3, %v3505_v43, %v10148_v7  ;;  %v3683_v55 = vadd.f32 %v9935_v54, %v3505_v43  ;;  %7324 = vmatprep.mubr.msk.bf16.mxu0 %vm896_vm3, %v4170_v1 }
 0x65a   : > { %v3775_v35 = vmul.f32 0.01, %v3679_v21  ;;  %v3682_v25 = vadd.f32 %v9939_v63, %v3569_v23  ;;  %v2785_v9 = vpop.permute.xlu0 %2784 }
 0x65b   : > { %4514 = vmatmul.mubr.bf16.gmra.mrb[200].mxu0 %v4169_v13  ;;  %v3779_v2 = vmul.f32 0.01, %v3683_v55  ;;  %v2880_v28 = vsel %vm896_vm3, %v9337_v60, %v2785_v9  ;;  %v3872_v31 = vmax.f32 %v3680_v41, %v3776_v52 }
 0x65c   : > { %v3778_v57 = vmul.f32 0.01, %v3682_v25  ;;  %v2931_v5 = vadd.f32 %v10390_v56, %v2880_v28  ;;  %v2787_v12 = vpop.permute.xlu1 %2786  ;;  %v3871_v7 = vmax.f32 %v3679_v21, %v3775_v35 }
 0x65d   : > { %v3875_v8 = vmax.f32 %v3683_v55, %v3779_v2  ;;  %v2881_v54 = vsel %vm896_vm3, %v9348_v11, %v2787_v12 }
 0x65e   : > { %v3874_v44 = vmax.f32 %v3682_v25, %v3778_v57  ;;  %v3027_v17 = vmul.f32 0.01, %v2931_v5  ;;  %v2934_v63 = vadd.f32 %v10390_v56, %v2881_v54  ;;  %v2789_v48 = vpop.permute.xlu0 %2788 }
 0x65f   : > { %v4172_v26 = vpack.c.bf16 %v3875_v8, %v3872_v31  ;;  %v2882_v1 = vsel %vm896_vm3, %v9333_v36, %v2789_v48 }
 0x660   : > { %v3030_v60 = vmul.f32 0.01, %v2934_v63  ;;  %v2937_v47 = vadd.f32 %v10390_v56, %v2882_v1  ;;  %v2791_v43 = vpop.permute.xlu1 %2790  ;;  %v4171_v62 = vpack.c.bf16 %v3874_v44, %v3871_v7  ;;  %v3123_v11 = vmax.f32 %v2931_v5, %v3027_v17 }
 0x661   : > { %v2883_v41 = vsel %vm896_vm3, %v9344_v6, %v2791_v43  ;;  %7325 = vmatprep.mubr.msk.bf16.mxu0 %vm896_vm3, %v4172_v26 }
 0x662   : > { %v3126_v21 = vmax.f32 %v2934_v63, %v3030_v60  ;;  %v3033_v13 = vmul.f32 0.01, %v2937_v47  ;;  %v2940_v52 = vadd.f32 %v10390_v56, %v2883_v41  ;;  %v2793_v23 = vpop.permute.xlu0 %2792 }
 0x663   : > { %4524 = vmatmul.mubr.bf16.gmra.mrb[204].mxu0 %v4171_v62  ;;  %v2884_v36 = vsel %vm896_vm3, %v9363_v14, %v2793_v23 }
 0x664   : > { %v3036_v55 = vmul.f32 0.01, %v2940_v52  ;;  %v2943_v35 = vadd.f32 %v10390_v56, %v2884_v36  ;;  %v2795_v25 = vpop.permute.xlu1 %2794  ;;  %v10413_v9 = vpack.c.bf16 %v3126_v21, %v3123_v11  ;;  %v3129_v2 = vmax.f32 %v2937_v47, %v3033_v13 }
 0x665   : > { %v2885_v6 = vsel %vm896_vm3, %v9376_v27, %v2795_v25 }
 0x666   : > { %v3132_v28 = vmax.f32 %v2940_v52, %v3036_v55  ;;  %v3039_v57 = vmul.f32 0.01, %v2943_v35  ;;  %v2946_v5 = vadd.f32 %v10390_v56, %v2885_v6  ;;  %v2797_v12 = vpop.permute.xlu0 %2796 }
 0x667   : > { %v2886_v31 = vsel %vm896_vm3, %v9357_v30, %v2797_v12 }
 0x668   : > { %v3042_v8 = vmul.f32 0.01, %v2946_v5  ;;  %v2949_v14 = vadd.f32 %v10390_v56, %v2886_v31  ;;  %v2799_v54 = vpop.permute.xlu1 %2798  ;;  %v10421_v7 = vpack.c.bf16 %v3132_v28, %v3129_v2  ;;  %v3135_v17 = vmax.f32 %v2943_v35, %v3039_v57 }
 0x669   : > { %v2887_v44 = vsel %vm896_vm3, %v9370_v50, %v2799_v54 }
 0x66a   : > { %v3138_v27 = vmax.f32 %v2946_v5, %v3042_v8  ;;  %v3045_v63 = vmul.f32 0.01, %v2949_v14  ;;  %v2952_v48 = vadd.f32 %v10390_v56, %v2887_v44  ;;  %v2801_v26 = vpop.permute.xlu0 %2800 }
 0x66b   : > { %v2888_v1 = vsel %vm896_vm3, %v9389_v61, %v2801_v26 }
 0x66c   : > { %v3048_v60 = vmul.f32 0.01, %v2952_v48  ;;  %v2955_v30 = vadd.f32 %v10390_v56, %v2888_v1  ;;  %v2803_v47 = vpop.permute.xlu1 %2802  ;;  %v10429_v43 = vpack.c.bf16 %v3138_v27, %v3135_v17  ;;  %v3141_v41 = vmax.f32 %v2949_v14, %v3045_v63 }
 0x66d   : > { %v2889_v62 = vsel %vm896_vm3, %v9404_v16, %v2803_v47 }
 0x66e   : > { %v3144_v50 = vmax.f32 %v2952_v48, %v3048_v60  ;;  %v3051_v11 = vmul.f32 0.01, %v2955_v30  ;;  %v2958_v21 = vadd.f32 %v10390_v56, %v2889_v62  ;;  %v2805_v13 = vpop.permute.xlu0 %2804 }
 0x66f   : > { %v2890_v52 = vsel %vm896_vm3, %v9385_v39, %v2805_v13 }
 0x670   : > { %v3054_v23 = vmul.f32 0.01, %v2958_v21  ;;  %v2961_v61 = vadd.f32 %v10390_v56, %v2890_v52  ;;  %v2807_v36 = vpop.permute.xlu1 %2806  ;;  %v10437_v55 = vpack.c.bf16 %v3144_v50, %v3141_v41  ;;  %v3147_v25 = vmax.f32 %v2955_v30, %v3051_v11 }
 0x671   : > { %v2891_v35 = vsel %vm896_vm3, %v9398_v4, %v2807_v36 }
 0x672   : > { %v3150_v16 = vmax.f32 %v2958_v21, %v3054_v23  ;;  %v3057_v6 = vmul.f32 0.01, %v2961_v61  ;;  %v2964_v2 = vadd.f32 %v10390_v56, %v2891_v35  ;;  %v2809_v28 = vpop.permute.xlu0 %2808 }
 0x673   : > { %v2892_v57 = vsel %vm896_vm3, %v9417_v34, %v2809_v28 }
 0x674   : > { %v3060_v5 = vmul.f32 0.01, %v2964_v2  ;;  %v2967_v39 = vadd.f32 %v10390_v56, %v2892_v57  ;;  %v2811_v12 = vpop.permute.xlu1 %2810  ;;  %v10445_v31 = vpack.c.bf16 %v3150_v16, %v3147_v25  ;;  %v3153_v14 = vmax.f32 %v2961_v61, %v3057_v6 }
 0x675   : > { %v2893_v8 = vsel %vm896_vm3, %v9432_v59, %v2811_v12  ;;  %v11500_v12 = vld [vmem:[#allocation6_spill] sm:$0xff] }
 0x676   : > { %v3156_v4 = vmax.f32 %v2964_v2, %v3060_v5  ;;  %v3063_v54 = vmul.f32 0.01, %v2967_v39  ;;  %v2970_v44 = vadd.f32 %v10390_v56, %v2893_v8  ;;  %v2813_v17 = vpop.permute.xlu0 %2812 }
 0x677   : > { %v2894_v27 = vsel %vm896_vm3, %v9413_v33, %v2813_v17 }
 0x678   : > { %v3066_v63 = vmul.f32 0.01, %v2970_v44  ;;  %v2973_v34 = vadd.f32 %v10390_v56, %v2894_v27  ;;  %v2815_v48 = vpop.permute.xlu1 %2814  ;;  %v10453_v26 = vpack.c.bf16 %v3156_v4, %v3153_v14  ;;  %v3159_v60 = vmax.f32 %v2967_v39, %v3063_v54 }
 0x679   : > { %v2895_v1 = vsel %vm896_vm3, %v9426_v42, %v2815_v48 }
 0x67a   : > { %v3162_v59 = vmax.f32 %v2970_v44, %v3066_v63  ;;  %v3069_v30 = vmul.f32 0.01, %v2973_v34  ;;  %v2976_v47 = vadd.f32 %v10390_v56, %v2895_v1  ;;  %v2817_v62 = vpop.permute.xlu0 %2816 }
 0x67b   : > { %v2896_v41 = vsel %vm896_vm3, %v9445_v18, %v2817_v62 }
 0x67c   : > { %v3072_v50 = vmul.f32 0.01, %v2976_v47  ;;  %v2979_v33 = vadd.f32 %v10390_v56, %v2896_v41  ;;  %v2819_v11 = vpop.permute.xlu1 %2818  ;;  %v10461_v21 = vpack.c.bf16 %v3162_v59, %v3159_v60  ;;  %v3165_v52 = vmax.f32 %v2973_v34, %v3069_v30 }
 0x67d   : > { %v2897_v13 = vsel %vm896_vm3, %v9460_v15, %v2819_v11  ;;  %v8495_v15 = vld [vmem:[%s11342_s11 + $0x6] ss:$8 sm:$0x7] }
 0x67e   : > { %v3168_v42 = vmax.f32 %v2976_v47, %v3072_v50  ;;  %v3075_v23 = vmul.f32 0.01, %v2979_v33  ;;  %v2982_v61 = vadd.f32 %v10390_v56, %v2897_v13  ;;  %v2821_v36 = vpop.permute.xlu0 %2820  ;;  %v10477_v28 = vrot.slane %v8495_v15, %v11499_v29 }
 0x67f   : > { %v2898_v35 = vsel %vm896_vm3, %v11453_v32, %v2821_v36  ;;  %v10481_v8 = vrot.slane %v8495_v15, %v11500_v12 }
 0x680   : > { %v3078_v25 = vmul.f32 0.01, %v2982_v61  ;;  %v2985_v18 = vadd.f32 %v10390_v56, %v2898_v35  ;;  %v2823_v16 = vpop.permute.xlu1 %2822  ;;  %v10469_v6 = vpack.c.bf16 %v3168_v42, %v3165_v52  ;;  %v3171_v57 = vmax.f32 %v2979_v33, %v3075_v23 }
 0x681   : > { %v2899_v2 = vsel %vm896_vm3, %v11455_v46, %v2823_v16 }
 0x682   : > { %v3174_v5 = vmax.f32 %v2982_v61, %v3078_v25  ;;  %v2988_v32 = vadd.f32 %v10390_v56, %v2899_v2  ;;  %v2825_v39 = vpop.permute.xlu0 %2824  ;;  %v3081_v4 = vmul.f32 0.01, %v2985_v18 }
 0x683   : > { %v2900_v14 = vsel %vm896_vm3, %v11457_v58, %v2825_v39 }
 0x684   : > { %v3084_v46 = vmul.f32 0.01, %v2988_v32  ;;  %v2991_v54 = vadd.f32 %v10390_v56, %v2900_v14  ;;  %v2827_v44 = vpop.permute.xlu1 %2826  ;;  %v4375_v17 = vpop.f32.mrb[144].mxu0  ;;  %v10486_v27 = vpack.c.bf16 %v3174_v5, %v3171_v57  ;;  %v3177_v11 = vmax.f32 %v2985_v18, %v3081_v4 }
 0x685   : > { %v2901_v63 = vsel %vm896_vm3, %v11459_v49, %v2827_v44  ;;  %v4553_v34 = vadd.f32 %v10477_v28, %v4375_v17  ;;  %v4377_v48 = vpop.f32.mrb[145].mxu0 }
 0x686   : > { %v3087_v1 = vmul.f32 0.01, %v2991_v54  ;;  %v2994_v60 = vadd.f32 %v10390_v56, %v2901_v63  ;;  %v4554_v59 = vadd.f32 %v10481_v8, %v4377_v48  ;;  %v2829_v58 = vpop.permute.xlu0 %2828  ;;  %v4379_v30 = vpop.f32.mrb[146].mxu0  ;;  %v3180_v47 = vmax.f32 %v2988_v32, %v3084_v46 }
 0x687   : > { %v4649_v62 = vmul.f32 0.01, %v4553_v34  ;;  %v2902_v41 = vsel %vm896_vm3, %v11463_v51, %v2829_v58  ;;  %v4556_v50 = vadd.f32 %v10477_v28, %v4379_v30  ;;  %v4381_v33 = vpop.f32.mrb[147].mxu0 }
 0x688   : > { %v3090_v49 = vmul.f32 0.01, %v2994_v60  ;;  %v4650_v13 = vmul.f32 0.01, %v4554_v59  ;;  %v10497_v52 = vadd.f32 %v10390_v56, %v2902_v41  ;;  %v2831_v42 = vpop.permute.xlu1 %2830  ;;  %v3183_v23 = vmax.f32 %v2991_v54, %v3087_v1 }
 0x689   : > { %v4652_v61 = vmul.f32 0.01, %v4556_v50  ;;  %v4557_v36 = vadd.f32 %v10481_v8, %v4381_v33  ;;  %v2903_v35 = vsel %vm896_vm3, %v11465_v38, %v2831_v42  ;;  %v4745_v16 = vmax.f32 %v4553_v34, %v4649_v62 }
 0x68a   : > { %v3186_v25 = vmax.f32 %v2994_v60, %v3090_v49  ;;  %v4746_v51 = vmax.f32 %v4554_v59, %v4650_v13  ;;  %v3000_v2 = vadd.f32 %v10390_v56, %v2903_v35  ;;  %v2833_v15 = vpop.permute.xlu0 %2832  ;;  %v10505_v32 = vpack.c.bf16 %v3180_v47, %v3177_v11 }
 0x68b   : > { %v4748_v18 = vmax.f32 %v4556_v50, %v4652_v61  ;;  %v4653_v57 = vmul.f32 0.01, %v4557_v36  ;;  %v2904_v5 = vsel %vm896_vm3, %v11467_v0, %v2833_v15  ;;  %v3093_v39 = vmul.f32 0.01, %v10497_v52  ;;  %v8324_v0 = vld [vmem:[%s11339_s8 + $0x100] ss:$8 sps:$4 sm:$0xff]  }
 0x68c   : > { %v3096_v12 = vmul.f32 0.01, %v3000_v2  ;;  %v3003_v14 = vadd.f32 %v10390_v56, %v2904_v5  ;;  %v2835_v4 = vpop.permute.xlu1 %2834  ;;  %v10509_v46 = vpack.c.bf16 %v3186_v25, %v3183_v23  ;;  %v11501_v61 = vld [vmem:[#allocation56_spill] sm:$0xff] }
 0x68d   : > { %v4385_v38 = vpop.f32.mrb[148].mxu0  ;;  %v4749_v54 = vmax.f32 %v4557_v36, %v4653_v57  ;;  %v2905_v44 = vsel %vm896_vm3, %v11469_v53, %v2835_v4  ;;  %v4881_v34 = vpack.c.bf16 %v4748_v18, %v4745_v16  ;;  %v8329_v53 = vld [vmem:[%s11339_s8 + $0x114] ss:$8 sps:$4 sm:$0xff]   ;;  %v3189_v11 = vmax.f32 %v10497_v52, %v3093_v39  ;;  %v8327_v52 = vld [vmem:[%s11339_s8 + $0x110] ss:$8 sps:$4 sm:$0xff]  }
 0x68e   : > { %v4559_v17 = vadd.f32 %v10477_v28, %v4385_v38  ;;  %v4387_v63 = vpop.f32.mrb[149].mxu0  ;;  %v3192_v48 = vmax.f32 %v3000_v2, %v3096_v12  ;;  %v3099_v1 = vmul.f32 0.01, %v3003_v14  ;;  %v3006_v60 = vadd.f32 %v10390_v56, %v2905_v44  ;;  %v2837_v58 = vpop.permute.xlu0 %2836  ;;  %v8332_v57 = vld [vmem:[%s11339_s8 + $0x124] ss:$8 sps:$4 sm:$0xff]  }
 0x68f   : > { %v4560_v59 = vadd.f32 %v10481_v8, %v4387_v63  ;;  %v4389_v30 = vpop.f32.mrb[150].mxu0  ;;  %v10522_v47 = vpack.c.bf16 %v4749_v54, %v4746_v51  ;;  %v2906_v41 = vsel %vm896_vm3, %v11473_v10, %v2837_v58  ;;  %5221 = vmatprep.mubr.bf16.mxu1 %v4881_v34 }
 0x690   : > { %v4655_v62 = vmul.f32 0.01, %v4559_v17  ;;  %v4562_v50 = vadd.f32 %v10477_v28, %v4389_v30  ;;  %v4391_v33 = vpop.f32.mrb[151].mxu0  ;;  %v3102_v49 = vmul.f32 0.01, %v3006_v60  ;;  %v10529_v42 = vadd.f32 %v10390_v56, %v2906_v41  ;;  %v2839_v23 = vpop.permute.xlu1 %2838  ;;  %5222 = vmatmul.mubr.bf16.vlgmr.msra.gmra.mrb[176].mxu1 %v11501_v61 }
 0x691   : > { %v4656_v13 = vmul.f32 0.01, %v4560_v59  ;;  %v3195_v36 = vmax.f32 %v3003_v14, %v3099_v1  ;;  %v4563_v25 = vadd.f32 %v10481_v8, %v4391_v33  ;;  %v2907_v10 = vsel %vm896_vm3, %v11475_v3, %v2839_v23  ;;  %5383 = vmatpush1.bf16.msra.mxu1 %v8324_v0 }
 0x692   : > { %v4658_v35 = vmul.f32 0.01, %v4562_v50  ;;  %v3198_v16 = vmax.f32 %v3006_v60, %v3102_v49  ;;  %v4751_v51 = vmax.f32 %v4559_v17, %v4655_v62  ;;  %v3012_v15 = vadd.f32 %v10390_v56, %v2907_v10  ;;  %v2841_v18 = vpop.permute.xlu0 %2840  ;;  %5384 = vmatprep.subr.bf16.mxu1 %v8329_v53 }
 0x693   : > { %v4752_v2 = vmax.f32 %v4560_v59, %v4656_v13  ;;  %v4659_v39 = vmul.f32 0.01, %v4563_v25  ;;  %v2908_v3 = vsel %vm896_vm3, %v11477_v40, %v2841_v18  ;;  %v10544_v12 = vpack.c.bf16 %v3192_v48, %v3189_v11  ;;  %v8330_v40 = vld [vmem:[%s11339_s8 + $0x120] ss:$8 sps:$4 sm:$0xff]  }
 0x694   : > { %v4754_v5 = vmax.f32 %v4562_v50, %v4658_v35  ;;  %v3105_v14 = vmul.f32 0.01, %v10529_v42  ;;  %v3108_v4 = vmul.f32 0.01, %v3012_v15  ;;  %v3015_v38 = vadd.f32 %v10390_v56, %v2908_v3  ;;  %v2843_v54 = vpop.permute.xlu1 %2842 }
 0x695   : > { %v4395_v44 = vpop.f32.mrb[152].mxu0  ;;  %v10548_v17 = vpack.c.bf16 %v3198_v16, %v3195_v36  ;;  %v4755_v63 = vmax.f32 %v4563_v25, %v4659_v39  ;;  %v2909_v34 = vsel %vm896_vm3, %v11478_v37, %v2843_v54  ;;  %5385 = vmatpush1.bf16.msra.mxu1 %v8327_v52  ;;  %v11502_v36 = vld [vmem:[#allocation55_spill] sm:$0xff] }
 0x696   : > { %v4565_v0 = vadd.f32 %v10477_v28, %v4395_v44  ;;  %v4397_v1 = vpop.f32.mrb[153].mxu0  ;;  %v4884_v60 = vpack.c.bf16 %v4754_v5, %v4751_v51  ;;  %v3204_v48 = vmax.f32 %v3012_v15, %v3108_v4  ;;  %v3111_v59 = vmul.f32 0.01, %v3015_v38  ;;  %v2845_v53 = vpop.permute.xlu0 %2844  ;;  %5386 = vmatprep.subr.bf16.mxu1 %v8332_v57 }
 0x697   : > { %v3018_v58 = vadd.f32 %v10390_v56, %v2909_v34  ;;  %v4566_v30 = vadd.f32 %v10481_v8, %v4397_v1  ;;  %v4399_v62 = vpop.f32.mrb[154].mxu0  ;;  %v10558_v41 = vpack.c.bf16 %v4755_v63, %v4752_v2  ;;  %v2910_v50 = vsel %vm896_vm3, %v11479_v19, %v2845_v53 }
 0x698   : > { %v4661_v37 = vmul.f32 0.01, %v4565_v0  ;;  %v4568_v33 = vadd.f32 %v10477_v28, %v4399_v62  ;;  %v4401_v11 = vpop.f32.mrb[155].mxu0  ;;  %5231 = vmatprep.mubr.bf16.mxu1 %v4884_v60  ;;  %v3201_v49 = vmax.f32 %v10529_v42, %v3105_v14  ;;  %v3021_v23 = vadd.f32 %v10390_v56, %v2910_v50  ;;  %v2847_v61 = vpop.permute.xlu1 %2846 }
 0x699   : > { %v3114_v13 = vmul.f32 0.01, %v3018_v58  ;;  %5232 = vmatmul.mubr.bf16.gmra.mrb[180].mxu1 %v11502_v36  ;;  %v4662_v35 = vmul.f32 0.01, %v4566_v30  ;;  %v4569_v10 = vadd.f32 %v10481_v8, %v4401_v11  ;;  %v2911_v52 = vsel %vm896_vm3, %v11480_v45, %v2847_v61 }
 0x69a   : > { %v4664_v25 = vmul.f32 0.01, %v4568_v33  ;;  %5387 = vmatpush1.bf16.msra.mxu1 %v8330_v40  ;;  %v3207_v19 = vmax.f32 %v3015_v38, %v3111_v59  ;;  %v3117_v51 = vmul.f32 0.01, %v3021_v23  ;;  %v3024_v2 = vadd.f32 %v10390_v56, %v2911_v52 }
 0x69b   : > { %v3210_v16 = vmax.f32 %v3018_v58, %v3114_v13  ;;  %v4757_v42 = vmax.f32 %v4565_v0, %v4661_v37  ;;  %v4665_v18 = vmul.f32 0.01, %v4569_v10  ;;  %v10570_v57 = vpack.c.bf16 %v3204_v48, %v3201_v49  ;;  %v11503_v58 = vld [vmem:[#allocation58_spill] sm:$0xff] }
 0x69c   : > { %v4760_v15 = vmax.f32 %v4568_v33, %v4664_v25  ;;  %v3120_v5 = vmul.f32 0.01, %v3024_v2  ;;  %v4758_v14 = vmax.f32 %v4566_v30, %v4662_v35  ;;  %v3213_v38 = vmax.f32 %v3021_v23, %v3117_v51 }
 0x69d   : > { %v4405_v39 = vpop.f32.mrb[156].mxu0  ;;  %v10572_v3 = vpack.c.bf16 %v3210_v16, %v3207_v19  ;;  %v4761_v4 = vmax.f32 %v4569_v10, %v4665_v18 }
 0x69e   : > { %v4571_v54 = vadd.f32 %v10477_v28, %v4405_v39  ;;  %v4407_v45 = vpop.f32.mrb[157].mxu0  ;;  %v4887_v44 = vpack.c.bf16 %v4760_v15, %v4757_v42  ;;  %v3216_v63 = vmax.f32 %v3024_v2, %v3120_v5  ;;  %v11504_v2 = vld [vmem:[#allocation57_spill] sm:$0xff] }
 0x69f   : > { %v4572_v34 = vadd.f32 %v10481_v8, %v4407_v45  ;;  %v4409_v56 = vpop.f32.mrb[158].mxu0  ;;  %v10576_v0 = vpack.c.bf16 %v4761_v4, %v4758_v14 }
 0x6a0   : > { %v4667_v1 = vmul.f32 0.01, %v4571_v54  ;;  %v4574_v60 = vadd.f32 %v10477_v28, %v4409_v56  ;;  %v4411_v40 = vpop.f32.mrb[159].mxu0  ;;  %5241 = vmatprep.mubr.bf16.mxu1 %v4887_v44  ;;  %v10581_v30 = vpack.c.bf16 %v3216_v63, %v3213_v38 }
 0x6a1   : > { %v4668_v48 = vmul.f32 0.01, %v4572_v34  ;;  %v4575_v59 = vadd.f32 %v10481_v8, %v4411_v40  ;;  %5242 = vmatmul.mubr.bf16.gmra.mrb[184].mxu1 %v11503_v58  ;;  %v8333_v40 = vld [vmem:[%s11339_s8 + $0x130] ss:$8 sps:$4 sm:$0xff]  }
 0x6a2   : > { %v4670_v53 = vmul.f32 0.01, %v4574_v60  ;;  %v4763_v37 = vmax.f32 %v4571_v54, %v4667_v1  ;;  %v11505_v58 = vld [vmem:[#allocation60_spill] sm:$0xff] }
 0x6a3   : > { %v4671_v62 = vmul.f32 0.01, %v4575_v59  ;;  %v4764_v33 = vmax.f32 %v4572_v34, %v4668_v48 }
 0x6a4   : > { %v4766_v50 = vmax.f32 %v4574_v60, %v4670_v53  ;;  %v8335_v53 = vld [vmem:[%s11339_s8 + $0x134] ss:$8 sps:$4 sm:$0xff]  }
 0x6a5   : > { %v4767_v11 = vmax.f32 %v4575_v59, %v4671_v62  ;;  %v4415_v49 = vpop.f32.mrb[160].mxu0  ;;  %5388 = vmatprep.subr.bf16.mxu1 %v8335_v53 }
 0x6a6   : > { %v4577_v13 = vadd.f32 %v10477_v28, %v4415_v49  ;;  %v4417_v23 = vpop.f32.mrb[161].mxu0  ;;  %v4890_v61 = vpack.c.bf16 %v4766_v50, %v4763_v37  ;;  %5389 = vmatpush1.bf16.msra.mxu1 %v8333_v40 }
 0x6a7   : > { %v10584_v36 = vpack.c.bf16 %v4767_v11, %v4764_v33  ;;  %v4578_v35 = vadd.f32 %v10481_v8, %v4417_v23  ;;  %v4419_v25 = vpop.f32.mrb[162].mxu0 }
 0x6a8   : > { %v4673_v10 = vmul.f32 0.01, %v4577_v13  ;;  %v4580_v52 = vadd.f32 %v10477_v28, %v4419_v25  ;;  %v4421_v19 = vpop.f32.mrb[163].mxu0  ;;  %5251 = vmatprep.mubr.bf16.mxu1 %v4890_v61 }
 0x6a9   : > { %v4674_v16 = vmul.f32 0.01, %v4578_v35  ;;  %v4581_v51 = vadd.f32 %v10481_v8, %v4421_v19  ;;  %5252 = vmatmul.mubr.bf16.gmra.mrb[188].mxu1 %v11504_v2 }
 0x6aa   : > { %v4676_v42 = vmul.f32 0.01, %v4580_v52  ;;  %v4769_v18 = vmax.f32 %v4577_v13, %v4673_v10 }
 0x6ab   : > { %v4677_v15 = vmul.f32 0.01, %v4581_v51  ;;  %v4770_v39 = vmax.f32 %v4578_v35, %v4674_v16 }
 0x6ac   : > { %v4772_v5 = vmax.f32 %v4580_v52, %v4676_v42 }
 0x6ad   : > { %v4773_v14 = vmax.f32 %v4581_v51, %v4677_v15  ;;  %v4425_v4 = vpop.f32.mrb[164].mxu0  ;;  %v11506_v15 = vld [vmem:[#allocation59_spill] sm:$0xff] }
 0x6ae   : > { %v4583_v54 = vadd.f32 %v10477_v28, %v4425_v4  ;;  %v4427_v45 = vpop.f32.mrb[165].mxu0  ;;  %v4893_v44 = vpack.c.bf16 %v4772_v5, %v4769_v18 }
 0x6af   : > { %v10591_v38 = vpack.c.bf16 %v4773_v14, %v4770_v39  ;;  %v4584_v63 = vadd.f32 %v10481_v8, %v4427_v45  ;;  %v4429_v34 = vpop.f32.mrb[166].mxu0 }
 0x6b0   : > { %v4679_v56 = vmul.f32 0.01, %v4583_v54  ;;  %v4586_v1 = vadd.f32 %v10477_v28, %v4429_v34  ;;  %v4431_v60 = vpop.f32.mrb[167].mxu0  ;;  %5261 = vmatprep.mubr.bf16.mxu1 %v4893_v44 }
 0x6b1   : > { %v4680_v48 = vmul.f32 0.01, %v4584_v63  ;;  %v4587_v59 = vadd.f32 %v10481_v8, %v4431_v60  ;;  %5262 = vmatmul.mubr.bf16.gmra.mrb[192].mxu1 %v11505_v58 }
 0x6b2   : > { %v4682_v62 = vmul.f32 0.01, %v4586_v1  ;;  %v4775_v50 = vmax.f32 %v4583_v54, %v4679_v56 }
 0x6b3   : > { %v4683_v37 = vmul.f32 0.01, %v4587_v59  ;;  %v4776_v11 = vmax.f32 %v4584_v63, %v4680_v48 }
 0x6b4   : > { %v4778_v33 = vmax.f32 %v4586_v1, %v4682_v62 }
 0x6b5   : > { %v4779_v49 = vmax.f32 %v4587_v59, %v4683_v37  ;;  %v4435_v13 = vpop.f32.mrb[168].mxu0 }
 0x6b6   : > { %v4589_v23 = vadd.f32 %v10477_v28, %v4435_v13  ;;  %v4437_v61 = vpop.f32.mrb[169].mxu0  ;;  %v4896_v35 = vpack.c.bf16 %v4778_v33, %v4775_v50 }
 0x6b7   : > { %v10604_v25 = vpack.c.bf16 %v4779_v49, %v4776_v11  ;;  %v4590_v10 = vadd.f32 %v10481_v8, %v4437_v61  ;;  %v4439_v52 = vpop.f32.mrb[170].mxu0 }
 0x6b8   : > { %v4685_v19 = vmul.f32 0.01, %v4589_v23  ;;  %v4592_v16 = vadd.f32 %v10477_v28, %v4439_v52  ;;  %v4441_v51 = vpop.f32.mrb[171].mxu0  ;;  %5271 = vmatprep.mubr.bf16.mxu1 %v4896_v35 }
 0x6b9   : > { %v4686_v2 = vmul.f32 0.01, %v4590_v10  ;;  %v4593_v42 = vadd.f32 %v10481_v8, %v4441_v51  ;;  %5272 = vmatmul.mubr.bf16.gmra.mrb[196].mxu1 %v11506_v15 }
 0x6ba   : > { %v4688_v18 = vmul.f32 0.01, %v4592_v16  ;;  %v4781_v39 = vmax.f32 %v4589_v23, %v4685_v19 }
 0x6bb   : > { %v4689_v5 = vmul.f32 0.01, %v4593_v42  ;;  %v4782_v4 = vmax.f32 %v4590_v10, %v4686_v2 }
 0x6bc   : > { %v4784_v14 = vmax.f32 %v4592_v16, %v4688_v18 }
 0x6bd   : > { %v4785_v54 = vmax.f32 %v4593_v42, %v4689_v5  ;;  %v4445_v45 = vpop.f32.mrb[172].mxu0 }
 0x6be   : > { %v4595_v44 = vadd.f32 %v10477_v28, %v4445_v45  ;;  %v4447_v63 = vpop.f32.mrb[173].mxu0  ;;  %v4899_v34 = vpack.c.bf16 %v4784_v14, %v4781_v39 }
 0x6bf   : > { %v10611_v56 = vpack.c.bf16 %v4785_v54, %v4782_v4  ;;  %v4596_v1 = vadd.f32 %v10481_v8, %v4447_v63  ;;  %v4449_v60 = vpop.f32.mrb[174].mxu0 }
 0x6c0   : > { %v4691_v40 = vmul.f32 0.01, %v4595_v44  ;;  %v4598_v48 = vadd.f32 %v10477_v28, %v4449_v60  ;;  %v4451_v59 = vpop.f32.mrb[175].mxu0  ;;  %5281 = vmatprep.mubr.bf16.mxu1 %v4899_v34 }
 0x6c1   : > { %v4692_v58 = vmul.f32 0.01, %v4596_v1  ;;  %v4599_v53 = vadd.f32 %v10481_v8, %v4451_v59  ;;  %5282 = vmatmul.mubr.bf16.gmra.mrb[200].mxu1 %v10138_v22 }
 0x6c2   : > { %v4694_v62 = vmul.f32 0.01, %v4598_v48  ;;  %v4787_v50 = vmax.f32 %v4595_v44, %v4691_v40 }
 0x6c3   : > { %v4695_v37 = vmul.f32 0.01, %v4599_v53  ;;  %v4788_v11 = vmax.f32 %v4596_v1, %v4692_v58 }
 0x6c4   : > { %v4790_v33 = vmax.f32 %v4598_v48, %v4694_v62 }
 0x6c5   : > { %v4791_v49 = vmax.f32 %v4599_v53, %v4695_v37 }
 0x6c6   : > { %v4902_v13 = vpack.c.bf16 %v4790_v33, %v4787_v50 }
 0x6c7   : > { %v10617_v23 = vpack.c.bf16 %v4791_v49, %v4788_v11 }
 0x6c8   : > { %5291 = vmatprep.mubr.bf16.mxu1 %v4902_v13 }
 0x6c9   : > { %5292 = vmatmul.mubr.bf16.gmra.mrb[204].mxu1 %v10123_v20 }
 0x6fd   : > { %v4455_v61 = vpop.f32.mrb[176].mxu0 }
 0x6fe   : > { %v4601_v35 = vadd.f32 %v10477_v28, %v4455_v61  ;;  %v4457_v10 = vpop.f32.mrb[177].mxu0 }
 0x6ff   : > { %v4602_v52 = vadd.f32 %v10481_v8, %v4457_v10  ;;  %v4459_v19 = vpop.f32.mrb[178].mxu0 }
 0x700   : > { %v4697_v22 = vmul.f32 0.01, %v4601_v35  ;;  %v4604_v16 = vadd.f32 %v10477_v28, %v4459_v19  ;;  %v4461_v51 = vpop.f32.mrb[179].mxu0 }
 0x701   : > { %v4698_v2 = vmul.f32 0.01, %v4602_v52  ;;  %v4605_v42 = vadd.f32 %v10481_v8, %v4461_v51 }
 0x702   : > { %v4700_v15 = vmul.f32 0.01, %v4604_v16  ;;  %v4793_v5 = vmax.f32 %v4601_v35, %v4697_v22 }
 0x703   : > { %v4701_v18 = vmul.f32 0.01, %v4605_v42  ;;  %v4794_v14 = vmax.f32 %v4602_v52, %v4698_v2 }
 0x704   : > { %v4796_v39 = vmax.f32 %v4604_v16, %v4700_v15 }
 0x705   : > { %v4797_v20 = vmax.f32 %v4605_v42, %v4701_v18  ;;  %v4465_v4 = vpop.f32.mrb[180].mxu0  ;;  %v11507_v42 = vld [vmem:[#allocation38_spill] sm:$0xff] }
 0x706   : > { %v4607_v54 = vadd.f32 %v10477_v28, %v4465_v4  ;;  %v4467_v45 = vpop.f32.mrb[181].mxu0  ;;  %v4905_v44 = vpack.c.bf16 %v4796_v39, %v4793_v5 }
 0x707   : > { %v10625_v63 = vpack.c.bf16 %v4797_v20, %v4794_v14  ;;  %v4608_v34 = vadd.f32 %v10481_v8, %v4467_v45  ;;  %v4469_v1 = vpop.f32.mrb[182].mxu0 }
 0x708   : > { %v4703_v60 = vmul.f32 0.01, %v4607_v54  ;;  %v4610_v40 = vadd.f32 %v10477_v28, %v4469_v1  ;;  %v4471_v48 = vpop.f32.mrb[183].mxu0  ;;  %5301 = vmatprep.mubr.bf16.mxu1 %v4905_v44 }
 0x709   : > { %v4704_v59 = vmul.f32 0.01, %v4608_v34  ;;  %v4611_v58 = vadd.f32 %v10481_v8, %v4471_v48  ;;  %5302 = vmatmul.mubr.bf16.gmra.mrb[208].mxu1 %v10187_v24 }
 0x70a   : > { %v4706_v53 = vmul.f32 0.01, %v4610_v40  ;;  %v4799_v37 = vmax.f32 %v4607_v54, %v4703_v60 }
 0x70b   : > { %v4707_v62 = vmul.f32 0.01, %v4611_v58  ;;  %v4800_v33 = vmax.f32 %v4608_v34, %v4704_v59 }
 0x70c   : > { %v4802_v50 = vmax.f32 %v4610_v40, %v4706_v53 }
 0x70d   : > { %v4803_v11 = vmax.f32 %v4611_v58, %v4707_v62  ;;  %v4475_v49 = vpop.f32.mrb[184].mxu0  ;;  %v11508_v62 = vld [vmem:[#allocation36_spill] sm:$0xff] }
 0x70e   : > { %v4613_v13 = vadd.f32 %v10477_v28, %v4475_v49  ;;  %v4477_v61 = vpop.f32.mrb[185].mxu0  ;;  %v4908_v35 = vpack.c.bf16 %v4802_v50, %v4799_v37 }
 0x70f   : > { %v10632_v10 = vpack.c.bf16 %v4803_v11, %v4800_v33  ;;  %v4614_v52 = vadd.f32 %v10481_v8, %v4477_v61  ;;  %v4479_v19 = vpop.f32.mrb[186].mxu0 }
 0x710   : > { %v4709_v22 = vmul.f32 0.01, %v4613_v13  ;;  %v4616_v16 = vadd.f32 %v10477_v28, %v4479_v19  ;;  %v4481_v24 = vpop.f32.mrb[187].mxu0  ;;  %5311 = vmatprep.mubr.bf16.mxu1 %v4908_v35 }
 0x711   : > { %v4710_v51 = vmul.f32 0.01, %v4614_v52  ;;  %v4617_v2 = vadd.f32 %v10481_v8, %v4481_v24  ;;  %5312 = vmatmul.mubr.bf16.gmra.mrb[212].mxu1 %v11507_v42 }
 0x712   : > { %v4712_v15 = vmul.f32 0.01, %v4616_v16  ;;  %v4805_v5 = vmax.f32 %v4613_v13, %v4709_v22 }
 0x713   : > { %v4713_v18 = vmul.f32 0.01, %v4617_v2  ;;  %v4806_v14 = vmax.f32 %v4614_v52, %v4710_v51 }
 0x714   : > { %v4808_v39 = vmax.f32 %v4616_v16, %v4712_v15 }
 0x715   : > { %v4809_v20 = vmax.f32 %v4617_v2, %v4713_v18  ;;  %v4485_v4 = vpop.f32.mrb[188].mxu0 }
 0x716   : > { %v4619_v54 = vadd.f32 %v10477_v28, %v4485_v4  ;;  %v4487_v45 = vpop.f32.mrb[189].mxu0  ;;  %v4911_v44 = vpack.c.bf16 %v4808_v39, %v4805_v5  ;;  %v11509_v5 = vld [vmem:[#allocation41_spill] sm:$0xff] }
 0x717   : > { %v10639_v34 = vpack.c.bf16 %v4809_v20, %v4806_v14  ;;  %v4620_v1 = vadd.f32 %v10481_v8, %v4487_v45  ;;  %v4489_v60 = vpop.f32.mrb[190].mxu0 }
 0x718   : > { %v4715_v40 = vmul.f32 0.01, %v4619_v54  ;;  %v4622_v48 = vadd.f32 %v10477_v28, %v4489_v60  ;;  %v4491_v59 = vpop.f32.mrb[191].mxu0  ;;  %5321 = vmatprep.mubr.bf16.mxu1 %v4911_v44 }
 0x719   : > { %v4716_v58 = vmul.f32 0.01, %v4620_v1  ;;  %v4623_v53 = vadd.f32 %v10481_v8, %v4491_v59  ;;  %5322 = vmatmul.mubr.bf16.gmra.mrb[216].mxu1 %v11508_v62 }
 0x71a   : > { %v4718_v37 = vmul.f32 0.01, %v4622_v48  ;;  %v4811_v33 = vmax.f32 %v4619_v54, %v4715_v40 }
 0x71b   : > { %v4719_v50 = vmul.f32 0.01, %v4623_v53  ;;  %v4812_v49 = vmax.f32 %v4620_v1, %v4716_v58 }
 0x71c   : > { %v4814_v11 = vmax.f32 %v4622_v48, %v4718_v37 }
 0x71d   : > { %v4815_v13 = vmax.f32 %v4623_v53, %v4719_v50 }
 0x71e   : > { %v4495_v61 = vpop.f32.mrb[192].mxu0  ;;  %v4914_v19 = vpack.c.bf16 %v4814_v11, %v4811_v33  ;;  %v11510_v11 = vld [vmem:[#allocation61_spill] sm:$0xff] }
 0x71f   : > { %v4625_v35 = vadd.f32 %v10477_v28, %v4495_v61  ;;  %v4497_v52 = vpop.f32.mrb[193].mxu0  ;;  %v10646_v22 = vpack.c.bf16 %v4815_v13, %v4812_v49  ;;  %v8336_v49 = vld [vmem:[%s11340_s9] sm:$0xff]  }
 0x720   : > { %v4626_v16 = vadd.f32 %v10481_v8, %v4497_v52  ;;  %v4499_v24 = vpop.f32.mrb[194].mxu0  ;;  %5331 = vmatprep.mubr.bf16.mxu1 %v4914_v19  ;;  %5866 = vmatpush1.bf16.msra.mxu0 %v8336_v49  ;;  %v11511_v19 = vmov 0  }
 0x721   : > { %v4721_v51 = vmul.f32 0.01, %v4625_v35  ;;  %v4628_v2 = vadd.f32 %v10477_v28, %v4499_v24  ;;  %v4501_v42 = vpop.f32.mrb[195].mxu0  ;;  %5332 = vmatmul.mubr.bf16.gmra.mrb[220].mxu1 %v11509_v5  ;;  %5867 = vmatprep.subr.bf16.mxu0 %v11511_v19 }
 0x722   : > { %v4722_v15 = vmul.f32 0.01, %v4626_v16  ;;  %v4629_v18 = vadd.f32 %v10481_v8, %v4501_v42 }
 0x723   : > { %v4724_v39 = vmul.f32 0.01, %v4628_v2  ;;  %v4817_v20 = vmax.f32 %v4625_v35, %v4721_v51 }
 0x724   : > { %v4725_v14 = vmul.f32 0.01, %v4629_v18  ;;  %v4818_v54 = vmax.f32 %v4626_v16, %v4722_v15 }
 0x725   : > { %v4820_v4 = vmax.f32 %v4628_v2, %v4724_v39 }
 0x726   : > { %v4821_v45 = vmax.f32 %v4629_v18, %v4725_v14  ;;  %v4505_v44 = vpop.f32.mrb[196].mxu0 }
 0x727   : > { %v4631_v1 = vadd.f32 %v10477_v28, %v4505_v44  ;;  %v4507_v60 = vpop.f32.mrb[197].mxu0  ;;  %v4917_v40 = vpack.c.bf16 %v4820_v4, %v4817_v20  ;;  %v11512_v44 = vld [vmem:[#allocation39_spill] sm:$0xff] }
 0x728   : > { %v10653_v48 = vpack.c.bf16 %v4821_v45, %v4818_v54  ;;  %v4632_v59 = vadd.f32 %v10481_v8, %v4507_v60  ;;  %v4509_v58 = vpop.f32.mrb[198].mxu0 }
 0x729   : > { %v4727_v53 = vmul.f32 0.01, %v4631_v1  ;;  %v4634_v62 = vadd.f32 %v10477_v28, %v4509_v58  ;;  %v4511_v37 = vpop.f32.mrb[199].mxu0  ;;  %5341 = vmatprep.mubr.bf16.mxu1 %v4917_v40 }
 0x72a   : > { %v4728_v50 = vmul.f32 0.01, %v4632_v59  ;;  %v4635_v33 = vadd.f32 %v10481_v8, %v4511_v37  ;;  %5342 = vmatmul.mubr.bf16.gmra.mrb[224].mxu1 %v11510_v11 }
 0x72b   : > { %v4730_v13 = vmul.f32 0.01, %v4634_v62  ;;  %v4823_v35 = vmax.f32 %v4631_v1, %v4727_v53  ;;  %v8337_v1 = vld [vmem:[%s11340_s9 + $0x8] sm:$0xff]  }
 0x72c   : > { %v4731_v61 = vmul.f32 0.01, %v4635_v33  ;;  %v4824_v16 = vmax.f32 %v4632_v59, %v4728_v50  ;;  %5868 = vmatpush1.bf16.msra.mxu0 %v8337_v1  ;;  %v8343_v1 = vld [vmem:[%s11340_s9 + $0x18] sm:$0xff]  }
 0x72d   : > { %v4826_v52 = vmax.f32 %v4634_v62, %v4730_v13  ;;  %5869 = vmatprep.subr.bf16.mxu0 %v11511_v19 }
 0x72e   : > { %v4827_v24 = vmax.f32 %v4635_v33, %v4731_v61  ;;  %v4515_v51 = vpop.f32.mrb[200].mxu0 }
 0x72f   : > { %v4637_v2 = vadd.f32 %v10477_v28, %v4515_v51  ;;  %v4517_v42 = vpop.f32.mrb[201].mxu0  ;;  %v4920_v15 = vpack.c.bf16 %v4826_v52, %v4823_v35 }
 0x730   : > { %v10664_v18 = vpack.c.bf16 %v4827_v24, %v4824_v16  ;;  %v4638_v5 = vadd.f32 %v10481_v8, %v4517_v42  ;;  %v4519_v39 = vpop.f32.mrb[202].mxu0  ;;  %v8338_v42 = vld [vmem:[%s11341_s10 + $0x80] sm:$0xff]  }
 0x731   : > { %v4733_v14 = vmul.f32 0.01, %v4637_v2  ;;  %v4640_v20 = vadd.f32 %v10477_v28, %v4519_v39  ;;  %v4521_v4 = vpop.f32.mrb[203].mxu0  ;;  %5351 = vmatprep.mubr.bf16.mxu1 %v4920_v15  ;;  %7982 = vmatprep.subr.bf16.mxu1 %v8338_v42 }
 0x732   : > { %v4734_v54 = vmul.f32 0.01, %v4638_v5  ;;  %v4641_v45 = vadd.f32 %v10481_v8, %v4521_v4  ;;  %5352 = vmatmul.mubr.bf16.gmra.mrb[228].mxu1 %v11512_v44  ;;  %v8339_v44 = vld [vmem:[%s11341_s10 + $0x88] sm:$0xff]  }
 0x733   : > { %v4736_v60 = vmul.f32 0.01, %v4640_v20  ;;  %v4829_v59 = vmax.f32 %v4637_v2, %v4733_v14  ;;  %v11513_v2 = vld [vmem:[#allocation63_spill] sm:$0xff] }
 0x734   : > { %v4737_v40 = vmul.f32 0.01, %v4641_v45  ;;  %v4830_v53 = vmax.f32 %v4638_v5, %v4734_v54 }
 0x735   : > { %v4832_v58 = vmax.f32 %v4640_v20, %v4736_v60  ;;  %v8340_v60 = vld [vmem:[%s11341_s10 + $0x90] sm:$0xff]  }
 0x736   : > { %v4833_v62 = vmax.f32 %v4641_v45, %v4737_v40  ;;  %v4525_v37 = vpop.f32.mrb[204].mxu0  ;;  %v11514_v45 = vld [vmem:[#allocation62_spill] sm:$0xff]  ;;  %v8344_v40 = vld [vmem:[%s11340_s9 + $0x20] sm:$0xff]  }
 0x737   : > { %v4643_v50 = vadd.f32 %v10477_v28, %v4525_v37  ;;  %v4527_v33 = vpop.f32.mrb[205].mxu0  ;;  %v4923_v11 = vpack.c.bf16 %v4832_v58, %v4829_v59  ;;  %v11523_v59 = vld [vmem:[#allocation26_spill] sm:$0xff]  ;;  %v11524_v58 = vld [vmem:[#allocation23_spill] sm:$0xff]  ;;  %v11527_v37 = vld [vmem:[#allocation40_spill] sm:$0xff] }
 0x738   : > { %v10675_v49 = vpack.c.bf16 %v4833_v62, %v4830_v53  ;;  %v4644_v13 = vadd.f32 %v10481_v8, %v4527_v33  ;;  %v4529_v61 = vpop.f32.mrb[206].mxu0  ;;  %v11525_v53 = vld [vmem:[#allocation33_spill] sm:$0xff]  ;;  %v11526_v62 = vld [vmem:[#allocation30_spill] sm:$0xff]  ;;  %v11529_v33 = vld [vmem:[#allocation44_spill] sm:$0xff] }
 0x739   : > { %v4739_v35 = vmul.f32 0.01, %v4643_v50  ;;  %v4646_v52 = vadd.f32 %v10477_v28, %v4529_v61  ;;  %v4531_v16 = vpop.f32.mrb[207].mxu0  ;;  %5361 = vmatprep.mubr.bf16.mxu1 %v4923_v11  ;;  %v11530_v11 = vld [vmem:[#allocation43_spill] sm:$0xff] }
 0x73a   : > { %v4740_v24 = vmul.f32 0.01, %v4644_v13  ;;  %v4647_v51 = vadd.f32 %v10481_v8, %v4531_v16  ;;  %5362 = vmatmul.mubr.bf16.gmra.mrb[232].mxu1 %v11513_v2  ;;  %v8341_v8 = vld [vmem:[%s11340_s9 + $0x10] sm:$0xff]  }
 0x73b   : > { %v4742_v15 = vmul.f32 0.01, %v4646_v52  ;;  %v4835_v39 = vmax.f32 %v4643_v50, %v4739_v35  ;;  %5870 = vmatpush1.bf16.msra.mxu0 %v8341_v8  ;;  %v11528_v50 = vld [vmem:[#allocation37_spill] sm:$0xff] }
 0x73c   : > { %v4743_v5 = vmul.f32 0.01, %v4647_v51  ;;  %v4836_v20 = vmax.f32 %v4644_v13, %v4740_v24  ;;  %5871 = vmatprep.subr.bf16.mxu0 %v11511_v19  ;;  %v11531_v13 = vld [vmem:[#allocation5_spill] sm:$0xff] }
 0x73d   : > { %v4838_v14 = vmax.f32 %v4646_v52, %v4742_v15 }
 0x73e   : > { %v4839_v4 = vmax.f32 %v4647_v51, %v4743_v5 }
 0x73f   : > { %v4926_v54 = vpack.c.bf16 %v4838_v14, %v4835_v39  ;;  %5872 = vmatpush1.bf16.msra.mxu0 %v8343_v1 }
 0x740   : > { %v10684_v28 = vpack.c.bf16 %v4839_v4, %v4836_v20  ;;  %5873 = vmatprep.subr.bf16.mxu0 %v11511_v19 }
 0x741   : > { %5371 = vmatprep.mubr.bf16.mxu1 %v4926_v54 }
 0x742   : > { %5372 = vmatmul.mubr.bf16.gmra.mrb[236].mxu1 %v11514_v45 }
 0x743   : > { %5414 = vmatprep.mubr.bf16.mxu1 %v11511_v19  ;;  %5874 = vmatpush1.bf16.msra.mxu0 %v8344_v40 }
 0x744   : > { %5875 = vmatprep.subr.bf16.mxu0 %v11511_v19 }
 0x74a   : > { %7368 = vmatmul.mubr.msk.bf16.vlgmr.msra.gmra.mrb[176].mxu1 %vm896_vm3, %v10522_v47  ;;  %v8342_v47 = vld [vmem:[%s11341_s10 + $0x98] sm:$0xff]  }
 0x74b   : > { %5424 = vmatprep.mubr.bf16.mxu1 %v11511_v19  ;;  %7983 = vmatpush3.bf16.msra.mxu1 %v8338_v42 }
 0x74c   : > { %7984 = vmatprep.subr.bf16.mxu1 %v8339_v44 }
 0x74f   : > { %7985 = vmatpush3.bf16.msra.mxu1 %v8339_v44 }
 0x750   : > { %7986 = vmatprep.subr.bf16.mxu1 %v8340_v60 }
 0x752   : > { %7369 = vmatmul.mubr.msk.bf16.gmra.mrb[180].mxu1 %vm896_vm3, %v10558_v41  ;;  %v8345_v41 = vld [vmem:[%s11340_s9 + $0x28] sm:$0xff]  }
 0x753   : > { %5434 = vmatprep.mubr.bf16.mxu1 %v11511_v19  ;;  %7987 = vmatpush3.bf16.msra.mxu1 %v8340_v60 }
 0x754   : > { %7988 = vmatprep.subr.bf16.mxu1 %v8342_v47  ;;  %5876 = vmatpush1.bf16.msra.mxu0 %v8345_v41 }
 0x755   : > { %5877 = vmatprep.subr.bf16.mxu0 %v11511_v19 }
 0x757   : > { %7989 = vmatpush3.bf16.msra.mxu1 %v8342_v47 }
 0x75a   : > { %7370 = vmatmul.mubr.msk.bf16.gmra.mrb[184].mxu1 %vm896_vm3, %v10576_v0  ;;  %v8346_v0 = vld [vmem:[%s11340_s9 + $0x30] sm:$0xff]  }
 0x75b   : > { %5444 = vmatprep.mubr.bf16.mxu1 %v11511_v19  ;;  %5878 = vmatpush1.bf16.msra.mxu0 %v8346_v0  ;;  %v8351_v0 = vld [vmem:[%s11341_s10] sm:$0xff]  }
 0x75c   : > { %5879 = vmatprep.subr.bf16.mxu0 %v11511_v19 }
 0x762   : > { %7371 = vmatmul.mubr.msk.bf16.gmra.mrb[188].mxu1 %vm896_vm3, %v10584_v36  ;;  %v8347_v36 = vld [vmem:[%s11340_s9 + $0x38] sm:$0xff]  }
 0x763   : > { %5454 = vmatprep.mubr.bf16.mxu1 %v11511_v19  ;;  %5880 = vmatpush1.bf16.msra.mxu0 %v8347_v36 }
 0x764   : > { %5881 = vmatprep.subr.bf16.mxu0 %v11511_v19 }
 0x76a   : > { %7372 = vmatmul.mubr.msk.bf16.gmra.mrb[192].mxu1 %vm896_vm3, %v10591_v38  ;;  %v8348_v38 = vld [vmem:[%s11340_s9 + $0x40] sm:$0xff]  }
 0x76b   : > { %5464 = vmatprep.mubr.bf16.mxu1 %v11511_v19  ;;  %5882 = vmatpush1.bf16.msra.mxu0 %v8348_v38 }
 0x76c   : > { %5883 = vmatprep.subr.bf16.mxu0 %v11511_v19 }
 0x772   : > { %7373 = vmatmul.mubr.msk.bf16.gmra.mrb[196].mxu1 %vm896_vm3, %v10604_v25  ;;  %v8349_v25 = vld [vmem:[%s11340_s9 + $0x48] sm:$0xff]  }
 0x773   : > { %5474 = vmatprep.mubr.bf16.mxu1 %v11511_v19  ;;  %5884 = vmatpush1.bf16.msra.mxu0 %v8349_v25 }
 0x77a   : > { %7374 = vmatmul.mubr.msk.bf16.gmra.mrb[200].mxu1 %vm896_vm3, %v10611_v56  ;;  %v8350_v56 = vld [vmem:[%s11341_s10 + $0x40] sm:$0xff]  }
 0x77b   : > { %5484 = vmatprep.mubr.bf16.mxu1 %v11511_v19  ;;  %7606 = vmatprep.subr.bf16.mxu0 %v8350_v56  ;;  %v8352_v56 = vld [vmem:[%s11341_s10 + $0x48] sm:$0xff]  }
 0x782   : > { %7375 = vmatmul.mubr.msk.bf16.gmra.mrb[204].mxu1 %vm896_vm3, %v10617_v23  ;;  %v11515_v23 = vld [vmem:[#allocation9_spill] sm:$0xff] }
 0x783   : > { %5494 = vmatprep.mubr.bf16.mxu1 %v11511_v19 }
 0x78a   : > { %7376 = vmatmul.mubr.msk.bf16.gmra.mrb[208].mxu1 %vm896_vm3, %v10625_v63  ;;  %v11516_v63 = vld [vmem:[#allocation8_spill] sm:$0xff] }
 0x78b   : > { %5504 = vmatprep.mubr.bf16.mxu1 %v11511_v19 }
 0x792   : > { %7377 = vmatmul.mubr.msk.bf16.gmra.mrb[212].mxu1 %vm896_vm3, %v10632_v10  ;;  %v11517_v10 = vld [vmem:[#allocation12_spill] sm:$0xff] }
 0x793   : > { %5514 = vmatprep.mubr.bf16.mxu1 %v11511_v19 }
 0x79a   : > { %7378 = vmatmul.mubr.msk.bf16.gmra.mrb[216].mxu1 %vm896_vm3, %v10639_v34  ;;  %v11518_v34 = vld [vmem:[#allocation11_spill] sm:$0xff] }
 0x79b   : > { %5524 = vmatprep.mubr.bf16.mxu1 %v11511_v19 }
 0x7a2   : > { %7379 = vmatmul.mubr.msk.bf16.gmra.mrb[220].mxu1 %vm896_vm3, %v10646_v22  ;;  %v11519_v22 = vld [vmem:[#allocation15_spill] sm:$0xff] }
 0x7a3   : > { %5534 = vmatprep.mubr.bf16.mxu1 %v11511_v19 }
 0x7aa   : > { %7380 = vmatmul.mubr.msk.bf16.gmra.mrb[224].mxu1 %vm896_vm3, %v10653_v48  ;;  %v11520_v48 = vld [vmem:[#allocation14_spill] sm:$0xff] }
 0x7ab   : > { %5544 = vmatprep.mubr.bf16.mxu1 %v11511_v19 }
 0x7b2   : > { %7381 = vmatmul.mubr.msk.bf16.gmra.mrb[228].mxu1 %vm896_vm3, %v10664_v18  ;;  %v11522_v18 = vld [vmem:[#allocation18_spill] sm:$0xff] }
 0x7b3   : > { %5554 = vmatprep.mubr.bf16.mxu1 %v11511_v19 }
 0x7ba   : > { %7382 = vmatmul.mubr.msk.bf16.gmra.mrb[232].mxu1 %vm896_vm3, %v10675_v49  ;;  %v7327_v49 = vld [vmem:[%s11342_s11 + $0x7] ss:$8 sm:$0x3] }
 0x7bb   : > { %5564 = vmatprep.mubr.bf16.mxu1 %v11511_v19  ;;  %v11521_v19 = vld [vmem:[#allocation20_spill] sm:$0xff]  ;;  %v10814_v61 = vrot.slane %v7327_v49, %v11531_v13  ;;  %v10817_v35 = vrot.slane %v7327_v49, %v11499_v29  ;;  %v8355_v13 = vld [vmem:[%s11341_s10 + $0x10] sm:$0xff]  }
 0x7c2   : > { %7383 = vmatmul.mubr.msk.bf16.gmra.mrb[236].mxu1 %vm896_vm3, %v10684_v28 }
 0x7c3   : > { %7990 = vmatprep.mubr.msk.bf16.mxu1 %vm896_vm3, %v11515_v23 }
 0x7ca   : > { %7991 = vmatmul.mubr.msk.bf16.vlgmr.msra.gmra.mrb[240].mxu1 %vm896_vm3, %v11516_v63 }
 0x7cb   : > { %7994 = vmatprep.mubr.msk.bf16.mxu1 %vm896_vm3, %v11517_v10 }
 0x7d2   : > { %7995 = vmatmul.mubr.msk.bf16.gmra.mrb[244].mxu1 %vm896_vm3, %v11518_v34 }
 0x7d3   : > { %7998 = vmatprep.mubr.msk.bf16.mxu1 %vm896_vm3, %v11519_v22  ;;  %v8353_v22 = vld [vmem:[%s11341_s10 + $0x8] sm:$0xff]  }
 0x7da   : > { %7999 = vmatmul.mubr.msk.bf16.gmra.mrb[248].mxu1 %vm896_vm3, %v11520_v48 }
 0x7db   : > { %8002 = vmatprep.mubr.msk.bf16.mxu1 %vm896_vm3, %v11521_v19 }
 0x7e2   : > { %8003 = vmatmul.mubr.msk.bf16.gmra.mrb[252].mxu1 %vm896_vm3, %v11522_v18  ;;  %v8354_v18 = vld [vmem:[%s11341_s10 + $0x50] sm:$0xff]  }
 0x7e3   : > { %8006 = vmatprep.mubr.msk.bf16.mxu1 %vm896_vm3, %v11523_v59 }
 0x7ea   : > { %8007 = vmatmul.mubr.msk.bf16.gmra.mrb[0].mxu1 %vm896_vm3, %v11524_v58 }
 0x7eb   : > { %8010 = vmatprep.mubr.msk.bf16.mxu1 %vm896_vm3, %v11525_v53 }
 0x7f2   : > { %8011 = vmatmul.mubr.msk.bf16.gmra.mrb[4].mxu1 %vm896_vm3, %v11526_v62 }
 0x7f3   : > { %8014 = vmatprep.mubr.msk.bf16.mxu1 %vm896_vm3, %v11527_v37 }
 0x7fa   : > { %8015 = vmatmul.mubr.msk.bf16.gmra.mrb[8].mxu1 %vm896_vm3, %v11528_v50 }
 0x7fb   : > { %8018 = vmatprep.mubr.msk.bf16.mxu1 %vm896_vm3, %v11529_v33 }
 0x802   : > { %8019 = vmatmul.mubr.msk.bf16.gmra.mrb[12].mxu1 %vm896_vm3, %v11530_v11 }
 0x81d   : > { %v5416_v52 = vpop.f32.mrb[176].mxu1 }
 0x81e   : > { %v8026_v16 = vadd.f32 %v5416_v52, %v10814_v61  ;;  %v5418_v24 = vpop.f32.mrb[177].mxu1 }
 0x81f   : > { %v8027_v51 = vadd.f32 %v5418_v24, %v10817_v35  ;;  %v5420_v2 = vpop.f32.mrb[178].mxu1 }
 0x820   : > { %v5575_v42 = vmul.f32 0.01, %v8026_v16  ;;  %v8028_v15 = vadd.f32 %v5420_v2, %v10814_v61  ;;  %v5422_v5 = vpop.f32.mrb[179].mxu1 }
 0x821   : > { %v5576_v39 = vmul.f32 0.01, %v8027_v51  ;;  %v8029_v14 = vadd.f32 %v5422_v5, %v10817_v35 }
 0x822   : > { %v5577_v20 = vmul.f32 0.01, %v8028_v15  ;;  %v5639_v54 = vmax.f32 %v8026_v16, %v5575_v42 }
 0x823   : > { %v5578_v4 = vmul.f32 0.01, %v8029_v14  ;;  %v5640_v29 = vmax.f32 %v8027_v51, %v5576_v39  ;;  %v8356_v51 = vld [vmem:[%s11341_s10 + $0x58] sm:$0xff]  }
 0x824   : > { %v5641_v28 = vmax.f32 %v8028_v15, %v5577_v20  ;;  %v8357_v39 = vld [vmem:[%s11341_s10 + $0x18] sm:$0xff]  }
 0x825   : > { %v5642_v45 = vmax.f32 %v8029_v14, %v5578_v4  ;;  %v5426_v8 = vpop.f32.mrb[180].mxu1  ;;  %v8358_v4 = vld [vmem:[%s11341_s10 + $0x60] sm:$0xff]  }
 0x826   : > { %v5723_v44 = vpack.c.bf16 %v5641_v28, %v5639_v54  ;;  %v8030_v1 = vadd.f32 %v5426_v8, %v10814_v61  ;;  %v5428_v60 = vpop.f32.mrb[181].mxu1 }
 0x827   : > { %v5724_v47 = vpack.c.bf16 %v5642_v45, %v5640_v29  ;;  %v8031_v40 = vadd.f32 %v5428_v60, %v10817_v35  ;;  %v5430_v41 = vpop.f32.mrb[182].mxu1 }
 0x828   : > { %v5579_v36 = vmul.f32 0.01, %v8030_v1  ;;  %v8032_v38 = vadd.f32 %v5430_v41, %v10814_v61  ;;  %v5432_v25 = vpop.f32.mrb[183].mxu1 }
 0x829   : > { %v5580_v23 = vmul.f32 0.01, %v8031_v40  ;;  %v8033_v63 = vadd.f32 %v5432_v25, %v10817_v35  ;;  %7394 = vmatprep.mubr.msk.bf16.mxu0 %vm5816_vm7, %v5724_v47 }
 0x82a   : > { %v5581_v10 = vmul.f32 0.01, %v8032_v38  ;;  %5898 = vmatmul.mubr.bf16.vlgmr.msra.gmra.mrb[208].mxu0 %v5723_v44  ;;  %v5643_v48 = vmax.f32 %v8030_v1, %v5579_v36 }
 0x82b   : > { %v5582_v34 = vmul.f32 0.01, %v8033_v63  ;;  %7607 = vmatpush3.bf16.msra.mxu0 %v8351_v0  ;;  %v5644_v59 = vmax.f32 %v8031_v40, %v5580_v23  ;;  %v8359_v40 = vld [vmem:[%s11341_s10 + $0x20] sm:$0xff]  }
 0x82c   : > { %v5645_v19 = vmax.f32 %v8032_v38, %v5581_v10  ;;  %7608 = vmatprep.subr.bf16.mxu0 %v8352_v56  ;;  %v8360_v38 = vld [vmem:[%s11341_s10 + $0x68] sm:$0xff]  }
 0x82d   : > { %v5646_v58 = vmax.f32 %v8033_v63, %v5582_v34  ;;  %v5436_v53 = vpop.f32.mrb[184].mxu1  ;;  %v8361_v10 = vld [vmem:[%s11341_s10 + $0x28] sm:$0xff]  }
 0x82e   : > { %v8034_v62 = vadd.f32 %v5436_v53, %v10814_v61  ;;  %v5438_v37 = vpop.f32.mrb[185].mxu1  ;;  %v5725_v50 = vpack.c.bf16 %v5645_v19, %v5643_v48  ;;  %v8362_v48 = vld [vmem:[%s11341_s10 + $0x70] sm:$0xff]  }
 0x82f   : > { %v5726_v33 = vpack.c.bf16 %v5646_v58, %v5644_v59  ;;  %v8035_v11 = vadd.f32 %v5438_v37, %v10817_v35  ;;  %v5440_v49 = vpop.f32.mrb[186].mxu1  ;;  %7609 = vmatpush3.bf16.msra.mxu0 %v8353_v22 }
 0x830   : > { %v5583_v52 = vmul.f32 0.01, %v8034_v62  ;;  %v8036_v16 = vadd.f32 %v5440_v49, %v10814_v61  ;;  %v5442_v24 = vpop.f32.mrb[187].mxu1  ;;  %7610 = vmatprep.subr.bf16.mxu0 %v8354_v18 }
 0x831   : > { %v5584_v2 = vmul.f32 0.01, %v8035_v11  ;;  %v8037_v42 = vadd.f32 %v5442_v24, %v10817_v35  ;;  %7395 = vmatprep.mubr.msk.bf16.mxu0 %vm5816_vm7, %v5726_v33 }
 0x832   : > { %v5585_v15 = vmul.f32 0.01, %v8036_v16  ;;  %5906 = vmatmul.mubr.bf16.gmra.mrb[212].mxu0 %v5725_v50  ;;  %v5647_v14 = vmax.f32 %v8034_v62, %v5583_v52 }
 0x833   : > { %v5586_v5 = vmul.f32 0.01, %v8037_v42  ;;  %7611 = vmatpush3.bf16.msra.mxu0 %v8355_v13  ;;  %v5648_v54 = vmax.f32 %v8035_v11, %v5584_v2  ;;  %v8363_v11 = vld [vmem:[%s11341_s10 + $0x30] sm:$0xff]  }
 0x834   : > { %v5649_v20 = vmax.f32 %v8036_v16, %v5585_v15  ;;  %7612 = vmatprep.subr.bf16.mxu0 %v8356_v51  ;;  %v8364_v16 = vld [vmem:[%s11341_s10 + $0x78] sm:$0xff]  }
 0x835   : > { %v5650_v28 = vmax.f32 %v8037_v42, %v5586_v5  ;;  %v5446_v29 = vpop.f32.mrb[188].mxu1  ;;  %v8365_v15 = vld [vmem:[%s11341_s10 + $0x38] sm:$0xff]  }
 0x836   : > { %v8038_v45 = vadd.f32 %v5446_v29, %v10814_v61  ;;  %v5448_v8 = vpop.f32.mrb[189].mxu1  ;;  %v5727_v44 = vpack.c.bf16 %v5649_v20, %v5647_v14 }
 0x837   : > { %v5728_v1 = vpack.c.bf16 %v5650_v28, %v5648_v54  ;;  %v8039_v60 = vadd.f32 %v5448_v8, %v10817_v35  ;;  %v5450_v47 = vpop.f32.mrb[190].mxu1  ;;  %7613 = vmatpush3.bf16.msra.mxu0 %v8357_v39 }
 0x838   : > { %v5587_v41 = vmul.f32 0.01, %v8038_v45  ;;  %v8040_v0 = vadd.f32 %v5450_v47, %v10814_v61  ;;  %v5452_v36 = vpop.f32.mrb[191].mxu1  ;;  %7614 = vmatprep.subr.bf16.mxu0 %v8358_v4 }
 0x839   : > { %v5588_v25 = vmul.f32 0.01, %v8039_v60  ;;  %v8041_v56 = vadd.f32 %v5452_v36, %v10817_v35  ;;  %7396 = vmatprep.mubr.msk.bf16.mxu0 %vm5816_vm7, %v5728_v1 }
 0x83a   : > { %v5589_v23 = vmul.f32 0.01, %v8040_v0  ;;  %5914 = vmatmul.mubr.bf16.gmra.mrb[216].mxu0 %v5727_v44  ;;  %v5651_v34 = vmax.f32 %v8038_v45, %v5587_v41 }
 0x83b   : > { %v5590_v63 = vmul.f32 0.01, %v8041_v56  ;;  %7615 = vmatpush3.bf16.msra.mxu0 %v8359_v40  ;;  %v5652_v19 = vmax.f32 %v8039_v60, %v5588_v25 }
 0x83c   : > { %v5653_v22 = vmax.f32 %v8040_v0, %v5589_v23  ;;  %7616 = vmatprep.subr.bf16.mxu0 %v8360_v38 }
 0x83d   : > { %v5654_v18 = vmax.f32 %v8041_v56, %v5590_v63  ;;  %v5456_v59 = vpop.f32.mrb[192].mxu1 }
 0x83e   : > { %v8042_v58 = vadd.f32 %v5456_v59, %v10814_v61  ;;  %v5458_v53 = vpop.f32.mrb[193].mxu1  ;;  %v5729_v62 = vpack.c.bf16 %v5653_v22, %v5651_v34 }
 0x83f   : > { %v5730_v37 = vpack.c.bf16 %v5654_v18, %v5652_v19  ;;  %v8043_v50 = vadd.f32 %v5458_v53, %v10817_v35  ;;  %v5460_v33 = vpop.f32.mrb[194].mxu1  ;;  %7617 = vmatpush3.bf16.msra.mxu0 %v8361_v10 }
 0x840   : > { %v5591_v49 = vmul.f32 0.01, %v8042_v58  ;;  %v8044_v13 = vadd.f32 %v5460_v33, %v10814_v61  ;;  %v5462_v52 = vpop.f32.mrb[195].mxu1  ;;  %7618 = vmatprep.subr.bf16.mxu0 %v8362_v48 }
 0x841   : > { %v5592_v24 = vmul.f32 0.01, %v8043_v50  ;;  %v8045_v51 = vadd.f32 %v5462_v52, %v10817_v35  ;;  %7397 = vmatprep.mubr.msk.bf16.mxu0 %vm5816_vm7, %v5730_v37 }
 0x842   : > { %v5593_v2 = vmul.f32 0.01, %v8044_v13  ;;  %5922 = vmatmul.mubr.bf16.gmra.mrb[220].mxu0 %v5729_v62  ;;  %v5655_v5 = vmax.f32 %v8042_v58, %v5591_v49 }
 0x843   : > { %v5594_v42 = vmul.f32 0.01, %v8045_v51  ;;  %7619 = vmatpush3.bf16.msra.mxu0 %v8363_v11  ;;  %v5656_v14 = vmax.f32 %v8043_v50, %v5592_v24 }
 0x844   : > { %v5657_v39 = vmax.f32 %v8044_v13, %v5593_v2  ;;  %7620 = vmatprep.subr.bf16.mxu0 %v8364_v16 }
 0x845   : > { %v5658_v20 = vmax.f32 %v8045_v51, %v5594_v42  ;;  %v5466_v4 = vpop.f32.mrb[196].mxu1 }
 0x846   : > { %v8046_v54 = vadd.f32 %v5466_v4, %v10814_v61  ;;  %v5468_v28 = vpop.f32.mrb[197].mxu1  ;;  %v5731_v29 = vpack.c.bf16 %v5657_v39, %v5655_v5 }
 0x847   : > { %v5732_v45 = vpack.c.bf16 %v5658_v20, %v5656_v14  ;;  %v8047_v8 = vadd.f32 %v5468_v28, %v10817_v35  ;;  %v5470_v44 = vpop.f32.mrb[198].mxu1  ;;  %7621 = vmatpush3.bf16.msra.mxu0 %v8365_v15 }
 0x848   : > { %v5595_v1 = vmul.f32 0.01, %v8046_v54  ;;  %v8048_v60 = vadd.f32 %v5470_v44, %v10814_v61  ;;  %v5472_v47 = vpop.f32.mrb[199].mxu1 }
 0x849   : > { %v5596_v40 = vmul.f32 0.01, %v8047_v8  ;;  %v8049_v41 = vadd.f32 %v5472_v47, %v10817_v35  ;;  %7398 = vmatprep.mubr.msk.bf16.mxu0 %vm5816_vm7, %v5732_v45 }
 0x84a   : > { %v5597_v0 = vmul.f32 0.01, %v8048_v60  ;;  %5930 = vmatmul.mubr.bf16.gmra.mrb[224].mxu0 %v5731_v29  ;;  %v5659_v38 = vmax.f32 %v8046_v54, %v5595_v1 }
 0x84b   : > { %v5598_v36 = vmul.f32 0.01, %v8049_v41  ;;  %v5660_v56 = vmax.f32 %v8047_v8, %v5596_v40 }
 0x84c   : > { %v5661_v25 = vmax.f32 %v8048_v60, %v5597_v0 }
 0x84d   : > { %v5662_v23 = vmax.f32 %v8049_v41, %v5598_v36  ;;  %v5476_v63 = vpop.f32.mrb[200].mxu1 }
 0x84e   : > { %v8050_v10 = vadd.f32 %v5476_v63, %v10814_v61  ;;  %v5478_v34 = vpop.f32.mrb[201].mxu1  ;;  %v5733_v22 = vpack.c.bf16 %v5661_v25, %v5659_v38 }
 0x84f   : > { %v5734_v48 = vpack.c.bf16 %v5662_v23, %v5660_v56  ;;  %v8051_v19 = vadd.f32 %v5478_v34, %v10817_v35  ;;  %v5480_v18 = vpop.f32.mrb[202].mxu1 }
 0x850   : > { %v5599_v59 = vmul.f32 0.01, %v8050_v10  ;;  %v8052_v58 = vadd.f32 %v5480_v18, %v10814_v61  ;;  %v5482_v53 = vpop.f32.mrb[203].mxu1 }
 0x851   : > { %v5600_v62 = vmul.f32 0.01, %v8051_v19  ;;  %v8053_v37 = vadd.f32 %v5482_v53, %v10817_v35  ;;  %7399 = vmatprep.mubr.msk.bf16.mxu0 %vm5816_vm7, %v5734_v48 }
 0x852   : > { %v5601_v50 = vmul.f32 0.01, %v8052_v58  ;;  %5938 = vmatmul.mubr.bf16.gmra.mrb[228].mxu0 %v5733_v22  ;;  %v5663_v11 = vmax.f32 %v8050_v10, %v5599_v59 }
 0x853   : > { %v5602_v33 = vmul.f32 0.01, %v8053_v37  ;;  %v5664_v13 = vmax.f32 %v8051_v19, %v5600_v62 }
 0x854   : > { %v5665_v49 = vmax.f32 %v8052_v58, %v5601_v50 }
 0x855   : > { %v5666_v52 = vmax.f32 %v8053_v37, %v5602_v33  ;;  %v5486_v16 = vpop.f32.mrb[204].mxu1 }
 0x856   : > { %v8054_v24 = vadd.f32 %v5486_v16, %v10814_v61  ;;  %v5488_v51 = vpop.f32.mrb[205].mxu1  ;;  %v5735_v2 = vpack.c.bf16 %v5665_v49, %v5663_v11 }
 0x857   : > { %v5736_v42 = vpack.c.bf16 %v5666_v52, %v5664_v13  ;;  %v8055_v15 = vadd.f32 %v5488_v51, %v10817_v35  ;;  %v5490_v5 = vpop.f32.mrb[206].mxu1 }
 0x858   : > { %v5603_v39 = vmul.f32 0.01, %v8054_v24  ;;  %v8056_v14 = vadd.f32 %v5490_v5, %v10814_v61  ;;  %v5492_v20 = vpop.f32.mrb[207].mxu1 }
 0x859   : > { %v5604_v4 = vmul.f32 0.01, %v8055_v15  ;;  %v8057_v54 = vadd.f32 %v5492_v20, %v10817_v35  ;;  %7400 = vmatprep.mubr.msk.bf16.mxu0 %vm5816_vm7, %v5736_v42 }
 0x85a   : > { %v5605_v28 = vmul.f32 0.01, %v8056_v14  ;;  %5946 = vmatmul.mubr.bf16.gmra.mrb[232].mxu0 %v5735_v2  ;;  %v5667_v45 = vmax.f32 %v8054_v24, %v5603_v39 }
 0x85b   : > { %v5606_v29 = vmul.f32 0.01, %v8057_v54  ;;  %v5668_v44 = vmax.f32 %v8055_v15, %v5604_v4 }
 0x85c   : > { %v5669_v8 = vmax.f32 %v8056_v14, %v5605_v28 }
 0x85d   : > { %v5670_v1 = vmax.f32 %v8057_v54, %v5606_v29  ;;  %v5496_v60 = vpop.f32.mrb[208].mxu1 }
 0x85e   : > { %v8058_v47 = vadd.f32 %v5496_v60, %v10814_v61  ;;  %v5498_v40 = vpop.f32.mrb[209].mxu1  ;;  %v5737_v41 = vpack.c.bf16 %v5669_v8, %v5667_v45 }
 0x85f   : > { %v5738_v0 = vpack.c.bf16 %v5670_v1, %v5668_v44  ;;  %v8059_v36 = vadd.f32 %v5498_v40, %v10817_v35  ;;  %v5500_v38 = vpop.f32.mrb[210].mxu1 }
 0x860   : > { %v5607_v25 = vmul.f32 0.01, %v8058_v47  ;;  %v8060_v56 = vadd.f32 %v5500_v38, %v10814_v61  ;;  %v5502_v23 = vpop.f32.mrb[211].mxu1 }
 0x861   : > { %v5608_v63 = vmul.f32 0.01, %v8059_v36  ;;  %v8061_v10 = vadd.f32 %v5502_v23, %v10817_v35  ;;  %7401 = vmatprep.mubr.msk.bf16.mxu0 %vm5816_vm7, %v5738_v0 }
 0x862   : > { %v5609_v34 = vmul.f32 0.01, %v8060_v56  ;;  %5954 = vmatmul.mubr.bf16.gmra.mrb[236].mxu0 %v5737_v41  ;;  %v5671_v48 = vmax.f32 %v8058_v47, %v5607_v25 }
 0x863   : > { %v5610_v22 = vmul.f32 0.01, %v8061_v10  ;;  %v5672_v18 = vmax.f32 %v8059_v36, %v5608_v63 }
 0x864   : > { %v5673_v19 = vmax.f32 %v8060_v56, %v5609_v34 }
 0x865   : > { %v5674_v59 = vmax.f32 %v8061_v10, %v5610_v22  ;;  %v5506_v58 = vpop.f32.mrb[212].mxu1 }
 0x866   : > { %v8062_v53 = vadd.f32 %v5506_v58, %v10814_v61  ;;  %v5508_v62 = vpop.f32.mrb[213].mxu1  ;;  %v5739_v37 = vpack.c.bf16 %v5673_v19, %v5671_v48 }
 0x867   : > { %v5740_v50 = vpack.c.bf16 %v5674_v59, %v5672_v18  ;;  %v8063_v33 = vadd.f32 %v5508_v62, %v10817_v35  ;;  %v5510_v11 = vpop.f32.mrb[214].mxu1 }
 0x868   : > { %v5611_v49 = vmul.f32 0.01, %v8062_v53  ;;  %v8064_v13 = vadd.f32 %v5510_v11, %v10814_v61  ;;  %v5512_v52 = vpop.f32.mrb[215].mxu1 }
 0x869   : > { %v5612_v16 = vmul.f32 0.01, %v8063_v33  ;;  %v8065_v24 = vadd.f32 %v5512_v52, %v10817_v35  ;;  %7402 = vmatprep.mubr.msk.bf16.mxu0 %vm5816_vm7, %v5740_v50 }
 0x86a   : > { %v5613_v51 = vmul.f32 0.01, %v8064_v13  ;;  %5962 = vmatmul.mubr.bf16.gmra.mrb[240].mxu0 %v5739_v37  ;;  %v5675_v42 = vmax.f32 %v8062_v53, %v5611_v49 }
 0x86b   : > { %v5614_v2 = vmul.f32 0.01, %v8065_v24  ;;  %v5676_v5 = vmax.f32 %v8063_v33, %v5612_v16 }
 0x86c   : > { %v5677_v15 = vmax.f32 %v8064_v13, %v5613_v51 }
 0x86d   : > { %v5678_v39 = vmax.f32 %v8065_v24, %v5614_v2  ;;  %v5516_v14 = vpop.f32.mrb[216].mxu1 }
 0x86e   : > { %v8066_v20 = vadd.f32 %v5516_v14, %v10814_v61  ;;  %v5518_v4 = vpop.f32.mrb[217].mxu1  ;;  %v5741_v54 = vpack.c.bf16 %v5677_v15, %v5675_v42 }
 0x86f   : > { %v5742_v28 = vpack.c.bf16 %v5678_v39, %v5676_v5  ;;  %v8067_v29 = vadd.f32 %v5518_v4, %v10817_v35  ;;  %v5520_v45 = vpop.f32.mrb[218].mxu1 }
 0x870   : > { %v5615_v8 = vmul.f32 0.01, %v8066_v20  ;;  %v8068_v44 = vadd.f32 %v5520_v45, %v10814_v61  ;;  %v5522_v1 = vpop.f32.mrb[219].mxu1 }
 0x871   : > { %v5616_v60 = vmul.f32 0.01, %v8067_v29  ;;  %v8069_v47 = vadd.f32 %v5522_v1, %v10817_v35  ;;  %7403 = vmatprep.mubr.msk.bf16.mxu0 %vm5816_vm7, %v5742_v28 }
 0x872   : > { %v5617_v40 = vmul.f32 0.01, %v8068_v44  ;;  %5970 = vmatmul.mubr.bf16.gmra.mrb[244].mxu0 %v5741_v54  ;;  %v5679_v0 = vmax.f32 %v8066_v20, %v5615_v8 }
 0x873   : > { %v5618_v41 = vmul.f32 0.01, %v8069_v47  ;;  %v5680_v38 = vmax.f32 %v8067_v29, %v5616_v60 }
 0x874   : > { %v5681_v36 = vmax.f32 %v8068_v44, %v5617_v40 }
 0x875   : > { %v5682_v25 = vmax.f32 %v8069_v47, %v5618_v41  ;;  %v5526_v56 = vpop.f32.mrb[220].mxu1 }
 0x876   : > { %v8070_v23 = vadd.f32 %v5526_v56, %v10814_v61  ;;  %v5528_v63 = vpop.f32.mrb[221].mxu1  ;;  %v5743_v10 = vpack.c.bf16 %v5681_v36, %v5679_v0 }
 0x877   : > { %v5744_v34 = vpack.c.bf16 %v5682_v25, %v5680_v38  ;;  %v8071_v22 = vadd.f32 %v5528_v63, %v10817_v35  ;;  %v5530_v48 = vpop.f32.mrb[222].mxu1 }
 0x878   : > { %v5619_v19 = vmul.f32 0.01, %v8070_v23  ;;  %v8072_v18 = vadd.f32 %v5530_v48, %v10814_v61  ;;  %v5532_v59 = vpop.f32.mrb[223].mxu1 }
 0x879   : > { %v5620_v58 = vmul.f32 0.01, %v8071_v22  ;;  %v8073_v53 = vadd.f32 %v5532_v59, %v10817_v35  ;;  %7404 = vmatprep.mubr.msk.bf16.mxu0 %vm5816_vm7, %v5744_v34 }
 0x87a   : > { %v5621_v62 = vmul.f32 0.01, %v8072_v18  ;;  %5978 = vmatmul.mubr.bf16.gmra.mrb[248].mxu0 %v5743_v10  ;;  %v5683_v50 = vmax.f32 %v8070_v23, %v5619_v19 }
 0x87b   : > { %v5622_v37 = vmul.f32 0.01, %v8073_v53  ;;  %v5684_v11 = vmax.f32 %v8071_v22, %v5620_v58 }
 0x87c   : > { %v5685_v33 = vmax.f32 %v8072_v18, %v5621_v62 }
 0x87d   : > { %v5686_v49 = vmax.f32 %v8073_v53, %v5622_v37  ;;  %v5536_v13 = vpop.f32.mrb[224].mxu1 }
 0x87e   : > { %v8074_v52 = vadd.f32 %v5536_v13, %v10814_v61  ;;  %v5538_v16 = vpop.f32.mrb[225].mxu1  ;;  %v5745_v24 = vpack.c.bf16 %v5685_v33, %v5683_v50 }
 0x87f   : > { %v5746_v51 = vpack.c.bf16 %v5686_v49, %v5684_v11  ;;  %v8075_v2 = vadd.f32 %v5538_v16, %v10817_v35  ;;  %v5540_v42 = vpop.f32.mrb[226].mxu1 }
 0x880   : > { %v5623_v15 = vmul.f32 0.01, %v8074_v52  ;;  %v8076_v5 = vadd.f32 %v5540_v42, %v10814_v61  ;;  %v5542_v39 = vpop.f32.mrb[227].mxu1 }
 0x881   : > { %v5624_v14 = vmul.f32 0.01, %v8075_v2  ;;  %v8077_v20 = vadd.f32 %v5542_v39, %v10817_v35  ;;  %7405 = vmatprep.mubr.msk.bf16.mxu0 %vm5816_vm7, %v5746_v51 }
 0x882   : > { %v5625_v4 = vmul.f32 0.01, %v8076_v5  ;;  %5986 = vmatmul.mubr.bf16.gmra.mrb[252].mxu0 %v5745_v24  ;;  %v5687_v28 = vmax.f32 %v8074_v52, %v5623_v15 }
 0x883   : > { %v5626_v54 = vmul.f32 0.01, %v8077_v20  ;;  %v5688_v45 = vmax.f32 %v8075_v2, %v5624_v14 }
 0x884   : > { %v5689_v29 = vmax.f32 %v8076_v5, %v5625_v4 }
 0x885   : > { %v5690_v8 = vmax.f32 %v8077_v20, %v5626_v54  ;;  %v5546_v44 = vpop.f32.mrb[228].mxu1 }
 0x886   : > { %v5747_v1 = vpack.c.bf16 %v5689_v29, %v5687_v28  ;;  %v8078_v60 = vadd.f32 %v5546_v44, %v10814_v61  ;;  %v5548_v47 = vpop.f32.mrb[229].mxu1 }
 0x887   : > { %v5748_v40 = vpack.c.bf16 %v5690_v8, %v5688_v45  ;;  %v8079_v41 = vadd.f32 %v5548_v47, %v10817_v35  ;;  %v5550_v0 = vpop.f32.mrb[230].mxu1 }
 0x888   : > { %v5627_v36 = vmul.f32 0.01, %v8078_v60  ;;  %v8080_v38 = vadd.f32 %v5550_v0, %v10814_v61  ;;  %v5552_v25 = vpop.f32.mrb[231].mxu1 }
 0x889   : > { %v5628_v56 = vmul.f32 0.01, %v8079_v41  ;;  %v8081_v23 = vadd.f32 %v5552_v25, %v10817_v35  ;;  %7406 = vmatprep.mubr.msk.bf16.mxu0 %vm5816_vm7, %v5748_v40 }
 0x88a   : > { %v5629_v63 = vmul.f32 0.01, %v8080_v38  ;;  %5994 = vmatmul.mubr.bf16.gmra.mrb[0].mxu0 %v5747_v1  ;;  %v5691_v34 = vmax.f32 %v8078_v60, %v5627_v36 }
 0x88b   : > { %v5630_v10 = vmul.f32 0.01, %v8081_v23  ;;  %v5692_v48 = vmax.f32 %v8079_v41, %v5628_v56 }
 0x88c   : > { %v5693_v22 = vmax.f32 %v8080_v38, %v5629_v63 }
 0x88d   : > { %v5694_v19 = vmax.f32 %v8081_v23, %v5630_v10  ;;  %v5556_v18 = vpop.f32.mrb[232].mxu1 }
 0x88e   : > { %v5749_v59 = vpack.c.bf16 %v5693_v22, %v5691_v34  ;;  %v8082_v58 = vadd.f32 %v5556_v18, %v10814_v61  ;;  %v5558_v53 = vpop.f32.mrb[233].mxu1 }
 0x88f   : > { %v5750_v62 = vpack.c.bf16 %v5694_v19, %v5692_v48  ;;  %v8083_v37 = vadd.f32 %v5558_v53, %v10817_v35  ;;  %v5560_v50 = vpop.f32.mrb[234].mxu1  ;;  %v11532_v48 = vld [vmem:[#allocation7_spill] sm:$0xff] }
 0x890   : > { %v5631_v33 = vmul.f32 0.01, %v8082_v58  ;;  %v8084_v11 = vadd.f32 %v5560_v50, %v10814_v61  ;;  %v5562_v49 = vpop.f32.mrb[235].mxu1 }
 0x891   : > { %v5632_v13 = vmul.f32 0.01, %v8083_v37  ;;  %v8085_v52 = vadd.f32 %v5562_v49, %v10817_v35  ;;  %7407 = vmatprep.mubr.msk.bf16.mxu0 %vm5816_vm7, %v5750_v62 }
 0x892   : > { %v5633_v16 = vmul.f32 0.01, %v8084_v11  ;;  %6002 = vmatmul.mubr.bf16.gmra.mrb[4].mxu0 %v5749_v59  ;;  %v5695_v51 = vmax.f32 %v8082_v58, %v5631_v33 }
 0x893   : > { %v5634_v24 = vmul.f32 0.01, %v8085_v52  ;;  %v5696_v42 = vmax.f32 %v8083_v37, %v5632_v13 }
 0x894   : > { %v5697_v2 = vmax.f32 %v8084_v11, %v5633_v16 }
 0x895   : > { %v5698_v15 = vmax.f32 %v8085_v52, %v5634_v24  ;;  %v5566_v5 = vpop.f32.mrb[236].mxu1 }
 0x896   : > { %v5751_v39 = vpack.c.bf16 %v5697_v2, %v5695_v51  ;;  %v8086_v14 = vadd.f32 %v5566_v5, %v10814_v61  ;;  %v5568_v20 = vpop.f32.mrb[237].mxu1 }
 0x897   : > { %v5752_v4 = vpack.c.bf16 %v5698_v15, %v5696_v42  ;;  %v8087_v54 = vadd.f32 %v5568_v20, %v10817_v35  ;;  %v5570_v28 = vpop.f32.mrb[238].mxu1 }
 0x898   : > { %v5635_v29 = vmul.f32 0.01, %v8086_v14  ;;  %v8088_v45 = vadd.f32 %v5570_v28, %v10814_v61  ;;  %v5572_v8 = vpop.f32.mrb[239].mxu1  ;;  %v11540_v28 = vld [vmem:[#allocation45_spill] sm:$0xff] }
 0x899   : > { %v5636_v44 = vmul.f32 0.01, %v8087_v54  ;;  %v8089_v1 = vadd.f32 %v5572_v8, %v10817_v35  ;;  %7408 = vmatprep.mubr.msk.bf16.mxu0 %vm5816_vm7, %v5752_v4 }
 0x89a   : > { %v5637_v60 = vmul.f32 0.01, %v8088_v45  ;;  %6010 = vmatmul.mubr.bf16.gmra.mrb[8].mxu0 %v5751_v39  ;;  %v5699_v40 = vmax.f32 %v8086_v14, %v5635_v29  ;;  %v11542_v29 = vld [vmem:[#allocation47_spill] sm:$0xff] }
 0x89b   : > { %v5638_v47 = vmul.f32 0.01, %v8089_v1  ;;  %v5700_v0 = vmax.f32 %v8087_v54, %v5636_v44  ;;  %v11539_v54 = vld [vmem:[#allocation42_spill] sm:$0xff] }
 0x89c   : > { %v5701_v41 = vmax.f32 %v8088_v45, %v5637_v60 }
 0x89d   : > { %v5702_v36 = vmax.f32 %v8089_v1, %v5638_v47  ;;  %v10943_v38 = vpop.f32.mrb[240].mxu1  ;;  %v11543_v47 = vld [vmem:[#allocation48_spill] sm:$0xff] }
 0x89e   : > { %v5753_v25 = vpack.c.bf16 %v5701_v41, %v5699_v40  ;;  %v10945_v56 = vpop.f32.mrb[241].mxu1 }
 0x89f   : > { %v5754_v23 = vpack.c.bf16 %v5702_v36, %v5700_v0  ;;  %v10947_v61 = vpop.f32.mrb[242].mxu1 }
 0x8a0   : > { %v10949_v63 = vpop.f32.mrb[243].mxu1 }
 0x8a1   : > { %7409 = vmatprep.mubr.msk.bf16.mxu0 %vm5816_vm7, %v5754_v23 }
 0x8a2   : > { %6018 = vmatmul.mubr.bf16.gmra.mrb[12].mxu0 %v5753_v25 }
 0x8a3   : > { %6507 = vmatprep.mubr.bf16.mxu0 %v10413_v9  ;;  %v11533_v9 = vld [vmem:[#allocation10_spill] sm:$0xff] }
 0x8a5   : > { %v10953_v35 = vpop.f32.mrb[244].mxu1 }
 0x8a6   : > { %v10955_v10 = vpop.f32.mrb[245].mxu1 }
 0x8a7   : > { %v10957_v34 = vpop.f32.mrb[246].mxu1 }
 0x8a8   : > { %v10959_v22 = vpop.f32.mrb[247].mxu1 }
 0x8aa   : > { %6508 = vmatmul.mubr.bf16.vlgmr.msra.gmra.mrb[16].mxu0 %v11532_v48 }
 0x8ab   : > { %6515 = vmatprep.mubr.bf16.mxu0 %v10421_v7  ;;  %v11534_v7 = vld [vmem:[#allocation13_spill] sm:$0xff] }
 0x8ad   : > { %v10963_v19 = vpop.f32.mrb[248].mxu1 }
 0x8ae   : > { %v10965_v18 = vpop.f32.mrb[249].mxu1 }
 0x8af   : > { %v10967_v59 = vpop.f32.mrb[250].mxu1 }
 0x8b0   : > { %v10969_v58 = vpop.f32.mrb[251].mxu1 }
 0x8b2   : > { %6516 = vmatmul.mubr.bf16.gmra.mrb[20].mxu0 %v11533_v9  ;;  %v11544_v9 = vld [vmem:[#allocation49_spill] sm:$0xff] }
 0x8b3   : > { %6523 = vmatprep.mubr.bf16.mxu0 %v10429_v43  ;;  %v11535_v43 = vld [vmem:[#allocation16_spill] sm:$0xff] }
 0x8b5   : > { %v10973_v53 = vpop.f32.mrb[252].mxu1 }
 0x8b6   : > { %v10975_v62 = vpop.f32.mrb[253].mxu1 }
 0x8b7   : > { %v10977_v37 = vpop.f32.mrb[254].mxu1 }
 0x8b8   : > { %v10979_v50 = vpop.f32.mrb[255].mxu1 }
 0x8ba   : > { %6524 = vmatmul.mubr.bf16.gmra.mrb[24].mxu0 %v11534_v7 }
 0x8bb   : > { %6531 = vmatprep.mubr.bf16.mxu0 %v10437_v55  ;;  %v11536_v55 = vld [vmem:[#allocation21_spill] sm:$0xff] }
 0x8bd   : > { %v10983_v33 = vpop.f32.mrb[0].mxu1 }
 0x8be   : > { %v10985_v11 = vpop.f32.mrb[1].mxu1 }
 0x8bf   : > { %v10987_v49 = vpop.f32.mrb[2].mxu1 }
 0x8c0   : > { %v10989_v13 = vpop.f32.mrb[3].mxu1 }
 0x8c2   : > { %6532 = vmatmul.mubr.bf16.gmra.mrb[28].mxu0 %v11535_v43 }
 0x8c3   : > { %6539 = vmatprep.mubr.bf16.mxu0 %v10445_v31  ;;  %v11537_v31 = vld [vmem:[#allocation28_spill] sm:$0xff] }
 0x8c5   : > { %v10993_v52 = vpop.f32.mrb[4].mxu1 }
 0x8c6   : > { %v10995_v16 = vpop.f32.mrb[5].mxu1 }
 0x8c7   : > { %v10997_v24 = vpop.f32.mrb[6].mxu1 }
 0x8c8   : > { %v10999_v51 = vpop.f32.mrb[7].mxu1 }
 0x8ca   : > { %6540 = vmatmul.mubr.bf16.gmra.mrb[32].mxu0 %v11536_v55 }
 0x8cb   : > { %6547 = vmatprep.mubr.bf16.mxu0 %v10453_v26  ;;  %v11538_v26 = vld [vmem:[#allocation35_spill] sm:$0xff] }
 0x8cd   : > { %v11003_v2 = vpop.f32.mrb[8].mxu1 }
 0x8ce   : > { %v11005_v42 = vpop.f32.mrb[9].mxu1 }
 0x8cf   : > { %v11007_v15 = vpop.f32.mrb[10].mxu1 }
 0x8d0   : > { %v11009_v5 = vpop.f32.mrb[11].mxu1 }
 0x8d2   : > { %6548 = vmatmul.mubr.bf16.gmra.mrb[36].mxu0 %v11537_v31 }
 0x8d3   : > { %6555 = vmatprep.mubr.bf16.mxu0 %v10461_v21  ;;  %v11541_v21 = vld [vmem:[#allocation46_spill] sm:$0xff] }
 0x8d5   : > { %v11013_v39 = vpop.f32.mrb[12].mxu1 }
 0x8d6   : > { %v11015_v14 = vpop.f32.mrb[13].mxu1 }
 0x8d7   : > { %v11017_v20 = vpop.f32.mrb[14].mxu1 }
 0x8d8   : > { %v11019_v4 = vpop.f32.mrb[15].mxu1 }
 0x8da   : > { %6556 = vmatmul.mubr.bf16.gmra.mrb[40].mxu0 %v11538_v26 }
 0x8db   : > { %6563 = vmatprep.mubr.bf16.mxu0 %v10469_v6  ;;  %v11034_v6 = vld [vmem:[%s11342_s11 + $0x18] ss:$0 sm:$0xff] }
 0x8e2   : > { %6564 = vmatmul.mubr.bf16.gmra.mrb[44].mxu0 %v11539_v54 }
 0x8e3   : > { %6571 = vmatprep.mubr.bf16.mxu0 %v10486_v27 }
 0x8ea   : > { %6572 = vmatmul.mubr.bf16.gmra.mrb[48].mxu0 %v11540_v28 }
 0x8eb   : > { %6579 = vmatprep.mubr.bf16.mxu0 %v10505_v32 }
 0x8f2   : > { %6580 = vmatmul.mubr.bf16.gmra.mrb[52].mxu0 %v11541_v21 }
 0x8f3   : > { %6587 = vmatprep.mubr.bf16.mxu0 %v10509_v46 }
 0x8fa   : > { %6588 = vmatmul.mubr.bf16.gmra.mrb[56].mxu0 %v11542_v29 }
 0x8fb   : > { %6595 = vmatprep.mubr.bf16.mxu0 %v10544_v12 }
 0x8fd   : > { %v5899_v45 = vpop.f32.mrb[208].mxu0 }
 0x8fe   : > { %v5900_v27 = vadd.f32 %v5899_v45, %v11034_v6  ;;  %v5901_v8 = vpop.f32.mrb[209].mxu0 }
 0x8ff   : > { %v5902_v44 = vpop.f32.mrb[210].mxu0  ;;  %v11545_v8 = vld [vmem:[#allocation50_spill] sm:$0xff] }
 0x900   : > { %v7410_v1 = vmul.f32 -1.442695, %v5900_v27  ;;  %v5903_v32 = vadd.f32 %v5902_v44, %v11034_v6  ;;  %v5904_v60 = vpop.f32.mrb[211].mxu0 }
 0x902   : > { %8366 = vpow2.f32 %v7410_v1  ;;  %v7411_v46 = vmul.f32 -1.442695, %v5903_v32  ;;  %6596 = vmatmul.mubr.bf16.gmra.mrb[60].mxu0 %v11543_v47 }
 0x903   : > { %6603 = vmatprep.mubr.bf16.mxu0 %v10548_v17 }
 0x904   : > { %8368 = vpow2.f32 %v7411_v46 }
 0x905   : > { %v5907_v12 = vpop.f32.mrb[212].mxu0 }
 0x906   : > { %v5908_v40 = vadd.f32 %v5907_v12, %v11034_v6  ;;  %v5909_v41 = vpop.f32.mrb[213].mxu0 }
 0x907   : > { %v5910_v0 = vpop.f32.mrb[214].mxu0 }
 0x908   : > { %v7412_v36 = vmul.f32 -1.442695, %v5908_v40  ;;  %v5911_v25 = vadd.f32 %v5910_v0, %v11034_v6  ;;  %v5912_v23 = vpop.f32.mrb[215].mxu0 }
 0x90a   : > { %8370 = vpow2.f32 %v7412_v36  ;;  %v7413_v48 = vmul.f32 -1.442695, %v5911_v25  ;;  %6604 = vmatmul.mubr.bf16.gmra.mrb[64].mxu0 %v11544_v9 }
 0x90b   : > { %6611 = vmatprep.mubr.bf16.mxu0 %v10570_v57 }
 0x90c   : > { %v8367_v7 = vpop.eup %8366  ;;  %8372 = vpow2.f32 %v7413_v48 }
 0x90d   : > { %v6122_v43 = vadd.f32 1.0, %v8367_v7  ;;  %v5915_v17 = vpop.f32.mrb[216].mxu0 }
 0x90e   : > { %v8369_v55 = vpop.eup %8368  ;;  %v5916_v31 = vadd.f32 %v5915_v17, %v11034_v6  ;;  %v5917_v26 = vpop.f32.mrb[217].mxu0 }
 0x90f   : > { %8374 = vrcp.f32 %v6122_v43  ;;  %v6123_v54 = vadd.f32 1.0, %v8369_v55  ;;  %v5918_v28 = vpop.f32.mrb[218].mxu0 }
 0x910   : > { %v7414_v21 = vmul.f32 -1.442695, %v5916_v31  ;;  %v5919_v29 = vadd.f32 %v5918_v28, %v11034_v6  ;;  %v5920_v45 = vpop.f32.mrb[219].mxu0 }
 0x911   : > { %8376 = vrcp.f32 %v6123_v54  ;;  %v11547_v45 = vld [vmem:[#allocation52_spill] sm:$0xff] }
 0x912   : > { %8378 = vpow2.f32 %v7414_v21  ;;  %v7415_v27 = vmul.f32 -1.442695, %v5919_v29  ;;  %6612 = vmatmul.mubr.bf16.gmra.mrb[68].mxu0 %v11545_v8 }
 0x913   : > { %6619 = vmatprep.mubr.bf16.mxu0 %v10572_v3  ;;  %v11546_v3 = vld [vmem:[#allocation51_spill] sm:$0xff] }
 0x914   : > { %v8371_v57 = vpop.eup %8370  ;;  %8380 = vpow2.f32 %v7415_v27 }
 0x915   : > { %v6124_v44 = vadd.f32 1.0, %v8371_v57  ;;  %v5923_v1 = vpop.f32.mrb[220].mxu0 }
 0x916   : > { %v8373_v32 = vpop.eup %8372  ;;  %v5924_v60 = vadd.f32 %v5923_v1, %v11034_v6  ;;  %v5925_v46 = vpop.f32.mrb[221].mxu0 }
 0x917   : > { %8382 = vrcp.f32 %v6124_v44  ;;  %v6125_v47 = vadd.f32 1.0, %v8373_v32  ;;  %v5926_v12 = vpop.f32.mrb[222].mxu0 }
 0x918   : > { %v7416_v40 = vmul.f32 -1.442695, %v5924_v60  ;;  %v5927_v41 = vadd.f32 %v5926_v12, %v11034_v6  ;;  %v5928_v0 = vpop.f32.mrb[223].mxu0 }
 0x919   : > { %v8375_v36 = vpop.eup %8374  ;;  %8384 = vrcp.f32 %v6125_v47 }
 0x91a   : > { %8386 = vpow2.f32 %v7416_v40  ;;  %v7417_v25 = vmul.f32 -1.442695, %v5927_v41  ;;  %6829 = vrot.lane.b32.xlu0 %v8375_v36, %s8563_s19  ;;  %6620 = vmatmul.mubr.bf16.gmra.mrb[72].mxu0 %v11546_v3 }
 0x91b   : > { %v8377_v23 = vpop.eup %8376  ;;  %6627 = vmatprep.mubr.bf16.mxu0 %v10581_v30 }
 0x91c   : > { %v8379_v48 = vpop.eup %8378  ;;  %8388 = vpow2.f32 %v7417_v25  ;;  %6831 = vrot.lane.b32.xlu1 %v8377_v23, %s8563_s19 }
 0x91d   : > { %v6126_v9 = vadd.f32 1.0, %v8379_v48  ;;  %v5931_v7 = vpop.f32.mrb[224].mxu0 }
 0x91e   : > { %v8381_v43 = vpop.eup %8380  ;;  %v5932_v17 = vadd.f32 %v5931_v7, %v11034_v6  ;;  %v5933_v55 = vpop.f32.mrb[225].mxu0 }
 0x91f   : > { %8390 = vrcp.f32 %v6126_v9  ;;  %v6127_v31 = vadd.f32 1.0, %v8381_v43  ;;  %v5934_v26 = vpop.f32.mrb[226].mxu0 }
 0x920   : > { %v7418_v54 = vmul.f32 -1.442695, %v5932_v17  ;;  %v5935_v28 = vadd.f32 %v5934_v26, %v11034_v6  ;;  %v5936_v21 = vpop.f32.mrb[227].mxu0 }
 0x921   : > { %v8383_v29 = vpop.eup %8382  ;;  %8392 = vrcp.f32 %v6127_v31 }
 0x922   : > { %8394 = vpow2.f32 %v7418_v54  ;;  %v7419_v30 = vmul.f32 -1.442695, %v5935_v28  ;;  %6833 = vrot.lane.b32.xlu0 %v8383_v29, %s8563_s19  ;;  %6628 = vmatmul.mubr.bf16.gmra.mrb[76].mxu0 %v11547_v45 }
 0x923   : > { %v8385_v27 = vpop.eup %8384 }
 0x924   : > { %v8387_v8 = vpop.eup %8386  ;;  %8396 = vpow2.f32 %v7419_v30  ;;  %6835 = vrot.lane.b32.xlu1 %v8385_v27, %s8563_s19 }
 0x925   : > { %v6128_v57 = vadd.f32 1.0, %v8387_v8  ;;  %v5939_v44 = vpop.f32.mrb[228].mxu0 }
 0x926   : > { %v8389_v1 = vpop.eup %8388  ;;  %v5940_v32 = vadd.f32 %v5939_v44, %v11034_v6  ;;  %v5941_v60 = vpop.f32.mrb[229].mxu0 }
 0x927   : > { %8398 = vrcp.f32 %v6128_v57  ;;  %v6129_v46 = vadd.f32 1.0, %v8389_v1  ;;  %v5942_v47 = vpop.f32.mrb[230].mxu0 }
 0x928   : > { %v7420_v12 = vmul.f32 -1.442695, %v5940_v32  ;;  %v5943_v40 = vadd.f32 %v5942_v47, %v11034_v6  ;;  %v5944_v41 = vpop.f32.mrb[231].mxu0 }
 0x929   : > { %v8391_v0 = vpop.eup %8390  ;;  %8400 = vrcp.f32 %v6129_v46 }
 0x92a   : > { %8402 = vpow2.f32 %v7420_v12  ;;  %v7421_v36 = vmul.f32 -1.442695, %v5943_v40  ;;  %6837 = vrot.lane.b32.xlu0 %v8391_v0, %s8563_s19 }
 0x92b   : > { %v8393_v25 = vpop.eup %8392 }
 0x92c   : > { %v8395_v3 = vpop.eup %8394  ;;  %8404 = vpow2.f32 %v7421_v36  ;;  %6839 = vrot.lane.b32.xlu1 %v8393_v25, %s8563_s19 }
 0x92d   : > { %v6130_v23 = vadd.f32 1.0, %v8395_v3  ;;  %v5947_v48 = vpop.f32.mrb[232].mxu0 }
 0x92e   : > { %v8397_v9 = vpop.eup %8396  ;;  %v5948_v7 = vadd.f32 %v5947_v48, %v11034_v6  ;;  %v5949_v43 = vpop.f32.mrb[233].mxu0 }
 0x92f   : > { %8406 = vrcp.f32 %v6130_v23  ;;  %v6131_v17 = vadd.f32 1.0, %v8397_v9  ;;  %v5950_v55 = vpop.f32.mrb[234].mxu0 }
 0x930   : > { %v7422_v31 = vmul.f32 -1.442695, %v5948_v7  ;;  %v5951_v26 = vadd.f32 %v5950_v55, %v11034_v6  ;;  %v5952_v54 = vpop.f32.mrb[235].mxu0 }
 0x931   : > { %v8399_v28 = vpop.eup %8398  ;;  %8408 = vrcp.f32 %v6131_v17 }
 0x932   : > { %8410 = vpow2.f32 %v7422_v31  ;;  %v7423_v21 = vmul.f32 -1.442695, %v5951_v26  ;;  %6841 = vrot.lane.b32.xlu0 %v8399_v28, %s8563_s19 }
 0x933   : > { %v8401_v29 = vpop.eup %8400 }
 0x934   : > { %v8403_v30 = vpop.eup %8402  ;;  %8412 = vpow2.f32 %v7423_v21  ;;  %6843 = vrot.lane.b32.xlu1 %v8401_v29, %s8563_s19 }
 0x935   : > { %v6132_v45 = vadd.f32 1.0, %v8403_v30  ;;  %v5955_v27 = vpop.f32.mrb[236].mxu0 }
 0x936   : > { %v8405_v8 = vpop.eup %8404  ;;  %v5956_v57 = vadd.f32 %v5955_v27, %v11034_v6  ;;  %v5957_v44 = vpop.f32.mrb[237].mxu0 }
 0x937   : > { %8414 = vrcp.f32 %v6132_v45  ;;  %v6133_v1 = vadd.f32 1.0, %v8405_v8  ;;  %v5958_v32 = vpop.f32.mrb[238].mxu0 }
 0x938   : > { %v7424_v60 = vmul.f32 -1.442695, %v5956_v57  ;;  %v5959_v46 = vadd.f32 %v5958_v32, %v11034_v6  ;;  %v5960_v47 = vpop.f32.mrb[239].mxu0 }
 0x939   : > { %v8407_v12 = vpop.eup %8406  ;;  %8416 = vrcp.f32 %v6133_v1 }
 0x93a   : > { %8418 = vpow2.f32 %v7424_v60  ;;  %v7425_v40 = vmul.f32 -1.442695, %v5959_v46  ;;  %6845 = vrot.lane.b32.xlu0 %v8407_v12, %s8563_s19 }
 0x93b   : > { %v8409_v41 = vpop.eup %8408 }
 0x93c   : > { %v8411_v0 = vpop.eup %8410  ;;  %8420 = vpow2.f32 %v7425_v40  ;;  %6847 = vrot.lane.b32.xlu1 %v8409_v41, %s8563_s19 }
 0x93d   : > { %v6134_v36 = vadd.f32 1.0, %v8411_v0  ;;  %v5963_v25 = vpop.f32.mrb[240].mxu0 }
 0x93e   : > { %v8413_v3 = vpop.eup %8412  ;;  %v5964_v23 = vadd.f32 %v5963_v25, %v11034_v6  ;;  %v5965_v48 = vpop.f32.mrb[241].mxu0 }
 0x93f   : > { %8422 = vrcp.f32 %v6134_v36  ;;  %v6135_v9 = vadd.f32 1.0, %v8413_v3  ;;  %v5966_v7 = vpop.f32.mrb[242].mxu0 }
 0x940   : > { %v7426_v43 = vmul.f32 -1.442695, %v5964_v23  ;;  %v5967_v17 = vadd.f32 %v5966_v7, %v11034_v6  ;;  %v5968_v55 = vpop.f32.mrb[243].mxu0 }
 0x941   : > { %v8415_v31 = vpop.eup %8414  ;;  %8424 = vrcp.f32 %v6135_v9 }
 0x942   : > { %8426 = vpow2.f32 %v7426_v43  ;;  %v7427_v26 = vmul.f32 -1.442695, %v5967_v17  ;;  %6849 = vrot.lane.b32.xlu0 %v8415_v31, %s8563_s19 }
 0x943   : > { %v8417_v54 = vpop.eup %8416 }
 0x944   : > { %v8419_v28 = vpop.eup %8418  ;;  %8428 = vpow2.f32 %v7427_v26  ;;  %6851 = vrot.lane.b32.xlu1 %v8417_v54, %s8563_s19 }
 0x945   : > { %v6136_v21 = vadd.f32 1.0, %v8419_v28  ;;  %v5971_v29 = vpop.f32.mrb[244].mxu0 }
 0x946   : > { %v8421_v30 = vpop.eup %8420  ;;  %v5972_v45 = vadd.f32 %v5971_v29, %v11034_v6  ;;  %v5973_v27 = vpop.f32.mrb[245].mxu0 }
 0x947   : > { %8430 = vrcp.f32 %v6136_v21  ;;  %v6137_v8 = vadd.f32 1.0, %v8421_v30  ;;  %v5974_v57 = vpop.f32.mrb[246].mxu0 }
 0x948   : > { %v7428_v44 = vmul.f32 -1.442695, %v5972_v45  ;;  %v5975_v1 = vadd.f32 %v5974_v57, %v11034_v6  ;;  %v5976_v32 = vpop.f32.mrb[247].mxu0 }
 0x949   : > { %v8423_v60 = vpop.eup %8422  ;;  %8432 = vrcp.f32 %v6137_v8 }
 0x94a   : > { %8434 = vpow2.f32 %v7428_v44  ;;  %v7429_v46 = vmul.f32 -1.442695, %v5975_v1  ;;  %6853 = vrot.lane.b32.xlu0 %v8423_v60, %s8563_s19 }
 0x94b   : > { %v8425_v47 = vpop.eup %8424 }
 0x94c   : > { %v8427_v12 = vpop.eup %8426  ;;  %8436 = vpow2.f32 %v7429_v46  ;;  %6855 = vrot.lane.b32.xlu1 %v8425_v47, %s8563_s19 }
 0x94d   : > { %v6138_v40 = vadd.f32 1.0, %v8427_v12  ;;  %v5979_v41 = vpop.f32.mrb[248].mxu0 }
 0x94e   : > { %v8429_v0 = vpop.eup %8428  ;;  %v5980_v36 = vadd.f32 %v5979_v41, %v11034_v6  ;;  %v5981_v25 = vpop.f32.mrb[249].mxu0 }
 0x94f   : > { %8438 = vrcp.f32 %v6138_v40  ;;  %v6139_v3 = vadd.f32 1.0, %v8429_v0  ;;  %v5982_v23 = vpop.f32.mrb[250].mxu0 }
 0x950   : > { %v7430_v48 = vmul.f32 -1.442695, %v5980_v36  ;;  %v5983_v9 = vadd.f32 %v5982_v23, %v11034_v6  ;;  %v5984_v7 = vpop.f32.mrb[251].mxu0 }
 0x951   : > { %v8431_v43 = vpop.eup %8430  ;;  %8440 = vrcp.f32 %v6139_v3 }
 0x952   : > { %8442 = vpow2.f32 %v7430_v48  ;;  %v7431_v17 = vmul.f32 -1.442695, %v5983_v9  ;;  %6857 = vrot.lane.b32.xlu0 %v8431_v43, %s8563_s19 }
 0x953   : > { %v8433_v55 = vpop.eup %8432 }
 0x954   : > { %v8435_v31 = vpop.eup %8434  ;;  %8444 = vpow2.f32 %v7431_v17  ;;  %6859 = vrot.lane.b32.xlu1 %v8433_v55, %s8563_s19 }
 0x955   : > { %v6140_v26 = vadd.f32 1.0, %v8435_v31  ;;  %v5987_v54 = vpop.f32.mrb[252].mxu0 }
 0x956   : > { %v8437_v28 = vpop.eup %8436  ;;  %v5988_v21 = vadd.f32 %v5987_v54, %v11034_v6  ;;  %v5989_v29 = vpop.f32.mrb[253].mxu0 }
 0x957   : > { %8446 = vrcp.f32 %v6140_v26  ;;  %v6141_v30 = vadd.f32 1.0, %v8437_v28  ;;  %v5990_v45 = vpop.f32.mrb[254].mxu0 }
 0x958   : > { %v7432_v27 = vmul.f32 -1.442695, %v5988_v21  ;;  %v5991_v8 = vadd.f32 %v5990_v45, %v11034_v6  ;;  %v5992_v57 = vpop.f32.mrb[255].mxu0 }
 0x959   : > { %v8439_v44 = vpop.eup %8438  ;;  %8448 = vrcp.f32 %v6141_v30 }
 0x95a   : > { %8450 = vpow2.f32 %v7432_v27  ;;  %v7433_v1 = vmul.f32 -1.442695, %v5991_v8  ;;  %6861 = vrot.lane.b32.xlu0 %v8439_v44, %s8563_s19 }
 0x95b   : > { %v8441_v32 = vpop.eup %8440 }
 0x95c   : > { %v8443_v60 = vpop.eup %8442  ;;  %8452 = vpow2.f32 %v7433_v1  ;;  %6863 = vrot.lane.b32.xlu1 %v8441_v32, %s8563_s19 }
 0x95d   : > { %v6142_v46 = vadd.f32 1.0, %v8443_v60  ;;  %v5995_v47 = vpop.f32.mrb[0].mxu0 }
 0x95e   : > { %v8445_v12 = vpop.eup %8444  ;;  %v5996_v40 = vadd.f32 %v5995_v47, %v11034_v6  ;;  %v5997_v41 = vpop.f32.mrb[1].mxu0 }
 0x95f   : > { %8454 = vrcp.f32 %v6142_v46  ;;  %v6143_v0 = vadd.f32 1.0, %v8445_v12  ;;  %v5998_v36 = vpop.f32.mrb[2].mxu0 }
 0x960   : > { %v7434_v25 = vmul.f32 -1.442695, %v5996_v40  ;;  %v5999_v3 = vadd.f32 %v5998_v36, %v11034_v6  ;;  %v6000_v23 = vpop.f32.mrb[3].mxu0 }
 0x961   : > { %v8447_v48 = vpop.eup %8446  ;;  %8456 = vrcp.f32 %v6143_v0 }
 0x962   : > { %8458 = vpow2.f32 %v7434_v25  ;;  %v7435_v9 = vmul.f32 -1.442695, %v5999_v3  ;;  %6865 = vrot.lane.b32.xlu0 %v8447_v48, %s8563_s19 }
 0x963   : > { %v8449_v7 = vpop.eup %8448 }
 0x964   : > { %v8451_v43 = vpop.eup %8450  ;;  %8460 = vpow2.f32 %v7435_v9  ;;  %6867 = vrot.lane.b32.xlu1 %v8449_v7, %s8563_s19 }
 0x965   : > { %v6144_v17 = vadd.f32 1.0, %v8451_v43  ;;  %v6003_v55 = vpop.f32.mrb[4].mxu0 }
 0x966   : > { %v8453_v31 = vpop.eup %8452  ;;  %v6004_v26 = vadd.f32 %v6003_v55, %v11034_v6  ;;  %v6005_v54 = vpop.f32.mrb[5].mxu0 }
 0x967   : > { %8462 = vrcp.f32 %v6144_v17  ;;  %v6145_v28 = vadd.f32 1.0, %v8453_v31  ;;  %v6006_v21 = vpop.f32.mrb[6].mxu0 }
 0x968   : > { %v7436_v29 = vmul.f32 -1.442695, %v6004_v26  ;;  %v6007_v30 = vadd.f32 %v6006_v21, %v11034_v6  ;;  %v6008_v45 = vpop.f32.mrb[7].mxu0 }
 0x969   : > { %v8455_v27 = vpop.eup %8454  ;;  %8464 = vrcp.f32 %v6145_v28 }
 0x96a   : > { %8466 = vpow2.f32 %v7436_v29  ;;  %v7437_v8 = vmul.f32 -1.442695, %v6007_v30  ;;  %6869 = vrot.lane.b32.xlu0 %v8455_v27, %s8563_s19 }
 0x96b   : > { %v8457_v57 = vpop.eup %8456 }
 0x96c   : > { %v8459_v44 = vpop.eup %8458  ;;  %8468 = vpow2.f32 %v7437_v8  ;;  %6871 = vrot.lane.b32.xlu1 %v8457_v57, %s8563_s19 }
 0x96d   : > { %v6146_v1 = vadd.f32 1.0, %v8459_v44  ;;  %v6011_v32 = vpop.f32.mrb[8].mxu0 }
 0x96e   : > { %v8461_v60 = vpop.eup %8460  ;;  %v6012_v46 = vadd.f32 %v6011_v32, %v11034_v6  ;;  %v6013_v47 = vpop.f32.mrb[9].mxu0 }
 0x96f   : > { %8470 = vrcp.f32 %v6146_v1  ;;  %v6147_v12 = vadd.f32 1.0, %v8461_v60  ;;  %v6014_v40 = vpop.f32.mrb[10].mxu0  ;;  %v11106_v1 = vld [vmem:[%s11342_s11 + $0x19] ss:$0 sm:$0xff] }
 0x970   : > { %v7438_v41 = vmul.f32 -1.442695, %v6012_v46  ;;  %v6015_v0 = vadd.f32 %v6014_v40, %v11034_v6  ;;  %v6016_v36 = vpop.f32.mrb[11].mxu0 }
 0x971   : > { %v8463_v25 = vpop.eup %8462  ;;  %8472 = vrcp.f32 %v6147_v12 }
 0x972   : > { %8474 = vpow2.f32 %v7438_v41  ;;  %v7439_v3 = vmul.f32 -1.442695, %v6015_v0  ;;  %6873 = vrot.lane.b32.xlu0 %v8463_v25, %s8563_s19 }
 0x973   : > { %v8465_v23 = vpop.eup %8464 }
 0x974   : > { %v8467_v48 = vpop.eup %8466  ;;  %8476 = vpow2.f32 %v7439_v3  ;;  %6875 = vrot.lane.b32.xlu1 %v8465_v23, %s8563_s19 }
 0x975   : > { %v6148_v9 = vadd.f32 1.0, %v8467_v48  ;;  %v6019_v7 = vpop.f32.mrb[12].mxu0 }
 0x976   : > { %v8469_v43 = vpop.eup %8468  ;;  %v6020_v17 = vadd.f32 %v6019_v7, %v11034_v6  ;;  %v6021_v55 = vpop.f32.mrb[13].mxu0 }
 0x977   : > { %8478 = vrcp.f32 %v6148_v9  ;;  %v6149_v31 = vadd.f32 1.0, %v8469_v43  ;;  %v6022_v26 = vpop.f32.mrb[14].mxu0 }
 0x978   : > { %v7440_v54 = vmul.f32 -1.442695, %v6020_v17  ;;  %v6023_v28 = vadd.f32 %v6022_v26, %v11034_v6  ;;  %v6024_v21 = vpop.f32.mrb[15].mxu0 }
 0x979   : > { %v8471_v29 = vpop.eup %8470  ;;  %8480 = vrcp.f32 %v6149_v31 }
 0x97a   : > { %8482 = vpow2.f32 %v7440_v54  ;;  %v7441_v30 = vmul.f32 -1.442695, %v6023_v28  ;;  %6877 = vrot.lane.b32.xlu0 %v8471_v29, %s8563_s19 }
 0x97b   : > { %v8473_v45 = vpop.eup %8472 }
 0x97c   : > { %v8475_v27 = vpop.eup %8474  ;;  %8484 = vpow2.f32 %v7441_v30  ;;  %6879 = vrot.lane.b32.xlu1 %v8473_v45, %s8563_s19 }
 0x97d   : > { %v6150_v8 = vadd.f32 1.0, %v8475_v27  ;;  %v7622_v57 = vpop.f32.mrb[16].mxu0 }
 0x97e   : > { %v8477_v44 = vpop.eup %8476  ;;  %v7623_v6 = vpop.f32.mrb[17].mxu0 }
 0x97f   : > { %8486 = vrcp.f32 %v6150_v8  ;;  %v6151_v32 = vadd.f32 1.0, %v8477_v44  ;;  %v7624_v60 = vadd.f32 %v7623_v6, %v7622_v57  ;;  %v7625_v46 = vpop.f32.mrb[18].mxu0 }
 0x980   : > { %v7626_v47 = vpop.f32.mrb[19].mxu0 }
 0x981   : > { %v8479_v12 = vpop.eup %8478  ;;  %8488 = vrcp.f32 %v6151_v32  ;;  %v6510_v40 = vadd.f32 %v7624_v60, %v11106_v1  ;;  %v7627_v41 = vadd.f32 %v7626_v47, %v7625_v46 }
 0x982   : > { %6881 = vrot.lane.b32.xlu0 %v8479_v12, %s8563_s19 }
 0x983   : > { %v8481_v0 = vpop.eup %8480  ;;  %v6671_v36 = vadd.f32 %v10945_v56, %v6510_v40  ;;  %v6513_v25 = vadd.f32 %v7627_v41, %v11106_v1 }
 0x984   : > { %v8483_v3 = vpop.eup %8482  ;;  %6883 = vrot.lane.b32.xlu1 %v8481_v0, %s8563_s19 }
 0x985   : > { %v6152_v23 = vadd.f32 1.0, %v8483_v3  ;;  %v6674_v48 = vadd.f32 %v10949_v63, %v6513_v25  ;;  %v7628_v9 = vpop.f32.mrb[20].mxu0 }
 0x986   : > { %v8485_v7 = vpop.eup %8484  ;;  %v7629_v43 = vpop.f32.mrb[21].mxu0 }
 0x987   : > { %8490 = vrcp.f32 %v6152_v23  ;;  %v6153_v17 = vadd.f32 1.0, %v8485_v7  ;;  %v7630_v55 = vadd.f32 %v7629_v43, %v7628_v9  ;;  %v7631_v31 = vpop.f32.mrb[22].mxu0 }
 0x988   : > { %v7632_v26 = vpop.f32.mrb[23].mxu0 }
 0x989   : > { %v8487_v54 = vpop.eup %8486  ;;  %8492 = vrcp.f32 %v6153_v17  ;;  %v6518_v56 = vadd.f32 %v7630_v55, %v11106_v1  ;;  %v7633_v28 = vadd.f32 %v7632_v26, %v7631_v31 }
 0x98a   : > { %6885 = vrot.lane.b32.xlu0 %v8487_v54, %s8563_s19 }
 0x98b   : > { %v8489_v63 = vpop.eup %8488  ;;  %v6679_v21 = vadd.f32 %v10943_v38, %v6518_v56  ;;  %v6521_v29 = vadd.f32 %v7633_v28, %v11106_v1 }
 0x98c   : > { %6887 = vrot.lane.b32.xlu1 %v8489_v63, %s8563_s19  ;;  %v6830_v30 = vpop.permute.xlu0 %6829 }
 0x98d   : > { %v6682_v45 = vadd.f32 %v10947_v61, %v6521_v29  ;;  %v6926_v27 = vsel %vm6925_vm8, %v6671_v36, %v6830_v30  ;;  %v7634_v8 = vpop.f32.mrb[24].mxu0 }
 0x98e   : > { %v6959_v57 = vsel %vm6958_vm9, %v6926_v27, 0.0  ;;  %v6832_v44 = vpop.permute.xlu1 %6831  ;;  %v7635_v6 = vpop.f32.mrb[25].mxu0 }
 0x98f   : > { %6991 = vst [vmem:[%s11125_s2] sm:$0xff] %v6959_v57  ;;  %v6927_v38 = vsel %vm6925_vm8, %v6674_v48, %v6832_v44  ;;  %v7636_v32 = vadd.f32 %v7635_v6, %v7634_v8  ;;  %v7637_v60 = vpop.f32.mrb[26].mxu0 }
 0x990   : > { %v6960_v46 = vsel %vm6958_vm9, %v6927_v38, 0.0  ;;  %v7638_v47 = vpop.f32.mrb[27].mxu0 }
 0x991   : > { %v8491_v61 = vpop.eup %8490  ;;  %6992 = vst [vmem:[%s11125_s2 + $0x8] sm:$0xff] %v6960_v46  ;;  %v6526_v12 = vadd.f32 %v7636_v32, %v11106_v1  ;;  %v7639_v40 = vadd.f32 %v7638_v47, %v7637_v60 }
 0x992   : > { %6889 = vrot.lane.b32.xlu0 %v8491_v61, %s8563_s19 }
 0x993   : > { %v8493_v41 = vpop.eup %8492  ;;  %v6687_v0 = vadd.f32 %v10955_v10, %v6526_v12  ;;  %v6529_v36 = vadd.f32 %v7639_v40, %v11106_v1 }
 0x994   : > { %v6834_v25 = vpop.permute.xlu0 %6833  ;;  %6891 = vrot.lane.b32.xlu1 %v8493_v41, %s8563_s19  ;;  %s8496_s19 = scalar_lea.vmem %s11282_s18, 4096 }
 0x995   : > { %v6690_v3 = vadd.f32 %v10959_v22, %v6529_v36  ;;  %v6928_v23 = vsel %vm6925_vm8, %v6679_v21, %v6834_v25  ;;  %v7640_v48 = vpop.f32.mrb[28].mxu0  ;;  %p8497_p11 = scmp.ne.s32.totalorder %s11282_s18, %s8496_s19  ;;  %p8504_p1 = scmp.lt.s32.totalorder %s8502_s29, %s8496_s19 }
 0x996   : > { %v6961_v9 = vsel %vm6958_vm9, %v6928_v23, 0.0  ;;  %v6836_v7 = vpop.permute.xlu1 %6835  ;;  %v7641_v43 = vpop.f32.mrb[29].mxu0 }
 0x997   : > { %6993 = vst [vmem:[%s11125_s2 + $0x10] sm:$0xff] %v6961_v9  ;;  %v6929_v17 = vsel %vm6925_vm8, %v6682_v45, %v6836_v7  ;;  %v7642_v55 = vadd.f32 %v7641_v43, %v7640_v48  ;;  %v7643_v10 = vpop.f32.mrb[30].mxu0  ;;  %p8498_p12 = pnand %p8497_p11, %p8670_p5  ;;  %p8505_p2 = por %p8504_p1, %p8503_p0 }
 0x998   : > { %v6962_v31 = vsel %vm6958_vm9, %v6929_v17, 0.0  ;;  %v7644_v26 = vpop.f32.mrb[31].mxu0 }
 0x999   : > { %6994 = vst [vmem:[%s11125_s2 + $0x18] sm:$0xff] %v6962_v31  ;;  %v6534_v54 = vadd.f32 %v7642_v55, %v11106_v1  ;;  %v7645_v22 = vadd.f32 %v7644_v26, %v7643_v10  ;;  %p8499_p13 = pneg %p8498_p12 }
 0x99b   : > { %v6695_v56 = vadd.f32 %v10953_v35, %v6534_v54  ;;  %v6537_v28 = vadd.f32 %v7645_v22, %v11106_v1  ;;  %p8506_p3 = pnand %p8505_p2, %p8499_p13 }
 0x99c   : > { %v6838_v63 = vpop.permute.xlu0 %6837 }
 0x99d   : > { %v6698_v21 = vadd.f32 %v10957_v34, %v6537_v28  ;;  %v6930_v29 = vsel %vm6925_vm8, %v6687_v0, %v6838_v63  ;;  %v7646_v30 = vpop.f32.mrb[32].mxu0 }
 0x99e   : > { %v6963_v45 = vsel %vm6958_vm9, %v6930_v29, 0.0  ;;  %v6840_v27 = vpop.permute.xlu1 %6839  ;;  %v7647_v8 = vpop.f32.mrb[33].mxu0 }
 0x99f   : > { %6995 = vst [vmem:[%s11125_s2 + $0x20] sm:$0xff] %v6963_v45  ;;  %v6931_v57 = vsel %vm6925_vm8, %v6690_v3, %v6840_v27  ;;  %v7648_v44 = vadd.f32 %v7647_v8, %v7646_v30  ;;  %v7649_v6 = vpop.f32.mrb[34].mxu0 }
 0x9a0   : > { %v6964_v35 = vsel %vm6958_vm9, %v6931_v57, 0.0  ;;  %v7650_v38 = vpop.f32.mrb[35].mxu0 }
 0x9a1   : > { %6996 = vst [vmem:[%s11125_s2 + $0x28] sm:$0xff] %v6964_v35  ;;  %v6542_v32 = vadd.f32 %v7648_v44, %v11106_v1  ;;  %v7651_v34 = vadd.f32 %v7650_v38, %v7649_v6 }
 0x9a3   : > { %v6703_v60 = vadd.f32 %v10965_v18, %v6542_v32  ;;  %v6545_v46 = vadd.f32 %v7651_v34, %v11106_v1 }
 0x9a4   : > { %v6842_v47 = vpop.permute.xlu0 %6841 }
 0x9a5   : > { %v6706_v61 = vadd.f32 %v10969_v58, %v6545_v46  ;;  %v6932_v12 = vsel %vm6925_vm8, %v6695_v56, %v6842_v47  ;;  %v7652_v40 = vpop.f32.mrb[36].mxu0 }
 0x9a6   : > { %v6965_v41 = vsel %vm6958_vm9, %v6932_v12, 0.0  ;;  %v6844_v0 = vpop.permute.xlu1 %6843  ;;  %v7653_v36 = vpop.f32.mrb[37].mxu0 }
 0x9a7   : > { %6997 = vst [vmem:[%s11125_s2 + $0x30] sm:$0xff] %v6965_v41  ;;  %v6933_v25 = vsel %vm6925_vm8, %v6698_v21, %v6844_v0  ;;  %v7654_v3 = vadd.f32 %v7653_v36, %v7652_v40  ;;  %v7655_v23 = vpop.f32.mrb[38].mxu0 }
 0x9a8   : > { %v6966_v18 = vsel %vm6958_vm9, %v6933_v25, 0.0  ;;  %v7656_v48 = vpop.f32.mrb[39].mxu0 }
 0x9a9   : > { %6998 = vst [vmem:[%s11125_s2 + $0x38] sm:$0xff] %v6966_v18  ;;  %v6550_v9 = vadd.f32 %v7654_v3, %v11106_v1  ;;  %v7657_v58 = vadd.f32 %v7656_v48, %v7655_v23 }
 0x9ab   : > { %v6711_v7 = vadd.f32 %v10963_v19, %v6550_v9  ;;  %v6553_v43 = vadd.f32 %v7657_v58, %v11106_v1 }
 0x9ac   : > { %v6846_v17 = vpop.permute.xlu0 %6845 }
 0x9ad   : > { %v6714_v55 = vadd.f32 %v10967_v59, %v6553_v43  ;;  %v6934_v10 = vsel %vm6925_vm8, %v6703_v60, %v6846_v17  ;;  %v7658_v31 = vpop.f32.mrb[40].mxu0 }
 0x9ae   : > { %v6967_v26 = vsel %vm6958_vm9, %v6934_v10, 0.0  ;;  %v6848_v54 = vpop.permute.xlu1 %6847  ;;  %v7659_v22 = vpop.f32.mrb[41].mxu0 }
 0x9af   : > { %6999 = vst [vmem:[%s11125_s2 + $0x40] sm:$0xff] %v6967_v26  ;;  %v6935_v56 = vsel %vm6925_vm8, %v6706_v61, %v6848_v54  ;;  %v7660_v28 = vadd.f32 %v7659_v22, %v7658_v31  ;;  %v7661_v63 = vpop.f32.mrb[42].mxu0 }
 0x9b0   : > { %v6968_v19 = vsel %vm6958_vm9, %v6935_v56, 0.0  ;;  %v7662_v21 = vpop.f32.mrb[43].mxu0 }
 0x9b1   : > { %7000 = vst [vmem:[%s11125_s2 + $0x48] sm:$0xff] %v6968_v19  ;;  %v6558_v29 = vadd.f32 %v7660_v28, %v11106_v1  ;;  %v7663_v59 = vadd.f32 %v7662_v21, %v7661_v63 }
 0x9b3   : > { %v6719_v30 = vadd.f32 %v10975_v62, %v6558_v29  ;;  %v6561_v45 = vadd.f32 %v7663_v59, %v11106_v1 }
 0x9b4   : > { %v6850_v27 = vpop.permute.xlu0 %6849 }
 0x9b5   : > { %v6722_v8 = vadd.f32 %v10979_v50, %v6561_v45  ;;  %v6936_v57 = vsel %vm6925_vm8, %v6711_v7, %v6850_v27  ;;  %v7664_v44 = vpop.f32.mrb[44].mxu0 }
 0x9b6   : > { %v6969_v6 = vsel %vm6958_vm9, %v6936_v57, 0.0  ;;  %v6852_v35 = vpop.permute.xlu1 %6851  ;;  %v7665_v38 = vpop.f32.mrb[45].mxu0 }
 0x9b7   : > { %7001 = vst [vmem:[%s11125_s2 + $0x50] sm:$0xff] %v6969_v6  ;;  %v6937_v32 = vsel %vm6925_vm8, %v6714_v55, %v6852_v35  ;;  %v7666_v34 = vadd.f32 %v7665_v38, %v7664_v44  ;;  %v7667_v60 = vpop.f32.mrb[46].mxu0 }
 0x9b8   : > { %v6970_v62 = vsel %vm6958_vm9, %v6937_v32, 0.0  ;;  %v7668_v46 = vpop.f32.mrb[47].mxu0 }
 0x9b9   : > { %7002 = vst [vmem:[%s11125_s2 + $0x58] sm:$0xff] %v6970_v62  ;;  %v6566_v47 = vadd.f32 %v7666_v34, %v11106_v1  ;;  %v7669_v50 = vadd.f32 %v7668_v46, %v7667_v60 }
 0x9bb   : > { %v6727_v61 = vadd.f32 %v10973_v53, %v6566_v47  ;;  %v6569_v12 = vadd.f32 %v7669_v50, %v11106_v1 }
 0x9bc   : > { %v6854_v40 = vpop.permute.xlu0 %6853 }
 0x9bd   : > { %v6730_v41 = vadd.f32 %v10977_v37, %v6569_v12  ;;  %v6938_v0 = vsel %vm6925_vm8, %v6719_v30, %v6854_v40  ;;  %v7670_v36 = vpop.f32.mrb[48].mxu0 }
 0x9be   : > { %v6971_v25 = vsel %vm6958_vm9, %v6938_v0, 0.0  ;;  %v6856_v3 = vpop.permute.xlu1 %6855  ;;  %v7671_v23 = vpop.f32.mrb[49].mxu0 }
 0x9bf   : > { %7003 = vst [vmem:[%s11125_s2 + $0x60] sm:$0xff] %v6971_v25  ;;  %v6939_v18 = vsel %vm6925_vm8, %v6722_v8, %v6856_v3  ;;  %v7672_v48 = vadd.f32 %v7671_v23, %v7670_v36  ;;  %v7673_v9 = vpop.f32.mrb[50].mxu0 }
 0x9c0   : > { %v6972_v53 = vsel %vm6958_vm9, %v6939_v18, 0.0  ;;  %v7674_v58 = vpop.f32.mrb[51].mxu0 }
 0x9c1   : > { %7004 = vst [vmem:[%s11125_s2 + $0x68] sm:$0xff] %v6972_v53  ;;  %v6574_v7 = vadd.f32 %v7672_v48, %v11106_v1  ;;  %v7675_v37 = vadd.f32 %v7674_v58, %v7673_v9 }
 0x9c3   : > { %v6735_v43 = vadd.f32 %v10985_v11, %v6574_v7  ;;  %v6577_v17 = vadd.f32 %v7675_v37, %v11106_v1 }
 0x9c4   : > { %v6858_v55 = vpop.permute.xlu0 %6857 }
 0x9c5   : > { %v6738_v10 = vadd.f32 %v10989_v13, %v6577_v17  ;;  %v6940_v31 = vsel %vm6925_vm8, %v6727_v61, %v6858_v55  ;;  %v7676_v26 = vpop.f32.mrb[52].mxu0 }
 0x9c6   : > { %v6973_v54 = vsel %vm6958_vm9, %v6940_v31, 0.0  ;;  %v6860_v22 = vpop.permute.xlu1 %6859  ;;  %v7677_v56 = vpop.f32.mrb[53].mxu0 }
 0x9c7   : > { %7005 = vst [vmem:[%s11125_s2 + $0x70] sm:$0xff] %v6973_v54  ;;  %v6941_v28 = vsel %vm6925_vm8, %v6730_v41, %v6860_v22  ;;  %v7678_v63 = vadd.f32 %v7677_v56, %v7676_v26  ;;  %v7679_v19 = vpop.f32.mrb[54].mxu0 }
 0x9c8   : > { %v6974_v11 = vsel %vm6958_vm9, %v6941_v28, 0.0  ;;  %v7680_v21 = vpop.f32.mrb[55].mxu0 }
 0x9c9   : > { %7006 = vst [vmem:[%s11125_s2 + $0x78] sm:$0xff] %v6974_v11  ;;  %v6582_v29 = vadd.f32 %v7678_v63, %v11106_v1  ;;  %v7681_v13 = vadd.f32 %v7680_v21, %v7679_v19 }
 0x9cb   : > { %v6743_v59 = vadd.f32 %v10983_v33, %v6582_v29  ;;  %v6585_v30 = vadd.f32 %v7681_v13, %v11106_v1 }
 0x9cc   : > { %v6862_v45 = vpop.permute.xlu0 %6861 }
 0x9cd   : > { %v6746_v27 = vadd.f32 %v10987_v49, %v6585_v30  ;;  %v6942_v8 = vsel %vm6925_vm8, %v6735_v43, %v6862_v45  ;;  %v7682_v57 = vpop.f32.mrb[56].mxu0 }
 0x9ce   : > { %v6975_v44 = vsel %vm6958_vm9, %v6942_v8, 0.0  ;;  %v6864_v6 = vpop.permute.xlu1 %6863  ;;  %v7683_v35 = vpop.f32.mrb[57].mxu0 }
 0x9cf   : > { %7007 = vst [vmem:[%s11125_s2 + $0x80] sm:$0xff] %v6975_v44  ;;  %v6943_v38 = vsel %vm6925_vm8, %v6738_v10, %v6864_v6  ;;  %v7684_v32 = vadd.f32 %v7683_v35, %v7682_v57  ;;  %v7685_v34 = vpop.f32.mrb[58].mxu0 }
 0x9d0   : > { %v6976_v33 = vsel %vm6958_vm9, %v6943_v38, 0.0  ;;  %v7686_v60 = vpop.f32.mrb[59].mxu0 }
 0x9d1   : > { %7008 = vst [vmem:[%s11125_s2 + $0x88] sm:$0xff] %v6976_v33  ;;  %v6590_v62 = vadd.f32 %v7684_v32, %v11106_v1  ;;  %v7687_v49 = vadd.f32 %v7686_v60, %v7685_v34 }
 0x9d3   : > { %v6751_v46 = vadd.f32 %v10995_v16, %v6590_v62  ;;  %v6593_v47 = vadd.f32 %v7687_v49, %v11106_v1 }
 0x9d4   : > { %v6866_v50 = vpop.permute.xlu0 %6865 }
 0x9d5   : > { %v6754_v61 = vadd.f32 %v10999_v51, %v6593_v47  ;;  %v6944_v12 = vsel %vm6925_vm8, %v6743_v59, %v6866_v50  ;;  %v7688_v40 = vpop.f32.mrb[60].mxu0 }
 0x9d6   : > { %v6977_v41 = vsel %vm6958_vm9, %v6944_v12, 0.0  ;;  %v6868_v0 = vpop.permute.xlu1 %6867  ;;  %v7689_v36 = vpop.f32.mrb[61].mxu0 }
 0x9d7   : > { %7009 = vst [vmem:[%s11125_s2 + $0x90] sm:$0xff] %v6977_v41  ;;  %v6945_v25 = vsel %vm6925_vm8, %v6746_v27, %v6868_v0  ;;  %v7690_v3 = vadd.f32 %v7689_v36, %v7688_v40  ;;  %v7691_v23 = vpop.f32.mrb[62].mxu0 }
 0x9d8   : > { %v6978_v16 = vsel %vm6958_vm9, %v6945_v25, 0.0  ;;  %v7692_v18 = vpop.f32.mrb[63].mxu0 }
 0x9d9   : > { %7010 = vst [vmem:[%s11125_s2 + $0x98] sm:$0xff] %v6978_v16  ;;  %v6598_v48 = vadd.f32 %v7690_v3, %v11106_v1  ;;  %v7693_v51 = vadd.f32 %v7692_v18, %v7691_v23 }
 0x9db   : > { %v6759_v9 = vadd.f32 %v10993_v52, %v6598_v48  ;;  %v6601_v53 = vadd.f32 %v7693_v51, %v11106_v1 }
 0x9dc   : > { %v6870_v58 = vpop.permute.xlu0 %6869 }
 0x9dd   : > { %v6762_v7 = vadd.f32 %v10997_v24, %v6601_v53  ;;  %v6946_v37 = vsel %vm6925_vm8, %v6751_v46, %v6870_v58  ;;  %v7694_v43 = vpop.f32.mrb[64].mxu0 }
 0x9de   : > { %v6979_v17 = vsel %vm6958_vm9, %v6946_v37, 0.0  ;;  %v6872_v55 = vpop.permute.xlu1 %6871  ;;  %v7695_v10 = vpop.f32.mrb[65].mxu0 }
 0x9df   : > { %7011 = vst [vmem:[%s11125_s2 + $0xa0] sm:$0xff] %v6979_v17  ;;  %v6947_v31 = vsel %vm6925_vm8, %v6754_v61, %v6872_v55  ;;  %v7696_v26 = vadd.f32 %v7695_v10, %v7694_v43  ;;  %v7697_v54 = vpop.f32.mrb[66].mxu0 }
 0x9e0   : > { %v6980_v52 = vsel %vm6958_vm9, %v6947_v31, 0.0  ;;  %v7698_v22 = vpop.f32.mrb[67].mxu0 }
 0x9e1   : > { %7012 = vst [vmem:[%s11125_s2 + $0xa8] sm:$0xff] %v6980_v52  ;;  %v6606_v56 = vadd.f32 %v7696_v26, %v11106_v1  ;;  %v7699_v24 = vadd.f32 %v7698_v22, %v7697_v54 }
 0x9e3   : > { %v6767_v28 = vadd.f32 %v11005_v42, %v6606_v56  ;;  %v6609_v63 = vadd.f32 %v7699_v24, %v11106_v1 }
 0x9e4   : > { %v6874_v19 = vpop.permute.xlu0 %6873 }
 0x9e5   : > { %v6770_v11 = vadd.f32 %v11009_v5, %v6609_v63  ;;  %v6948_v21 = vsel %vm6925_vm8, %v6759_v9, %v6874_v19  ;;  %v7700_v29 = vpop.f32.mrb[68].mxu0 }
 0x9e6   : > { %v6981_v13 = vsel %vm6958_vm9, %v6948_v21, 0.0  ;;  %v6876_v59 = vpop.permute.xlu1 %6875  ;;  %v7701_v30 = vpop.f32.mrb[69].mxu0 }
 0x9e7   : > { %7013 = vst [vmem:[%s11125_s2 + $0xb0] sm:$0xff] %v6981_v13  ;;  %v6949_v45 = vsel %vm6925_vm8, %v6762_v7, %v6876_v59  ;;  %v7702_v27 = vadd.f32 %v7701_v30, %v7700_v29  ;;  %v7703_v8 = vpop.f32.mrb[70].mxu0 }
 0x9e8   : > { %v6982_v42 = vsel %vm6958_vm9, %v6949_v45, 0.0  ;;  %v7704_v57 = vpop.f32.mrb[71].mxu0 }
 0x9e9   : > { %7014 = vst [vmem:[%s11125_s2 + $0xb8] sm:$0xff] %v6982_v42  ;;  %v6614_v44 = vadd.f32 %v7702_v27, %v11106_v1  ;;  %v7705_v5 = vadd.f32 %v7704_v57, %v7703_v8 }
 0x9eb   : > { %v6775_v6 = vadd.f32 %v11003_v2, %v6614_v44  ;;  %v6617_v35 = vadd.f32 %v7705_v5, %v11106_v1 }
 0x9ec   : > { %v6878_v38 = vpop.permute.xlu0 %6877 }
 0x9ed   : > { %v6778_v32 = vadd.f32 %v11007_v15, %v6617_v35  ;;  %v6950_v34 = vsel %vm6925_vm8, %v6767_v28, %v6878_v38  ;;  %v7706_v33 = vpop.f32.mrb[72].mxu0 }
 0x9ee   : > { %v6983_v60 = vsel %vm6958_vm9, %v6950_v34, 0.0  ;;  %v6880_v62 = vpop.permute.xlu1 %6879  ;;  %v7707_v49 = vpop.f32.mrb[73].mxu0 }
 0x9ef   : > { %7015 = vst [vmem:[%s11125_s2 + $0xc0] sm:$0xff] %v6983_v60  ;;  %v6951_v46 = vsel %vm6925_vm8, %v6770_v11, %v6880_v62  ;;  %v7708_v47 = vadd.f32 %v7707_v49, %v7706_v33  ;;  %v7709_v50 = vpop.f32.mrb[74].mxu0 }
 0x9f0   : > { %v6984_v2 = vsel %vm6958_vm9, %v6951_v46, 0.0  ;;  %v7710_v61 = vpop.f32.mrb[75].mxu0 }
 0x9f1   : > { %7016 = vst [vmem:[%s11125_s2 + $0xc8] sm:$0xff] %v6984_v2  ;;  %v6622_v12 = vadd.f32 %v7708_v47, %v11106_v1  ;;  %v7711_v15 = vadd.f32 %v7710_v61, %v7709_v50 }
 0x9f3   : > { %v6783_v40 = vadd.f32 %v11015_v14, %v6622_v12  ;;  %v6625_v41 = vadd.f32 %v7711_v15, %v11106_v1 }
 0x9f4   : > { %v6882_v0 = vpop.permute.xlu0 %6881 }
 0x9f5   : > { %v6786_v36 = vadd.f32 %v11019_v4, %v6625_v41  ;;  %v6952_v25 = vsel %vm6925_vm8, %v6775_v6, %v6882_v0  ;;  %v7712_v3 = vpop.f32.mrb[76].mxu0 }
 0x9f6   : > { %v6985_v23 = vsel %vm6958_vm9, %v6952_v25, 0.0  ;;  %v6884_v16 = vpop.permute.xlu1 %6883  ;;  %v7713_v18 = vpop.f32.mrb[77].mxu0 }
 0x9f7   : > { %7017 = vst [vmem:[%s11125_s2 + $0xd0] sm:$0xff] %v6985_v23  ;;  %v6953_v48 = vsel %vm6925_vm8, %v6778_v32, %v6884_v16  ;;  %v7714_v51 = vadd.f32 %v7713_v18, %v7712_v3  ;;  %v7715_v9 = vpop.f32.mrb[78].mxu0 }
 0x9f8   : > { %v6986_v14 = vsel %vm6958_vm9, %v6953_v48, 0.0  ;;  %v7716_v53 = vpop.f32.mrb[79].mxu0 }
 0x9f9   : > { %7018 = vst [vmem:[%s11125_s2 + $0xd8] sm:$0xff] %v6986_v14  ;;  %v6630_v4 = vadd.f32 %v7714_v51, %v11106_v1  ;;  %v7717_v58 = vadd.f32 %v7716_v53, %v7715_v9 }
 0x9fb   : > { %v6791_v7 = vadd.f32 %v11013_v39, %v6630_v4  ;;  %v6633_v37 = vadd.f32 %v7717_v58, %v11106_v1 }
 0x9fc   : > { %v6886_v43 = vpop.permute.xlu0 %6885 }
 0x9fd   : > { %v6794_v17 = vadd.f32 %v11017_v20, %v6633_v37  ;;  %v6954_v55 = vsel %vm6925_vm8, %v6783_v40, %v6886_v43 }
 0x9fe   : > { %v6987_v10 = vsel %vm6958_vm9, %v6954_v55, 0.0  ;;  %v6888_v31 = vpop.permute.xlu1 %6887 }
 0x9ff   : > { %7019 = vst [vmem:[%s11125_s2 + $0xe0] sm:$0xff] %v6987_v10  ;;  %v6955_v26 = vsel %vm6925_vm8, %v6786_v36, %v6888_v31 }
 0xa00   : > { %v6988_v54 = vsel %vm6958_vm9, %v6955_v26, 0.0 }
 0xa01   : > { %7020 = vst [vmem:[%s11125_s2 + $0xe8] sm:$0xff] %v6988_v54 }
 0xa04   : > { %v6890_v39 = vpop.permute.xlu0 %6889 }
 0xa05   : > { %v6956_v20 = vsel %vm6925_vm8, %v6791_v7, %v6890_v39 }
 0xa06   : > { %v6989_v1 = vsel %vm6958_vm9, %v6956_v20, 0.0  ;;  %v6892_v52 = vpop.permute.xlu1 %6891 }
 0xa07   : > { %7021 = vst [vmem:[%s11125_s2 + $0xf0] sm:$0xff] %v6989_v1  ;;  %v6957_v22 = vsel %vm6925_vm8, %v6794_v17, %v6892_v52 }
 0xa08   : > { %v6990_v56 = vsel %vm6958_vm9, %v6957_v22, 0.0 }
 0xa09   : > { %7022 = vst [vmem:[%s11125_s2 + $0xf8] sm:$0xff] %v6990_v56 }
 0xa0a   : > { %8509 = shalt.err (!%p8506_p3)
}
 0xa0b   : > { %s8510_s0 = scalar_lea.hbm %s11280_s26, 4096  ;;  %s8514_s20 = scalar_lea.hbm %s11343_s12, 8192 }
 0xa0c   : > { %p8511_p4 = scmp.ne.s32.totalorder %s11280_s26, %s8510_s0  ;;  %p8515_p9 = scmp.lt.u32.totalorder %s11280_s26, %s11343_s12 }
 0xa0d   : > { %p8516_p10 = scmp.lt.u32.totalorder %s8514_s20, %s8510_s0  ;;  %p8518_p12 = scmp.lt.u32.totalorder %s8510_s0, %s11280_s26 }
 0xa0e   : > { %p8512_p7 = pnand %p8511_p4, %p8670_p5 }
 0xa0f   : > { %p8517_p11 = por %p8516_p10, %p8515_p9 }
 0xa10   : > { %p8513_p8 = pneg %p8512_p7 }
 0xa11   : > { %p8519_p13 = por %p8518_p12, %p8517_p11 }
 0xa13   : > { %p8520_p0 = pnand %p8519_p13, %p8513_p8 }
 0xa15   : > { %8523 = shalt.err (!%p8520_p0)
}
 0xa16   : > { %s8565_s19 = smov 128   ;;  %s8566_s16 = smov 8  }
 0xa17   : > { %8154 = dma.vmem_to_hbm [thread:$0]  (%p8670_p5), %s11282_s18, 4096, %s11280_s26, %s11290_s25, %s8565_s19, %s8565_s19, %s8566_s16  }
 0xa18 PF: > { %p8160_p1 = scmp.ge.s32.totalorder %s8558_s24, 2  ;;  %s7052_s29 = sand.u32 1, %s8546_s21  }
 0xa19   : > { %s7053_s0 = scalar_lea.sflag [#allocation3], %s7052_s29 }
 0xa1a   : > { %p8157_p2 = pnand %p8160_p1, %p8674_p6 }
 0xa1c   : > { %8541 = dma.done.wait (!%p8157_p2), %s7053_s0, 4096  }
 0xa1d   : > { %8543 = vsyncadd (!%p8157_p2), %s7053_s0, 4294963200  ;;  %p22_p3 = scmp.ge.s32.totalorder %s8657_s27, 4   ;;  %s11548_s21 = smov %s8550_s22 }
 0xa1e   : > { %s11549_s22 = smov %s8554_s23  ;;  %s11550_s23 = smov %s8668_s30 }
 0xa1f   : > { %s11551_s24 = smov %s8657_s27  ;;  %24 = sbr.rel (!%p22_p3) target bundleno = 6 (0x6), region = 112 }
 0xa26   :  { %7058 = vsyncpa [#allocation3], 1 }
 0xa27   :  { %7060 = vsyncpa [#allocation3 + $0x1], 1 }

</bundles_post_ra>
